<compile_context>
chip_gen: v7x
topology: tpu7x:2x2x1
jax: 0.10.0
libtpu: 0.0.40
codegen_flags: <defaults>
</compile_context>

<pallas_src>
import functools

import jax
import jax.numpy as jnp
from jax.experimental import pallas as pl
from jax.experimental.pallas import tpu as pltpu

IMAGE_SIZE = 64
EPS = 1e-5            # torch.nn.BatchNorm2d default eps
SLOPE = 0.2           # LeakyReLU negative slope
VMEM_LIMIT = 32 * 1024 * 1024   # explicit scoped-VMEM budget; fits v5e/v6e/v7x
TILE_M_CAP = 512      # keeps (tile_m, K<=2048) bf16 patch blocks <= 2 MiB each
TILE_K_CAP = 2048     # this net's K is <= 2048 -> single K step per M tile


# ----------------------------------------------------------------------------
# Glue helpers (no compute beyond pad/slice/reshape)
# ----------------------------------------------------------------------------
def _im2col(x, k, stride, pad):
    """x: (N, H, W, C) bf16 -> (N*Ho*Wo, k*k*C) with patch order (kh, kw, cin)."""
    if pad:
        x = jnp.pad(x, ((0, 0), (pad, pad), (pad, pad), (0, 0)))
    n, h, w, c = x.shape
    ho = (h - k) // stride + 1
    wo = (w - k) // stride + 1
    cols = []
    for i in range(k):
        for j in range(k):
            cols.append(x[:, i:i + stride * ho:stride, j:j + stride * wo:stride, :])
    patches = jnp.stack(cols, axis=3)                    # (N, Ho, Wo, k*k, C)
    return patches.reshape(n * ho * wo, k * k * c), (n, ho, wo)


def _pick_tile(m, cap):
    """Largest power-of-two-ish divisor of m that is <= cap (m if m <= cap)."""
    if m <= cap:
        return m
    t = cap
    while m % t:
        t //= 2
    return t


# ----------------------------------------------------------------------------
# Pallas kernels
# ----------------------------------------------------------------------------
def _conv_stats_kernel(p_ref, w_ref, y_ref, ssum_ref, ssq_ref):
    """bf16 matmul, f32 accumulation directly in the output block; on the last
    K step also emit per-tile per-channel sum / sum-of-squares (broadcast over
    an 8-row slab so the stats output block is (8, Cout) and lane/sublane legal)."""
    k = pl.program_id(1)

    @pl.when(k == 0)
    def _():
        y_ref[...] = jnp.zeros_like(y_ref)

    y_ref[...] += jnp.dot(p_ref[...], w_ref[...],
                          preferred_element_type=jnp.float32)

    @pl.when(k == pl.num_programs(1) - 1)
    def _():
        y = y_ref[...]                                        # (tile_m, Cout) f32
        s = jnp.sum(y, axis=0, keepdims=True)                 # (1, Cout)
        sq = jnp.sum(y * y, axis=0, keepdims=True)            # (1, Cout)
        ssum_ref[...] = jnp.broadcast_to(s, ssum_ref.shape)   # (8, Cout)
        ssq_ref[...] = jnp.broadcast_to(sq, ssq_ref.shape)    # (8, Cout)


def _bn_lrelu_kernel(y_ref, scale_ref, bias_ref, o_ref, *, slope):
    """Elementwise y*scale + bias, then LeakyReLU; output in bf16."""
    yn = y_ref[...] * scale_ref[...] + bias_ref[...]
    o_ref[...] = jnp.where(yn >= 0, yn, slope * yn).astype(o_ref.dtype)


def _matmul_sigmoid_kernel(x_ref, w_ref, o_ref):
    """Final 4x4 valid conv as a single (N, 2048)@(2048, 1) matmul + sigmoid."""
    acc = jnp.dot(x_ref[...], w_ref[...], preferred_element_type=jnp.float32)
    o_ref[...] = jax.nn.sigmoid(acc)


# ----------------------------------------------------------------------------
# Layer wrappers
# ----------------------------------------------------------------------------
def conv_bn_lrelu(x_nhwc, w_mat, gamma, beta, *, stride, pad):
    patches, (n, ho, wo) = _im2col(x_nhwc, 4, stride, pad)     # bf16 patches
    m, kdim = patches.shape
    cout = w_mat.shape[1]
    w_bf = w_mat.astype(jnp.bfloat16)

    tile_m = _pick_tile(m, TILE_M_CAP)
    nm = m // tile_m
    tk = _pick_tile(kdim, TILE_K_CAP)                          # full K for this net
    nk = kdim // tk

    # --- phase 1: conv matmul + per-tile channel statistics -------------------
    y, psum, psq = pl.pallas_call(
        _conv_stats_kernel,
        out_shape=(jax.ShapeDtypeStruct((m, cout), jnp.float32),
                   jax.ShapeDtypeStruct((8 * nm, cout), jnp.float32),
                   jax.ShapeDtypeStruct((8 * nm, cout), jnp.float32)),
        grid_spec=pltpu.PrefetchScalarGridSpec(
            num_scalar_prefetch=0,
            grid=(nm, nk),
            in_specs=[
                pl.BlockSpec((tile_m, tk), lambda i, k: (i, k)),
                pl.BlockSpec((tk, cout), lambda i, k: (k, 0)),
            ],
            out_specs=[
                pl.BlockSpec((tile_m, cout), lambda i, k: (i, 0)),
                pl.BlockSpec((8, cout), lambda i, k: (i, 0)),
                pl.BlockSpec((8, cout), lambda i, k: (i, 0)),
            ],
        ),
        compiler_params=pltpu.CompilerParams(
            dimension_semantics=("parallel", "arbitrary"),
            vmem_limit_bytes=VMEM_LIMIT),
    )(patches, w_bf)

    # --- phase 2: tiny per-channel reduction (O(Cout) work, plain JAX) --------
    # Each M-tile wrote its sums replicated over 8 rows -> divide by 8 (exact).
    mean = jnp.sum(psum, axis=0, keepdims=True) / (8.0 * m)          # (1, Cout)
    ex2 = jnp.sum(psq, axis=0, keepdims=True) / (8.0 * m)
    var = jnp.maximum(ex2 - mean * mean, 0.0)                        # biased var
    scale = gamma * jax.lax.rsqrt(var + EPS)
    bias = beta - mean * scale

    # --- phase 3: normalize + LeakyReLU (elementwise, M-parallel) -------------
    out = pl.pallas_call(
        functools.partial(_bn_lrelu_kernel, slope=SLOPE),
        out_shape=jax.ShapeDtypeStruct((m, cout), jnp.bfloat16),
        grid_spec=pltpu.PrefetchScalarGridSpec(
            num_scalar_prefetch=0,
            grid=(nm,),
            in_specs=[
                pl.BlockSpec((tile_m, cout), lambda i: (i, 0)),
                pl.BlockSpec((1, cout), lambda i: (0, 0)),
                pl.BlockSpec((1, cout), lambda i: (0, 0)),
            ],
            out_specs=pl.BlockSpec((tile_m, cout), lambda i: (i, 0)),
        ),
        compiler_params=pltpu.CompilerParams(
            dimension_semantics=("parallel",),
            vmem_limit_bytes=VMEM_LIMIT),
    )(y, scale, bias)
    return out.reshape(n, ho, wo, cout)


def conv_sigmoid(x_nhwc, w_mat):
    """Final 4x4 valid conv over a 4x4 map: im2col is just a flatten of
    (N, 4, 4, 128) -> (N, 2048) in (kh, kw, cin) order, then matmul+sigmoid."""
    n, h, w, c = x_nhwc.shape
    kdim = h * w * c
    cout = w_mat.shape[1]
    xf = x_nhwc.reshape(n, kdim)
    w_bf = w_mat.astype(jnp.bfloat16)

    out = pl.pallas_call(
        _matmul_sigmoid_kernel,
        out_shape=jax.ShapeDtypeStruct((n, cout), jnp.float32),
        grid_spec=pltpu.PrefetchScalarGridSpec(
            num_scalar_prefetch=0,
            grid=(1,),
            in_specs=[
                pl.BlockSpec((n, kdim), lambda i: (0, 0)),
                pl.BlockSpec((kdim, cout), lambda i: (0, 0)),
            ],
            out_specs=pl.BlockSpec((n, cout), lambda i: (0, 0)),
        ),
        compiler_params=pltpu.CompilerParams(
            dimension_semantics=("arbitrary",),
            vmem_limit_bytes=VMEM_LIMIT),
    )(xf, w_bf)
    return out                                   # (N, 1) == Flatten of (N,1,1,1)


# ----------------------------------------------------------------------------
# Parameters (PyTorch-default-like: kaiming-uniform conv weights, bias=False,
# BatchNorm gamma=1 / beta=0, training-mode batch statistics)
# ----------------------------------------------------------------------------
def make_params(key):
    def conv_w(k, cin, cout):
        # stored as (kh, kw, cin, cout) flattened to (kh*kw*cin, cout) to match
        # the im2col patch ordering.
        bound = 1.0 / jnp.sqrt(jnp.float32(cin * 16))
        w = jax.random.uniform(k, (4, 4, cin, cout), jnp.float32, -bound, bound)
        return w.reshape(16 * cin, cout)

    def bn(c):
        return jnp.ones((1, c), jnp.float32), jnp.zeros((1, c), jnp.float32)

    ks = jax.random.split(key, 5)
    return {
        "w0": conv_w(ks[0], 3, IMAGE_SIZE), "bn0": bn(64),
        "w1": conv_w(ks[1], 64, 128),       "bn1": bn(128),
        "w2": conv_w(ks[2], 128, 128),      "bn2": bn(128),
        "w3": conv_w(ks[3], 128, 128),      "bn3": bn(128),
        "w4": conv_w(ks[4], 128, 1),
    }


def discriminator_forward(x_nchw, params):
    x = jnp.transpose(x_nchw, (0, 2, 3, 1)).astype(jnp.bfloat16)   # NCHW -> NHWC
    x = conv_bn_lrelu(x, params["w0"], *params["bn0"], stride=2, pad=1)  # 64->32
    x = conv_bn_lrelu(x, params["w1"], *params["bn1"], stride=2, pad=1)  # 32->16
    x = conv_bn_lrelu(x, params["w2"], *params["bn2"], stride=2, pad=1)  # 16->8
    x = conv_bn_lrelu(x, params["w3"], *params["bn3"], stride=2, pad=1)  # 8->4
    return conv_sigmoid(x, params["w4"])                                 # 4->1, (N,1)


# ----------------------------------------------------------------------------
if __name__ == "__main__":
    key = jax.random.PRNGKey(0)
    kx, kp = jax.random.split(key)
    N = 2
    # The module architecture requires 64x64 spatial input (final valid 4x4 conv).
    x = jax.random.normal(kx, (N, 3, IMAGE_SIZE, IMAGE_SIZE), jnp.float32)
    params = make_params(kp)

    out = jax.jit(discriminator_forward)(x, params)
    out = jax.block_until_ready(out)

    assert out.shape == (N, 1), out.shape
    assert bool(jnp.all((out >= 0.0) & (out <= 1.0))), "sigmoid range violated"
    assert bool(jnp.all(jnp.isfinite(out))), "non-finite output"
    print("KERNEL_OK")
</pallas_src>

<mosaic_0001>
module attributes {stable_mosaic.version = 11 : i64} {
  func.func @_conv_stats_kernel(%arg0: i32, %arg1: i32, %arg2: memref<512x48xbf16, #tpu.memory_space<vmem>>, %arg3: memref<48x64xbf16, #tpu.memory_space<vmem>>, %arg4: memref<512x64xf32, #tpu.memory_space<vmem>>, %arg5: memref<8x64xf32, #tpu.memory_space<vmem>>, %arg6: memref<8x64xf32, #tpu.memory_space<vmem>>) attributes {dimension_semantics = [#tpu.dimension_semantics<parallel>, #tpu.dimension_semantics<arbitrary>], iteration_bounds = array<i64: 4, 1>, scalar_prefetch = 0 : i64, scratch_operands = 0 : i64, tpu.core_type = #tpu.core_type<tc>, window_params = [{transform_indices = @transform_0, window_bounds = array<i64: 512, 48>}, {transform_indices = @transform_1, window_bounds = array<i64: 48, 64>}, {transform_indices = @transform_2, window_bounds = array<i64: 512, 64>}, {transform_indices = @transform_3, window_bounds = array<i64: 8, 64>}, {transform_indices = @transform_4, window_bounds = array<i64: 8, 64>}]} {
    %c0_i32 = arith.constant 0 : i32
    %0 = arith.cmpi eq, %arg1, %c0_i32 : i32
    %1 = arith.extui %0 : i1 to i32
    %c0_i32_0 = arith.constant 0 : i32
    %2 = arith.cmpi ne, %1, %c0_i32_0 : i32
    scf.if %2 {
      %cst_10 = arith.constant 0.000000e+00 : f32
      %12 = vector.broadcast %cst_10 : f32 to vector<512x64xf32>
      %c0_11 = arith.constant 0 : index
      %c0_12 = arith.constant 0 : index
      %13 = vector.load %arg4[%c0_11, %c0_12] : memref<512x64xf32, #tpu.memory_space<vmem>>, vector<512x64xf32>
      tpu.vector_store %arg4[%c0_11, %c0_12], %12 {strides = array<i32>} : memref<512x64xf32, #tpu.memory_space<vmem>>, vector<512x64xf32>,
    } else {
    }
    %c0 = arith.constant 0 : index
    %c0_1 = arith.constant 0 : index
    %3 = vector.load %arg4[%c0, %c0_1] : memref<512x64xf32, #tpu.memory_space<vmem>>, vector<512x64xf32>
    %c0_2 = arith.constant 0 : index
    %c0_3 = arith.constant 0 : index
    %4 = vector.load %arg2[%c0_2, %c0_3] : memref<512x48xbf16, #tpu.memory_space<vmem>>, vector<512x48xbf16>
    %c0_4 = arith.constant 0 : index
    %c0_5 = arith.constant 0 : index
    %5 = vector.load %arg3[%c0_4, %c0_5] : memref<48x64xbf16, #tpu.memory_space<vmem>>, vector<48x64xbf16>
    %cst = arith.constant dense<0.000000e+00> : vector<512x64xf32>
    %6 = tpu.matmul %4, %5, %cst {dimension_numbers = #tpu.dot_dimension_numbers<[1], [0], [0], [1], [0, 0, 1, 1], [], []>} : vector<512x48xbf16>, vector<48x64xbf16>, vector<512x64xf32> -> vector<512x64xf32>
    %7 = arith.addf %3, %6 : vector<512x64xf32>
    %c0_6 = arith.constant 0 : index
    %c0_7 = arith.constant 0 : index
    %8 = vector.load %arg4[%c0_6, %c0_7] : memref<512x64xf32, #tpu.memory_space<vmem>>, vector<512x64xf32>
    tpu.vector_store %arg4[%c0_6, %c0_7], %7 {strides = array<i32>} : memref<512x64xf32, #tpu.memory_space<vmem>>, vector<512x64xf32>,
    %c0_i32_8 = arith.constant 0 : i32
    %9 = arith.cmpi eq, %arg1, %c0_i32_8 : i32
    %10 = arith.extui %9 : i1 to i32
    %c0_i32_9 = arith.constant 0 : i32
    %11 = arith.cmpi ne, %10, %c0_i32_9 : i32
    scf.if %11 {
      %c0_10 = arith.constant 0 : index
      %c0_11 = arith.constant 0 : index
      %12 = vector.load %arg4[%c0_10, %c0_11] : memref<512x64xf32, #tpu.memory_space<vmem>>, vector<512x64xf32>
      %cst_12 = arith.constant dense<0.000000e+00> : vector<64xf32>
      %13 = vector.multi_reduction <add>, %12, %cst_12 [0] : vector<512x64xf32> to vector<64xf32>
      %14 = vector.shape_cast %13 : vector<64xf32> to vector<1x64xf32>
      %15 = arith.mulf %12, %12 : vector<512x64xf32>
      %cst_13 = arith.constant dense<0.000000e+00> : vector<64xf32>
      %16 = vector.multi_reduction <add>, %15, %cst_13 [0] : vector<512x64xf32> to vector<64xf32>
      %17 = vector.shape_cast %16 : vector<64xf32> to vector<1x64xf32>
      %18 = vector.shape_cast %14 : vector<1x64xf32> to vector<1x64xf32>
      %19 = vector.broadcast %18 : vector<1x64xf32> to vector<8x64xf32>
      %c0_14 = arith.constant 0 : index
      %c0_15 = arith.constant 0 : index
      %20 = vector.load %arg5[%c0_14, %c0_15] : memref<8x64xf32, #tpu.memory_space<vmem>>, vector<8x64xf32>
      tpu.vector_store %arg5[%c0_14, %c0_15], %19 {strides = array<i32>} : memref<8x64xf32, #tpu.memory_space<vmem>>, vector<8x64xf32>,
      %21 = vector.shape_cast %17 : vector<1x64xf32> to vector<1x64xf32>
      %22 = vector.broadcast %21 : vector<1x64xf32> to vector<8x64xf32>
      %c0_16 = arith.constant 0 : index
      %c0_17 = arith.constant 0 : index
      %23 = vector.load %arg6[%c0_16, %c0_17] : memref<8x64xf32, #tpu.memory_space<vmem>>, vector<8x64xf32>
      tpu.vector_store %arg6[%c0_16, %c0_17], %22 {strides = array<i32>} : memref<8x64xf32, #tpu.memory_space<vmem>>, vector<8x64xf32>,
    } else {
    }
    return
  }
  func.func @transform_0(%arg0: i32, %arg1: i32) -> (i32, i32) {
    %c0_i32 = arith.constant 0 : i32
    return %arg0, %arg1 : i32, i32
  }
  func.func @transform_1(%arg0: i32, %arg1: i32) -> (i32, i32) {
    %c0_i32 = arith.constant 0 : i32
    %c0_i32_0 = arith.constant 0 : i32
    return %arg1, %c0_i32 : i32, i32
  }
  func.func @transform_2(%arg0: i32, %arg1: i32) -> (i32, i32) {
    %c0_i32 = arith.constant 0 : i32
    %c0_i32_0 = arith.constant 0 : i32
    return %arg0, %c0_i32 : i32, i32
  }
  func.func @transform_3(%arg0: i32, %arg1: i32) -> (i32, i32) {
    %c0_i32 = arith.constant 0 : i32
    %c0_i32_0 = arith.constant 0 : i32
    return %arg0, %c0_i32 : i32, i32
  }
  func.func @transform_4(%arg0: i32, %arg1: i32) -> (i32, i32) {
    %c0_i32 = arith.constant 0 : i32
    %c0_i32_0 = arith.constant 0 : i32
    return %arg0, %c0_i32 : i32, i32
  }
}

module attributes {stable_mosaic.version = 11 : i64} {
  func.func @_bn_lrelu_kernel(%arg0: i32, %arg1: memref<512x64xf32, #tpu.memory_space<vmem>>, %arg2: memref<1x64xf32, #tpu.memory_space<vmem>>, %arg3: memref<1x64xf32, #tpu.memory_space<vmem>>, %arg4: memref<512x64xbf16, #tpu.memory_space<vmem>>) attributes {dimension_semantics = [#tpu.dimension_semantics<parallel>], iteration_bounds = array<i64: 4>, scalar_prefetch = 0 : i64, scratch_operands = 0 : i64, tpu.core_type = #tpu.core_type<tc>, window_params = [{transform_indices = @transform_0, window_bounds = array<i64: 512, 64>}, {pipeline_mode = #tpu.pipeline_mode<synchronous>, transform_indices = @transform_1, window_bounds = array<i64: 1, 64>}, {pipeline_mode = #tpu.pipeline_mode<synchronous>, transform_indices = @transform_2, window_bounds = array<i64: 1, 64>}, {transform_indices = @transform_3, window_bounds = array<i64: 512, 64>}]} {
    %c0 = arith.constant 0 : index
    %c0_0 = arith.constant 0 : index
    %0 = vector.load %arg1[%c0, %c0_0] : memref<512x64xf32, #tpu.memory_space<vmem>>, vector<512x64xf32>
    %c0_1 = arith.constant 0 : index
    %c0_2 = arith.constant 0 : index
    %1 = vector.load %arg2[%c0_1, %c0_2] : memref<1x64xf32, #tpu.memory_space<vmem>>, vector<1x64xf32>
    %2 = vector.broadcast %1 : vector<1x64xf32> to vector<512x64xf32>
    %3 = arith.mulf %0, %2 : vector<512x64xf32>
    %c0_3 = arith.constant 0 : index
    %c0_4 = arith.constant 0 : index
    %4 = vector.load %arg3[%c0_3, %c0_4] : memref<1x64xf32, #tpu.memory_space<vmem>>, vector<1x64xf32>
    %5 = vector.broadcast %4 : vector<1x64xf32> to vector<512x64xf32>
    %6 = arith.addf %3, %5 : vector<512x64xf32>
    %cst = arith.constant 0.000000e+00 : f32
    %7 = vector.broadcast %cst : f32 to vector<512x64xf32>
    %8 = arith.cmpf oge, %6, %7 : vector<512x64xf32>
    %cst_5 = arith.constant 2.000000e-01 : f32
    %9 = vector.broadcast %cst_5 : f32 to vector<512x64xf32>
    %10 = arith.mulf %9, %6 : vector<512x64xf32>
    %11 = arith.select %8, %6, %10 : vector<512x64xi1>, vector<512x64xf32>
    %12 = arith.truncf %11 : vector<512x64xf32> to vector<512x64xbf16>
    %c0_6 = arith.constant 0 : index
    %c0_7 = arith.constant 0 : index
    %13 = vector.load %arg4[%c0_6, %c0_7] : memref<512x64xbf16, #tpu.memory_space<vmem>>, vector<512x64xbf16>
    tpu.vector_store %arg4[%c0_6, %c0_7], %12 {strides = array<i32>} : memref<512x64xbf16, #tpu.memory_space<vmem>>, vector<512x64xbf16>,
    return
  }
  func.func @transform_0(%arg0: i32) -> (i32, i32) {
    %c0_i32 = arith.constant 0 : i32
    %c0_i32_0 = arith.constant 0 : i32
    return %arg0, %c0_i32 : i32, i32
  }
  func.func @transform_1(%arg0: i32) -> (i32, i32) {
    %c0_i32 = arith.constant 0 : i32
    %c0_i32_0 = arith.constant 0 : i32
    %c0_i32_1 = arith.constant 0 : i32
    return %c0_i32, %c0_i32_0 : i32, i32
  }
  func.func @transform_2(%arg0: i32) -> (i32, i32) {
    %c0_i32 = arith.constant 0 : i32
    %c0_i32_0 = arith.constant 0 : i32
    %c0_i32_1 = arith.constant 0 : i32
    return %c0_i32, %c0_i32_0 : i32, i32
  }
  func.func @transform_3(%arg0: i32) -> (i32, i32) {
    %c0_i32 = arith.constant 0 : i32
    %c0_i32_0 = arith.constant 0 : i32
    return %arg0, %c0_i32 : i32, i32
  }
}

module attributes {stable_mosaic.version = 11 : i64} {
  func.func @_conv_stats_kernel(%arg0: i32, %arg1: i32, %arg2: memref<512x1024xbf16, #tpu.memory_space<vmem>>, %arg3: memref<1024x128xbf16, #tpu.memory_space<vmem>>, %arg4: memref<512x128xf32, #tpu.memory_space<vmem>>, %arg5: memref<8x128xf32, #tpu.memory_space<vmem>>, %arg6: memref<8x128xf32, #tpu.memory_space<vmem>>) attributes {dimension_semantics = [#tpu.dimension_semantics<parallel>, #tpu.dimension_semantics<arbitrary>], iteration_bounds = array<i64: 1, 1>, scalar_prefetch = 0 : i64, scratch_operands = 0 : i64, tpu.core_type = #tpu.core_type<tc>, window_params = [{transform_indices = @transform_0, window_bounds = array<i64: 512, 1024>}, {transform_indices = @transform_1, window_bounds = array<i64: 1024, 128>}, {transform_indices = @transform_2, window_bounds = array<i64: 512, 128>}, {transform_indices = @transform_3, window_bounds = array<i64: 8, 128>}, {transform_indices = @transform_4, window_bounds = array<i64: 8, 128>}]} {
    %c0_i32 = arith.constant 0 : i32
    %0 = arith.cmpi eq, %arg1, %c0_i32 : i32
    %1 = arith.extui %0 : i1 to i32
    %c0_i32_0 = arith.constant 0 : i32
    %2 = arith.cmpi ne, %1, %c0_i32_0 : i32
    scf.if %2 {
      %cst_10 = arith.constant 0.000000e+00 : f32
      %12 = vector.broadcast %cst_10 : f32 to vector<512x128xf32>
      %c0_11 = arith.constant 0 : index
      %c0_12 = arith.constant 0 : index
      %13 = vector.load %arg4[%c0_11, %c0_12] : memref<512x128xf32, #tpu.memory_space<vmem>>, vector<512x128xf32>
      tpu.vector_store %arg4[%c0_11, %c0_12], %12 {strides = array<i32>} : memref<512x128xf32, #tpu.memory_space<vmem>>, vector<512x128xf32>,
    } else {
    }
    %c0 = arith.constant 0 : index
    %c0_1 = arith.constant 0 : index
    %3 = vector.load %arg4[%c0, %c0_1] : memref<512x128xf32, #tpu.memory_space<vmem>>, vector<512x128xf32>
    %c0_2 = arith.constant 0 : index
    %c0_3 = arith.constant 0 : index
    %4 = vector.load %arg2[%c0_2, %c0_3] : memref<512x1024xbf16, #tpu.memory_space<vmem>>, vector<512x1024xbf16>
    %c0_4 = arith.constant 0 : index
    %c0_5 = arith.constant 0 : index
    %5 = vector.load %arg3[%c0_4, %c0_5] : memref<1024x128xbf16, #tpu.memory_space<vmem>>, vector<1024x128xbf16>
    %cst = arith.constant dense<0.000000e+00> : vector<512x128xf32>
    %6 = tpu.matmul %4, %5, %cst {dimension_numbers = #tpu.dot_dimension_numbers<[1], [0], [0], [1], [0, 0, 1, 1], [], []>} : vector<512x1024xbf16>, vector<1024x128xbf16>, vector<512x128xf32> -> vector<512x128xf32>
    %7 = arith.addf %3, %6 : vector<512x128xf32>
    %c0_6 = arith.constant 0 : index
    %c0_7 = arith.constant 0 : index
    %8 = vector.load %arg4[%c0_6, %c0_7] : memref<512x128xf32, #tpu.memory_space<vmem>>, vector<512x128xf32>
    tpu.vector_store %arg4[%c0_6, %c0_7], %7 {strides = array<i32>} : memref<512x128xf32, #tpu.memory_space<vmem>>, vector<512x128xf32>,
    %c0_i32_8 = arith.constant 0 : i32
    %9 = arith.cmpi eq, %arg1, %c0_i32_8 : i32
    %10 = arith.extui %9 : i1 to i32
    %c0_i32_9 = arith.constant 0 : i32
    %11 = arith.cmpi ne, %10, %c0_i32_9 : i32
    scf.if %11 {
      %c0_10 = arith.constant 0 : index
      %c0_11 = arith.constant 0 : index
      %12 = vector.load %arg4[%c0_10, %c0_11] : memref<512x128xf32, #tpu.memory_space<vmem>>, vector<512x128xf32>
      %cst_12 = arith.constant dense<0.000000e+00> : vector<128xf32>
      %13 = vector.multi_reduction <add>, %12, %cst_12 [0] : vector<512x128xf32> to vector<128xf32>
      %14 = vector.shape_cast %13 : vector<128xf32> to vector<1x128xf32>
      %15 = arith.mulf %12, %12 : vector<512x128xf32>
      %cst_13 = arith.constant dense<0.000000e+00> : vector<128xf32>
      %16 = vector.multi_reduction <add>, %15, %cst_13 [0] : vector<512x128xf32> to vector<128xf32>
      %17 = vector.shape_cast %16 : vector<128xf32> to vector<1x128xf32>
      %18 = vector.shape_cast %14 : vector<1x128xf32> to vector<1x128xf32>
      %19 = vector.broadcast %18 : vector<1x128xf32> to vector<8x128xf32>
      %c0_14 = arith.constant 0 : index
      %c0_15 = arith.constant 0 : index
      %20 = vector.load %arg5[%c0_14, %c0_15] : memref<8x128xf32, #tpu.memory_space<vmem>>, vector<8x128xf32>
      tpu.vector_store %arg5[%c0_14, %c0_15], %19 {strides = array<i32>} : memref<8x128xf32, #tpu.memory_space<vmem>>, vector<8x128xf32>,
      %21 = vector.shape_cast %17 : vector<1x128xf32> to vector<1x128xf32>
      %22 = vector.broadcast %21 : vector<1x128xf32> to vector<8x128xf32>
      %c0_16 = arith.constant 0 : index
      %c0_17 = arith.constant 0 : index
      %23 = vector.load %arg6[%c0_16, %c0_17] : memref<8x128xf32, #tpu.memory_space<vmem>>, vector<8x128xf32>
      tpu.vector_store %arg6[%c0_16, %c0_17], %22 {strides = array<i32>} : memref<8x128xf32, #tpu.memory_space<vmem>>, vector<8x128xf32>,
    } else {
    }
    return
  }
  func.func @transform_0(%arg0: i32, %arg1: i32) -> (i32, i32) {
    %c0_i32 = arith.constant 0 : i32
    return %arg0, %arg1 : i32, i32
  }
  func.func @transform_1(%arg0: i32, %arg1: i32) -> (i32, i32) {
    %c0_i32 = arith.constant 0 : i32
    %c0_i32_0 = arith.constant 0 : i32
    return %arg1, %c0_i32 : i32, i32
  }
  func.func @transform_2(%arg0: i32, %arg1: i32) -> (i32, i32) {
    %c0_i32 = arith.constant 0 : i32
    %c0_i32_0 = arith.constant 0 : i32
    return %arg0, %c0_i32 : i32, i32
  }
  func.func @transform_3(%arg0: i32, %arg1: i32) -> (i32, i32) {
    %c0_i32 = arith.constant 0 : i32
    %c0_i32_0 = arith.constant 0 : i32
    return %arg0, %c0_i32 : i32, i32
  }
  func.func @transform_4(%arg0: i32, %arg1: i32) -> (i32, i32) {
    %c0_i32 = arith.constant 0 : i32
    %c0_i32_0 = arith.constant 0 : i32
    return %arg0, %c0_i32 : i32, i32
  }
}

module attributes {stable_mosaic.version = 11 : i64} {
  func.func @_bn_lrelu_kernel(%arg0: i32, %arg1: memref<512x128xf32, #tpu.memory_space<vmem>>, %arg2: memref<1x128xf32, #tpu.memory_space<vmem>>, %arg3: memref<1x128xf32, #tpu.memory_space<vmem>>, %arg4: memref<512x128xbf16, #tpu.memory_space<vmem>>) attributes {dimension_semantics = [#tpu.dimension_semantics<parallel>], iteration_bounds = array<i64: 1>, scalar_prefetch = 0 : i64, scratch_operands = 0 : i64, tpu.core_type = #tpu.core_type<tc>, window_params = [{transform_indices = @transform_0, window_bounds = array<i64: 512, 128>}, {pipeline_mode = #tpu.pipeline_mode<synchronous>, transform_indices = @transform_1, window_bounds = array<i64: 1, 128>}, {pipeline_mode = #tpu.pipeline_mode<synchronous>, transform_indices = @transform_2, window_bounds = array<i64: 1, 128>}, {transform_indices = @transform_3, window_bounds = array<i64: 512, 128>}]} {
    %c0 = arith.constant 0 : index
    %c0_0 = arith.constant 0 : index
    %0 = vector.load %arg1[%c0, %c0_0] : memref<512x128xf32, #tpu.memory_space<vmem>>, vector<512x128xf32>
    %c0_1 = arith.constant 0 : index
    %c0_2 = arith.constant 0 : index
    %1 = vector.load %arg2[%c0_1, %c0_2] : memref<1x128xf32, #tpu.memory_space<vmem>>, vector<1x128xf32>
    %2 = vector.broadcast %1 : vector<1x128xf32> to vector<512x128xf32>
    %3 = arith.mulf %0, %2 : vector<512x128xf32>
    %c0_3 = arith.constant 0 : index
    %c0_4 = arith.constant 0 : index
    %4 = vector.load %arg3[%c0_3, %c0_4] : memref<1x128xf32, #tpu.memory_space<vmem>>, vector<1x128xf32>
    %5 = vector.broadcast %4 : vector<1x128xf32> to vector<512x128xf32>
    %6 = arith.addf %3, %5 : vector<512x128xf32>
    %cst = arith.constant 0.000000e+00 : f32
    %7 = vector.broadcast %cst : f32 to vector<512x128xf32>
    %8 = arith.cmpf oge, %6, %7 : vector<512x128xf32>
    %cst_5 = arith.constant 2.000000e-01 : f32
    %9 = vector.broadcast %cst_5 : f32 to vector<512x128xf32>
    %10 = arith.mulf %9, %6 : vector<512x128xf32>
    %11 = arith.select %8, %6, %10 : vector<512x128xi1>, vector<512x128xf32>
    %12 = arith.truncf %11 : vector<512x128xf32> to vector<512x128xbf16>
    %c0_6 = arith.constant 0 : index
    %c0_7 = arith.constant 0 : index
    %13 = vector.load %arg4[%c0_6, %c0_7] : memref<512x128xbf16, #tpu.memory_space<vmem>>, vector<512x128xbf16>
    tpu.vector_store %arg4[%c0_6, %c0_7], %12 {strides = array<i32>} : memref<512x128xbf16, #tpu.memory_space<vmem>>, vector<512x128xbf16>,
    return
  }
  func.func @transform_0(%arg0: i32) -> (i32, i32) {
    %c0_i32 = arith.constant 0 : i32
    %c0_i32_0 = arith.constant 0 : i32
    return %arg0, %c0_i32 : i32, i32
  }
  func.func @transform_1(%arg0: i32) -> (i32, i32) {
    %c0_i32 = arith.constant 0 : i32
    %c0_i32_0 = arith.constant 0 : i32
    %c0_i32_1 = arith.constant 0 : i32
    return %c0_i32, %c0_i32_0 : i32, i32
  }
  func.func @transform_2(%arg0: i32) -> (i32, i32) {
    %c0_i32 = arith.constant 0 : i32
    %c0_i32_0 = arith.constant 0 : i32
    %c0_i32_1 = arith.constant 0 : i32
    return %c0_i32, %c0_i32_0 : i32, i32
  }
  func.func @transform_3(%arg0: i32) -> (i32, i32) {
    %c0_i32 = arith.constant 0 : i32
    %c0_i32_0 = arith.constant 0 : i32
    return %arg0, %c0_i32 : i32, i32
  }
}

module attributes {stable_mosaic.version = 11 : i64} {
  func.func @_bn_lrelu_kernel(%arg0: i32, %arg1: memref<128x128xf32, #tpu.memory_space<vmem>>, %arg2: memref<1x128xf32, #tpu.memory_space<vmem>>, %arg3: memref<1x128xf32, #tpu.memory_space<vmem>>, %arg4: memref<128x128xbf16, #tpu.memory_space<vmem>>) attributes {dimension_semantics = [#tpu.dimension_semantics<parallel>], iteration_bounds = array<i64: 1>, scalar_prefetch = 0 : i64, scratch_operands = 0 : i64, tpu.core_type = #tpu.core_type<tc>, window_params = [{transform_indices = @transform_0, window_bounds = array<i64: 128, 128>}, {pipeline_mode = #tpu.pipeline_mode<synchronous>, transform_indices = @transform_1, window_bounds = array<i64: 1, 128>}, {pipeline_mode = #tpu.pipeline_mode<synchronous>, transform_indices = @transform_2, window_bounds = array<i64: 1, 128>}, {transform_indices = @transform_3, window_bounds = array<i64: 128, 128>}]} {
    %c0 = arith.constant 0 : index
    %c0_0 = arith.constant 0 : index
    %0 = vector.load %arg1[%c0, %c0_0] : memref<128x128xf32, #tpu.memory_space<vmem>>, vector<128x128xf32>
    %c0_1 = arith.constant 0 : index
    %c0_2 = arith.constant 0 : index
    %1 = vector.load %arg2[%c0_1, %c0_2] : memref<1x128xf32, #tpu.memory_space<vmem>>, vector<1x128xf32>
    %2 = vector.broadcast %1 : vector<1x128xf32> to vector<128x128xf32>
    %3 = arith.mulf %0, %2 : vector<128x128xf32>
    %c0_3 = arith.constant 0 : index
    %c0_4 = arith.constant 0 : index
    %4 = vector.load %arg3[%c0_3, %c0_4] : memref<1x128xf32, #tpu.memory_space<vmem>>, vector<1x128xf32>
    %5 = vector.broadcast %4 : vector<1x128xf32> to vector<128x128xf32>
    %6 = arith.addf %3, %5 : vector<128x128xf32>
    %cst = arith.constant 0.000000e+00 : f32
    %7 = vector.broadcast %cst : f32 to vector<128x128xf32>
    %8 = arith.cmpf oge, %6, %7 : vector<128x128xf32>
    %cst_5 = arith.constant 2.000000e-01 : f32
    %9 = vector.broadcast %cst_5 : f32 to vector<128x128xf32>
    %10 = arith.mulf %9, %6 : vector<128x128xf32>
    %11 = arith.select %8, %6, %10 : vector<128x128xi1>, vector<128x128xf32>
    %12 = arith.truncf %11 : vector<128x128xf32> to vector<128x128xbf16>
    %c0_6 = arith.constant 0 : index
    %c0_7 = arith.constant 0 : index
    %13 = vector.load %arg4[%c0_6, %c0_7] : memref<128x128xbf16, #tpu.memory_space<vmem>>, vector<128x128xbf16>
    tpu.vector_store %arg4[%c0_6, %c0_7], %12 {strides = array<i32>} : memref<128x128xbf16, #tpu.memory_space<vmem>>, vector<128x128xbf16>,
    return
  }
  func.func @transform_0(%arg0: i32) -> (i32, i32) {
    %c0_i32 = arith.constant 0 : i32
    %c0_i32_0 = arith.constant 0 : i32
    return %arg0, %c0_i32 : i32, i32
  }
  func.func @transform_1(%arg0: i32) -> (i32, i32) {
    %c0_i32 = arith.constant 0 : i32
    %c0_i32_0 = arith.constant 0 : i32
    %c0_i32_1 = arith.constant 0 : i32
    return %c0_i32, %c0_i32_0 : i32, i32
  }
  func.func @transform_2(%arg0: i32) -> (i32, i32) {
    %c0_i32 = arith.constant 0 : i32
    %c0_i32_0 = arith.constant 0 : i32
    %c0_i32_1 = arith.constant 0 : i32
    return %c0_i32, %c0_i32_0 : i32, i32
  }
  func.func @transform_3(%arg0: i32) -> (i32, i32) {
    %c0_i32 = arith.constant 0 : i32
    %c0_i32_0 = arith.constant 0 : i32
    return %arg0, %c0_i32 : i32, i32
  }
}

module attributes {stable_mosaic.version = 11 : i64} {
  func.func @_conv_stats_kernel(%arg0: i32, %arg1: i32, %arg2: memref<128x2048xbf16, #tpu.memory_space<vmem>>, %arg3: memref<2048x128xbf16, #tpu.memory_space<vmem>>, %arg4: memref<128x128xf32, #tpu.memory_space<vmem>>, %arg5: memref<8x128xf32, #tpu.memory_space<vmem>>, %arg6: memref<8x128xf32, #tpu.memory_space<vmem>>) attributes {dimension_semantics = [#tpu.dimension_semantics<parallel>, #tpu.dimension_semantics<arbitrary>], iteration_bounds = array<i64: 1, 1>, scalar_prefetch = 0 : i64, scratch_operands = 0 : i64, tpu.core_type = #tpu.core_type<tc>, window_params = [{transform_indices = @transform_0, window_bounds = array<i64: 128, 2048>}, {transform_indices = @transform_1, window_bounds = array<i64: 2048, 128>}, {transform_indices = @transform_2, window_bounds = array<i64: 128, 128>}, {transform_indices = @transform_3, window_bounds = array<i64: 8, 128>}, {transform_indices = @transform_4, window_bounds = array<i64: 8, 128>}]} {
    %c0_i32 = arith.constant 0 : i32
    %0 = arith.cmpi eq, %arg1, %c0_i32 : i32
    %1 = arith.extui %0 : i1 to i32
    %c0_i32_0 = arith.constant 0 : i32
    %2 = arith.cmpi ne, %1, %c0_i32_0 : i32
    scf.if %2 {
      %cst_10 = arith.constant 0.000000e+00 : f32
      %12 = vector.broadcast %cst_10 : f32 to vector<128x128xf32>
      %c0_11 = arith.constant 0 : index
      %c0_12 = arith.constant 0 : index
      %13 = vector.load %arg4[%c0_11, %c0_12] : memref<128x128xf32, #tpu.memory_space<vmem>>, vector<128x128xf32>
      tpu.vector_store %arg4[%c0_11, %c0_12], %12 {strides = array<i32>} : memref<128x128xf32, #tpu.memory_space<vmem>>, vector<128x128xf32>,
    } else {
    }
    %c0 = arith.constant 0 : index
    %c0_1 = arith.constant 0 : index
    %3 = vector.load %arg4[%c0, %c0_1] : memref<128x128xf32, #tpu.memory_space<vmem>>, vector<128x128xf32>
    %c0_2 = arith.constant 0 : index
    %c0_3 = arith.constant 0 : index
    %4 = vector.load %arg2[%c0_2, %c0_3] : memref<128x2048xbf16, #tpu.memory_space<vmem>>, vector<128x2048xbf16>
    %c0_4 = arith.constant 0 : index
    %c0_5 = arith.constant 0 : index
    %5 = vector.load %arg3[%c0_4, %c0_5] : memref<2048x128xbf16, #tpu.memory_space<vmem>>, vector<2048x128xbf16>
    %cst = arith.constant dense<0.000000e+00> : vector<128x128xf32>
    %6 = tpu.matmul %4, %5, %cst {dimension_numbers = #tpu.dot_dimension_numbers<[1], [0], [0], [1], [0, 0, 1, 1], [], []>} : vector<128x2048xbf16>, vector<2048x128xbf16>, vector<128x128xf32> -> vector<128x128xf32>
    %7 = arith.addf %3, %6 : vector<128x128xf32>
    %c0_6 = arith.constant 0 : index
    %c0_7 = arith.constant 0 : index
    %8 = vector.load %arg4[%c0_6, %c0_7] : memref<128x128xf32, #tpu.memory_space<vmem>>, vector<128x128xf32>
    tpu.vector_store %arg4[%c0_6, %c0_7], %7 {strides = array<i32>} : memref<128x128xf32, #tpu.memory_space<vmem>>, vector<128x128xf32>,
    %c0_i32_8 = arith.constant 0 : i32
    %9 = arith.cmpi eq, %arg1, %c0_i32_8 : i32
    %10 = arith.extui %9 : i1 to i32
    %c0_i32_9 = arith.constant 0 : i32
    %11 = arith.cmpi ne, %10, %c0_i32_9 : i32
    scf.if %11 {
      %c0_10 = arith.constant 0 : index
      %c0_11 = arith.constant 0 : index
      %12 = vector.load %arg4[%c0_10, %c0_11] : memref<128x128xf32, #tpu.memory_space<vmem>>, vector<128x128xf32>
      %cst_12 = arith.constant dense<0.000000e+00> : vector<128xf32>
      %13 = vector.multi_reduction <add>, %12, %cst_12 [0] : vector<128x128xf32> to vector<128xf32>
      %14 = vector.shape_cast %13 : vector<128xf32> to vector<1x128xf32>
      %15 = arith.mulf %12, %12 : vector<128x128xf32>
      %cst_13 = arith.constant dense<0.000000e+00> : vector<128xf32>
      %16 = vector.multi_reduction <add>, %15, %cst_13 [0] : vector<128x128xf32> to vector<128xf32>
      %17 = vector.shape_cast %16 : vector<128xf32> to vector<1x128xf32>
      %18 = vector.shape_cast %14 : vector<1x128xf32> to vector<1x128xf32>
      %19 = vector.broadcast %18 : vector<1x128xf32> to vector<8x128xf32>
      %c0_14 = arith.constant 0 : index
      %c0_15 = arith.constant 0 : index
      %20 = vector.load %arg5[%c0_14, %c0_15] : memref<8x128xf32, #tpu.memory_space<vmem>>, vector<8x128xf32>
      tpu.vector_store %arg5[%c0_14, %c0_15], %19 {strides = array<i32>} : memref<8x128xf32, #tpu.memory_space<vmem>>, vector<8x128xf32>,
      %21 = vector.shape_cast %17 : vector<1x128xf32> to vector<1x128xf32>
      %22 = vector.broadcast %21 : vector<1x128xf32> to vector<8x128xf32>
      %c0_16 = arith.constant 0 : index
      %c0_17 = arith.constant 0 : index
      %23 = vector.load %arg6[%c0_16, %c0_17] : memref<8x128xf32, #tpu.memory_space<vmem>>, vector<8x128xf32>
      tpu.vector_store %arg6[%c0_16, %c0_17], %22 {strides = array<i32>} : memref<8x128xf32, #tpu.memory_space<vmem>>, vector<8x128xf32>,
    } else {
    }
    return
  }
  func.func @transform_0(%arg0: i32, %arg1: i32) -> (i32, i32) {
    %c0_i32 = arith.constant 0 : i32
    return %arg0, %arg1 : i32, i32
  }
  func.func @transform_1(%arg0: i32, %arg1: i32) -> (i32, i32) {
    %c0_i32 = arith.constant 0 : i32
    %c0_i32_0 = arith.constant 0 : i32
    return %arg1, %c0_i32 : i32, i32
  }
  func.func @transform_2(%arg0: i32, %arg1: i32) -> (i32, i32) {
    %c0_i32 = arith.constant 0 : i32
    %c0_i32_0 = arith.constant 0 : i32
    return %arg0, %c0_i32 : i32, i32
  }
  func.func @transform_3(%arg0: i32, %arg1: i32) -> (i32, i32) {
    %c0_i32 = arith.constant 0 : i32
    %c0_i32_0 = arith.constant 0 : i32
    return %arg0, %c0_i32 : i32, i32
  }
  func.func @transform_4(%arg0: i32, %arg1: i32) -> (i32, i32) {
    %c0_i32 = arith.constant 0 : i32
    %c0_i32_0 = arith.constant 0 : i32
    return %arg0, %c0_i32 : i32, i32
  }
}

module attributes {stable_mosaic.version = 11 : i64} {
  func.func @_conv_stats_kernel(%arg0: i32, %arg1: i32, %arg2: memref<32x2048xbf16, #tpu.memory_space<vmem>>, %arg3: memref<2048x128xbf16, #tpu.memory_space<vmem>>, %arg4: memref<32x128xf32, #tpu.memory_space<vmem>>, %arg5: memref<8x128xf32, #tpu.memory_space<vmem>>, %arg6: memref<8x128xf32, #tpu.memory_space<vmem>>) attributes {dimension_semantics = [#tpu.dimension_semantics<parallel>, #tpu.dimension_semantics<arbitrary>], iteration_bounds = array<i64: 1, 1>, scalar_prefetch = 0 : i64, scratch_operands = 0 : i64, tpu.core_type = #tpu.core_type<tc>, window_params = [{transform_indices = @transform_0, window_bounds = array<i64: 32, 2048>}, {transform_indices = @transform_1, window_bounds = array<i64: 2048, 128>}, {transform_indices = @transform_2, window_bounds = array<i64: 32, 128>}, {transform_indices = @transform_3, window_bounds = array<i64: 8, 128>}, {transform_indices = @transform_4, window_bounds = array<i64: 8, 128>}]} {
    %c0_i32 = arith.constant 0 : i32
    %0 = arith.cmpi eq, %arg1, %c0_i32 : i32
    %1 = arith.extui %0 : i1 to i32
    %c0_i32_0 = arith.constant 0 : i32
    %2 = arith.cmpi ne, %1, %c0_i32_0 : i32
    scf.if %2 {
      %cst_10 = arith.constant 0.000000e+00 : f32
      %12 = vector.broadcast %cst_10 : f32 to vector<32x128xf32>
      %c0_11 = arith.constant 0 : index
      %c0_12 = arith.constant 0 : index
      %13 = vector.load %arg4[%c0_11, %c0_12] : memref<32x128xf32, #tpu.memory_space<vmem>>, vector<32x128xf32>
      tpu.vector_store %arg4[%c0_11, %c0_12], %12 {strides = array<i32>} : memref<32x128xf32, #tpu.memory_space<vmem>>, vector<32x128xf32>,
    } else {
    }
    %c0 = arith.constant 0 : index
    %c0_1 = arith.constant 0 : index
    %3 = vector.load %arg4[%c0, %c0_1] : memref<32x128xf32, #tpu.memory_space<vmem>>, vector<32x128xf32>
    %c0_2 = arith.constant 0 : index
    %c0_3 = arith.constant 0 : index
    %4 = vector.load %arg2[%c0_2, %c0_3] : memref<32x2048xbf16, #tpu.memory_space<vmem>>, vector<32x2048xbf16>
    %c0_4 = arith.constant 0 : index
    %c0_5 = arith.constant 0 : index
    %5 = vector.load %arg3[%c0_4, %c0_5] : memref<2048x128xbf16, #tpu.memory_space<vmem>>, vector<2048x128xbf16>
    %cst = arith.constant dense<0.000000e+00> : vector<32x128xf32>
    %6 = tpu.matmul %4, %5, %cst {dimension_numbers = #tpu.dot_dimension_numbers<[1], [0], [0], [1], [0, 0, 1, 1], [], []>} : vector<32x2048xbf16>, vector<2048x128xbf16>, vector<32x128xf32> -> vector<32x128xf32>
    %7 = arith.addf %3, %6 : vector<32x128xf32>
    %c0_6 = arith.constant 0 : index
    %c0_7 = arith.constant 0 : index
    %8 = vector.load %arg4[%c0_6, %c0_7] : memref<32x128xf32, #tpu.memory_space<vmem>>, vector<32x128xf32>
    tpu.vector_store %arg4[%c0_6, %c0_7], %7 {strides = array<i32>} : memref<32x128xf32, #tpu.memory_space<vmem>>, vector<32x128xf32>,
    %c0_i32_8 = arith.constant 0 : i32
    %9 = arith.cmpi eq, %arg1, %c0_i32_8 : i32
    %10 = arith.extui %9 : i1 to i32
    %c0_i32_9 = arith.constant 0 : i32
    %11 = arith.cmpi ne, %10, %c0_i32_9 : i32
    scf.if %11 {
      %c0_10 = arith.constant 0 : index
      %c0_11 = arith.constant 0 : index
      %12 = vector.load %arg4[%c0_10, %c0_11] : memref<32x128xf32, #tpu.memory_space<vmem>>, vector<32x128xf32>
      %cst_12 = arith.constant dense<0.000000e+00> : vector<128xf32>
      %13 = vector.multi_reduction <add>, %12, %cst_12 [0] : vector<32x128xf32> to vector<128xf32>
      %14 = vector.shape_cast %13 : vector<128xf32> to vector<1x128xf32>
      %15 = arith.mulf %12, %12 : vector<32x128xf32>
      %cst_13 = arith.constant dense<0.000000e+00> : vector<128xf32>
      %16 = vector.multi_reduction <add>, %15, %cst_13 [0] : vector<32x128xf32> to vector<128xf32>
      %17 = vector.shape_cast %16 : vector<128xf32> to vector<1x128xf32>
      %18 = vector.shape_cast %14 : vector<1x128xf32> to vector<1x128xf32>
      %19 = vector.broadcast %18 : vector<1x128xf32> to vector<8x128xf32>
      %c0_14 = arith.constant 0 : index
      %c0_15 = arith.constant 0 : index
      %20 = vector.load %arg5[%c0_14, %c0_15] : memref<8x128xf32, #tpu.memory_space<vmem>>, vector<8x128xf32>
      tpu.vector_store %arg5[%c0_14, %c0_15], %19 {strides = array<i32>} : memref<8x128xf32, #tpu.memory_space<vmem>>, vector<8x128xf32>,
      %21 = vector.shape_cast %17 : vector<1x128xf32> to vector<1x128xf32>
      %22 = vector.broadcast %21 : vector<1x128xf32> to vector<8x128xf32>
      %c0_16 = arith.constant 0 : index
      %c0_17 = arith.constant 0 : index
      %23 = vector.load %arg6[%c0_16, %c0_17] : memref<8x128xf32, #tpu.memory_space<vmem>>, vector<8x128xf32>
      tpu.vector_store %arg6[%c0_16, %c0_17], %22 {strides = array<i32>} : memref<8x128xf32, #tpu.memory_space<vmem>>, vector<8x128xf32>,
    } else {
    }
    return
  }
  func.func @transform_0(%arg0: i32, %arg1: i32) -> (i32, i32) {
    %c0_i32 = arith.constant 0 : i32
    return %arg0, %arg1 : i32, i32
  }
  func.func @transform_1(%arg0: i32, %arg1: i32) -> (i32, i32) {
    %c0_i32 = arith.constant 0 : i32
    %c0_i32_0 = arith.constant 0 : i32
    return %arg1, %c0_i32 : i32, i32
  }
  func.func @transform_2(%arg0: i32, %arg1: i32) -> (i32, i32) {
    %c0_i32 = arith.constant 0 : i32
    %c0_i32_0 = arith.constant 0 : i32
    return %arg0, %c0_i32 : i32, i32
  }
  func.func @transform_3(%arg0: i32, %arg1: i32) -> (i32, i32) {
    %c0_i32 = arith.constant 0 : i32
    %c0_i32_0 = arith.constant 0 : i32
    return %arg0, %c0_i32 : i32, i32
  }
  func.func @transform_4(%arg0: i32, %arg1: i32) -> (i32, i32) {
    %c0_i32 = arith.constant 0 : i32
    %c0_i32_0 = arith.constant 0 : i32
    return %arg0, %c0_i32 : i32, i32
  }
}

module attributes {stable_mosaic.version = 11 : i64} {
  func.func @_bn_lrelu_kernel(%arg0: i32, %arg1: memref<32x128xf32, #tpu.memory_space<vmem>>, %arg2: memref<1x128xf32, #tpu.memory_space<vmem>>, %arg3: memref<1x128xf32, #tpu.memory_space<vmem>>, %arg4: memref<32x128xbf16, #tpu.memory_space<vmem>>) attributes {dimension_semantics = [#tpu.dimension_semantics<parallel>], iteration_bounds = array<i64: 1>, scalar_prefetch = 0 : i64, scratch_operands = 0 : i64, tpu.core_type = #tpu.core_type<tc>, window_params = [{transform_indices = @transform_0, window_bounds = array<i64: 32, 128>}, {pipeline_mode = #tpu.pipeline_mode<synchronous>, transform_indices = @transform_1, window_bounds = array<i64: 1, 128>}, {pipeline_mode = #tpu.pipeline_mode<synchronous>, transform_indices = @transform_2, window_bounds = array<i64: 1, 128>}, {transform_indices = @transform_3, window_bounds = array<i64: 32, 128>}]} {
    %c0 = arith.constant 0 : index
    %c0_0 = arith.constant 0 : index
    %0 = vector.load %arg1[%c0, %c0_0] : memref<32x128xf32, #tpu.memory_space<vmem>>, vector<32x128xf32>
    %c0_1 = arith.constant 0 : index
    %c0_2 = arith.constant 0 : index
    %1 = vector.load %arg2[%c0_1, %c0_2] : memref<1x128xf32, #tpu.memory_space<vmem>>, vector<1x128xf32>
    %2 = vector.broadcast %1 : vector<1x128xf32> to vector<32x128xf32>
    %3 = arith.mulf %0, %2 : vector<32x128xf32>
    %c0_3 = arith.constant 0 : index
    %c0_4 = arith.constant 0 : index
    %4 = vector.load %arg3[%c0_3, %c0_4] : memref<1x128xf32, #tpu.memory_space<vmem>>, vector<1x128xf32>
    %5 = vector.broadcast %4 : vector<1x128xf32> to vector<32x128xf32>
    %6 = arith.addf %3, %5 : vector<32x128xf32>
    %cst = arith.constant 0.000000e+00 : f32
    %7 = vector.broadcast %cst : f32 to vector<32x128xf32>
    %8 = arith.cmpf oge, %6, %7 : vector<32x128xf32>
    %cst_5 = arith.constant 2.000000e-01 : f32
    %9 = vector.broadcast %cst_5 : f32 to vector<32x128xf32>
    %10 = arith.mulf %9, %6 : vector<32x128xf32>
    %11 = arith.select %8, %6, %10 : vector<32x128xi1>, vector<32x128xf32>
    %12 = arith.truncf %11 : vector<32x128xf32> to vector<32x128xbf16>
    %c0_6 = arith.constant 0 : index
    %c0_7 = arith.constant 0 : index
    %13 = vector.load %arg4[%c0_6, %c0_7] : memref<32x128xbf16, #tpu.memory_space<vmem>>, vector<32x128xbf16>
    tpu.vector_store %arg4[%c0_6, %c0_7], %12 {strides = array<i32>} : memref<32x128xbf16, #tpu.memory_space<vmem>>, vector<32x128xbf16>,
    return
  }
  func.func @transform_0(%arg0: i32) -> (i32, i32) {
    %c0_i32 = arith.constant 0 : i32
    %c0_i32_0 = arith.constant 0 : i32
    return %arg0, %c0_i32 : i32, i32
  }
  func.func @transform_1(%arg0: i32) -> (i32, i32) {
    %c0_i32 = arith.constant 0 : i32
    %c0_i32_0 = arith.constant 0 : i32
    %c0_i32_1 = arith.constant 0 : i32
    return %c0_i32, %c0_i32_0 : i32, i32
  }
  func.func @transform_2(%arg0: i32) -> (i32, i32) {
    %c0_i32 = arith.constant 0 : i32
    %c0_i32_0 = arith.constant 0 : i32
    %c0_i32_1 = arith.constant 0 : i32
    return %c0_i32, %c0_i32_0 : i32, i32
  }
  func.func @transform_3(%arg0: i32) -> (i32, i32) {
    %c0_i32 = arith.constant 0 : i32
    %c0_i32_0 = arith.constant 0 : i32
    return %arg0, %c0_i32 : i32, i32
  }
}

module attributes {stable_mosaic.version = 11 : i64} {
  func.func @_matmul_sigmoid_kernel(%arg0: i32, %arg1: memref<2x2048xbf16, #tpu.memory_space<vmem>>, %arg2: memref<2048x1xbf16, #tpu.memory_space<vmem>>, %arg3: memref<2x1xf32, #tpu.memory_space<vmem>>) attributes {dimension_semantics = [#tpu.dimension_semantics<arbitrary>], iteration_bounds = array<i64: 1>, scalar_prefetch = 0 : i64, scratch_operands = 0 : i64, tpu.core_type = #tpu.core_type<tc>, window_params = [{pipeline_mode = #tpu.pipeline_mode<synchronous>, transform_indices = @transform_0, window_bounds = array<i64: 2, 2048>}, {pipeline_mode = #tpu.pipeline_mode<synchronous>, transform_indices = @transform_1, window_bounds = array<i64: 2048, 1>}, {pipeline_mode = #tpu.pipeline_mode<synchronous>, transform_indices = @transform_2, window_bounds = array<i64: 2, 1>}]} {
    %c0 = arith.constant 0 : index
    %c0_0 = arith.constant 0 : index
    %0 = vector.load %arg1[%c0, %c0_0] : memref<2x2048xbf16, #tpu.memory_space<vmem>>, vector<2x2048xbf16>
    %c0_1 = arith.constant 0 : index
    %c0_2 = arith.constant 0 : index
    %1 = vector.load %arg2[%c0_1, %c0_2] : memref<2048x1xbf16, #tpu.memory_space<vmem>>, vector<2048x1xbf16>
    %cst = arith.constant dense<0.000000e+00> : vector<2x1xf32>
    %2 = tpu.matmul %0, %1, %cst {dimension_numbers = #tpu.dot_dimension_numbers<[1], [0], [0], [1], [0, 0, 1, 1], [], []>} : vector<2x2048xbf16>, vector<2048x1xbf16>, vector<2x1xf32> -> vector<2x1xf32>
    %3 = arith.negf %2 : vector<2x1xf32>
    %4 = math.exp %3 : vector<2x1xf32>
    %cst_3 = arith.constant 1.000000e+00 : f32
    %5 = vector.broadcast %cst_3 : f32 to vector<2x1xf32>
    %6 = arith.addf %5, %4 : vector<2x1xf32>
    %7 = arith.divf %5, %6 : vector<2x1xf32>
    %c0_4 = arith.constant 0 : index
    %c0_5 = arith.constant 0 : index
    %8 = vector.load %arg3[%c0_4, %c0_5] : memref<2x1xf32, #tpu.memory_space<vmem>>, vector<2x1xf32>
    tpu.vector_store %arg3[%c0_4, %c0_5], %7 {strides = array<i32>} : memref<2x1xf32, #tpu.memory_space<vmem>>, vector<2x1xf32>,
    return
  }
  func.func @transform_0(%arg0: i32) -> (i32, i32) {
    %c0_i32 = arith.constant 0 : i32
    %c0_i32_0 = arith.constant 0 : i32
    %c0_i32_1 = arith.constant 0 : i32
    return %c0_i32, %c0_i32_0 : i32, i32
  }
  func.func @transform_1(%arg0: i32) -> (i32, i32) {
    %c0_i32 = arith.constant 0 : i32
    %c0_i32_0 = arith.constant 0 : i32
    %c0_i32_1 = arith.constant 0 : i32
    return %c0_i32, %c0_i32_0 : i32, i32
  }
  func.func @transform_2(%arg0: i32) -> (i32, i32) {
    %c0_i32 = arith.constant 0 : i32
    %c0_i32_0 = arith.constant 0 : i32
    %c0_i32_1 = arith.constant 0 : i32
    return %c0_i32, %c0_i32_0 : i32, i32
  }
}

</mosaic_0001>

<bundles_post_ra>
// kernel: discriminator_forward.9
= control target key start
LH: loop header
LB: loop body
LE: loop exit
PB: predicated region body
PF: predicated region fallthrough
CT: control target
= control target key end

     0   :  { %s2010_s15 = smov 0   ;;  %s2012_s16 = smov 0   ;;  %s2795_s0 = inlined_call_operand.vmem [shape: bf16[2048,48], index: 0, kind: input, shape index: {}]   ;;  %s2796_s1 = inlined_call_operand.vmem [shape: bf16[48,64], index: 1, kind: input, shape index: {}]   ;;  %s2797_s2 = inlined_call_operand.vmem [shape: f32[2048,64], index: 2, kind: output, shape index: {0}]   ;;  %s2798_s3 = inlined_call_operand.vmem [shape: f32[32,64], index: 3, kind: output, shape index: {1}]   ;;  %s2799_s4 = inlined_call_operand.vmem [shape: f32[32,64], index: 4, kind: output, shape index: {2}]  }
   0x1   :  { %s2014_s17 = smov 0  }
   0x2 LB: > { %s27_s18 = sadd.s32 1, %s1978_s16  ;;  %p1713_p0 = scmp.ge.s32.totalorder %s1982_s17, 1  ;;  %s1982_s17 = sphi %s2014_s17, %s15_s17   ;;  %s1978_s16 = sphi %s2012_s16, %s2801_s16   ;;  %s1974_s15 = sphi %s2010_s15, %s2800_s15  }
   0x3   : > { %p29_p1 = scmp.ge.s32.totalorder %s27_s18, 4  ;;  %p196_p2 = scmp.lt.s32.totalorder %s1982_s17, 5 }
   0x5   : > { %s2803_s18 = smov (%p29_p1, %s27_s18), 0  ;;  %p197_p3 = pnand %p1713_p0, %p196_p2 }
   0x6   : > { %v1925_v0 = vld [vmem:[%s2796_s1] sm:$0xff] (!%p197_p3)   ;;  %s1714_s21 = sshll.u32 (!%p197_p3), %s1974_s15, 6  ;;  %v1926_v1 = vld [vmem:[%s2796_s1 + $0x8] sm:$0xff] (!%p197_p3)   ;;  %v2040_v2 = vld [vmem:[%s2796_s1 + $0x10] sm:$0xff] (!%p197_p3)   ;;  %vm272_vm0 = vcmask (!%p197_p3), 523264   ;;  %vm649_vm1 = vcmask (!%p197_p3), 392192  }
   0x7   : > { %200 = sbr.rel (%p197_p3) target bundleno = 386 (0x182), region = 28  ;;  %p239_p4 = scmp.lt.s32.totalorder (!%p197_p3), %s1714_s21, 255  ;;  %1824 = vmatprep.subr.bf16.mxu0 (!%p197_p3), %v1925_v0  ;;  %1894 = vmatprep.subr.bf16.mxu1 (!%p197_p3), %v1925_v0  ;;  %v1984_v4 = vmov (!%p197_p3), 0.0  }
   0x8   : > { %1825 = vmatpush3.bf16.msra.mxu0 (!%p197_p3), %v1925_v0  ;;  %1897 = vmatpush3.bf16.msra.mxu1 (!%p197_p3), %v1925_v0  ;;  %p259_p5 = scmp.lt.s32.totalorder (!%p197_p3), %s1974_s15, 3 }
   0x9   : > { %1826 = vmatprep.subr.bf16.mxu0 (!%p197_p3), %v1926_v1  ;;  %1895 = vmatprep.subr.bf16.mxu1 (!%p197_p3), %v1926_v1 }
   0xc   : > { %1827 = vmatpush3.bf16.msra.mxu0 (!%p197_p3), %v1926_v1  ;;  %1898 = vmatpush3.bf16.msra.mxu1 (!%p197_p3), %v1926_v1 }
   0xd   : > { %1828 = vmatprep.subr.bf16.mxu0 (!%p197_p3), %v2040_v2  ;;  %1896 = vmatprep.subr.bf16.mxu1 (!%p197_p3), %v2040_v2 }
   0xe   : > { %s2805_s21 = smov (!%p239_p4, %s1714_s21), 255  ;;  %s2807_s15 = smov (!%p259_p5, %s1974_s15), 3 }
   0xf   : > { %s1715_s26 = sshll.u32 %s2805_s21, 2  ;;  %s1717_s27 = sshll.u32 %s2805_s21, 3 }
  0x10   : > { %s2045_s30 = scalar_lea.vmem %s2795_s0, %s1715_s26  ;;  %s2050_s7 = scalar_lea.vmem %s2797_s2, %s1717_s27  ;;  %1829 = vmatpush3.bf16.msra.mxu0 %v2040_v2  ;;  %1899 = vmatpush3.bf16.msra.mxu1 %v2040_v2 }
  0x11   : > { %v2053_v3 = vld [vmem:[%s2045_s30] sm:$0xff]   ;;  %275 = vst.msk [vmem:[%s2050_s7 + $0x10] sm:$0xff] %vm272_vm0, %v1984_v4  ;;  %273 = vst.msk [vmem:[%s2050_s7] sm:$0xff] %vm272_vm0, %v1984_v4  ;;  %v1929_v5 = vld [vmem:[%s2045_s30 + $0x8] sm:$0xff]   ;;  %s1718_s8 = sshll.u32 %s2807_s15, 3 }
  0x12   : > { %274 = vst.msk [vmem:[%s2050_s7 + $0x8] sm:$0xff] %vm272_vm0, %v1984_v4  ;;  %276 = vst.msk [vmem:[%s2050_s7 + $0x18] sm:$0xff] %vm272_vm0, %v1984_v4  ;;  %1830 = vmatprep.mubr.msk.bf16.mxu0 %vm649_vm1, %v2053_v3  ;;  %v1930_v6 = vld [vmem:[%s2045_s30 + $0x10] sm:$0xff]   ;;  %v1931_v7 = vld [vmem:[%s2045_s30 + $0x18] sm:$0xff]   ;;  %s262_s11 = scalar_lea.vmem %s2798_s3, %s1718_s8  ;;  %s266_s14 = scalar_lea.vmem %s2799_s4, %s1718_s8 }
  0x13   : > { %277 = vst.msk [vmem:[%s2050_s7 + $0x20] sm:$0xff] %vm272_vm0, %v1984_v4  ;;  %278 = vst.msk [vmem:[%s2050_s7 + $0x28] sm:$0xff] %vm272_vm0, %v1984_v4  ;;  %1831 = vmatmul.mubr.msk.bf16.vlgmr.msra.gmra.mrb[0].mxu0 %vm649_vm1, %v1929_v5  ;;  %v1932_v8 = vld [vmem:[%s2045_s30 + $0x20] sm:$0xff]   ;;  %v1945_v10 = vld [vmem:[%s2045_s30 + $0x88] sm:$0xff]  }
  0x14   : > { %279 = vst.msk [vmem:[%s2050_s7 + $0x30] sm:$0xff] %vm272_vm0, %v1984_v4  ;;  %280 = vst.msk [vmem:[%s2050_s7 + $0x38] sm:$0xff] %vm272_vm0, %v1984_v4  ;;  %1834 = vmatprep.mubr.msk.bf16.mxu0 %vm649_vm1, %v1930_v6  ;;  %v1944_v9 = vld [vmem:[%s2045_s30 + $0x80] sm:$0xff]   ;;  %v1946_v11 = vld [vmem:[%s2045_s30 + $0x90] sm:$0xff]  }
  0x15   : > { %281 = vst.msk [vmem:[%s2050_s7 + $0x40] sm:$0xff] %vm272_vm0, %v1984_v4  ;;  %282 = vst.msk [vmem:[%s2050_s7 + $0x48] sm:$0xff] %vm272_vm0, %v1984_v4  ;;  %1862 = vmatprep.mubr.msk.bf16.mxu1 %vm649_vm1, %v1944_v9  ;;  %v1933_v12 = vld [vmem:[%s2045_s30 + $0x28] sm:$0xff]   ;;  %v1934_v13 = vld [vmem:[%s2045_s30 + $0x30] sm:$0xff]  }
  0x16   : > { %283 = vst.msk [vmem:[%s2050_s7 + $0x50] sm:$0xff] %vm272_vm0, %v1984_v4  ;;  %284 = vst.msk [vmem:[%s2050_s7 + $0x58] sm:$0xff] %vm272_vm0, %v1984_v4  ;;  %1863 = vmatmul.mubr.msk.bf16.vlgmr.msra.gmra.mrb[0].mxu1 %vm649_vm1, %v1945_v10  ;;  %v1947_v14 = vld [vmem:[%s2045_s30 + $0x98] sm:$0xff]   ;;  %v1948_v15 = vld [vmem:[%s2045_s30 + $0xa0] sm:$0xff]  }
  0x17   : > { %285 = vst.msk [vmem:[%s2050_s7 + $0x60] sm:$0xff] %vm272_vm0, %v1984_v4  ;;  %286 = vst.msk [vmem:[%s2050_s7 + $0x68] sm:$0xff] %vm272_vm0, %v1984_v4  ;;  %1866 = vmatprep.mubr.msk.bf16.mxu1 %vm649_vm1, %v1946_v11  ;;  %v1935_v16 = vld [vmem:[%s2045_s30 + $0x38] sm:$0xff]   ;;  %v1936_v17 = vld [vmem:[%s2045_s30 + $0x40] sm:$0xff]  }
  0x18   : > { %287 = vst.msk [vmem:[%s2050_s7 + $0x70] sm:$0xff] %vm272_vm0, %v1984_v4  ;;  %288 = vst.msk [vmem:[%s2050_s7 + $0x78] sm:$0xff] %vm272_vm0, %v1984_v4  ;;  %v1949_v18 = vld [vmem:[%s2045_s30 + $0xa8] sm:$0xff]   ;;  %v1950_v19 = vld [vmem:[%s2045_s30 + $0xb0] sm:$0xff]  }
  0x19   : > { %289 = vst.msk [vmem:[%s2050_s7 + $0x80] sm:$0xff] %vm272_vm0, %v1984_v4  ;;  %290 = vst.msk [vmem:[%s2050_s7 + $0x88] sm:$0xff] %vm272_vm0, %v1984_v4  ;;  %v1937_v20 = vld [vmem:[%s2045_s30 + $0x48] sm:$0xff]   ;;  %v1938_v21 = vld [vmem:[%s2045_s30 + $0x50] sm:$0xff]  }
  0x1a   : > { %291 = vst.msk [vmem:[%s2050_s7 + $0x90] sm:$0xff] %vm272_vm0, %v1984_v4  ;;  %292 = vst.msk [vmem:[%s2050_s7 + $0x98] sm:$0xff] %vm272_vm0, %v1984_v4  ;;  %v1951_v22 = vld [vmem:[%s2045_s30 + $0xb8] sm:$0xff]   ;;  %v1952_v23 = vld [vmem:[%s2045_s30 + $0xc0] sm:$0xff]  }
  0x1b   : > { %293 = vst.msk [vmem:[%s2050_s7 + $0xa0] sm:$0xff] %vm272_vm0, %v1984_v4  ;;  %294 = vst.msk [vmem:[%s2050_s7 + $0xa8] sm:$0xff] %vm272_vm0, %v1984_v4  ;;  %1835 = vmatmul.mubr.msk.bf16.gmra.mrb[4].mxu0 %vm649_vm1, %v1931_v7  ;;  %v1939_v24 = vld [vmem:[%s2045_s30 + $0x58] sm:$0xff]   ;;  %v1940_v25 = vld [vmem:[%s2045_s30 + $0x60] sm:$0xff]  }
  0x1c   : > { %295 = vst.msk [vmem:[%s2050_s7 + $0xb0] sm:$0xff] %vm272_vm0, %v1984_v4  ;;  %296 = vst.msk [vmem:[%s2050_s7 + $0xb8] sm:$0xff] %vm272_vm0, %v1984_v4  ;;  %1838 = vmatprep.mubr.msk.bf16.mxu0 %vm649_vm1, %v1932_v8  ;;  %v1953_v26 = vld [vmem:[%s2045_s30 + $0xc8] sm:$0xff]   ;;  %v1954_v27 = vld [vmem:[%s2045_s30 + $0xd0] sm:$0xff]  }
  0x1d   : > { %297 = vst.msk [vmem:[%s2050_s7 + $0xc0] sm:$0xff] %vm272_vm0, %v1984_v4  ;;  %298 = vst.msk [vmem:[%s2050_s7 + $0xc8] sm:$0xff] %vm272_vm0, %v1984_v4  ;;  %v1941_v28 = vld [vmem:[%s2045_s30 + $0x68] sm:$0xff]   ;;  %v1942_v29 = vld [vmem:[%s2045_s30 + $0x70] sm:$0xff]  }
  0x1e   : > { %299 = vst.msk [vmem:[%s2050_s7 + $0xd0] sm:$0xff] %vm272_vm0, %v1984_v4  ;;  %300 = vst.msk [vmem:[%s2050_s7 + $0xd8] sm:$0xff] %vm272_vm0, %v1984_v4  ;;  %1867 = vmatmul.mubr.msk.bf16.gmra.mrb[4].mxu1 %vm649_vm1, %v1947_v14  ;;  %v1955_v30 = vld [vmem:[%s2045_s30 + $0xd8] sm:$0xff]   ;;  %v1956_v31 = vld [vmem:[%s2045_s30 + $0xe0] sm:$0xff]  }
  0x1f   : > { %301 = vst.msk [vmem:[%s2050_s7 + $0xe0] sm:$0xff] %vm272_vm0, %v1984_v4  ;;  %302 = vst.msk [vmem:[%s2050_s7 + $0xe8] sm:$0xff] %vm272_vm0, %v1984_v4  ;;  %1870 = vmatprep.mubr.msk.bf16.mxu1 %vm649_vm1, %v1948_v15  ;;  %v1943_v32 = vld [vmem:[%s2045_s30 + $0x78] sm:$0xff]   ;;  %v1957_v33 = vld [vmem:[%s2045_s30 + $0xe8] sm:$0xff]  }
  0x20   : > { %303 = vst.msk [vmem:[%s2050_s7 + $0xf0] sm:$0xff] %vm272_vm0, %v1984_v4  ;;  %304 = vst.msk [vmem:[%s2050_s7 + $0xf8] sm:$0xff] %vm272_vm0, %v1984_v4  ;;  %v1958_v34 = vld [vmem:[%s2045_s30 + $0xf0] sm:$0xff]   ;;  %v1959_v35 = vld [vmem:[%s2045_s30 + $0xf8] sm:$0xff]  }
  0x21   : > { %305 = vst.msk [vmem:[%s2050_s7 + $0x100] sm:$0xff] %vm272_vm0, %v1984_v4  ;;  %306 = vst.msk [vmem:[%s2050_s7 + $0x108] sm:$0xff] %vm272_vm0, %v1984_v4  ;;  %v339_v36 = vld [vmem:[%s2050_s7 + $0x10] sm:$0xff]  ;;  %v337_v37 = vld [vmem:[%s2050_s7] sm:$0xff] }
  0x22   : > { %307 = vst.msk [vmem:[%s2050_s7 + $0x110] sm:$0xff] %vm272_vm0, %v1984_v4  ;;  %308 = vst.msk [vmem:[%s2050_s7 + $0x118] sm:$0xff] %vm272_vm0, %v1984_v4  ;;  %v340_v39 = vld [vmem:[%s2050_s7 + $0x18] sm:$0xff]  ;;  %v338_v42 = vld [vmem:[%s2050_s7 + $0x8] sm:$0xff] }
  0x23   : > { %309 = vst.msk [vmem:[%s2050_s7 + $0x120] sm:$0xff] %vm272_vm0, %v1984_v4  ;;  %310 = vst.msk [vmem:[%s2050_s7 + $0x128] sm:$0xff] %vm272_vm0, %v1984_v4  ;;  %1839 = vmatmul.mubr.msk.bf16.gmra.mrb[8].mxu0 %vm649_vm1, %v1933_v12  ;;  %v343_v48 = vld [vmem:[%s2050_s7 + $0x30] sm:$0xff]  ;;  %v341_v49 = vld [vmem:[%s2050_s7 + $0x20] sm:$0xff] }
  0x24   : > { %311 = vst.msk [vmem:[%s2050_s7 + $0x130] sm:$0xff] %vm272_vm0, %v1984_v4  ;;  %312 = vst.msk [vmem:[%s2050_s7 + $0x138] sm:$0xff] %vm272_vm0, %v1984_v4  ;;  %1842 = vmatprep.mubr.msk.bf16.mxu0 %vm649_vm1, %v1934_v13  ;;  %v344_v51 = vld [vmem:[%s2050_s7 + $0x38] sm:$0xff]  ;;  %v342_v54 = vld [vmem:[%s2050_s7 + $0x28] sm:$0xff] }
  0x25   : > { %313 = vst.msk [vmem:[%s2050_s7 + $0x140] sm:$0xff] %vm272_vm0, %v1984_v4  ;;  %314 = vst.msk [vmem:[%s2050_s7 + $0x148] sm:$0xff] %vm272_vm0, %v1984_v4  ;;  %v347_v12 = vld [vmem:[%s2050_s7 + $0x50] sm:$0xff] }
  0x26   : > { %315 = vst.msk [vmem:[%s2050_s7 + $0x150] sm:$0xff] %vm272_vm0, %v1984_v4  ;;  %316 = vst.msk [vmem:[%s2050_s7 + $0x158] sm:$0xff] %vm272_vm0, %v1984_v4  ;;  %1871 = vmatmul.mubr.msk.bf16.gmra.mrb[8].mxu1 %vm649_vm1, %v1949_v18 }
  0x27   : > { %317 = vst.msk [vmem:[%s2050_s7 + $0x160] sm:$0xff] %vm272_vm0, %v1984_v4  ;;  %318 = vst.msk [vmem:[%s2050_s7 + $0x168] sm:$0xff] %vm272_vm0, %v1984_v4  ;;  %1874 = vmatprep.mubr.msk.bf16.mxu1 %vm649_vm1, %v1950_v19 }
  0x28   : > { %319 = vst.msk [vmem:[%s2050_s7 + $0x170] sm:$0xff] %vm272_vm0, %v1984_v4  ;;  %320 = vst.msk [vmem:[%s2050_s7 + $0x178] sm:$0xff] %vm272_vm0, %v1984_v4  ;;  %v369_v62 = vld [vmem:[%s2050_s7 + $0x100] sm:$0xff]  ;;  %v370_v8 = vld [vmem:[%s2050_s7 + $0x108] sm:$0xff] }
  0x29   : > { %321 = vst.msk [vmem:[%s2050_s7 + $0x180] sm:$0xff] %vm272_vm0, %v1984_v4  ;;  %322 = vst.msk [vmem:[%s2050_s7 + $0x188] sm:$0xff] %vm272_vm0, %v1984_v4  ;;  %v371_v58 = vld [vmem:[%s2050_s7 + $0x110] sm:$0xff]  ;;  %v372_v3 = vld [vmem:[%s2050_s7 + $0x118] sm:$0xff] }
  0x2a   : > { %323 = vst.msk [vmem:[%s2050_s7 + $0x190] sm:$0xff] %vm272_vm0, %v1984_v4  ;;  %324 = vst.msk [vmem:[%s2050_s7 + $0x198] sm:$0xff] %vm272_vm0, %v1984_v4 }
  0x2b   : > { %325 = vst.msk [vmem:[%s2050_s7 + $0x1a0] sm:$0xff] %vm272_vm0, %v1984_v4  ;;  %326 = vst.msk [vmem:[%s2050_s7 + $0x1a8] sm:$0xff] %vm272_vm0, %v1984_v4  ;;  %1843 = vmatmul.mubr.msk.bf16.gmra.mrb[12].mxu0 %vm649_vm1, %v1935_v16 }
  0x2c   : > { %327 = vst.msk [vmem:[%s2050_s7 + $0x1b0] sm:$0xff] %vm272_vm0, %v1984_v4  ;;  %328 = vst.msk [vmem:[%s2050_s7 + $0x1b8] sm:$0xff] %vm272_vm0, %v1984_v4  ;;  %1846 = vmatprep.mubr.msk.bf16.mxu0 %vm649_vm1, %v1936_v17  ;;  %v345_v17 = vld [vmem:[%s2050_s7 + $0x40] sm:$0xff] }
  0x2d   : > { %329 = vst.msk [vmem:[%s2050_s7 + $0x1c0] sm:$0xff] %vm272_vm0, %v1984_v4  ;;  %330 = vst.msk [vmem:[%s2050_s7 + $0x1c8] sm:$0xff] %vm272_vm0, %v1984_v4 }
  0x2e   : > { %331 = vst.msk [vmem:[%s2050_s7 + $0x1d0] sm:$0xff] %vm272_vm0, %v1984_v4  ;;  %332 = vst.msk [vmem:[%s2050_s7 + $0x1d8] sm:$0xff] %vm272_vm0, %v1984_v4  ;;  %1875 = vmatmul.mubr.msk.bf16.gmra.mrb[12].mxu1 %vm649_vm1, %v1951_v22 }
  0x2f   : > { %333 = vst.msk [vmem:[%s2050_s7 + $0x1e0] sm:$0xff] %vm272_vm0, %v1984_v4  ;;  %334 = vst.msk [vmem:[%s2050_s7 + $0x1e8] sm:$0xff] %vm272_vm0, %v1984_v4  ;;  %1878 = vmatprep.mubr.msk.bf16.mxu1 %vm649_vm1, %v1952_v23 }
  0x30   : > { %335 = vst.msk [vmem:[%s2050_s7 + $0x1f0] sm:$0xff] %vm272_vm0, %v1984_v4  ;;  %336 = vst.msk [vmem:[%s2050_s7 + $0x1f8] sm:$0xff] %vm272_vm0, %v1984_v4 }
  0x33   : > { %1847 = vmatmul.mubr.msk.bf16.gmra.mrb[16].mxu0 %vm649_vm1, %v1937_v20 }
  0x34   : > { %1850 = vmatprep.mubr.msk.bf16.mxu0 %vm649_vm1, %v1938_v21 }
  0x36   : > { %1879 = vmatmul.mubr.msk.bf16.gmra.mrb[16].mxu1 %vm649_vm1, %v1953_v26 }
  0x37   : > { %1882 = vmatprep.mubr.msk.bf16.mxu1 %vm649_vm1, %v1954_v27 }
  0x3b   : > { %1851 = vmatmul.mubr.msk.bf16.gmra.mrb[20].mxu0 %vm649_vm1, %v1939_v24 }
  0x3c   : > { %1854 = vmatprep.mubr.msk.bf16.mxu0 %vm649_vm1, %v1940_v25 }
  0x3e   : > { %1883 = vmatmul.mubr.msk.bf16.gmra.mrb[20].mxu1 %vm649_vm1, %v1955_v30  ;;  %v346_v30 = vld [vmem:[%s2050_s7 + $0x48] sm:$0xff] }
  0x3f   : > { %1886 = vmatprep.mubr.msk.bf16.mxu1 %vm649_vm1, %v1956_v31 }
  0x43   : > { %1855 = vmatmul.mubr.msk.bf16.gmra.mrb[24].mxu0 %vm649_vm1, %v1941_v28 }
  0x44   : > { %1858 = vmatprep.mubr.msk.bf16.mxu0 %vm649_vm1, %v1942_v29  ;;  %v348_v29 = vld [vmem:[%s2050_s7 + $0x58] sm:$0xff] }
  0x46   : > { %1887 = vmatmul.mubr.msk.bf16.gmra.mrb[24].mxu1 %vm649_vm1, %v1957_v33 }
  0x47   : > { %1890 = vmatprep.mubr.msk.bf16.mxu1 %vm649_vm1, %v1958_v34 }
  0x4b   : > { %1859 = vmatmul.mubr.msk.bf16.gmra.mrb[28].mxu0 %vm649_vm1, %v1943_v32 }
  0x4e   : > { %1891 = vmatmul.mubr.msk.bf16.gmra.mrb[28].mxu1 %vm649_vm1, %v1959_v35 }
  0xe6   : > { %v1832_v38 = vpop.f32.mrb[0].mxu0 }
  0xe7   : > { %v1037_v40 = vadd.f32 %v1832_v38, %v339_v36  ;;  %v780_v41 = vpop.f32.mrb[1].mxu0 }
  0xe8   : > { %v1035_v43 = vadd.f32 %v780_v41, %v337_v37  ;;  %v1833_v44 = vpop.f32.mrb[2].mxu0 }
  0xe9   : > { %1102 = vst.msk [vmem:[%s2050_s7 + $0x10] sm:$0xff] %vm272_vm0, %v1037_v40  ;;  %v1038_v45 = vadd.f32 %v1833_v44, %v340_v39  ;;  %v783_v46 = vpop.f32.mrb[3].mxu0  ;;  %v1864_v2 = vpop.f32.mrb[0].mxu1 }
  0xea   : > { %1100 = vst.msk [vmem:[%s2050_s7] sm:$0xff] %vm272_vm0, %v1035_v43  ;;  %v1036_v47 = vadd.f32 %v783_v46, %v338_v42  ;;  %v1069_v6 = vadd.f32 %v1864_v2, %v371_v58  ;;  %v908_v7 = vpop.f32.mrb[1].mxu1 }
  0xeb   : > { %1103 = vst.msk [vmem:[%s2050_s7 + $0x18] sm:$0xff] %vm272_vm0, %v1038_v45  ;;  %v1067_v13 = vadd.f32 %v908_v7, %v369_v62  ;;  %v1865_v14 = vpop.f32.mrb[2].mxu1 }
  0xec   : > { %1101 = vst.msk [vmem:[%s2050_s7 + $0x8] sm:$0xff] %vm272_vm0, %v1036_v47  ;;  %1134 = vst.msk [vmem:[%s2050_s7 + $0x110] sm:$0xff] %vm272_vm0, %v1069_v6  ;;  %v1070_v18 = vadd.f32 %v1865_v14, %v372_v3  ;;  %v911_v19 = vpop.f32.mrb[3].mxu1  ;;  %v350_v6 = vld [vmem:[%s2050_s7 + $0x68] sm:$0xff] }
  0xed   : > { %1132 = vst.msk [vmem:[%s2050_s7 + $0x100] sm:$0xff] %vm272_vm0, %v1067_v13  ;;  %v1068_v24 = vadd.f32 %v911_v19, %v370_v8 }
  0xee   : > { %v1836_v50 = vpop.f32.mrb[4].mxu0  ;;  %1135 = vst.msk [vmem:[%s2050_s7 + $0x118] sm:$0xff] %vm272_vm0, %v1070_v18 }
  0xef   : > { %v1041_v52 = vadd.f32 %v1836_v50, %v343_v48  ;;  %v796_v53 = vpop.f32.mrb[5].mxu0  ;;  %1133 = vst.msk [vmem:[%s2050_s7 + $0x108] sm:$0xff] %vm272_vm0, %v1068_v24 }
  0xf0   : > { %v1169_v55 = vld [vmem:[%s2050_s7 + $0x10] sm:$0xff]  ;;  %v1039_v56 = vadd.f32 %v796_v53, %v341_v49  ;;  %v1837_v57 = vpop.f32.mrb[6].mxu0 }
  0xf1   : > { %v1167_v59 = vld [vmem:[%s2050_s7] sm:$0xff]  ;;  %1106 = vst.msk [vmem:[%s2050_s7 + $0x30] sm:$0xff] %vm272_vm0, %v1041_v52  ;;  %v1042_v60 = vadd.f32 %v1837_v57, %v344_v51  ;;  %v799_v61 = vpop.f32.mrb[7].mxu0  ;;  %v1366_v4 = vmul.f32 %v1169_v55, %v1169_v55  ;;  %v1234_v20 = vsel %vm272_vm0, %v1169_v55, 0.0  ;;  %v2375_v46 = vpop.f32.mrb[4].mxu1  ;;  %v351_v55 = vld [vmem:[%s2050_s7 + $0x70] sm:$0xff] }
  0xf2   : > { %v1364_v63 = vmul.f32 %v1167_v59, %v1167_v59  ;;  %v1170_v0 = vld [vmem:[%s2050_s7 + $0x18] sm:$0xff]  ;;  %1104 = vst.msk [vmem:[%s2050_s7 + $0x20] sm:$0xff] %vm272_vm0, %v1039_v56  ;;  %v1040_v1 = vadd.f32 %v799_v61, %v342_v54  ;;  %v1231_v9 = vsel %vm272_vm0, %v1167_v59, 0.0  ;;  %v2378_v50 = vpop.f32.mrb[5].mxu1 }
  0xf3   : > { %v1168_v5 = vld [vmem:[%s2050_s7 + $0x8] sm:$0xff]  ;;  %1107 = vst.msk [vmem:[%s2050_s7 + $0x38] sm:$0xff] %vm272_vm0, %v1042_v60  ;;  %v1367_v15 = vmul.f32 %v1170_v0, %v1170_v0  ;;  %v1431_v31 = vsel %vm272_vm0, %v1366_v4, 0.0  ;;  %v1236_v32 = vsel %vm272_vm0, %v1170_v0, 0.0  ;;  %v2387_v56 = vpop.f32.mrb[6].mxu1  ;;  %v349_v60 = vld [vmem:[%s2050_s7 + $0x60] sm:$0xff] }
  0xf4   : > { %v1232_v10 = vsel %vm272_vm0, %v1168_v5, 0.0  ;;  %v1365_v11 = vmul.f32 %v1168_v5, %v1168_v5  ;;  %1105 = vst.msk [vmem:[%s2050_s7 + $0x28] sm:$0xff] %vm272_vm0, %v1040_v1  ;;  %v1428_v21 = vsel %vm272_vm0, %v1364_v63, 0.0  ;;  %v2390_v61 = vpop.f32.mrb[7].mxu1  ;;  %v352_v5 = vld [vmem:[%s2050_s7 + $0x78] sm:$0xff] }
  0xf5   : > { %v1233_v16 = vadd.f32 %v1232_v10, %v1231_v9  ;;  %v1433_v35 = vsel %vm272_vm0, %v1367_v15, 0.0 }
  0xf6   : > { %v1429_v22 = vsel %vm272_vm0, %v1365_v11, 0.0  ;;  %v1840_v23 = vpop.f32.mrb[8].mxu0 }
  0xf7   : > { %v1235_v25 = vadd.f32 %v1234_v20, %v1233_v16  ;;  %v1430_v26 = vadd.f32 %v1429_v22, %v1428_v21  ;;  %v1045_v27 = vadd.f32 %v1840_v23, %v347_v12  ;;  %v812_v28 = vpop.f32.mrb[9].mxu0  ;;  %v375_v21 = vld [vmem:[%s2050_s7 + $0x130] sm:$0xff] }
  0xf8   : > { %v1043_v33 = vadd.f32 %v812_v28, %v345_v17  ;;  %v1841_v34 = vpop.f32.mrb[10].mxu0  ;;  %v1173_v38 = vld [vmem:[%s2050_s7 + $0x30] sm:$0xff] }
  0xf9   : > { %v1237_v36 = vadd.f32 %v1236_v32, %v1235_v25  ;;  %v1432_v37 = vadd.f32 %v1431_v31, %v1430_v26  ;;  %v1171_v39 = vld [vmem:[%s2050_s7 + $0x20] sm:$0xff]  ;;  %1110 = vst.msk [vmem:[%s2050_s7 + $0x50] sm:$0xff] %vm272_vm0, %v1045_v27  ;;  %v815_v40 = vpop.f32.mrb[11].mxu0  ;;  %v1046_v44 = vadd.f32 %v1841_v34, %v348_v29  ;;  %v1370_v51 = vmul.f32 %v1173_v38, %v1173_v38  ;;  %v2407_v22 = vpop.f32.mrb[8].mxu1  ;;  %v355_v31 = vld [vmem:[%s2050_s7 + $0x90] sm:$0xff]  ;;  %v376_v32 = vld [vmem:[%s2050_s7 + $0x138] sm:$0xff] }
  0xfa   : > { %v1238_v41 = vsel %vm272_vm0, %v1171_v39, 0.0  ;;  %v1368_v42 = vmul.f32 %v1171_v39, %v1171_v39  ;;  %v1174_v43 = vld [vmem:[%s2050_s7 + $0x38] sm:$0xff]  ;;  %1108 = vst.msk [vmem:[%s2050_s7 + $0x40] sm:$0xff] %vm272_vm0, %v1043_v33  ;;  %v1044_v45 = vadd.f32 %v815_v40, %v346_v30  ;;  %v1242_v62 = vsel %vm272_vm0, %v1173_v38, 0.0  ;;  %v373_v27 = vld [vmem:[%s2050_s7 + $0x120] sm:$0xff]  ;;  %v940_v28 = vpop.f32.mrb[9].mxu1 }
  0xfb   : > { %v1434_v47 = vadd.f32 %v1433_v35, %v1432_v37  ;;  %v1239_v48 = vadd.f32 %v1238_v41, %v1237_v36  ;;  %v1172_v49 = vld [vmem:[%s2050_s7 + $0x28] sm:$0xff]  ;;  %1111 = vst.msk [vmem:[%s2050_s7 + $0x58] sm:$0xff] %vm272_vm0, %v1046_v44  ;;  %v1371_v58 = vmul.f32 %v1174_v43, %v1174_v43  ;;  %v1439_v7 = vsel %vm272_vm0, %v1370_v51, 0.0  ;;  %v2420_v33 = vpop.f32.mrb[10].mxu1  ;;  %v353_v38 = vld [vmem:[%s2050_s7 + $0x80] sm:$0xff]  ;;  %v356_v44 = vld [vmem:[%s2050_s7 + $0x98] sm:$0xff] }
  0xfc   : > { %v1435_v52 = vsel %vm272_vm0, %v1368_v42, 0.0  ;;  %v1240_v53 = vsel %vm272_vm0, %v1172_v49, 0.0  ;;  %v1369_v54 = vmul.f32 %v1172_v49, %v1172_v49  ;;  %1109 = vst.msk [vmem:[%s2050_s7 + $0x48] sm:$0xff] %vm272_vm0, %v1044_v45  ;;  %v1244_v8 = vsel %vm272_vm0, %v1174_v43, 0.0  ;;  %v374_v39 = vld [vmem:[%s2050_s7 + $0x128] sm:$0xff]  ;;  %v2424_v40 = vpop.f32.mrb[11].mxu1 }
  0xfd   : > { %v1436_v57 = vadd.f32 %v1435_v52, %v1434_v47  ;;  %v1241_v59 = vadd.f32 %v1240_v53, %v1239_v48  ;;  %v1441_v11 = vsel %vm272_vm0, %v1371_v58, 0.0  ;;  %v1073_v45 = vadd.f32 %v2375_v46, %v375_v21  ;;  %v354_v53 = vld [vmem:[%s2050_s7 + $0x88] sm:$0xff]  ;;  %v359_v21 = vld [vmem:[%s2050_s7 + $0xb0] sm:$0xff] }
  0xfe   : > { %v1437_v63 = vsel %vm272_vm0, %v1369_v54, 0.0  ;;  %v1844_v0 = vpop.f32.mrb[12].mxu0  ;;  %v1071_v47 = vadd.f32 %v2378_v50, %v373_v27  ;;  %v1074_v54 = vadd.f32 %v2387_v56, %v376_v32  ;;  %v1072_v50 = vadd.f32 %v2390_v61, %v374_v39  ;;  %v357_v27 = vld [vmem:[%s2050_s7 + $0xa0] sm:$0xff] }
  0xff   : > { %v1243_v1 = vadd.f32 %v1242_v62, %v1241_v59  ;;  %v1438_v2 = vadd.f32 %v1437_v63, %v1436_v57  ;;  %v1049_v3 = vadd.f32 %v1844_v0, %v351_v55  ;;  %v828_v4 = vpop.f32.mrb[13].mxu0  ;;  %1138 = vst.msk [vmem:[%s2050_s7 + $0x130] sm:$0xff] %vm272_vm0, %v1073_v45  ;;  %v379_v59 = vld [vmem:[%s2050_s7 + $0x150] sm:$0xff] }
 0x100   : > { %v1047_v9 = vadd.f32 %v828_v4, %v349_v60  ;;  %v1845_v10 = vpop.f32.mrb[14].mxu0  ;;  %v1177_v16 = vld [vmem:[%s2050_s7 + $0x50] sm:$0xff]  ;;  %1136 = vst.msk [vmem:[%s2050_s7 + $0x120] sm:$0xff] %vm272_vm0, %v1071_v47  ;;  %v377_v60 = vld [vmem:[%s2050_s7 + $0x140] sm:$0xff]  ;;  %1139 = vst.msk [vmem:[%s2050_s7 + $0x138] sm:$0xff] %vm272_vm0, %v1074_v54 }
 0x101   : > { %v1440_v12 = vadd.f32 %v1439_v7, %v1438_v2  ;;  %v1175_v13 = vld [vmem:[%s2050_s7 + $0x40] sm:$0xff]  ;;  %v1245_v14 = vadd.f32 %v1244_v8, %v1243_v1  ;;  %1114 = vst.msk [vmem:[%s2050_s7 + $0x70] sm:$0xff] %vm272_vm0, %v1049_v3  ;;  %v831_v15 = vpop.f32.mrb[15].mxu0  ;;  %v1050_v19 = vadd.f32 %v1845_v10, %v352_v5  ;;  %v1374_v34 = vmul.f32 %v1177_v16, %v1177_v16  ;;  %v378_v7 = vld [vmem:[%s2050_s7 + $0x148] sm:$0xff]  ;;  %v1876_v8 = vpop.f32.mrb[12].mxu1 }
 0x102   : > { %v1246_v17 = vsel %vm272_vm0, %v1175_v13, 0.0  ;;  %v1372_v18 = vmul.f32 %v1175_v13, %v1175_v13  ;;  %1112 = vst.msk [vmem:[%s2050_s7 + $0x60] sm:$0xff] %vm272_vm0, %v1047_v9  ;;  %v1048_v20 = vadd.f32 %v831_v15, %v350_v6  ;;  %v1178_v25 = vld [vmem:[%s2050_s7 + $0x58] sm:$0xff]  ;;  %v1250_v41 = vsel %vm272_vm0, %v1177_v16, 0.0  ;;  %1137 = vst.msk [vmem:[%s2050_s7 + $0x128] sm:$0xff] %vm272_vm0, %v1072_v50  ;;  %v383_v15 = vld [vmem:[%s2050_s7 + $0x170] sm:$0xff] }
 0x103   : > { %v1247_v23 = vadd.f32 %v1246_v17, %v1245_v14  ;;  %v1442_v24 = vadd.f32 %v1441_v11, %v1440_v12  ;;  %v1176_v26 = vld [vmem:[%s2050_s7 + $0x48] sm:$0xff]  ;;  %1115 = vst.msk [vmem:[%s2050_s7 + $0x78] sm:$0xff] %vm272_vm0, %v1050_v19  ;;  %v1375_v42 = vmul.f32 %v1178_v25, %v1178_v25  ;;  %v1252_v55 = vsel %vm272_vm0, %v1178_v25, 0.0  ;;  %v380_v6 = vld [vmem:[%s2050_s7 + $0x158] sm:$0xff]  ;;  %v956_v16 = vpop.f32.mrb[13].mxu1 }
 0x104   : > { %v1443_v29 = vsel %vm272_vm0, %v1372_v18, 0.0  ;;  %v1248_v30 = vsel %vm272_vm0, %v1176_v26, 0.0  ;;  %1113 = vst.msk [vmem:[%s2050_s7 + $0x68] sm:$0xff] %vm272_vm0, %v1048_v20  ;;  %v1373_v37 = vmul.f32 %v1176_v26, %v1176_v26  ;;  %v1447_v56 = vsel %vm272_vm0, %v1374_v34, 0.0  ;;  %v1877_v25 = vpop.f32.mrb[14].mxu1  ;;  %v358_v47 = vld [vmem:[%s2050_s7 + $0xa8] sm:$0xff] }
 0x105   : > { %v1444_v35 = vadd.f32 %v1443_v29, %v1442_v24  ;;  %v1249_v36 = vadd.f32 %v1248_v30, %v1247_v23  ;;  %v1449_v9 = vsel %vm272_vm0, %v1375_v42, 0.0  ;;  %v1077_v13 = vadd.f32 %v2407_v22, %v379_v59  ;;  %v381_v23 = vld [vmem:[%s2050_s7 + $0x160] sm:$0xff]  ;;  %v384_v24 = vld [vmem:[%s2050_s7 + $0x178] sm:$0xff]  ;;  %v2477_v30 = vpop.f32.mrb[15].mxu1 }
 0x106   : > { %v1848_v43 = vpop.f32.mrb[16].mxu0  ;;  %v1445_v49 = vsel %vm272_vm0, %v1373_v37, 0.0  ;;  %v1075_v14 = vadd.f32 %v940_v28, %v377_v60  ;;  %v1078_v28 = vadd.f32 %v2420_v33, %v380_v6  ;;  %v1076_v29 = vadd.f32 %v2424_v40, %v378_v7  ;;  %v361_v7 = vld [vmem:[%s2050_s7 + $0xc0] sm:$0xff] }
 0x107   : > { %v1251_v48 = vadd.f32 %v1250_v41, %v1249_v36  ;;  %v1053_v51 = vadd.f32 %v1848_v43, %v355_v31  ;;  %v844_v52 = vpop.f32.mrb[17].mxu0  ;;  %v1446_v57 = vadd.f32 %v1445_v49, %v1444_v35  ;;  %1142 = vst.msk [vmem:[%s2050_s7 + $0x150] sm:$0xff] %vm272_vm0, %v1077_v13  ;;  %v360_v36 = vld [vmem:[%s2050_s7 + $0xb8] sm:$0xff]  ;;  %v1081_v37 = vadd.f32 %v1876_v8, %v383_v15 }
 0x108   : > { %v1051_v58 = vadd.f32 %v844_v52, %v353_v38  ;;  %v1849_v46 = vpop.f32.mrb[18].mxu0  ;;  %v1181_v62 = vld [vmem:[%s2050_s7 + $0x70] sm:$0xff]  ;;  %1140 = vst.msk [vmem:[%s2050_s7 + $0x140] sm:$0xff] %vm272_vm0, %v1075_v14  ;;  %1143 = vst.msk [vmem:[%s2050_s7 + $0x158] sm:$0xff] %vm272_vm0, %v1078_v28  ;;  %v1079_v33 = vadd.f32 %v956_v16, %v381_v23  ;;  %v1082_v40 = vadd.f32 %v1877_v25, %v384_v24  ;;  %v362_v23 = vld [vmem:[%s2050_s7 + $0xc8] sm:$0xff] }
 0x109   : > { %v1179_v63 = vld [vmem:[%s2050_s7 + $0x60] sm:$0xff]  ;;  %v1253_v0 = vadd.f32 %v1252_v55, %v1251_v48  ;;  %1118 = vst.msk [vmem:[%s2050_s7 + $0x90] sm:$0xff] %vm272_vm0, %v1053_v51  ;;  %v1054_v1 = vadd.f32 %v1849_v46, %v356_v44  ;;  %v847_v2 = vpop.f32.mrb[19].mxu0  ;;  %v1448_v61 = vadd.f32 %v1447_v56, %v1446_v57  ;;  %v1258_v17 = vsel %vm272_vm0, %v1181_v62, 0.0  ;;  %1141 = vst.msk [vmem:[%s2050_s7 + $0x148] sm:$0xff] %vm272_vm0, %v1076_v29  ;;  %v2501_v50 = vpop.f32.mrb[16].mxu1 }
 0x10a   : > { %v1254_v3 = vsel %vm272_vm0, %v1179_v63, 0.0  ;;  %v1376_v4 = vmul.f32 %v1179_v63, %v1179_v63  ;;  %1116 = vst.msk [vmem:[%s2050_s7 + $0x80] sm:$0xff] %vm272_vm0, %v1051_v58  ;;  %v1052_v5 = vadd.f32 %v847_v2, %v354_v53  ;;  %v1182_v11 = vld [vmem:[%s2050_s7 + $0x78] sm:$0xff]  ;;  %v1378_v18 = vmul.f32 %v1181_v62, %v1181_v62  ;;  %1146 = vst.msk [vmem:[%s2050_s7 + $0x170] sm:$0xff] %vm272_vm0, %v1081_v37  ;;  %v2507_v62 = vpop.f32.mrb[17].mxu1 }
 0x10b   : > { %v1255_v10 = vadd.f32 %v1254_v3, %v1253_v0  ;;  %v1180_v12 = vld [vmem:[%s2050_s7 + $0x68] sm:$0xff]  ;;  %1119 = vst.msk [vmem:[%s2050_s7 + $0x98] sm:$0xff] %vm272_vm0, %v1054_v1  ;;  %v1450_v19 = vadd.f32 %v1449_v9, %v1448_v61  ;;  %v1379_v32 = vmul.f32 %v1182_v11, %v1182_v11  ;;  %v1260_v49 = vsel %vm272_vm0, %v1182_v11, 0.0  ;;  %1144 = vst.msk [vmem:[%s2050_s7 + $0x160] sm:$0xff] %vm272_vm0, %v1079_v33  ;;  %v363_v3 = vld [vmem:[%s2050_s7 + $0xd0] sm:$0xff] }
 0x10c   : > { %v1451_v20 = vsel %vm272_vm0, %v1376_v4, 0.0  ;;  %1117 = vst.msk [vmem:[%s2050_s7 + $0x88] sm:$0xff] %vm272_vm0, %v1052_v5  ;;  %v1256_v22 = vsel %vm272_vm0, %v1180_v12, 0.0  ;;  %v1377_v26 = vmul.f32 %v1180_v12, %v1180_v12  ;;  %v1455_v48 = vsel %vm272_vm0, %v1378_v18, 0.0  ;;  %1147 = vst.msk [vmem:[%s2050_s7 + $0x178] sm:$0xff] %vm272_vm0, %v1082_v40  ;;  %v2513_v4 = vpop.f32.mrb[18].mxu1 }
 0x10d   : > { %v1452_v31 = vadd.f32 %v1451_v20, %v1450_v19  ;;  %v1257_v34 = vadd.f32 %v1256_v22, %v1255_v10  ;;  %v1457_v59 = vsel %vm272_vm0, %v1379_v32, 0.0  ;;  %v2518_v8 = vpop.f32.mrb[19].mxu1  ;;  %v364_v12 = vld [vmem:[%s2050_s7 + $0xd8] sm:$0xff] }
 0x10e   : > { %v1852_v35 = vpop.f32.mrb[20].mxu0  ;;  %v1453_v38 = vsel %vm272_vm0, %v1377_v26, 0.0 }
 0x10f   : > { %v1057_v39 = vadd.f32 %v1852_v35, %v359_v21  ;;  %v860_v41 = vpop.f32.mrb[21].mxu0  ;;  %v1259_v42 = vadd.f32 %v1258_v17, %v1257_v34  ;;  %v1454_v43 = vadd.f32 %v1453_v38, %v1452_v31 }
 0x110   : > { %v1055_v44 = vadd.f32 %v860_v41, %v357_v27  ;;  %v1853_v45 = vpop.f32.mrb[22].mxu0  ;;  %v1185_v55 = vld [vmem:[%s2050_s7 + $0x90] sm:$0xff] }
 0x111   : > { %v1183_v51 = vld [vmem:[%s2050_s7 + $0x80] sm:$0xff]  ;;  %1122 = vst.msk [vmem:[%s2050_s7 + $0xb0] sm:$0xff] %vm272_vm0, %v1057_v39  ;;  %v1058_v52 = vadd.f32 %v1853_v45, %v360_v36  ;;  %v863_v53 = vpop.f32.mrb[23].mxu0  ;;  %v1456_v54 = vadd.f32 %v1455_v48, %v1454_v43  ;;  %v1261_v57 = vadd.f32 %v1260_v49, %v1259_v42  ;;  %v1382_v5 = vmul.f32 %v1185_v55, %v1185_v55  ;;  %v2533_v35 = vpop.f32.mrb[20].mxu1  ;;  %v367_v43 = vld [vmem:[%s2050_s7 + $0xf0] sm:$0xff] }
 0x112   : > { %v1262_v58 = vsel %vm272_vm0, %v1183_v51, 0.0  ;;  %v1380_v46 = vmul.f32 %v1183_v51, %v1183_v51  ;;  %1120 = vst.msk [vmem:[%s2050_s7 + $0xa0] sm:$0xff] %vm272_vm0, %v1055_v44  ;;  %v1056_v56 = vadd.f32 %v863_v53, %v358_v47  ;;  %v1186_v2 = vld [vmem:[%s2050_s7 + $0x98] sm:$0xff]  ;;  %v1266_v13 = vsel %vm272_vm0, %v1185_v55, 0.0  ;;  %v2538_v38 = vpop.f32.mrb[21].mxu1  ;;  %v365_v49 = vld [vmem:[%s2050_s7 + $0xe0] sm:$0xff] }
 0x113   : > { %v1184_v60 = vld [vmem:[%s2050_s7 + $0x88] sm:$0xff]  ;;  %1123 = vst.msk [vmem:[%s2050_s7 + $0xb8] sm:$0xff] %vm272_vm0, %v1058_v52  ;;  %v1263_v63 = vadd.f32 %v1262_v58, %v1261_v57  ;;  %v1458_v0 = vadd.f32 %v1457_v59, %v1456_v54  ;;  %v1383_v14 = vmul.f32 %v1186_v2, %v1186_v2  ;;  %v1463_v24 = vsel %vm272_vm0, %v1382_v5, 0.0  ;;  %v2544_v44 = vpop.f32.mrb[22].mxu1  ;;  %v368_v55 = vld [vmem:[%s2050_s7 + $0xf8] sm:$0xff] }
 0x114   : > { %v1459_v1 = vsel %vm272_vm0, %v1380_v46, 0.0  ;;  %v1264_v61 = vsel %vm272_vm0, %v1184_v60, 0.0  ;;  %v1381_v6 = vmul.f32 %v1184_v60, %v1184_v60  ;;  %1121 = vst.msk [vmem:[%s2050_s7 + $0xa8] sm:$0xff] %vm272_vm0, %v1056_v56  ;;  %v1268_v25 = vsel %vm272_vm0, %v1186_v2, 0.0  ;;  %v2550_v51 = vpop.f32.mrb[23].mxu1  ;;  %v366_v2 = vld [vmem:[%s2050_s7 + $0xe8] sm:$0xff] }
 0x115   : > { %v1460_v9 = vadd.f32 %v1459_v1, %v1458_v0  ;;  %v1265_v10 = vadd.f32 %v1264_v61, %v1263_v63  ;;  %v1465_v36 = vsel %vm272_vm0, %v1383_v14, 0.0 }
 0x116   : > { %v1856_v11 = vpop.f32.mrb[24].mxu0  ;;  %v1461_v15 = vsel %vm272_vm0, %v1381_v6, 0.0 }
 0x117   : > { %v1061_v16 = vadd.f32 %v1856_v11, %v363_v3  ;;  %v876_v17 = vpop.f32.mrb[25].mxu0  ;;  %v1267_v18 = vadd.f32 %v1266_v13, %v1265_v10  ;;  %v1462_v19 = vadd.f32 %v1461_v15, %v1460_v9 }
 0x118   : > { %v1059_v20 = vadd.f32 %v876_v17, %v361_v7  ;;  %v1857_v21 = vpop.f32.mrb[26].mxu0  ;;  %v1189_v29 = vld [vmem:[%s2050_s7 + $0xb0] sm:$0xff] }
 0x119   : > { %v1187_v22 = vld [vmem:[%s2050_s7 + $0xa0] sm:$0xff]  ;;  %1126 = vst.msk [vmem:[%s2050_s7 + $0xd0] sm:$0xff] %vm272_vm0, %v1061_v16  ;;  %v1062_v26 = vadd.f32 %v1857_v21, %v364_v12  ;;  %v879_v27 = vpop.f32.mrb[27].mxu0  ;;  %v1464_v28 = vadd.f32 %v1463_v24, %v1462_v19  ;;  %v1269_v31 = vadd.f32 %v1268_v25, %v1267_v18  ;;  %v1386_v45 = vmul.f32 %v1189_v29, %v1189_v29  ;;  %v2565_v14 = vpop.f32.mrb[24].mxu1 }
 0x11a   : > { %v1270_v32 = vsel %vm272_vm0, %v1187_v22, 0.0  ;;  %v1384_v34 = vmul.f32 %v1187_v22, %v1187_v22  ;;  %1124 = vst.msk [vmem:[%s2050_s7 + $0xc0] sm:$0xff] %vm272_vm0, %v1059_v20  ;;  %v1060_v37 = vadd.f32 %v879_v27, %v362_v23  ;;  %v1190_v40 = vld [vmem:[%s2050_s7 + $0xb8] sm:$0xff]  ;;  %v1274_v57 = vsel %vm272_vm0, %v1189_v29, 0.0  ;;  %v2570_v17 = vpop.f32.mrb[25].mxu1  ;;  %v1199_v24 = vld [vmem:[%s2050_s7 + $0x100] sm:$0xff] }
 0x11b   : > { %1127 = vst.msk [vmem:[%s2050_s7 + $0xd8] sm:$0xff] %vm272_vm0, %v1062_v26  ;;  %v1271_v39 = vadd.f32 %v1270_v32, %v1269_v31  ;;  %v1466_v41 = vadd.f32 %v1465_v36, %v1464_v28  ;;  %v1188_v42 = vld [vmem:[%s2050_s7 + $0xa8] sm:$0xff]  ;;  %v1387_v58 = vmul.f32 %v1190_v40, %v1190_v40  ;;  %v1471_v61 = vsel %vm272_vm0, %v1386_v45, 0.0  ;;  %v2576_v25 = vpop.f32.mrb[26].mxu1 }
 0x11c   : > { %v1467_v33 = vsel %vm272_vm0, %v1384_v34, 0.0  ;;  %v1272_v47 = vsel %vm272_vm0, %v1188_v42, 0.0  ;;  %v1385_v48 = vmul.f32 %v1188_v42, %v1188_v42  ;;  %1125 = vst.msk [vmem:[%s2050_s7 + $0xc8] sm:$0xff] %vm272_vm0, %v1060_v37  ;;  %v1276_v3 = vsel %vm272_vm0, %v1190_v40, 0.0  ;;  %v2581_v28 = vpop.f32.mrb[27].mxu1  ;;  %v2587_v40 = vld [vmem:[%s2050_s7 + $0x108] sm:$0xff] }
 0x11d   : > { %v1468_v52 = vadd.f32 %v1467_v33, %v1466_v41  ;;  %v1273_v53 = vadd.f32 %v1272_v47, %v1271_v39  ;;  %v1473_v15 = vsel %vm272_vm0, %v1387_v58, 0.0  ;;  %v1396_v37 = vmul.f32 %v1199_v24, %v1199_v24 }
 0x11e   : > { %v1860_v54 = vpop.f32.mrb[28].mxu0  ;;  %v1469_v46 = vsel %vm272_vm0, %v1385_v48, 0.0  ;;  %v2593_v48 = vsel %vm272_vm0, %v1199_v24, 0.0 }
 0x11f   : > { %v1065_v59 = vadd.f32 %v1860_v54, %v367_v43  ;;  %v892_v60 = vpop.f32.mrb[29].mxu0  ;;  %v1275_v56 = vadd.f32 %v1274_v57, %v1273_v53  ;;  %v1470_v63 = vadd.f32 %v1469_v46, %v1468_v52 }
 0x120   : > { %v1063_v0 = vadd.f32 %v892_v60, %v365_v49  ;;  %v1861_v1 = vpop.f32.mrb[30].mxu0  ;;  %v1193_v10 = vld [vmem:[%s2050_s7 + $0xd0] sm:$0xff]  ;;  %v2605_v60 = vmul.f32 %v2587_v40, %v2587_v40 }
 0x121   : > { %v1191_v5 = vld [vmem:[%s2050_s7 + $0xc0] sm:$0xff]  ;;  %1130 = vst.msk [vmem:[%s2050_s7 + $0xf0] sm:$0xff] %vm272_vm0, %v1065_v59  ;;  %v1066_v6 = vadd.f32 %v1861_v1, %v368_v55  ;;  %v895_v7 = vpop.f32.mrb[31].mxu0  ;;  %v1472_v9 = vadd.f32 %v1471_v61, %v1470_v63  ;;  %v1277_v11 = vadd.f32 %v1276_v3, %v1275_v56  ;;  %v1390_v22 = vmul.f32 %v1193_v10, %v1193_v10  ;;  %v2597_v57 = vpop.f32.mrb[28].mxu1  ;;  %v382_v56 = vld [vmem:[%s2050_s7 + $0x168] sm:$0xff]  ;;  %v387_v63 = vld [vmem:[%s2050_s7 + $0x190] sm:$0xff] }
 0x122   : > { %v1278_v12 = vsel %vm272_vm0, %v1191_v5, 0.0  ;;  %v1388_v13 = vmul.f32 %v1191_v5, %v1191_v5  ;;  %1128 = vst.msk [vmem:[%s2050_s7 + $0xe0] sm:$0xff] %vm272_vm0, %v1063_v0  ;;  %v1064_v16 = vadd.f32 %v895_v7, %v366_v2  ;;  %v1194_v21 = vld [vmem:[%s2050_s7 + $0xd8] sm:$0xff]  ;;  %v1282_v32 = vsel %vm272_vm0, %v1193_v10, 0.0  ;;  %v385_v0 = vld [vmem:[%s2050_s7 + $0x180] sm:$0xff]  ;;  %v1020_v1 = vpop.f32.mrb[29].mxu1 }
 0x123   : > { %1131 = vst.msk [vmem:[%s2050_s7 + $0xf8] sm:$0xff] %vm272_vm0, %v1066_v6  ;;  %v1279_v18 = vadd.f32 %v1278_v12, %v1277_v11  ;;  %v1474_v19 = vadd.f32 %v1473_v15, %v1472_v9  ;;  %v1192_v23 = vld [vmem:[%s2050_s7 + $0xc8] sm:$0xff]  ;;  %v1391_v34 = vmul.f32 %v1194_v21, %v1194_v21  ;;  %v1479_v42 = vsel %vm272_vm0, %v1390_v22, 0.0  ;;  %v388_v7 = vld [vmem:[%s2050_s7 + $0x198] sm:$0xff]  ;;  %v1893_v10 = vpop.f32.mrb[30].mxu1 }
 0x124   : > { %v1475_v20 = vsel %vm272_vm0, %v1388_v13, 0.0  ;;  %v1280_v26 = vsel %vm272_vm0, %v1192_v23, 0.0  ;;  %v1389_v27 = vmul.f32 %v1192_v23, %v1192_v23  ;;  %1129 = vst.msk [vmem:[%s2050_s7 + $0xe8] sm:$0xff] %vm272_vm0, %v1064_v16  ;;  %v1284_v43 = vsel %vm272_vm0, %v1194_v21, 0.0  ;;  %v386_v9 = vld [vmem:[%s2050_s7 + $0x188] sm:$0xff]  ;;  %v391_v16 = vld [vmem:[%s2050_s7 + $0x1b0] sm:$0xff] }
 0x125   : > { %v1476_v29 = vadd.f32 %v1475_v20, %v1474_v19  ;;  %v1281_v31 = vadd.f32 %v1280_v26, %v1279_v18  ;;  %v1481_v58 = vsel %vm272_vm0, %v1391_v34, 0.0  ;;  %v2601_v59 = vsel %vm272_vm0, %v1396_v37, 0.0  ;;  %v389_v18 = vld [vmem:[%s2050_s7 + $0x1a0] sm:$0xff]  ;;  %v1023_v19 = vpop.f32.mrb[31].mxu1  ;;  %v392_v22 = vld [vmem:[%s2050_s7 + $0x1b8] sm:$0xff]  ;;  %v390_v26 = vld [vmem:[%s2050_s7 + $0x1a8] sm:$0xff] }
 0x126   : > { %v1477_v36 = vsel %vm272_vm0, %v1389_v27, 0.0  ;;  %v1080_v23 = vadd.f32 %v2477_v30, %v382_v56  ;;  %v1085_v24 = vadd.f32 %v2501_v50, %v387_v63  ;;  %v395_v27 = vld [vmem:[%s2050_s7 + $0x1d0] sm:$0xff]  ;;  %v1086_v34 = vadd.f32 %v2513_v4, %v388_v7  ;;  %v396_v30 = vld [vmem:[%s2050_s7 + $0x1d8] sm:$0xff]  ;;  %v394_v37 = vld [vmem:[%s2050_s7 + $0x1c8] sm:$0xff] }
 0x127   : > { %v1283_v39 = vadd.f32 %v1282_v32, %v1281_v31  ;;  %v1478_v41 = vadd.f32 %v1477_v36, %v1476_v29  ;;  %v1083_v32 = vadd.f32 %v2507_v62, %v385_v0  ;;  %v393_v36 = vld [vmem:[%s2050_s7 + $0x1c0] sm:$0xff]  ;;  %v399_v62 = vld [vmem:[%s2050_s7 + $0x1f0] sm:$0xff]  ;;  %v400_v4 = vld [vmem:[%s2050_s7 + $0x1f8] sm:$0xff] }
 0x128   : > { %v1197_v33 = vld [vmem:[%s2050_s7 + $0xf0] sm:$0xff]  ;;  %1145 = vst.msk [vmem:[%s2050_s7 + $0x168] sm:$0xff] %vm272_vm0, %v1080_v23  ;;  %1150 = vst.msk [vmem:[%s2050_s7 + $0x190] sm:$0xff] %vm272_vm0, %v1085_v24 }
 0x129   : > { %v1394_v45 = vmul.f32 %v1197_v33, %v1197_v33  ;;  %v1195_v47 = vld [vmem:[%s2050_s7 + $0xe0] sm:$0xff]  ;;  %v1480_v49 = vadd.f32 %v1479_v42, %v1478_v41  ;;  %v1285_v52 = vadd.f32 %v1284_v43, %v1283_v39  ;;  %v1290_v2 = vsel %vm272_vm0, %v1197_v33, 0.0  ;;  %1148 = vst.msk [vmem:[%s2050_s7 + $0x180] sm:$0xff] %vm272_vm0, %v1083_v32  ;;  %1151 = vst.msk [vmem:[%s2050_s7 + $0x198] sm:$0xff] %vm272_vm0, %v1086_v34  ;;  %v1208_v34 = vld [vmem:[%s2050_s7 + $0x148] sm:$0xff] }
 0x12a   : > { %v1286_v53 = vsel %vm272_vm0, %v1195_v47, 0.0  ;;  %v1392_v54 = vmul.f32 %v1195_v47, %v1195_v47  ;;  %v1198_v55 = vld [vmem:[%s2050_s7 + $0xf8] sm:$0xff]  ;;  %v1084_v41 = vadd.f32 %v2518_v8, %v386_v9  ;;  %v1089_v33 = vadd.f32 %v2533_v35, %v391_v16  ;;  %v397_v42 = vld [vmem:[%s2050_s7 + $0x1e0] sm:$0xff]  ;;  %v398_v35 = vld [vmem:[%s2050_s7 + $0x1e8] sm:$0xff] }
 0x12b   : > { %v1395_v46 = vmul.f32 %v1198_v55, %v1198_v55  ;;  %v1287_v61 = vadd.f32 %v1286_v53, %v1285_v52  ;;  %v1482_v3 = vadd.f32 %v1481_v58, %v1480_v49  ;;  %v1196_v6 = vld [vmem:[%s2050_s7 + $0xe8] sm:$0xff]  ;;  %v1487_v11 = vsel %vm272_vm0, %v1394_v45, 0.0  ;;  %v1201_v52 = vld [vmem:[%s2050_s7 + $0x110] sm:$0xff]  ;;  %v1202_v58 = vld [vmem:[%s2050_s7 + $0x118] sm:$0xff] }
 0x12c   : > { %v1483_v5 = vsel %vm272_vm0, %v1392_v54, 0.0  ;;  %v1292_v12 = vsel %vm272_vm0, %v1198_v55, 0.0  ;;  %v1288_v13 = vsel %vm272_vm0, %v1196_v6, 0.0  ;;  %v1393_v15 = vmul.f32 %v1196_v6, %v1196_v6  ;;  %1149 = vst.msk [vmem:[%s2050_s7 + $0x188] sm:$0xff] %vm272_vm0, %v1084_v41  ;;  %1154 = vst.msk [vmem:[%s2050_s7 + $0x1b0] sm:$0xff] %vm272_vm0, %v1089_v33 }
 0x12d   : > { %v1484_v20 = vadd.f32 %v1483_v5, %v1482_v3  ;;  %v1289_v21 = vadd.f32 %v1288_v13, %v1287_v61  ;;  %v1489_v29 = vsel %vm272_vm0, %v1395_v46, 0.0  ;;  %v1087_v43 = vadd.f32 %v2538_v38, %v389_v18  ;;  %v1203_v46 = vld [vmem:[%s2050_s7 + $0x120] sm:$0xff]  ;;  %v1204_v5 = vld [vmem:[%s2050_s7 + $0x128] sm:$0xff]  ;;  %v1206_v18 = vld [vmem:[%s2050_s7 + $0x138] sm:$0xff] }
 0x12e   : > { %v1485_v31 = vsel %vm272_vm0, %v1393_v15, 0.0  ;;  %v1090_v45 = vadd.f32 %v2544_v44, %v392_v22  ;;  %v1088_v8 = vadd.f32 %v2550_v51, %v390_v26  ;;  %v1093_v47 = vadd.f32 %v2565_v14, %v395_v27 }
 0x12f   : > { %v1291_v50 = vadd.f32 %v1290_v2, %v1289_v21  ;;  %v1486_v39 = vadd.f32 %v1485_v31, %v1484_v20  ;;  %v1091_v38 = vadd.f32 %v2570_v17, %v393_v36  ;;  %v1094_v44 = vadd.f32 %v2576_v25, %v396_v30  ;;  %1152 = vst.msk [vmem:[%s2050_s7 + $0x1a0] sm:$0xff] %vm272_vm0, %v1087_v43 }
 0x130   : > { %1155 = vst.msk [vmem:[%s2050_s7 + $0x1b8] sm:$0xff] %vm272_vm0, %v1090_v45  ;;  %1153 = vst.msk [vmem:[%s2050_s7 + $0x1a8] sm:$0xff] %vm272_vm0, %v1088_v8  ;;  %v1092_v51 = vadd.f32 %v2581_v28, %v394_v37  ;;  %v1097_v14 = vadd.f32 %v2597_v57, %v399_v62  ;;  %v1095_v54 = vadd.f32 %v1020_v1, %v397_v42  ;;  %v1296_v28 = vsel %vm272_vm0, %v2587_v40, 0.0  ;;  %v1210_v45 = vld [vmem:[%s2050_s7 + $0x158] sm:$0xff]  ;;  %v1211_v8 = vld [vmem:[%s2050_s7 + $0x160] sm:$0xff] }
 0x131   : > { %v1488_v49 = vadd.f32 %v1487_v11, %v1486_v39  ;;  %v1293_v53 = vadd.f32 %v1292_v12, %v1291_v50  ;;  %1158 = vst.msk [vmem:[%s2050_s7 + $0x1d0] sm:$0xff] %vm272_vm0, %v1093_v47  ;;  %v1098_v17 = vadd.f32 %v1893_v10, %v400_v4  ;;  %1156 = vst.msk [vmem:[%s2050_s7 + $0x1c0] sm:$0xff] %vm272_vm0, %v1091_v38  ;;  %v1298_v0 = vsel %vm272_vm0, %v1201_v52, 0.0  ;;  %v1205_v10 = vld [vmem:[%s2050_s7 + $0x130] sm:$0xff] }
 0x132   : > { %1159 = vst.msk [vmem:[%s2050_s7 + $0x1d8] sm:$0xff] %vm272_vm0, %v1094_v44  ;;  %v1096_v56 = vadd.f32 %v1023_v19, %v398_v35  ;;  %v1398_v63 = vmul.f32 %v1201_v52, %v1201_v52  ;;  %1157 = vst.msk [vmem:[%s2050_s7 + $0x1c8] sm:$0xff] %vm272_vm0, %v1092_v51  ;;  %v1399_v1 = vmul.f32 %v1202_v58, %v1202_v58  ;;  %v1493_v40 = vsel %vm272_vm0, %v2605_v60, 0.0  ;;  %v1207_v19 = vld [vmem:[%s2050_s7 + $0x140] sm:$0xff]  ;;  %v1209_v39 = vld [vmem:[%s2050_s7 + $0x150] sm:$0xff] }
 0x133   : > { %v1295_v25 = vadd.f32 %v2593_v48, %v1293_v53  ;;  %v1490_v55 = vadd.f32 %v1489_v29, %v1488_v49  ;;  %1162 = vst.msk [vmem:[%s2050_s7 + $0x1f0] sm:$0xff] %vm272_vm0, %v1097_v14  ;;  %1160 = vst.msk [vmem:[%s2050_s7 + $0x1e0] sm:$0xff] %vm272_vm0, %v1095_v54  ;;  %v1400_v2 = vmul.f32 %v1203_v46, %v1203_v46  ;;  %v1300_v7 = vsel %vm272_vm0, %v1202_v58, 0.0 }
 0x134   : > { %1163 = vst.msk [vmem:[%s2050_s7 + $0x1f8] sm:$0xff] %vm272_vm0, %v1098_v17  ;;  %1161 = vst.msk [vmem:[%s2050_s7 + $0x1e8] sm:$0xff] %vm272_vm0, %v1096_v56  ;;  %v1495_v6 = vsel %vm272_vm0, %v1398_v63, 0.0  ;;  %v1497_v12 = vsel %vm272_vm0, %v1399_v1, 0.0  ;;  %v1401_v60 = vmul.f32 %v1204_v5, %v1204_v5  ;;  %v1402_v20 = vmul.f32 %v1205_v10, %v1205_v10  ;;  %v1212_v17 = vld [vmem:[%s2050_s7 + $0x168] sm:$0xff]  ;;  %v1213_v56 = vld [vmem:[%s2050_s7 + $0x170] sm:$0xff] }
 0x135   : > { %v1492_v48 = vadd.f32 %v2601_v59, %v1490_v55  ;;  %v1297_v57 = vadd.f32 %v1296_v28, %v1295_v25  ;;  %v1302_v59 = vsel %vm272_vm0, %v1203_v46, 0.0  ;;  %v1499_v13 = vsel %vm272_vm0, %v1400_v2, 0.0  ;;  %v1215_v2 = vld [vmem:[%s2050_s7 + $0x180] sm:$0xff] }
 0x136   : > { %v1304_v21 = vsel %vm272_vm0, %v1204_v5, 0.0  ;;  %v1306_v22 = vsel %vm272_vm0, %v1205_v10, 0.0  ;;  %v1403_v26 = vmul.f32 %v1206_v18, %v1206_v18  ;;  %v1501_v27 = vsel %vm272_vm0, %v1401_v60, 0.0 }
 0x137   : > { %v1299_v61 = vadd.f32 %v1298_v0, %v1297_v57  ;;  %v1494_v3 = vadd.f32 %v1493_v40, %v1492_v48  ;;  %v1404_v29 = vmul.f32 %v1207_v19, %v1207_v19  ;;  %v1503_v36 = vsel %vm272_vm0, %v1402_v20, 0.0  ;;  %v1214_v40 = vld [vmem:[%s2050_s7 + $0x178] sm:$0xff] }
 0x138   : > { %v1308_v30 = vsel %vm272_vm0, %v1206_v18, 0.0  ;;  %v1310_v37 = vsel %vm272_vm0, %v1207_v19, 0.0  ;;  %v1505_v33 = vsel %vm272_vm0, %v1403_v26, 0.0  ;;  %v1405_v42 = vmul.f32 %v1208_v34, %v1208_v34  ;;  %v1217_v19 = vld [vmem:[%s2050_s7 + $0x190] sm:$0xff] }
 0x139   : > { %v1496_v9 = vadd.f32 %v1495_v6, %v1494_v3  ;;  %v1301_v11 = vadd.f32 %v1300_v7, %v1299_v61  ;;  %v1507_v62 = vsel %vm272_vm0, %v1404_v29, 0.0  ;;  %v1406_v47 = vmul.f32 %v1209_v39, %v1209_v39  ;;  %v1219_v29 = vld [vmem:[%s2050_s7 + $0x1a0] sm:$0xff] }
 0x13a   : > { %v1312_v35 = vsel %vm272_vm0, %v1208_v34, 0.0  ;;  %v1314_v53 = vsel %vm272_vm0, %v1209_v39, 0.0  ;;  %v1407_v38 = vmul.f32 %v1210_v45, %v1210_v45  ;;  %v1509_v44 = vsel %vm272_vm0, %v1405_v42, 0.0 }
 0x13b   : > { %v1303_v15 = vadd.f32 %v1302_v59, %v1301_v11  ;;  %v1498_v16 = vadd.f32 %v1497_v12, %v1496_v9  ;;  %v1408_v51 = vmul.f32 %v1211_v8, %v1211_v8  ;;  %v1511_v25 = vsel %vm272_vm0, %v1406_v47, 0.0 }
 0x13c   : > { %v1316_v55 = vsel %vm272_vm0, %v1210_v45, 0.0  ;;  %v1318_v58 = vsel %vm272_vm0, %v1211_v8, 0.0  ;;  %v1513_v28 = vsel %vm272_vm0, %v1407_v38, 0.0  ;;  %v1409_v57 = vmul.f32 %v1212_v17, %v1212_v17  ;;  %v1221_v8 = vld [vmem:[%s2050_s7 + $0x1b0] sm:$0xff] }
 0x13d   : > { %v1500_v23 = vadd.f32 %v1499_v13, %v1498_v16  ;;  %v1305_v24 = vadd.f32 %v1304_v21, %v1303_v15  ;;  %v1515_v48 = vsel %vm272_vm0, %v1408_v51, 0.0  ;;  %v1410_v61 = vmul.f32 %v1213_v56, %v1213_v56  ;;  %v1216_v13 = vld [vmem:[%s2050_s7 + $0x188] sm:$0xff]  ;;  %v1223_v51 = vld [vmem:[%s2050_s7 + $0x1c0] sm:$0xff] }
 0x13e   : > { %v1320_v3 = vsel %vm272_vm0, %v1212_v17, 0.0  ;;  %v1322_v7 = vsel %vm272_vm0, %v1213_v56, 0.0  ;;  %v1411_v59 = vmul.f32 %v1214_v40, %v1214_v40  ;;  %v1517_v9 = vsel %vm272_vm0, %v1409_v57, 0.0 }
 0x13f   : > { %v1307_v31 = vadd.f32 %v1306_v22, %v1305_v24  ;;  %v1502_v32 = vadd.f32 %v1501_v27, %v1500_v23  ;;  %v1412_v10 = vmul.f32 %v1215_v2, %v1215_v2  ;;  %v1519_v60 = vsel %vm272_vm0, %v1410_v61, 0.0  ;;  %v1218_v27 = vld [vmem:[%s2050_s7 + $0x198] sm:$0xff] }
 0x140   : > { %v1324_v15 = vsel %vm272_vm0, %v1214_v40, 0.0  ;;  %v1326_v16 = vsel %vm272_vm0, %v1215_v2, 0.0  ;;  %v1521_v21 = vsel %vm272_vm0, %v1411_v59, 0.0  ;;  %v1413_v24 = vmul.f32 %v1216_v13, %v1216_v13  ;;  %v1225_v2 = vld [vmem:[%s2050_s7 + $0x1d0] sm:$0xff] }
 0x141   : > { %v1504_v50 = vadd.f32 %v1503_v36, %v1502_v32  ;;  %v1309_v41 = vadd.f32 %v1308_v30, %v1307_v31  ;;  %v1523_v23 = vsel %vm272_vm0, %v1412_v10, 0.0  ;;  %v1414_v31 = vmul.f32 %v1217_v19, %v1217_v19  ;;  %v1227_v10 = vld [vmem:[%s2050_s7 + $0x1e0] sm:$0xff] }
 0x142   : > { %v1328_v32 = vsel %vm272_vm0, %v1216_v13, 0.0  ;;  %v1330_v30 = vsel %vm272_vm0, %v1217_v19, 0.0  ;;  %v1416_v39 = vmul.f32 %v1219_v29, %v1219_v29  ;;  %v1420_v56 = vmul.f32 %v1223_v51, %v1223_v51 }
 0x143   : > { %v1311_v4 = vadd.f32 %v1310_v37, %v1309_v41  ;;  %v1506_v43 = vadd.f32 %v1505_v33, %v1504_v50  ;;  %v1415_v37 = vmul.f32 %v1218_v27, %v1218_v27  ;;  %v1525_v50 = vsel %vm272_vm0, %v1413_v24, 0.0 }
 0x144   : > { %v1527_v42 = vsel %vm272_vm0, %v1414_v31, 0.0  ;;  %v1424_v19 = vmul.f32 %v1227_v10, %v1227_v10 }
 0x145   : > { %v1508_v49 = vadd.f32 %v1507_v62, %v1506_v43  ;;  %v1313_v52 = vadd.f32 %v1312_v35, %v1311_v4  ;;  %v1220_v62 = vld [vmem:[%s2050_s7 + $0x1a8] sm:$0xff]  ;;  %v1332_v4 = vsel %vm272_vm0, %v1218_v27, 0.0  ;;  %v1334_v43 = vsel %vm272_vm0, %v1219_v29, 0.0  ;;  %v1229_v29 = vld [vmem:[%s2050_s7 + $0x1f0] sm:$0xff] }
 0x146   : > { %v1529_v35 = vsel %vm272_vm0, %v1415_v37, 0.0 }
 0x147   : > { %v1315_v14 = vadd.f32 %v1314_v53, %v1313_v52  ;;  %v1510_v54 = vadd.f32 %v1509_v44, %v1508_v49  ;;  %v1531_v49 = vsel %vm272_vm0, %v1416_v39, 0.0  ;;  %v1417_v52 = vmul.f32 %v1220_v62, %v1220_v62  ;;  %v1222_v44 = vld [vmem:[%s2050_s7 + $0x1b8] sm:$0xff] }
 0x148   : > { %v1426_v39 = vmul.f32 %v1229_v29, %v1229_v29 }
 0x149   : > { %v1512_v46 = vadd.f32 %v1511_v25, %v1510_v54  ;;  %v1317_v63 = vadd.f32 %v1316_v55, %v1315_v14  ;;  %v1418_v14 = vmul.f32 %v1221_v8, %v1221_v8  ;;  %v1336_v54 = vsel %vm272_vm0, %v1220_v62, 0.0 }
 0x14a   : > { %v1338_v55 = vsel %vm272_vm0, %v1221_v8, 0.0 }
 0x14b   : > { %v1319_v0 = vadd.f32 %v1318_v58, %v1317_v63  ;;  %v1514_v1 = vadd.f32 %v1513_v28, %v1512_v46  ;;  %v1419_v58 = vmul.f32 %v1222_v44, %v1222_v44  ;;  %v1533_v46 = vsel %vm272_vm0, %v1417_v52, 0.0 }
 0x14c   : > { %v1535_v57 = vsel %vm272_vm0, %v1418_v14, 0.0 }
 0x14d   : > { %v1516_v5 = vadd.f32 %v1515_v48, %v1514_v1  ;;  %v1321_v6 = vadd.f32 %v1320_v3, %v1319_v0  ;;  %v1224_v48 = vld [vmem:[%s2050_s7 + $0x1c8] sm:$0xff]  ;;  %v1340_v0 = vsel %vm272_vm0, %v1222_v44, 0.0  ;;  %v1342_v1 = vsel %vm272_vm0, %v1223_v51, 0.0 }
 0x14e   : > { %v1537_v3 = vsel %vm272_vm0, %v1419_v58, 0.0 }
 0x14f   : > { %v1323_v11 = vadd.f32 %v1322_v7, %v1321_v6  ;;  %v1518_v12 = vadd.f32 %v1517_v9, %v1516_v5  ;;  %v1539_v5 = vsel %vm272_vm0, %v1420_v56, 0.0  ;;  %v1421_v6 = vmul.f32 %v1224_v48, %v1224_v48  ;;  %v1226_v9 = vld [vmem:[%s2050_s7 + $0x1d8] sm:$0xff] }
 0x151   : > { %v1520_v18 = vadd.f32 %v1519_v60, %v1518_v12  ;;  %v1325_v20 = vadd.f32 %v1324_v15, %v1323_v11  ;;  %v1422_v11 = vmul.f32 %v1225_v2, %v1225_v2  ;;  %v1344_v12 = vsel %vm272_vm0, %v1224_v48, 0.0 }
 0x152   : > { %v1346_v15 = vsel %vm272_vm0, %v1225_v2, 0.0 }
 0x153   : > { %v1327_v22 = vadd.f32 %v1326_v16, %v1325_v20  ;;  %v1522_v26 = vadd.f32 %v1521_v21, %v1520_v18  ;;  %v1423_v16 = vmul.f32 %v1226_v9, %v1226_v9  ;;  %v1541_v18 = vsel %vm272_vm0, %v1421_v6, 0.0 }
 0x154   : > { %v1543_v24 = vsel %vm272_vm0, %v1422_v11, 0.0 }
 0x155   : > { %v1524_v34 = vadd.f32 %v1523_v23, %v1522_v26  ;;  %v1329_v36 = vadd.f32 %v1328_v32, %v1327_v22  ;;  %v1228_v23 = vld [vmem:[%s2050_s7 + $0x1e8] sm:$0xff]  ;;  %v1348_v22 = vsel %vm272_vm0, %v1226_v9, 0.0  ;;  %v1350_v26 = vsel %vm272_vm0, %v1227_v10, 0.0 }
 0x156   : > { %v1545_v32 = vsel %vm272_vm0, %v1423_v16, 0.0 }
 0x157   : > { %v1331_v41 = vadd.f32 %v1330_v30, %v1329_v36  ;;  %v1526_v33 = vadd.f32 %v1525_v50, %v1524_v34  ;;  %v1547_v34 = vsel %vm272_vm0, %v1424_v19, 0.0  ;;  %v1425_v36 = vmul.f32 %v1228_v23, %v1228_v23  ;;  %v1230_v50 = vld [vmem:[%s2050_s7 + $0x1f8] sm:$0xff] }
 0x159   : > { %v1528_v45 = vadd.f32 %v1527_v42, %v1526_v33  ;;  %v1333_v47 = vadd.f32 %v1332_v4, %v1331_v41  ;;  %v1352_v41 = vsel %vm272_vm0, %v1228_v23, 0.0  ;;  %v1354_v42 = vsel %vm272_vm0, %v1229_v29, 0.0 }
 0x15a   : > { %v1427_v4 = vmul.f32 %v1230_v50, %v1230_v50 }
 0x15b   : > { %v1335_v53 = vadd.f32 %v1334_v43, %v1333_v47  ;;  %v1530_v38 = vadd.f32 %v1529_v35, %v1528_v45  ;;  %v1549_v43 = vsel %vm272_vm0, %v1425_v36, 0.0  ;;  %v1551_v47 = vsel %vm272_vm0, %v1426_v39, 0.0 }
 0x15c   : > { %v1356_v35 = vsel %vm272_vm0, %v1230_v50, 0.0 }
 0x15d   : > { %v1532_v17 = vadd.f32 %v1531_v49, %v1530_v38  ;;  %v1337_v25 = vadd.f32 %v1336_v54, %v1335_v53  ;;  %v1553_v53 = vsel %vm272_vm0, %v1427_v4, 0.0 }
 0x15f   : > { %v1339_v63 = vadd.f32 %v1338_v55, %v1337_v25  ;;  %v1534_v28 = vadd.f32 %v1533_v46, %v1532_v17 }
 0x161   : > { %v1536_v40 = vadd.f32 %v1535_v57, %v1534_v28  ;;  %v1341_v61 = vadd.f32 %v1340_v0, %v1339_v63 }
 0x163   : > { %v1343_v7 = vadd.f32 %v1342_v1, %v1341_v61  ;;  %v1538_v59 = vadd.f32 %v1537_v3, %v1536_v40 }
 0x165   : > { %v1540_v13 = vadd.f32 %v1539_v5, %v1538_v59  ;;  %v1345_v60 = vadd.f32 %v1344_v12, %v1343_v7 }
 0x167   : > { %v1347_v20 = vadd.f32 %v1346_v15, %v1345_v60  ;;  %v1542_v21 = vadd.f32 %v1541_v18, %v1540_v13 }
 0x169   : > { %v1544_v27 = vadd.f32 %v1543_v24, %v1542_v21  ;;  %v1349_v31 = vadd.f32 %v1348_v22, %v1347_v20 }
 0x16b   : > { %v1351_v30 = vadd.f32 %v1350_v26, %v1349_v31  ;;  %v1546_v37 = vadd.f32 %v1545_v32, %v1544_v27 }
 0x16d   : > { %v1548_v33 = vadd.f32 %v1547_v34, %v1546_v37  ;;  %v1353_v62 = vadd.f32 %v1352_v41, %v1351_v30 }
 0x16f   : > { %v1355_v45 = vadd.f32 %v1354_v42, %v1353_v62  ;;  %v1550_v8 = vadd.f32 %v1549_v43, %v1548_v33 }
 0x171   : > { %v1357_v49 = vadd.f32 %v1356_v35, %v1355_v45  ;;  %v1552_v52 = vadd.f32 %v1551_v47, %v1550_v8 }
 0x173   : > { %v1358_v38 = vrot.slane %v1357_v49, 4  ;;  %v1554_v44 = vadd.f32 %v1553_v53, %v1552_v52 }
 0x175   : > { %v1359_v51 = vadd.f32 %v1358_v38, %v1357_v49  ;;  %v1555_v14 = vrot.slane %v1554_v44, 4 }
 0x177   : > { %v1360_v54 = vrot.slane %v1359_v51, 2  ;;  %v1556_v17 = vadd.f32 %v1555_v14, %v1554_v44 }
 0x179   : > { %v1361_v25 = vadd.f32 %v1360_v54, %v1359_v51  ;;  %v1557_v55 = vrot.slane %v1556_v17, 2 }
 0x17b   : > { %v1362_v58 = vrot.slane %v1361_v25, 1  ;;  %v1558_v46 = vadd.f32 %v1557_v55, %v1556_v17 }
 0x17d   : > { %v1363_v56 = vadd.f32 %v1362_v58, %v1361_v25  ;;  %v1559_v63 = vrot.slane %v1558_v46, 1 }
 0x17f   : > { %v1560_v28 = vadd.f32 %v1559_v63, %v1558_v46  ;;  %1561 = vst.msk [vmem:[%s262_s11] sm:$0xff] %vm272_vm0, %v1363_v56 }
 0x181   : > { %1562 = vst.msk [vmem:[%s266_s14] sm:$0xff] %vm272_vm0, %v1560_v28 }
 0x182 PF: > { %s15_s17 = sadd.s32 1, %s1982_s17   ;;  %s2800_s15 = smov %s1978_s16 }
 0x183   : > { %p12_p6 = scmp.ge.s32.totalorder %s15_s17, 6   ;;  %s2801_s16 = smov %s2803_s18 }
 0x185   :  { %14 = sbr.rel (!%p12_p6) target bundleno = 2 (0x2), region = 93 }

// kernel: discriminator_forward.10
= control target key start
LH: loop header
LB: loop body
LE: loop exit
PB: predicated region body
PF: predicated region fallthrough
CT: control target
= control target key end

     0   :  { %s1126_s12 = smov 0   ;;  %s1481_s0 = inlined_call_operand.vmem [shape: f32[2048,64], index: 0, kind: input, shape index: {}]   ;;  %s1482_s1 = inlined_call_operand.vmem [shape: f32[1,64], index: 1, kind: input, shape index: {}]   ;;  %s1483_s2 = inlined_call_operand.vmem [shape: f32[1,64], index: 2, kind: input, shape index: {}]   ;;  %s1484_s3 = inlined_call_operand.vmem [shape: bf16[2048,64], index: 3, kind: output, shape index: {}]  }
   0x1 LB: > { %s949_s13 = sadd.s32 4294967295, %s1104_s12   ;;  %p953_p0 = scmp.ge.s32.totalorder %s1104_s12, 1  ;;  %s1104_s12 = sphi %s1126_s12, %s13_s12  }
   0x2   : > { %p138_p1 = scmp.lt.s32.totalorder %s1104_s12, 5 }
   0x4   : > { %p139_p2 = pnand %p953_p0, %p138_p1 }
   0x5   : > { %s954_s14 = sshll.u32 (!%p139_p2), %s949_s13, 6  ;;  %v1140_v0 = vld [vmem:[%s1482_s1] ss:$0 sm:$0xff] (!%p139_p2)  ;;  %vm828_vm0 = vcmask (!%p139_p2), 519168  }
   0x6   : > { %142 = sbr.rel (%p139_p2) target bundleno = 120 (0x78), region = 32  ;;  %p163_p3 = scmp.lt.s32.totalorder (!%p139_p2), %s954_s14, 255  ;;  %v1150_v1 = vld [vmem:[%s1483_s2] ss:$0 sm:$0xff] (!%p139_p2) }
   0xd   : > { %s1486_s14 = smov (!%p163_p3, %s954_s14), 255 }
   0xe   : > { %s955_s15 = sshll.u32 %s1486_s14, 3  ;;  %s957_s23 = sshll.u32 %s1486_s14, 2 }
   0xf   : > { %s1145_s20 = scalar_lea.vmem %s1481_s0, %s955_s15  ;;  %s1178_s26 = scalar_lea.vmem %s1484_s3, %s957_s23 }
  0x10   : > { %v174_v2 = vld [vmem:[%s1145_s20] sm:$0xff]  ;;  %v175_v3 = vld [vmem:[%s1145_s20 + $0x8] sm:$0xff]  ;;  %v176_v4 = vld [vmem:[%s1145_s20 + $0x10] sm:$0xff] }
  0x11   : > { %v245_v5 = vmul.f32 %v1140_v0, %v174_v2  ;;  %v246_v6 = vmul.f32 %v1140_v0, %v175_v3  ;;  %v247_v7 = vmul.f32 %v1140_v0, %v176_v4  ;;  %v177_v8 = vld [vmem:[%s1145_s20 + $0x18] sm:$0xff]  ;;  %v178_v9 = vld [vmem:[%s1145_s20 + $0x20] sm:$0xff]  ;;  %v179_v10 = vld [vmem:[%s1145_s20 + $0x28] sm:$0xff] }
  0x12   : > { %v248_v11 = vmul.f32 %v1140_v0, %v177_v8  ;;  %v249_v12 = vmul.f32 %v1140_v0, %v178_v9  ;;  %v250_v13 = vmul.f32 %v1140_v0, %v179_v10  ;;  %v180_v14 = vld [vmem:[%s1145_s20 + $0x30] sm:$0xff]  ;;  %v181_v15 = vld [vmem:[%s1145_s20 + $0x38] sm:$0xff]  ;;  %v182_v31 = vld [vmem:[%s1145_s20 + $0x40] sm:$0xff] }
  0x13   : > { %v316_v16 = vadd.f32 %v1150_v1, %v245_v5  ;;  %v317_v17 = vadd.f32 %v1150_v1, %v246_v6  ;;  %v318_v18 = vadd.f32 %v1150_v1, %v247_v7  ;;  %v251_v19 = vmul.f32 %v1140_v0, %v180_v14  ;;  %v183_v36 = vld [vmem:[%s1145_s20 + $0x48] sm:$0xff]  ;;  %v184_v37 = vld [vmem:[%s1145_s20 + $0x50] sm:$0xff]  ;;  %v185_v38 = vld [vmem:[%s1145_s20 + $0x58] sm:$0xff] }
  0x14   : > { %v319_v20 = vadd.f32 %v1150_v1, %v248_v11  ;;  %v320_v21 = vadd.f32 %v1150_v1, %v249_v12  ;;  %v321_v22 = vadd.f32 %v1150_v1, %v250_v13  ;;  %v252_v23 = vmul.f32 %v1140_v0, %v181_v15  ;;  %v186_v50 = vld [vmem:[%s1145_s20 + $0x60] sm:$0xff]  ;;  %v187_v2 = vld [vmem:[%s1145_s20 + $0x68] sm:$0xff]  ;;  %v188_v5 = vld [vmem:[%s1145_s20 + $0x70] sm:$0xff] }
  0x15   : > { %vm380_vm1 = vcmp.ge.f32.partialorder %v316_v16, 0.0  ;;  %v444_v24 = vmul.f32 0.2, %v316_v16  ;;  %vm381_vm2 = vcmp.ge.f32.partialorder %v317_v17, 0.0  ;;  %v445_v25 = vmul.f32 0.2, %v317_v17 }
  0x16   : > { %vm382_vm3 = vcmp.ge.f32.partialorder %v318_v18, 0.0  ;;  %v446_v26 = vmul.f32 0.2, %v318_v18  ;;  %vm383_vm4 = vcmp.ge.f32.partialorder %v319_v20, 0.0  ;;  %v447_v27 = vmul.f32 0.2, %v319_v20 }
  0x17   : > { %v508_v28 = vsel %vm380_vm1, %v316_v16, %v444_v24  ;;  %v509_v29 = vsel %vm381_vm2, %v317_v17, %v445_v25  ;;  %vm384_vm5 = vcmp.ge.f32.partialorder %v320_v21, 0.0  ;;  %v448_v30 = vmul.f32 0.2, %v320_v21  ;;  %v189_v13 = vld [vmem:[%s1145_s20 + $0x78] sm:$0xff]  ;;  %v190_v14 = vld [vmem:[%s1145_s20 + $0x80] sm:$0xff] }
  0x18   : > { %v1026_v32 = vpack.c.bf16 %v508_v28, %v508_v28  ;;  %v1027_v33 = vpack.c.bf16 %v509_v29, %v509_v29  ;;  %v510_v34 = vsel %vm382_vm3, %v318_v18, %v446_v26  ;;  %v511_v35 = vsel %vm383_vm4, %v319_v20, %v447_v27  ;;  %v192_v20 = vld [vmem:[%s1145_s20 + $0x90] sm:$0xff] }
  0x19   : > { %v1028_v39 = vpack.c.bf16 %v510_v34, %v510_v34  ;;  %v1029_v40 = vpack.c.bf16 %v511_v35, %v511_v35  ;;  %v512_v41 = vsel %vm384_vm5, %v320_v21, %v448_v30  ;;  %vm385_vm6 = vcmp.ge.f32.partialorder %v321_v22, 0.0  ;;  %v193_v21 = vld [vmem:[%s1145_s20 + $0x98] sm:$0xff] }
  0x1a   : > { %829 = vst.msk [vmem:[%s1178_s26] sm:$0xf] %vm828_vm0, %v1026_v32  ;;  %830 = vst.msk [vmem:[%s1178_s26 + $0x4] sm:$0xf] %vm828_vm0, %v1027_v33  ;;  %v1030_v42 = vpack.c.bf16 %v512_v41, %v512_v41  ;;  %v449_v43 = vmul.f32 0.2, %v321_v22  ;;  %v322_v44 = vadd.f32 %v1150_v1, %v251_v19  ;;  %v323_v45 = vadd.f32 %v1150_v1, %v252_v23 }
  0x1b   : > { %831 = vst.msk [vmem:[%s1178_s26 + $0x8] sm:$0xf] %vm828_vm0, %v1028_v39  ;;  %832 = vst.msk [vmem:[%s1178_s26 + $0xc] sm:$0xf] %vm828_vm0, %v1029_v40  ;;  %v253_v46 = vmul.f32 %v1140_v0, %v182_v31  ;;  %v254_v47 = vmul.f32 %v1140_v0, %v183_v36  ;;  %v255_v48 = vmul.f32 %v1140_v0, %v184_v37  ;;  %v191_v19 = vld [vmem:[%s1145_s20 + $0x88] sm:$0xff]  ;;  %v194_v33 = vld [vmem:[%s1145_s20 + $0xa0] sm:$0xff] }
  0x1c   : > { %v256_v49 = vmul.f32 %v1140_v0, %v185_v38  ;;  %833 = vst.msk [vmem:[%s1178_s26 + $0x10] sm:$0xf] %vm828_vm0, %v1030_v42  ;;  %v513_v51 = vsel %vm385_vm6, %v321_v22, %v449_v43  ;;  %vm386_vm7 = vcmp.ge.f32.partialorder %v322_v44, 0.0  ;;  %v450_v52 = vmul.f32 0.2, %v322_v44 }
  0x1d   : > { %vm387_vm8 = vcmp.ge.f32.partialorder %v323_v45, 0.0  ;;  %v1031_v53 = vpack.c.bf16 %v513_v51, %v513_v51  ;;  %v451_v54 = vmul.f32 0.2, %v323_v45  ;;  %v324_v55 = vadd.f32 %v1150_v1, %v253_v46 }
  0x1e   : > { %v325_v56 = vadd.f32 %v1150_v1, %v254_v47  ;;  %v514_v57 = vsel %vm386_vm7, %v322_v44, %v450_v52  ;;  %v326_v58 = vadd.f32 %v1150_v1, %v255_v48  ;;  %v327_v59 = vadd.f32 %v1150_v1, %v256_v49  ;;  %v195_v52 = vld [vmem:[%s1145_s20 + $0xa8] sm:$0xff] }
  0x1f   : > { %v257_v60 = vmul.f32 %v1140_v0, %v186_v50  ;;  %834 = vst.msk [vmem:[%s1178_s26 + $0x14] sm:$0xf] %vm828_vm0, %v1031_v53  ;;  %v1032_v61 = vpack.c.bf16 %v514_v57, %v514_v57  ;;  %v515_v62 = vsel %vm387_vm8, %v323_v45, %v451_v54  ;;  %vm388_vm9 = vcmp.ge.f32.partialorder %v324_v55, 0.0 }
  0x20   : > { %v452_v63 = vmul.f32 0.2, %v324_v55  ;;  %v1033_v3 = vpack.c.bf16 %v515_v62, %v515_v62  ;;  %vm389_vm10 = vcmp.ge.f32.partialorder %v325_v56, 0.0  ;;  %v453_v4 = vmul.f32 0.2, %v325_v56  ;;  %v198_v62 = vld [vmem:[%s1145_s20 + $0xc0] sm:$0xff] }
  0x21   : > { %vm390_vm11 = vcmp.ge.f32.partialorder %v326_v58, 0.0  ;;  %835 = vst.msk [vmem:[%s1178_s26 + $0x18] sm:$0xf] %vm828_vm0, %v1032_v61  ;;  %v454_v7 = vmul.f32 0.2, %v326_v58  ;;  %vm391_vm12 = vcmp.ge.f32.partialorder %v327_v59, 0.0  ;;  %v328_v11 = vadd.f32 %v1150_v1, %v257_v60 }
  0x22   : > { %v516_v6 = vsel %vm388_vm9, %v324_v55, %v452_v63  ;;  %v455_v8 = vmul.f32 0.2, %v327_v59  ;;  %836 = vst.msk [vmem:[%s1178_s26 + $0x1c] sm:$0xf] %vm828_vm0, %v1033_v3  ;;  %v517_v10 = vsel %vm389_vm10, %v325_v56, %v453_v4  ;;  %v258_v12 = vmul.f32 %v1140_v0, %v187_v2  ;;  %v196_v56 = vld [vmem:[%s1145_s20 + $0xb0] sm:$0xff]  ;;  %v197_v61 = vld [vmem:[%s1145_s20 + $0xb8] sm:$0xff] }
  0x23   : > { %v1034_v9 = vpack.c.bf16 %v516_v6, %v516_v6  ;;  %v1035_v15 = vpack.c.bf16 %v517_v10, %v517_v10  ;;  %v518_v16 = vsel %vm390_vm11, %v326_v58, %v454_v7  ;;  %v259_v18 = vmul.f32 %v1140_v0, %v188_v5  ;;  %v199_v63 = vld [vmem:[%s1145_s20 + $0xc8] sm:$0xff]  ;;  %v200_v6 = vld [vmem:[%s1145_s20 + $0xd0] sm:$0xff]  ;;  %v201_v7 = vld [vmem:[%s1145_s20 + $0xd8] sm:$0xff] }
  0x24   : > { %v519_v17 = vsel %vm391_vm12, %v327_v59, %v455_v8  ;;  %v1036_v22 = vpack.c.bf16 %v518_v16, %v518_v16  ;;  %vm392_vm13 = vcmp.ge.f32.partialorder %v328_v11, 0.0  ;;  %v456_v24 = vmul.f32 0.2, %v328_v11 }
  0x25   : > { %837 = vst.msk [vmem:[%s1178_s26 + $0x20] sm:$0xf] %vm828_vm0, %v1034_v9  ;;  %v1037_v23 = vpack.c.bf16 %v519_v17, %v519_v17  ;;  %838 = vst.msk [vmem:[%s1178_s26 + $0x24] sm:$0xf] %vm828_vm0, %v1035_v15  ;;  %v329_v25 = vadd.f32 %v1150_v1, %v258_v12  ;;  %v330_v26 = vadd.f32 %v1150_v1, %v259_v18 }
  0x26   : > { %v260_v27 = vmul.f32 %v1140_v0, %v189_v13  ;;  %v261_v28 = vmul.f32 %v1140_v0, %v190_v14  ;;  %839 = vst.msk [vmem:[%s1178_s26 + $0x28] sm:$0xf] %vm828_vm0, %v1036_v22  ;;  %v520_v29 = vsel %vm392_vm13, %v328_v11, %v456_v24  ;;  %v262_v30 = vmul.f32 %v1140_v0, %v191_v19 }
  0x27   : > { %840 = vst.msk [vmem:[%s1178_s26 + $0x2c] sm:$0xf] %vm828_vm0, %v1037_v23  ;;  %v263_v31 = vmul.f32 %v1140_v0, %v192_v20  ;;  %v264_v32 = vmul.f32 %v1140_v0, %v193_v21  ;;  %v1038_v34 = vpack.c.bf16 %v520_v29, %v520_v29  ;;  %vm393_vm14 = vcmp.ge.f32.partialorder %v329_v25, 0.0 }
  0x28   : > { %v457_v35 = vmul.f32 0.2, %v329_v25  ;;  %vm394_vm15 = vcmp.ge.f32.partialorder %v330_v26, 0.0  ;;  %v458_v36 = vmul.f32 0.2, %v330_v26  ;;  %v331_v37 = vadd.f32 %v1150_v1, %v260_v27 }
  0x29   : > { %v332_v38 = vadd.f32 %v1150_v1, %v261_v28  ;;  %v333_v39 = vadd.f32 %v1150_v1, %v262_v30  ;;  %841 = vst.msk [vmem:[%s1178_s26 + $0x30] sm:$0xf] %vm828_vm0, %v1038_v34  ;;  %v334_v41 = vadd.f32 %v1150_v1, %v263_v31  ;;  %v335_v42 = vadd.f32 %v1150_v1, %v264_v32  ;;  %v202_v31 = vld [vmem:[%s1145_s20 + $0xe0] sm:$0xff] }
  0x2a   : > { %v521_v40 = vsel %vm393_vm14, %v329_v25, %v457_v35  ;;  %v265_v43 = vmul.f32 %v1140_v0, %v194_v33  ;;  %v522_v45 = vsel %vm394_vm15, %v330_v26, %v458_v36  ;;  %vm395_vm1 = vcmp.ge.f32.partialorder %v331_v37, 0.0  ;;  %v203_v35 = vld [vmem:[%s1145_s20 + $0xe8] sm:$0xff]  ;;  %v204_v36 = vld [vmem:[%s1145_s20 + $0xf0] sm:$0xff] }
  0x2b   : > { %v1039_v44 = vpack.c.bf16 %v521_v40, %v521_v40  ;;  %v459_v46 = vmul.f32 0.2, %v331_v37  ;;  %v1040_v47 = vpack.c.bf16 %v522_v45, %v522_v45  ;;  %vm396_vm2 = vcmp.ge.f32.partialorder %v332_v38, 0.0  ;;  %v206_v45 = vld [vmem:[%s1145_s20 + $0x100] sm:$0xff] }
  0x2c   : > { %v460_v48 = vmul.f32 0.2, %v332_v38  ;;  %vm397_vm3 = vcmp.ge.f32.partialorder %v333_v39, 0.0  ;;  %v461_v50 = vmul.f32 0.2, %v333_v39  ;;  %vm398_vm4 = vcmp.ge.f32.partialorder %v334_v41, 0.0 }
  0x2d   : > { %842 = vst.msk [vmem:[%s1178_s26 + $0x34] sm:$0xf] %vm828_vm0, %v1039_v44  ;;  %v523_v49 = vsel %vm395_vm1, %v331_v37, %v459_v46  ;;  %v462_v51 = vmul.f32 0.2, %v334_v41  ;;  %843 = vst.msk [vmem:[%s1178_s26 + $0x38] sm:$0xf] %vm828_vm0, %v1040_v47  ;;  %v336_v60 = vadd.f32 %v1150_v1, %v265_v43  ;;  %v266_v5 = vmul.f32 %v1140_v0, %v195_v52 }
  0x2e   : > { %v1041_v53 = vpack.c.bf16 %v523_v49, %v523_v49  ;;  %v524_v54 = vsel %vm396_vm2, %v332_v38, %v460_v48  ;;  %vm399_vm5 = vcmp.ge.f32.partialorder %v335_v42, 0.0  ;;  %v463_v55 = vmul.f32 0.2, %v335_v42  ;;  %v205_v44 = vld [vmem:[%s1145_s20 + $0xf8] sm:$0xff] }
  0x2f   : > { %v1042_v57 = vpack.c.bf16 %v524_v54, %v524_v54  ;;  %v525_v58 = vsel %vm397_vm3, %v333_v39, %v461_v50  ;;  %v526_v59 = vsel %vm398_vm4, %v334_v41, %v462_v51  ;;  %vm400_vm6 = vcmp.ge.f32.partialorder %v336_v60, 0.0  ;;  %v207_v50 = vld [vmem:[%s1145_s20 + $0x108] sm:$0xff] }
  0x30   : > { %844 = vst.msk [vmem:[%s1178_s26 + $0x3c] sm:$0xf] %vm828_vm0, %v1041_v53  ;;  %v1043_v2 = vpack.c.bf16 %v525_v58, %v525_v58  ;;  %v1044_v3 = vpack.c.bf16 %v526_v59, %v526_v59  ;;  %v527_v4 = vsel %vm399_vm5, %v335_v42, %v463_v55  ;;  %v464_v9 = vmul.f32 0.2, %v336_v60 }
  0x31   : > { %845 = vst.msk [vmem:[%s1178_s26 + $0x40] sm:$0xf] %vm828_vm0, %v1042_v57  ;;  %v1045_v8 = vpack.c.bf16 %v527_v4, %v527_v4  ;;  %v267_v10 = vmul.f32 %v1140_v0, %v196_v56  ;;  %v337_v11 = vadd.f32 %v1150_v1, %v266_v5  ;;  %v268_v12 = vmul.f32 %v1140_v0, %v197_v61  ;;  %v208_v61 = vld [vmem:[%s1145_s20 + $0x110] sm:$0xff] }
  0x32   : > { %846 = vst.msk [vmem:[%s1178_s26 + $0x44] sm:$0xf] %vm828_vm0, %v1043_v2  ;;  %847 = vst.msk [vmem:[%s1178_s26 + $0x48] sm:$0xf] %vm828_vm0, %v1044_v3  ;;  %v269_v13 = vmul.f32 %v1140_v0, %v198_v62  ;;  %v270_v14 = vmul.f32 %v1140_v0, %v199_v63  ;;  %v528_v15 = vsel %vm400_vm6, %v336_v60, %v464_v9 }
  0x33   : > { %848 = vst.msk [vmem:[%s1178_s26 + $0x4c] sm:$0xf] %vm828_vm0, %v1045_v8  ;;  %v338_v16 = vadd.f32 %v1150_v1, %v267_v10  ;;  %v271_v17 = vmul.f32 %v1140_v0, %v200_v6  ;;  %v272_v18 = vmul.f32 %v1140_v0, %v201_v7  ;;  %v1046_v19 = vpack.c.bf16 %v528_v15, %v528_v15  ;;  %v209_v10 = vld [vmem:[%s1145_s20 + $0x118] sm:$0xff]  ;;  %v211_v15 = vld [vmem:[%s1145_s20 + $0x128] sm:$0xff] }
  0x34   : > { %vm401_vm7 = vcmp.ge.f32.partialorder %v337_v11, 0.0  ;;  %v465_v20 = vmul.f32 0.2, %v337_v11  ;;  %v339_v21 = vadd.f32 %v1150_v1, %v268_v12  ;;  %v340_v23 = vadd.f32 %v1150_v1, %v269_v13 }
  0x35   : > { %vm402_vm8 = vcmp.ge.f32.partialorder %v338_v16, 0.0  ;;  %v466_v22 = vmul.f32 0.2, %v338_v16  ;;  %v341_v24 = vadd.f32 %v1150_v1, %v270_v14  ;;  %849 = vst.msk [vmem:[%s1178_s26 + $0x50] sm:$0xf] %vm828_vm0, %v1046_v19  ;;  %v342_v27 = vadd.f32 %v1150_v1, %v271_v17  ;;  %v210_v14 = vld [vmem:[%s1145_s20 + $0x120] sm:$0xff] }
  0x36   : > { %v529_v25 = vsel %vm401_vm7, %v337_v11, %v465_v20  ;;  %vm403_vm9 = vcmp.ge.f32.partialorder %v339_v21, 0.0  ;;  %v467_v26 = vmul.f32 0.2, %v339_v21  ;;  %vm404_vm10 = vcmp.ge.f32.partialorder %v340_v23, 0.0 }
  0x37   : > { %v1047_v28 = vpack.c.bf16 %v529_v25, %v529_v25  ;;  %v530_v29 = vsel %vm402_vm8, %v338_v16, %v466_v22  ;;  %v468_v30 = vmul.f32 0.2, %v340_v23  ;;  %vm405_vm11 = vcmp.ge.f32.partialorder %v341_v24, 0.0 }
  0x38   : > { %v1048_v32 = vpack.c.bf16 %v530_v29, %v530_v29  ;;  %v531_v33 = vsel %vm403_vm9, %v339_v21, %v467_v26  ;;  %v469_v34 = vmul.f32 0.2, %v341_v24  ;;  %vm406_vm12 = vcmp.ge.f32.partialorder %v342_v27, 0.0  ;;  %v212_v26 = vld [vmem:[%s1145_s20 + $0x130] sm:$0xff] }
  0x39   : > { %850 = vst.msk [vmem:[%s1178_s26 + $0x54] sm:$0xf] %vm828_vm0, %v1047_v28  ;;  %v1049_v37 = vpack.c.bf16 %v531_v33, %v531_v33  ;;  %v532_v38 = vsel %vm404_vm10, %v340_v23, %v468_v30  ;;  %v470_v39 = vmul.f32 0.2, %v342_v27  ;;  %v343_v42 = vadd.f32 %v1150_v1, %v272_v18  ;;  %v214_v28 = vld [vmem:[%s1145_s20 + $0x140] sm:$0xff] }
  0x3a   : > { %851 = vst.msk [vmem:[%s1178_s26 + $0x58] sm:$0xf] %vm828_vm0, %v1048_v32  ;;  %v1050_v40 = vpack.c.bf16 %v532_v38, %v532_v38  ;;  %v533_v41 = vsel %vm405_vm11, %v341_v24, %v469_v34  ;;  %v273_v43 = vmul.f32 %v1140_v0, %v202_v31  ;;  %v274_v48 = vmul.f32 %v1140_v0, %v203_v35 }
  0x3b   : > { %852 = vst.msk [vmem:[%s1178_s26 + $0x5c] sm:$0xf] %vm828_vm0, %v1049_v37  ;;  %v1051_v46 = vpack.c.bf16 %v533_v41, %v533_v41  ;;  %v534_v47 = vsel %vm406_vm12, %v342_v27, %v470_v39  ;;  %v275_v49 = vmul.f32 %v1140_v0, %v204_v36  ;;  %vm407_vm13 = vcmp.ge.f32.partialorder %v343_v42, 0.0  ;;  %v213_v27 = vld [vmem:[%s1145_s20 + $0x138] sm:$0xff] }
  0x3c   : > { %853 = vst.msk [vmem:[%s1178_s26 + $0x60] sm:$0xf] %vm828_vm0, %v1050_v40  ;;  %v1052_v51 = vpack.c.bf16 %v534_v47, %v534_v47  ;;  %v471_v52 = vmul.f32 0.2, %v343_v42  ;;  %v344_v53 = vadd.f32 %v1150_v1, %v273_v43  ;;  %v345_v54 = vadd.f32 %v1150_v1, %v274_v48  ;;  %v215_v40 = vld [vmem:[%s1145_s20 + $0x148] sm:$0xff] }
  0x3d   : > { %854 = vst.msk [vmem:[%s1178_s26 + $0x64] sm:$0xf] %vm828_vm0, %v1051_v46  ;;  %v346_v55 = vadd.f32 %v1150_v1, %v275_v49  ;;  %v276_v56 = vmul.f32 %v1140_v0, %v205_v44  ;;  %v277_v57 = vmul.f32 %v1140_v0, %v206_v45  ;;  %v278_v60 = vmul.f32 %v1140_v0, %v207_v50 }
  0x3e   : > { %855 = vst.msk [vmem:[%s1178_s26 + $0x68] sm:$0xf] %vm828_vm0, %v1052_v51  ;;  %v535_v58 = vsel %vm407_vm13, %v343_v42, %v471_v52  ;;  %vm408_vm14 = vcmp.ge.f32.partialorder %v344_v53, 0.0  ;;  %v472_v59 = vmul.f32 0.2, %v344_v53  ;;  %vm409_vm15 = vcmp.ge.f32.partialorder %v345_v54, 0.0 }
  0x3f   : > { %v1053_v62 = vpack.c.bf16 %v535_v58, %v535_v58  ;;  %v473_v63 = vmul.f32 0.2, %v345_v54  ;;  %vm410_vm1 = vcmp.ge.f32.partialorder %v346_v55, 0.0  ;;  %v474_v3 = vmul.f32 0.2, %v346_v55 }
  0x40   : > { %v536_v2 = vsel %vm408_vm14, %v344_v53, %v472_v59  ;;  %v347_v4 = vadd.f32 %v1150_v1, %v276_v56  ;;  %v348_v5 = vadd.f32 %v1150_v1, %v277_v57  ;;  %v349_v8 = vadd.f32 %v1150_v1, %v278_v60  ;;  %v216_v53 = vld [vmem:[%s1145_s20 + $0x150] sm:$0xff] }
  0x41   : > { %856 = vst.msk [vmem:[%s1178_s26 + $0x6c] sm:$0xf] %vm828_vm0, %v1053_v62  ;;  %v1054_v6 = vpack.c.bf16 %v536_v2, %v536_v2  ;;  %v537_v7 = vsel %vm409_vm15, %v345_v54, %v473_v63  ;;  %v279_v9 = vmul.f32 %v1140_v0, %v208_v61  ;;  %v538_v12 = vsel %vm410_vm1, %v346_v55, %v474_v3  ;;  %v217_v54 = vld [vmem:[%s1145_s20 + $0x158] sm:$0xff]  ;;  %v218_v55 = vld [vmem:[%s1145_s20 + $0x160] sm:$0xff] }
  0x42   : > { %v1055_v11 = vpack.c.bf16 %v537_v7, %v537_v7  ;;  %vm411_vm2 = vcmp.ge.f32.partialorder %v347_v4, 0.0  ;;  %v475_v13 = vmul.f32 0.2, %v347_v4  ;;  %v1056_v16 = vpack.c.bf16 %v538_v12, %v538_v12 }
  0x43   : > { %857 = vst.msk [vmem:[%s1178_s26 + $0x70] sm:$0xf] %vm828_vm0, %v1054_v6  ;;  %vm412_vm3 = vcmp.ge.f32.partialorder %v348_v5, 0.0  ;;  %v476_v17 = vmul.f32 0.2, %v348_v5  ;;  %vm413_vm4 = vcmp.ge.f32.partialorder %v349_v8, 0.0  ;;  %v350_v20 = vadd.f32 %v1150_v1, %v279_v9 }
  0x44   : > { %858 = vst.msk [vmem:[%s1178_s26 + $0x74] sm:$0xf] %vm828_vm0, %v1055_v11  ;;  %v539_v18 = vsel %vm411_vm2, %v347_v4, %v475_v13  ;;  %v477_v19 = vmul.f32 0.2, %v349_v8  ;;  %v280_v21 = vmul.f32 %v1140_v0, %v209_v10  ;;  %859 = vst.msk [vmem:[%s1178_s26 + $0x78] sm:$0xf] %vm828_vm0, %v1056_v16  ;;  %v281_v24 = vmul.f32 %v1140_v0, %v210_v14 }
  0x45   : > { %v1057_v22 = vpack.c.bf16 %v539_v18, %v539_v18  ;;  %v540_v23 = vsel %vm412_vm3, %v348_v5, %v476_v17  ;;  %v282_v25 = vmul.f32 %v1140_v0, %v211_v15  ;;  %vm414_vm5 = vcmp.ge.f32.partialorder %v350_v20, 0.0  ;;  %v219_v4 = vld [vmem:[%s1145_s20 + $0x168] sm:$0xff]  ;;  %v220_v5 = vld [vmem:[%s1145_s20 + $0x170] sm:$0xff]  ;;  %v221_v9 = vld [vmem:[%s1145_s20 + $0x178] sm:$0xff] }
  0x46   : > { %v1058_v29 = vpack.c.bf16 %v540_v23, %v540_v23  ;;  %v541_v30 = vsel %vm413_vm4, %v349_v8, %v477_v19  ;;  %v478_v31 = vmul.f32 0.2, %v350_v20  ;;  %v351_v33 = vadd.f32 %v1150_v1, %v280_v21  ;;  %v222_v21 = vld [vmem:[%s1145_s20 + $0x180] sm:$0xff] }
  0x47   : > { %860 = vst.msk [vmem:[%s1178_s26 + $0x7c] sm:$0xf] %vm828_vm0, %v1057_v22  ;;  %v1059_v32 = vpack.c.bf16 %v541_v30, %v541_v30  ;;  %v352_v34 = vadd.f32 %v1150_v1, %v281_v24  ;;  %v353_v35 = vadd.f32 %v1150_v1, %v282_v25  ;;  %v283_v37 = vmul.f32 %v1140_v0, %v212_v26 }
  0x48   : > { %861 = vst.msk [vmem:[%s1178_s26 + $0x80] sm:$0xf] %vm828_vm0, %v1058_v29  ;;  %v542_v36 = vsel %vm414_vm5, %v350_v20, %v478_v31  ;;  %v284_v38 = vmul.f32 %v1140_v0, %v213_v27  ;;  %v285_v39 = vmul.f32 %v1140_v0, %v214_v28  ;;  %vm415_vm6 = vcmp.ge.f32.partialorder %v351_v33, 0.0 }
  0x49   : > { %862 = vst.msk [vmem:[%s1178_s26 + $0x84] sm:$0xf] %vm828_vm0, %v1059_v32  ;;  %v1060_v41 = vpack.c.bf16 %v542_v36, %v542_v36  ;;  %v479_v42 = vmul.f32 0.2, %v351_v33  ;;  %vm416_vm7 = vcmp.ge.f32.partialorder %v352_v34, 0.0  ;;  %vm417_vm8 = vcmp.ge.f32.partialorder %v353_v35, 0.0 }
  0x4a   : > { %v480_v43 = vmul.f32 0.2, %v352_v34  ;;  %v481_v44 = vmul.f32 0.2, %v353_v35  ;;  %v354_v45 = vadd.f32 %v1150_v1, %v283_v37  ;;  %v355_v47 = vadd.f32 %v1150_v1, %v284_v38  ;;  %v223_v32 = vld [vmem:[%s1145_s20 + $0x188] sm:$0xff]  ;;  %v224_v36 = vld [vmem:[%s1145_s20 + $0x190] sm:$0xff] }
  0x4b   : > { %863 = vst.msk [vmem:[%s1178_s26 + $0x88] sm:$0xf] %vm828_vm0, %v1060_v41  ;;  %v543_v46 = vsel %vm415_vm6, %v351_v33, %v479_v42  ;;  %v356_v48 = vadd.f32 %v1150_v1, %v285_v39  ;;  %v286_v49 = vmul.f32 %v1140_v0, %v215_v40  ;;  %v287_v63 = vmul.f32 %v1140_v0, %v216_v53  ;;  %v225_v37 = vld [vmem:[%s1145_s20 + $0x198] sm:$0xff] }
  0x4c   : > { %v1061_v50 = vpack.c.bf16 %v543_v46, %v543_v46  ;;  %v544_v51 = vsel %vm416_vm7, %v352_v34, %v480_v43  ;;  %v545_v52 = vsel %vm417_vm8, %v353_v35, %v481_v44  ;;  %vm418_vm9 = vcmp.ge.f32.partialorder %v354_v45, 0.0 }
  0x4d   : > { %v1062_v56 = vpack.c.bf16 %v544_v51, %v544_v51  ;;  %v1063_v57 = vpack.c.bf16 %v545_v52, %v545_v52  ;;  %v482_v58 = vmul.f32 0.2, %v354_v45  ;;  %vm419_vm10 = vcmp.ge.f32.partialorder %v355_v47, 0.0 }
  0x4e   : > { %864 = vst.msk [vmem:[%s1178_s26 + $0x8c] sm:$0xf] %vm828_vm0, %v1061_v50  ;;  %v483_v59 = vmul.f32 0.2, %v355_v47  ;;  %vm420_vm11 = vcmp.ge.f32.partialorder %v356_v48, 0.0  ;;  %v357_v61 = vadd.f32 %v1150_v1, %v286_v49  ;;  %v288_v2 = vmul.f32 %v1140_v0, %v217_v54  ;;  %v227_v49 = vld [vmem:[%s1145_s20 + $0x1a8] sm:$0xff] }
  0x4f   : > { %v484_v60 = vmul.f32 0.2, %v356_v48  ;;  %865 = vst.msk [vmem:[%s1178_s26 + $0x90] sm:$0xf] %vm828_vm0, %v1062_v56  ;;  %866 = vst.msk [vmem:[%s1178_s26 + $0x94] sm:$0xf] %vm828_vm0, %v1063_v57  ;;  %v546_v62 = vsel %vm418_vm9, %v354_v45, %v482_v58  ;;  %v289_v3 = vmul.f32 %v1140_v0, %v218_v55  ;;  %v358_v13 = vadd.f32 %v1150_v1, %v287_v63 }
  0x50   : > { %v1064_v6 = vpack.c.bf16 %v546_v62, %v546_v62  ;;  %v547_v7 = vsel %vm419_vm10, %v355_v47, %v483_v59  ;;  %vm421_vm12 = vcmp.ge.f32.partialorder %v357_v61, 0.0  ;;  %v485_v12 = vmul.f32 0.2, %v357_v61  ;;  %v228_v50 = vld [vmem:[%s1145_s20 + $0x1b0] sm:$0xff]  ;;  %v229_v62 = vld [vmem:[%s1145_s20 + $0x1b8] sm:$0xff] }
  0x51   : > { %v548_v8 = vsel %vm420_vm11, %v356_v48, %v484_v60  ;;  %v1065_v10 = vpack.c.bf16 %v547_v7, %v547_v7  ;;  %v359_v14 = vadd.f32 %v1150_v1, %v288_v2  ;;  %v360_v15 = vadd.f32 %v1150_v1, %v289_v3  ;;  %v226_v48 = vld [vmem:[%s1145_s20 + $0x1a0] sm:$0xff] }
  0x52   : > { %v1066_v11 = vpack.c.bf16 %v548_v8, %v548_v8  ;;  %867 = vst.msk [vmem:[%s1178_s26 + $0x98] sm:$0xf] %vm828_vm0, %v1064_v6  ;;  %v290_v16 = vmul.f32 %v1140_v0, %v219_v4  ;;  %v291_v17 = vmul.f32 %v1140_v0, %v220_v5  ;;  %v549_v18 = vsel %vm421_vm12, %v357_v61, %v485_v12 }
  0x53   : > { %868 = vst.msk [vmem:[%s1178_s26 + $0x9c] sm:$0xf] %vm828_vm0, %v1065_v10  ;;  %vm422_vm13 = vcmp.ge.f32.partialorder %v358_v13, 0.0  ;;  %v486_v19 = vmul.f32 0.2, %v358_v13  ;;  %v292_v20 = vmul.f32 %v1140_v0, %v221_v9  ;;  %v1067_v22 = vpack.c.bf16 %v549_v18, %v549_v18 }
  0x54   : > { %869 = vst.msk [vmem:[%s1178_s26 + $0xa0] sm:$0xf] %vm828_vm0, %v1066_v11  ;;  %vm423_vm14 = vcmp.ge.f32.partialorder %v359_v14, 0.0  ;;  %v487_v23 = vmul.f32 0.2, %v359_v14  ;;  %vm424_vm15 = vcmp.ge.f32.partialorder %v360_v15, 0.0  ;;  %v361_v26 = vadd.f32 %v1150_v1, %v290_v16 }
  0x55   : > { %v550_v24 = vsel %vm422_vm13, %v358_v13, %v486_v19  ;;  %v488_v25 = vmul.f32 0.2, %v360_v15  ;;  %v362_v27 = vadd.f32 %v1150_v1, %v291_v17  ;;  %870 = vst.msk [vmem:[%s1178_s26 + $0xa4] sm:$0xf] %vm828_vm0, %v1067_v22  ;;  %v363_v30 = vadd.f32 %v1150_v1, %v292_v20  ;;  %v230_v13 = vld [vmem:[%s1145_s20 + $0x1c0] sm:$0xff] }
  0x56   : > { %v1068_v28 = vpack.c.bf16 %v550_v24, %v550_v24  ;;  %v551_v29 = vsel %vm423_vm14, %v359_v14, %v487_v23  ;;  %v293_v31 = vmul.f32 %v1140_v0, %v222_v21  ;;  %vm425_vm1 = vcmp.ge.f32.partialorder %v361_v26, 0.0  ;;  %v231_v14 = vld [vmem:[%s1145_s20 + $0x1c8] sm:$0xff] }
  0x57   : > { %v1069_v33 = vpack.c.bf16 %v551_v29, %v551_v29  ;;  %v552_v34 = vsel %vm424_vm15, %v360_v15, %v488_v25  ;;  %v489_v35 = vmul.f32 0.2, %v361_v26  ;;  %vm426_vm2 = vcmp.ge.f32.partialorder %v362_v27, 0.0  ;;  %v232_v15 = vld [vmem:[%s1145_s20 + $0x1d0] sm:$0xff] }
  0x58   : > { %871 = vst.msk [vmem:[%s1178_s26 + $0xa8] sm:$0xf] %vm828_vm0, %v1068_v28  ;;  %v1070_v38 = vpack.c.bf16 %v552_v34, %v552_v34  ;;  %v490_v39 = vmul.f32 0.2, %v362_v27  ;;  %vm427_vm3 = vcmp.ge.f32.partialorder %v363_v30, 0.0  ;;  %v364_v42 = vadd.f32 %v1150_v1, %v293_v31  ;;  %v235_v31 = vld [vmem:[%s1145_s20 + $0x1e8] sm:$0xff] }
  0x59   : > { %872 = vst.msk [vmem:[%s1178_s26 + $0xac] sm:$0xf] %vm828_vm0, %v1069_v33  ;;  %v553_v40 = vsel %vm425_vm1, %v361_v26, %v489_v35  ;;  %v491_v41 = vmul.f32 0.2, %v363_v30  ;;  %v294_v43 = vmul.f32 %v1140_v0, %v223_v32  ;;  %v295_v46 = vmul.f32 %v1140_v0, %v224_v36  ;;  %v233_v26 = vld [vmem:[%s1145_s20 + $0x1d8] sm:$0xff] }
  0x5a   : > { %873 = vst.msk [vmem:[%s1178_s26 + $0xb0] sm:$0xf] %vm828_vm0, %v1070_v38  ;;  %v1071_v44 = vpack.c.bf16 %v553_v40, %v553_v40  ;;  %v554_v45 = vsel %vm426_vm2, %v362_v27, %v490_v39  ;;  %v296_v47 = vmul.f32 %v1140_v0, %v225_v37  ;;  %vm428_vm4 = vcmp.ge.f32.partialorder %v364_v42, 0.0  ;;  %v234_v27 = vld [vmem:[%s1145_s20 + $0x1e0] sm:$0xff] }
  0x5b   : > { %v1072_v51 = vpack.c.bf16 %v554_v45, %v554_v45  ;;  %v555_v52 = vsel %vm427_vm3, %v363_v30, %v491_v41  ;;  %v492_v53 = vmul.f32 0.2, %v364_v42  ;;  %v365_v55 = vadd.f32 %v1150_v1, %v294_v43  ;;  %v236_v43 = vld [vmem:[%s1145_s20 + $0x1f0] sm:$0xff] }
  0x5c   : > { %874 = vst.msk [vmem:[%s1178_s26 + $0xb4] sm:$0xf] %vm828_vm0, %v1071_v44  ;;  %v1073_v54 = vpack.c.bf16 %v555_v52, %v555_v52  ;;  %v366_v56 = vadd.f32 %v1150_v1, %v295_v46  ;;  %v367_v57 = vadd.f32 %v1150_v1, %v296_v47  ;;  %v297_v59 = vmul.f32 %v1140_v0, %v226_v48 }
  0x5d   : > { %875 = vst.msk [vmem:[%s1178_s26 + $0xb8] sm:$0xf] %vm828_vm0, %v1072_v51  ;;  %v556_v58 = vsel %vm428_vm4, %v364_v42, %v492_v53  ;;  %v298_v60 = vmul.f32 %v1140_v0, %v227_v49  ;;  %v299_v61 = vmul.f32 %v1140_v0, %v228_v50  ;;  %vm429_vm5 = vcmp.ge.f32.partialorder %v365_v55, 0.0 }
  0x5e   : > { %876 = vst.msk [vmem:[%s1178_s26 + $0xbc] sm:$0xf] %vm828_vm0, %v1073_v54  ;;  %v1074_v63 = vpack.c.bf16 %v556_v58, %v556_v58  ;;  %v493_v2 = vmul.f32 0.2, %v365_v55  ;;  %vm430_vm6 = vcmp.ge.f32.partialorder %v366_v56, 0.0  ;;  %vm431_vm7 = vcmp.ge.f32.partialorder %v367_v57, 0.0 }
  0x5f   : > { %v494_v3 = vmul.f32 0.2, %v366_v56  ;;  %v495_v4 = vmul.f32 0.2, %v367_v57  ;;  %v368_v5 = vadd.f32 %v1150_v1, %v297_v59  ;;  %v369_v7 = vadd.f32 %v1150_v1, %v298_v60  ;;  %v237_v54 = vld [vmem:[%s1145_s20 + $0x1f8] sm:$0xff] }
  0x60   : > { %877 = vst.msk [vmem:[%s1178_s26 + $0xc0] sm:$0xf] %vm828_vm0, %v1074_v63  ;;  %v557_v6 = vsel %vm429_vm5, %v365_v55, %v493_v2  ;;  %v370_v8 = vadd.f32 %v1150_v1, %v299_v61  ;;  %v300_v9 = vmul.f32 %v1140_v0, %v229_v62  ;;  %v301_v23 = vmul.f32 %v1140_v0, %v230_v13 }
  0x61   : > { %v1075_v10 = vpack.c.bf16 %v557_v6, %v557_v6  ;;  %v558_v11 = vsel %vm430_vm6, %v366_v56, %v494_v3  ;;  %v559_v12 = vsel %vm431_vm7, %v367_v57, %v495_v4  ;;  %vm432_vm8 = vcmp.ge.f32.partialorder %v368_v5, 0.0 }
  0x62   : > { %v1076_v16 = vpack.c.bf16 %v558_v11, %v558_v11  ;;  %v1077_v17 = vpack.c.bf16 %v559_v12, %v559_v12  ;;  %v496_v18 = vmul.f32 0.2, %v368_v5  ;;  %vm433_vm9 = vcmp.ge.f32.partialorder %v369_v7, 0.0 }
  0x63   : > { %878 = vst.msk [vmem:[%s1178_s26 + $0xc4] sm:$0xf] %vm828_vm0, %v1075_v10  ;;  %v497_v19 = vmul.f32 0.2, %v369_v7  ;;  %vm434_vm10 = vcmp.ge.f32.partialorder %v370_v8, 0.0  ;;  %v371_v21 = vadd.f32 %v1150_v1, %v300_v9  ;;  %v302_v24 = vmul.f32 %v1140_v0, %v231_v14 }
  0x64   : > { %v498_v20 = vmul.f32 0.2, %v370_v8  ;;  %879 = vst.msk [vmem:[%s1178_s26 + $0xc8] sm:$0xf] %vm828_vm0, %v1076_v16  ;;  %880 = vst.msk [vmem:[%s1178_s26 + $0xcc] sm:$0xf] %vm828_vm0, %v1077_v17  ;;  %v560_v22 = vsel %vm432_vm8, %v368_v5, %v496_v18  ;;  %v303_v25 = vmul.f32 %v1140_v0, %v232_v15  ;;  %v372_v35 = vadd.f32 %v1150_v1, %v301_v23 }
  0x65   : > { %v1078_v28 = vpack.c.bf16 %v560_v22, %v560_v22  ;;  %v561_v29 = vsel %vm433_vm9, %v369_v7, %v497_v19  ;;  %vm435_vm11 = vcmp.ge.f32.partialorder %v371_v21, 0.0  ;;  %v499_v34 = vmul.f32 0.2, %v371_v21 }
  0x66   : > { %v562_v30 = vsel %vm434_vm10, %v370_v8, %v498_v20  ;;  %v1079_v32 = vpack.c.bf16 %v561_v29, %v561_v29  ;;  %v373_v36 = vadd.f32 %v1150_v1, %v302_v24  ;;  %v374_v37 = vadd.f32 %v1150_v1, %v303_v25 }
  0x67   : > { %v1080_v33 = vpack.c.bf16 %v562_v30, %v562_v30  ;;  %881 = vst.msk [vmem:[%s1178_s26 + $0xd0] sm:$0xf] %vm828_vm0, %v1078_v28  ;;  %v304_v38 = vmul.f32 %v1140_v0, %v233_v26  ;;  %v305_v39 = vmul.f32 %v1140_v0, %v234_v27  ;;  %v563_v40 = vsel %vm435_vm11, %v371_v21, %v499_v34 }
  0x68   : > { %882 = vst.msk [vmem:[%s1178_s26 + $0xd4] sm:$0xf] %vm828_vm0, %v1079_v32  ;;  %vm436_vm12 = vcmp.ge.f32.partialorder %v372_v35, 0.0  ;;  %v500_v41 = vmul.f32 0.2, %v372_v35  ;;  %v306_v42 = vmul.f32 %v1140_v0, %v235_v31  ;;  %v1081_v44 = vpack.c.bf16 %v563_v40, %v563_v40 }
  0x69   : > { %883 = vst.msk [vmem:[%s1178_s26 + $0xd8] sm:$0xf] %vm828_vm0, %v1080_v33  ;;  %vm437_vm13 = vcmp.ge.f32.partialorder %v373_v36, 0.0  ;;  %v501_v45 = vmul.f32 0.2, %v373_v36  ;;  %vm438_vm14 = vcmp.ge.f32.partialorder %v374_v37, 0.0  ;;  %v375_v48 = vadd.f32 %v1150_v1, %v304_v38 }
  0x6a   : > { %v564_v46 = vsel %vm436_vm12, %v372_v35, %v500_v41  ;;  %v502_v47 = vmul.f32 0.2, %v374_v37  ;;  %v376_v49 = vadd.f32 %v1150_v1, %v305_v39  ;;  %884 = vst.msk [vmem:[%s1178_s26 + $0xdc] sm:$0xf] %vm828_vm0, %v1081_v44  ;;  %v377_v52 = vadd.f32 %v1150_v1, %v306_v42 }
  0x6b   : > { %v1082_v50 = vpack.c.bf16 %v564_v46, %v564_v46  ;;  %v565_v51 = vsel %vm437_vm13, %v373_v36, %v501_v45  ;;  %v307_v53 = vmul.f32 %v1140_v0, %v236_v43  ;;  %vm439_vm15 = vcmp.ge.f32.partialorder %v375_v48, 0.0 }
  0x6c   : > { %v1083_v55 = vpack.c.bf16 %v565_v51, %v565_v51  ;;  %v566_v56 = vsel %vm438_vm14, %v374_v37, %v502_v47  ;;  %v503_v57 = vmul.f32 0.2, %v375_v48  ;;  %vm440_vm1 = vcmp.ge.f32.partialorder %v376_v49, 0.0 }
  0x6d   : > { %885 = vst.msk [vmem:[%s1178_s26 + $0xe0] sm:$0xf] %vm828_vm0, %v1082_v50  ;;  %v1084_v58 = vpack.c.bf16 %v566_v56, %v566_v56  ;;  %v504_v59 = vmul.f32 0.2, %v376_v49  ;;  %vm441_vm2 = vcmp.ge.f32.partialorder %v377_v52, 0.0  ;;  %v378_v62 = vadd.f32 %v1150_v1, %v307_v53 }
  0x6e   : > { %886 = vst.msk [vmem:[%s1178_s26 + $0xe4] sm:$0xf] %vm828_vm0, %v1083_v55  ;;  %v567_v60 = vsel %vm439_vm15, %v375_v48, %v503_v57  ;;  %v505_v61 = vmul.f32 0.2, %v377_v52  ;;  %v308_v63 = vmul.f32 %v1140_v0, %v237_v54 }
  0x6f   : > { %887 = vst.msk [vmem:[%s1178_s26 + $0xe8] sm:$0xf] %vm828_vm0, %v1084_v58  ;;  %v1085_v2 = vpack.c.bf16 %v567_v60, %v567_v60  ;;  %v568_v3 = vsel %vm440_vm1, %v376_v49, %v504_v59  ;;  %vm442_vm3 = vcmp.ge.f32.partialorder %v378_v62, 0.0  ;;  %v506_v6 = vmul.f32 0.2, %v378_v62 }
  0x70   : > { %v1086_v4 = vpack.c.bf16 %v568_v3, %v568_v3  ;;  %v569_v5 = vsel %vm441_vm2, %v377_v52, %v505_v61  ;;  %v379_v8 = vadd.f32 %v1150_v1, %v308_v63 }
  0x71   : > { %888 = vst.msk [vmem:[%s1178_s26 + $0xec] sm:$0xf] %vm828_vm0, %v1085_v2  ;;  %v1087_v7 = vpack.c.bf16 %v569_v5, %v569_v5  ;;  %v570_v9 = vsel %vm442_vm3, %v378_v62, %v506_v6 }
  0x72   : > { %889 = vst.msk [vmem:[%s1178_s26 + $0xf0] sm:$0xf] %vm828_vm0, %v1086_v4  ;;  %v1088_v0 = vpack.c.bf16 %v570_v9, %v570_v9  ;;  %vm443_vm4 = vcmp.ge.f32.partialorder %v379_v8, 0.0  ;;  %v507_v10 = vmul.f32 0.2, %v379_v8 }
  0x73   : > { %890 = vst.msk [vmem:[%s1178_s26 + $0xf4] sm:$0xf] %vm828_vm0, %v1087_v7 }
  0x74   : > { %891 = vst.msk [vmem:[%s1178_s26 + $0xf8] sm:$0xf] %vm828_vm0, %v1088_v0  ;;  %v571_v11 = vsel %vm443_vm4, %v379_v8, %v507_v10 }
  0x75   : > { %v1089_v12 = vpack.c.bf16 %v571_v11, %v571_v11 }
  0x77   : > { %892 = vst.msk [vmem:[%s1178_s26 + $0xfc] sm:$0xf] %vm828_vm0, %v1089_v12 }
  0x78 PF: > { %s13_s12 = sadd.s32 1, %s1104_s12  }
  0x79   : > { %p10_p4 = scmp.ge.s32.totalorder %s13_s12, 6  }
  0x7b   :  { %12 = sbr.rel (!%p10_p4) target bundleno = 1 (0x1), region = 62 }

// kernel: discriminator_forward.11
= control target key start
LH: loop header
LB: loop body
LE: loop exit
PB: predicated region body
PF: predicated region fallthrough
CT: control target
= control target key end

     0   :  { %v4148_v0 = vmov 0   ;;  %s5604_s1 = inlined_call_operand.vmem [shape: bf16[1024,128], index: 1, kind: input, shape index: {}]   ;;  %s5605_s0 = inlined_call_operand.vmem [shape: bf16[512,1024], index: 0, kind: input, shape index: {}]   ;;  %s5606_s2 = inlined_call_operand.vmem [shape: f32[512,128], index: 2, kind: output, shape index: {0}]   ;;  %s5607_s3 = inlined_call_operand.vmem [shape: f32[8,128], index: 3, kind: output, shape index: {1}]   ;;  %s5608_s4 = inlined_call_operand.vmem [shape: f32[8,128], index: 4, kind: output, shape index: {2}]  }
   0x1   :  { %2195 = vmatprep.subr.bf16.mxu0 %v4148_v0  ;;  %2484 = vmatprep.subr.bf16.mxu1 %v4148_v0  ;;  %v4084_v1 = vld [vmem:[%s5604_s1] sm:$0xff]   ;;  %v4086_v3 = vld [vmem:[%s5604_s1 + $0x8] sm:$0xff]   ;;  %v4088_v5 = vld [vmem:[%s5604_s1 + $0x10] sm:$0xff]  }
   0x2   :  { %v4085_v2 = vld [vmem:[%s5604_s1 + $0x80] sm:$0xff]   ;;  %2196 = vmatpush1.bf16.msra.mxu0 %v4084_v1  ;;  %v4087_v4 = vld [vmem:[%s5604_s1 + $0x88] sm:$0xff]   ;;  %v4089_v6 = vld [vmem:[%s5604_s1 + $0x90] sm:$0xff]  }
   0x3   :  { %2485 = vmatpush1.bf16.msra.mxu1 %v4085_v2  ;;  %2197 = vmatprep.subr.bf16.mxu0 %v4148_v0  ;;  %v4090_v7 = vld [vmem:[%s5604_s1 + $0x18] sm:$0xff]   ;;  %v4092_v9 = vld [vmem:[%s5604_s1 + $0x20] sm:$0xff]   ;;  %v4094_v11 = vld [vmem:[%s5604_s1 + $0x28] sm:$0xff]  }
   0x4   :  { %2486 = vmatprep.subr.bf16.mxu1 %v4148_v0  ;;  %v4091_v8 = vld [vmem:[%s5604_s1 + $0x98] sm:$0xff]   ;;  %v4093_v10 = vld [vmem:[%s5604_s1 + $0xa0] sm:$0xff]   ;;  %v4095_v12 = vld [vmem:[%s5604_s1 + $0xa8] sm:$0xff]  }
   0x5   :  { %v4096_v13 = vld [vmem:[%s5604_s1 + $0x30] sm:$0xff]   ;;  %v4098_v15 = vld [vmem:[%s5604_s1 + $0x38] sm:$0xff]   ;;  %v4100_v17 = vld [vmem:[%s5604_s1 + $0x40] sm:$0xff]  }
   0x6   :  { %2198 = vmatpush1.bf16.msra.mxu0 %v4086_v3  ;;  %v4097_v14 = vld [vmem:[%s5604_s1 + $0xb0] sm:$0xff]   ;;  %v4099_v16 = vld [vmem:[%s5604_s1 + $0xb8] sm:$0xff]   ;;  %v4101_v18 = vld [vmem:[%s5604_s1 + $0xc0] sm:$0xff]  }
   0x7   :  { %2487 = vmatpush1.bf16.msra.mxu1 %v4087_v4  ;;  %2199 = vmatprep.subr.bf16.mxu0 %v4148_v0  ;;  %v4249_v19 = vld [vmem:[%s5605_s0] sm:$0xff]  ;;  %v4259_v21 = vld [vmem:[%s5605_s0 + $0x8] sm:$0xff]  ;;  %v4104_v27 = vld [vmem:[%s5604_s1 + $0x50] sm:$0xff]  }
   0x8   :  { %2488 = vmatprep.subr.bf16.mxu1 %v4148_v0  ;;  %v4254_v20 = vld [vmem:[%s5605_s0 + $0x20] sm:$0xff]  ;;  %v4266_v23 = vld [vmem:[%s5605_s0 + $0x28] sm:$0xff]  ;;  %v4105_v28 = vld [vmem:[%s5604_s1 + $0xd0] sm:$0xff]  }
   0x9   :  { %v3763_v22 = vcombine.high %v4249_v19, %v4254_v20  ;;  %v4102_v24 = vld [vmem:[%s5604_s1 + $0x48] sm:$0xff]   ;;  %v3765_v25 = vcombine.high %v4259_v21, %v4266_v23  ;;  %v4106_v29 = vld [vmem:[%s5604_s1 + $0x58] sm:$0xff]   ;;  %v4108_v31 = vld [vmem:[%s5604_s1 + $0x60] sm:$0xff]   ;;  %v3762_v42 = vcombine.low %v4249_v19, %v4254_v20  ;;  %v3764_v44 = vcombine.low %v4259_v21, %v4266_v23 }
   0xa   :  { %2200 = vmatpush1.bf16.msra.mxu0 %v4088_v5  ;;  %v4103_v26 = vld [vmem:[%s5604_s1 + $0xc8] sm:$0xff]   ;;  %v4107_v30 = vld [vmem:[%s5604_s1 + $0xd8] sm:$0xff]   ;;  %v4109_v32 = vld [vmem:[%s5604_s1 + $0xe0] sm:$0xff]  }
   0xb   :  { %2489 = vmatpush1.bf16.msra.mxu1 %v4089_v6  ;;  %2201 = vmatprep.subr.bf16.mxu0 %v4148_v0  ;;  %v4110_v33 = vld [vmem:[%s5604_s1 + $0x68] sm:$0xff]   ;;  %v4112_v35 = vld [vmem:[%s5604_s1 + $0x70] sm:$0xff]   ;;  %v4114_v37 = vld [vmem:[%s5604_s1 + $0x78] sm:$0xff]  }
   0xc   :  { %2490 = vmatprep.subr.bf16.mxu1 %v4148_v0  ;;  %2227 = vmatprep.mubr.bf16.mxu0 %v3763_v22  ;;  %v4111_v34 = vld [vmem:[%s5604_s1 + $0xe8] sm:$0xff]   ;;  %v4113_v36 = vld [vmem:[%s5604_s1 + $0xf0] sm:$0xff]   ;;  %v4115_v38 = vld [vmem:[%s5604_s1 + $0xf8] sm:$0xff]  }
   0xd   :  { %2516 = vmatprep.mubr.bf16.mxu1 %v3765_v25  ;;  %v155_v39 = vld [vmem:[%s5605_s0 + $0x40] sm:$0xff]  ;;  %v156_v41 = vld [vmem:[%s5605_s0 + $0x48] sm:$0xff]  ;;  %v4120_v59 = vld [vmem:[%s5604_s1 + $0x110] sm:$0xff]  }
   0xe   :  { %2202 = vmatpush1.bf16.msra.mxu0 %v4090_v7  ;;  %v159_v40 = vld [vmem:[%s5605_s0 + $0x60] sm:$0xff]  ;;  %v160_v43 = vld [vmem:[%s5605_s0 + $0x68] sm:$0xff]  ;;  %v4121_v60 = vld [vmem:[%s5604_s1 + $0x190] sm:$0xff]  }
   0xf   :  { %2491 = vmatpush1.bf16.msra.mxu1 %v4091_v8  ;;  %2203 = vmatprep.subr.bf16.mxu0 %v4148_v0  ;;  %v4116_v45 = vld [vmem:[%s5604_s1 + $0x100] sm:$0xff]   ;;  %v3771_v47 = vcombine.high %v155_v39, %v159_v40  ;;  %v3773_v48 = vcombine.high %v156_v41, %v160_v43  ;;  %v4118_v51 = vld [vmem:[%s5604_s1 + $0x108] sm:$0xff]   ;;  %v3770_v55 = vcombine.low %v155_v39, %v159_v40  ;;  %v4122_v2 = vld [vmem:[%s5604_s1 + $0x118] sm:$0xff]  }
  0x10   :  { %2492 = vmatprep.subr.bf16.mxu1 %v4148_v0  ;;  %v4117_v46 = vld [vmem:[%s5604_s1 + $0x180] sm:$0xff]   ;;  %v4119_v52 = vld [vmem:[%s5604_s1 + $0x188] sm:$0xff]   ;;  %v3772_v56 = vcombine.low %v156_v41, %v160_v43  ;;  %v4123_v3 = vld [vmem:[%s5604_s1 + $0x198] sm:$0xff]  }
  0x11   :  { %v163_v49 = vld [vmem:[%s5605_s0 + $0x80] sm:$0xff]  ;;  %v164_v53 = vld [vmem:[%s5605_s0 + $0x88] sm:$0xff]  ;;  %v4128_v20 = vld [vmem:[%s5604_s1 + $0x130] sm:$0xff]  }
  0x12   :  { %2204 = vmatpush1.bf16.msra.mxu0 %v4092_v9  ;;  %v167_v50 = vld [vmem:[%s5605_s0 + $0xa0] sm:$0xff]  ;;  %v168_v54 = vld [vmem:[%s5605_s0 + $0xa8] sm:$0xff]  ;;  %v4129_v21 = vld [vmem:[%s5604_s1 + $0x1b0] sm:$0xff]  }
  0x13   :  { %2493 = vmatpush1.bf16.msra.mxu1 %v4093_v10  ;;  %2205 = vmatprep.subr.bf16.mxu0 %v4148_v0  ;;  %v3779_v57 = vcombine.high %v163_v49, %v167_v50  ;;  %v3781_v58 = vcombine.high %v164_v53, %v168_v54  ;;  %v171_v61 = vld [vmem:[%s5605_s0 + $0xc0] sm:$0xff]  ;;  %v172_v63 = vld [vmem:[%s5605_s0 + $0xc8] sm:$0xff]  ;;  %v3778_v4 = vcombine.low %v163_v49, %v167_v50 }
  0x14   :  { %2494 = vmatprep.subr.bf16.mxu1 %v4148_v0  ;;  %v175_v62 = vld [vmem:[%s5605_s0 + $0xe0] sm:$0xff]  ;;  %v176_v1 = vld [vmem:[%s5605_s0 + $0xe8] sm:$0xff]  ;;  %v3780_v6 = vcombine.low %v164_v53, %v168_v54  ;;  %v4138_v54 = vld [vmem:[%s5604_s1 + $0x158] sm:$0xff]  }
  0x15   :  { %v4124_v5 = vld [vmem:[%s5604_s1 + $0x120] sm:$0xff]   ;;  %v3787_v7 = vcombine.high %v171_v61, %v175_v62  ;;  %v3789_v9 = vcombine.high %v172_v63, %v176_v1  ;;  %v188_v25 = vld [vmem:[%s5605_s0 + $0x148] sm:$0xff] }
  0x16   :  { %2206 = vmatpush1.bf16.msra.mxu0 %v4094_v11  ;;  %v4125_v8 = vld [vmem:[%s5604_s1 + $0x1a0] sm:$0xff]   ;;  %v4135_v39 = vld [vmem:[%s5604_s1 + $0x1c8] sm:$0xff]  }
  0x17   :  { %2495 = vmatpush1.bf16.msra.mxu1 %v4095_v12  ;;  %2207 = vmatprep.subr.bf16.mxu0 %v4148_v0  ;;  %v179_v10 = vld [vmem:[%s5605_s0 + $0x100] sm:$0xff]  ;;  %v180_v12 = vld [vmem:[%s5605_s0 + $0x108] sm:$0xff] }
  0x18   :  { %2496 = vmatprep.subr.bf16.mxu1 %v4148_v0  ;;  %v183_v11 = vld [vmem:[%s5605_s0 + $0x120] sm:$0xff]  ;;  %v208_v49 = vld [vmem:[%s5605_s0 + $0x1e8] sm:$0xff] }
  0x19   :  { %v187_v22 = vld [vmem:[%s5605_s0 + $0x140] sm:$0xff] }
  0x1a   :  { %2208 = vmatpush1.bf16.msra.mxu0 %v4096_v13  ;;  %v184_v13 = vld [vmem:[%s5605_s0 + $0x128] sm:$0xff]  ;;  %v191_v23 = vld [vmem:[%s5605_s0 + $0x160] sm:$0xff] }
  0x1b   :  { %2497 = vmatpush1.bf16.msra.mxu1 %v4097_v14  ;;  %2209 = vmatprep.subr.bf16.mxu0 %v4148_v0  ;;  %v4126_v14 = vld [vmem:[%s5604_s1 + $0x128] sm:$0xff]   ;;  %v3797_v19 = vcombine.high %v180_v12, %v184_v13  ;;  %v3802_v40 = vcombine.low %v187_v22, %v191_v23 }
  0x1c   :  { %2498 = vmatprep.subr.bf16.mxu1 %v4148_v0 }
  0x1e   :  { %2210 = vmatpush1.bf16.msra.mxu0 %v4098_v15  ;;  %v4127_v15 = vld [vmem:[%s5604_s1 + $0x1a8] sm:$0xff]  }
  0x1f   :  { %2499 = vmatpush1.bf16.msra.mxu1 %v4099_v16  ;;  %2211 = vmatprep.subr.bf16.mxu0 %v4148_v0  ;;  %v3786_v16 = vcombine.low %v171_v61, %v175_v62 }
  0x20   :  { %2500 = vmatprep.subr.bf16.mxu1 %v4148_v0 }
  0x22   :  { %2212 = vmatpush1.bf16.msra.mxu0 %v4100_v17  ;;  %v3788_v17 = vcombine.low %v172_v63, %v176_v1  ;;  %v219_v1 = vld [vmem:[%s5605_s0 + $0x240] sm:$0xff] }
  0x23   :  { %2501 = vmatpush1.bf16.msra.mxu1 %v4101_v18  ;;  %2213 = vmatprep.subr.bf16.mxu0 %v4148_v0  ;;  %v3795_v18 = vcombine.high %v179_v10, %v183_v11 }
  0x24   :  { %2502 = vmatprep.subr.bf16.mxu1 %v4148_v0 }
  0x26   :  { %2214 = vmatpush1.bf16.msra.mxu0 %v4102_v24  ;;  %v4130_v24 = vld [vmem:[%s5604_s1 + $0x138] sm:$0xff]  }
  0x27   :  { %2503 = vmatpush1.bf16.msra.mxu1 %v4103_v26  ;;  %2215 = vmatprep.subr.bf16.mxu0 %v4148_v0  ;;  %v192_v26 = vld [vmem:[%s5605_s0 + $0x168] sm:$0xff] }
  0x28   :  { %2504 = vmatprep.subr.bf16.mxu1 %v4148_v0  ;;  %v3804_v41 = vcombine.low %v188_v25, %v192_v26 }
  0x2a   :  { %2216 = vmatpush1.bf16.msra.mxu0 %v4104_v27  ;;  %v4131_v27 = vld [vmem:[%s5604_s1 + $0x1b8] sm:$0xff]  }
  0x2b   :  { %2505 = vmatpush1.bf16.msra.mxu1 %v4105_v28  ;;  %2217 = vmatprep.subr.bf16.mxu0 %v4148_v0  ;;  %v3794_v28 = vcombine.low %v179_v10, %v183_v11  ;;  %v4141_v10 = vld [vmem:[%s5604_s1 + $0x1e0] sm:$0xff]  }
  0x2c   :  { %2506 = vmatprep.subr.bf16.mxu1 %v4148_v0  ;;  %v227_v11 = vld [vmem:[%s5605_s0 + $0x280] sm:$0xff] }
  0x2e   :  { %2218 = vmatpush1.bf16.msra.mxu0 %v4106_v29  ;;  %v3796_v29 = vcombine.low %v180_v12, %v184_v13  ;;  %v231_v12 = vld [vmem:[%s5605_s0 + $0x2a0] sm:$0xff]  ;;  %v228_v13 = vld [vmem:[%s5605_s0 + $0x288] sm:$0xff] }
  0x2f   :  { %2507 = vmatpush1.bf16.msra.mxu1 %v4107_v30  ;;  %2219 = vmatprep.subr.bf16.mxu0 %v4148_v0  ;;  %v3803_v30 = vcombine.high %v187_v22, %v191_v23  ;;  %v240_v22 = vld [vmem:[%s5605_s0 + $0x2e8] sm:$0xff]  ;;  %v3842_v23 = vcombine.low %v227_v11, %v231_v12 }
  0x30   :  { %2508 = vmatprep.subr.bf16.mxu1 %v4148_v0 }
  0x32   :  { %2220 = vmatpush1.bf16.msra.mxu0 %v4108_v31  ;;  %v3805_v31 = vcombine.high %v188_v25, %v192_v26 }
  0x33   :  { %2509 = vmatpush1.bf16.msra.mxu1 %v4109_v32  ;;  %2221 = vmatprep.subr.bf16.mxu0 %v4148_v0  ;;  %v4132_v32 = vld [vmem:[%s5604_s1 + $0x140] sm:$0xff]  }
  0x34   :  { %2510 = vmatprep.subr.bf16.mxu1 %v4148_v0 }
  0x36   :  { %2222 = vmatpush1.bf16.msra.mxu0 %v4110_v33  ;;  %v4133_v33 = vld [vmem:[%s5604_s1 + $0x1c0] sm:$0xff]  }
  0x37   :  { %2511 = vmatpush1.bf16.msra.mxu1 %v4111_v34  ;;  %2223 = vmatprep.subr.bf16.mxu0 %v4148_v0  ;;  %v195_v34 = vld [vmem:[%s5605_s0 + $0x180] sm:$0xff] }
  0x38   :  { %2512 = vmatprep.subr.bf16.mxu1 %v4148_v0 }
  0x3a   :  { %2224 = vmatpush1.bf16.msra.mxu0 %v4112_v35  ;;  %v199_v35 = vld [vmem:[%s5605_s0 + $0x1a0] sm:$0xff] }
  0x3b   :  { %2513 = vmatpush1.bf16.msra.mxu1 %v4113_v36  ;;  %2225 = vmatprep.subr.bf16.mxu0 %v4148_v0  ;;  %v4134_v36 = vld [vmem:[%s5604_s1 + $0x148] sm:$0xff]   ;;  %v3810_v50 = vcombine.low %v195_v34, %v199_v35 }
  0x3c   :  { %2514 = vmatprep.subr.bf16.mxu1 %v4148_v0 }
  0x3e   :  { %2226 = vmatpush1.bf16.msra.mxu0 %v4114_v37  ;;  %v196_v37 = vld [vmem:[%s5605_s0 + $0x188] sm:$0xff] }
  0x3f   :  { %2515 = vmatpush1.bf16.msra.mxu1 %v4115_v38  ;;  %2773 = vmatprep.subr.bf16.mxu0 %v4148_v0  ;;  %v200_v38 = vld [vmem:[%s5605_s0 + $0x1a8] sm:$0xff] }
  0x40   :  { %3062 = vmatprep.subr.bf16.mxu1 %v4148_v0  ;;  %v3813_v43 = vcombine.high %v196_v37, %v200_v38 }
  0x41   :  { %2228 = vmatmul.mubr.bf16.vlgmr.msra.gmra.mrb[0].mxu0 %v3762_v42  ;;  %v3811_v42 = vcombine.high %v195_v34, %v199_v35  ;;  %v4143_v35 = vld [vmem:[%s5604_s1 + $0x1e8] sm:$0xff]  }
  0x42   :  { %2517 = vmatmul.mubr.bf16.vlgmr.msra.gmra.mrb[0].mxu1 %v3764_v44  ;;  %2774 = vmatpush1.bf16.msra.mxu0 %v4116_v45  ;;  %v4136_v44 = vld [vmem:[%s5604_s1 + $0x150] sm:$0xff]  }
  0x43   :  { %3063 = vmatpush1.bf16.msra.mxu1 %v4117_v46  ;;  %2235 = vmatprep.mubr.bf16.mxu0 %v3771_v47  ;;  %v4137_v45 = vld [vmem:[%s5604_s1 + $0x1d0] sm:$0xff]   ;;  %v203_v46 = vld [vmem:[%s5605_s0 + $0x1c0] sm:$0xff] }
  0x44   :  { %2524 = vmatprep.mubr.bf16.mxu1 %v3773_v48  ;;  %2775 = vmatprep.subr.bf16.mxu0 %v4148_v0  ;;  %v207_v47 = vld [vmem:[%s5605_s0 + $0x1e0] sm:$0xff]  ;;  %v204_v48 = vld [vmem:[%s5605_s0 + $0x1c8] sm:$0xff] }
  0x45   :  { %3064 = vmatprep.subr.bf16.mxu1 %v4148_v0  ;;  %v3821_v53 = vcombine.high %v204_v48, %v208_v49  ;;  %v3820_v61 = vcombine.low %v204_v48, %v208_v49  ;;  %v260_v48 = vld [vmem:[%s5605_s0 + $0x388] sm:$0xff] }
  0x46   :  { %2776 = vmatpush1.bf16.msra.mxu0 %v4118_v51  ;;  %v3812_v51 = vcombine.low %v196_v37, %v200_v38  ;;  %v251_v37 = vld [vmem:[%s5605_s0 + $0x340] sm:$0xff]  ;;  %v264_v49 = vld [vmem:[%s5605_s0 + $0x3a8] sm:$0xff] }
  0x47   :  { %3065 = vmatpush1.bf16.msra.mxu1 %v4119_v52  ;;  %2777 = vmatprep.subr.bf16.mxu0 %v4148_v0  ;;  %v3819_v52 = vcombine.high %v203_v46, %v207_v47  ;;  %v255_v38 = vld [vmem:[%s5605_s0 + $0x360] sm:$0xff] }
  0x48   :  { %3066 = vmatprep.subr.bf16.mxu1 %v4148_v0 }
  0x49   :  { %2236 = vmatmul.mubr.bf16.gmra.mrb[4].mxu0 %v3770_v55  ;;  %v4139_v55 = vld [vmem:[%s5604_s1 + $0x1d8] sm:$0xff]  }
  0x4a   :  { %2525 = vmatmul.mubr.bf16.gmra.mrb[4].mxu1 %v3772_v56  ;;  %2243 = vmatprep.mubr.bf16.mxu0 %v3779_v57  ;;  %v211_v56 = vld [vmem:[%s5605_s0 + $0x200] sm:$0xff] }
  0x4b   :  { %2532 = vmatprep.mubr.bf16.mxu1 %v3781_v58  ;;  %2778 = vmatpush1.bf16.msra.mxu0 %v4120_v59  ;;  %v215_v57 = vld [vmem:[%s5605_s0 + $0x220] sm:$0xff]  ;;  %v212_v58 = vld [vmem:[%s5605_s0 + $0x208] sm:$0xff] }
  0x4c   :  { %3067 = vmatpush1.bf16.msra.mxu1 %v4121_v60  ;;  %2779 = vmatprep.subr.bf16.mxu0 %v4148_v0  ;;  %v216_v59 = vld [vmem:[%s5605_s0 + $0x228] sm:$0xff]  ;;  %v3818_v60 = vcombine.low %v203_v46, %v207_v47  ;;  %v3827_v62 = vcombine.high %v211_v56, %v215_v57  ;;  %v259_v46 = vld [vmem:[%s5605_s0 + $0x380] sm:$0xff] }
  0x4d   :  { %3068 = vmatprep.subr.bf16.mxu1 %v4148_v0  ;;  %v3829_v63 = vcombine.high %v212_v58, %v216_v59  ;;  %v263_v47 = vld [vmem:[%s5605_s0 + $0x3a0] sm:$0xff] }
  0x4f   :  { %2780 = vmatpush1.bf16.msra.mxu0 %v4122_v2  ;;  %v223_v2 = vld [vmem:[%s5605_s0 + $0x260] sm:$0xff] }
  0x50   :  { %3069 = vmatpush1.bf16.msra.mxu1 %v4123_v3  ;;  %2781 = vmatprep.subr.bf16.mxu0 %v4148_v0  ;;  %v220_v3 = vld [vmem:[%s5605_s0 + $0x248] sm:$0xff] }
  0x51   :  { %2244 = vmatmul.mubr.bf16.gmra.mrb[8].mxu0 %v3778_v4  ;;  %3070 = vmatprep.subr.bf16.mxu1 %v4148_v0  ;;  %v224_v4 = vld [vmem:[%s5605_s0 + $0x268] sm:$0xff] }
  0x52   :  { %2533 = vmatmul.mubr.bf16.gmra.mrb[8].mxu1 %v3780_v6  ;;  %2251 = vmatprep.mubr.bf16.mxu0 %v3787_v7  ;;  %v3828_v6 = vcombine.low %v212_v58, %v216_v59  ;;  %v3835_v7 = vcombine.high %v219_v1, %v223_v2  ;;  %v272_v58 = vld [vmem:[%s5605_s0 + $0x3e8] sm:$0xff]  ;;  %v3876_v59 = vcombine.low %v260_v48, %v264_v49 }
  0x53   :  { %2540 = vmatprep.mubr.bf16.mxu1 %v3789_v9  ;;  %2782 = vmatpush1.bf16.msra.mxu0 %v4124_v5  ;;  %v3826_v5 = vcombine.low %v211_v56, %v215_v57  ;;  %v4140_v9 = vld [vmem:[%s5604_s1 + $0x160] sm:$0xff]   ;;  %v268_v57 = vld [vmem:[%s5605_s0 + $0x3c8] sm:$0xff] }
  0x54   :  { %3071 = vmatpush1.bf16.msra.mxu1 %v4125_v8  ;;  %2783 = vmatprep.subr.bf16.mxu0 %v4148_v0  ;;  %v3837_v8 = vcombine.high %v220_v3, %v224_v4  ;;  %v271_v56 = vld [vmem:[%s5605_s0 + $0x3e0] sm:$0xff] }
  0x55   :  { %3072 = vmatprep.subr.bf16.mxu1 %v4148_v0 }
  0x57   :  { %2784 = vmatpush1.bf16.msra.mxu0 %v4126_v14  ;;  %v232_v14 = vld [vmem:[%s5605_s0 + $0x2a8] sm:$0xff] }
  0x58   :  { %3073 = vmatpush1.bf16.msra.mxu1 %v4127_v15  ;;  %2785 = vmatprep.subr.bf16.mxu0 %v4148_v0  ;;  %v3834_v15 = vcombine.low %v219_v1, %v223_v2  ;;  %v279_v1 = vld [vmem:[%s5605_s0 + $0x420] sm:$0xff]  ;;  %v276_v2 = vld [vmem:[%s5605_s0 + $0x408] sm:$0xff] }
  0x59   :  { %2252 = vmatmul.mubr.bf16.gmra.mrb[12].mxu0 %v3786_v16  ;;  %3074 = vmatprep.subr.bf16.mxu1 %v4148_v0  ;;  %v3836_v16 = vcombine.low %v220_v3, %v224_v4  ;;  %v280_v3 = vld [vmem:[%s5605_s0 + $0x428] sm:$0xff] }
  0x5a   :  { %2541 = vmatmul.mubr.bf16.gmra.mrb[12].mxu1 %v3788_v17  ;;  %2259 = vmatprep.mubr.bf16.mxu0 %v3795_v18  ;;  %v3843_v17 = vcombine.high %v227_v11, %v231_v12  ;;  %v3845_v18 = vcombine.high %v228_v13, %v232_v14  ;;  %v284_v11 = vld [vmem:[%s5605_s0 + $0x448] sm:$0xff] }
  0x5b   :  { %2548 = vmatprep.mubr.bf16.mxu1 %v3797_v19  ;;  %2786 = vmatpush1.bf16.msra.mxu0 %v4128_v20  ;;  %v235_v19 = vld [vmem:[%s5605_s0 + $0x2c0] sm:$0xff]  ;;  %v288_v12 = vld [vmem:[%s5605_s0 + $0x468] sm:$0xff] }
  0x5c   :  { %3075 = vmatpush1.bf16.msra.mxu1 %v4129_v21  ;;  %2787 = vmatprep.subr.bf16.mxu0 %v4148_v0  ;;  %v239_v20 = vld [vmem:[%s5605_s0 + $0x2e0] sm:$0xff]  ;;  %v236_v21 = vld [vmem:[%s5605_s0 + $0x2c8] sm:$0xff] }
  0x5d   :  { %3076 = vmatprep.subr.bf16.mxu1 %v4148_v0  ;;  %v3851_v25 = vcombine.high %v235_v19, %v239_v20  ;;  %v3853_v26 = vcombine.high %v236_v21, %v240_v22 }
  0x5f   :  { %2788 = vmatpush1.bf16.msra.mxu0 %v4130_v24  ;;  %v3844_v24 = vcombine.low %v228_v13, %v232_v14  ;;  %v3892_v14 = vcombine.low %v276_v2, %v280_v3 }
  0x60   :  { %3077 = vmatpush1.bf16.msra.mxu1 %v4131_v27  ;;  %2789 = vmatprep.subr.bf16.mxu0 %v4148_v0  ;;  %v4142_v27 = vld [vmem:[%s5604_s1 + $0x168] sm:$0xff]  }
  0x61   :  { %2260 = vmatmul.mubr.bf16.gmra.mrb[16].mxu0 %v3794_v28  ;;  %3078 = vmatprep.subr.bf16.mxu1 %v4148_v0  ;;  %v243_v28 = vld [vmem:[%s5605_s0 + $0x300] sm:$0xff] }
  0x62   :  { %2549 = vmatmul.mubr.bf16.gmra.mrb[16].mxu1 %v3796_v29  ;;  %2267 = vmatprep.mubr.bf16.mxu0 %v3803_v30  ;;  %v247_v29 = vld [vmem:[%s5605_s0 + $0x320] sm:$0xff]  ;;  %v244_v30 = vld [vmem:[%s5605_s0 + $0x308] sm:$0xff] }
  0x63   :  { %2556 = vmatprep.mubr.bf16.mxu1 %v3805_v31  ;;  %2790 = vmatpush1.bf16.msra.mxu0 %v4132_v32  ;;  %v248_v31 = vld [vmem:[%s5605_s0 + $0x328] sm:$0xff]  ;;  %v3850_v32 = vcombine.low %v235_v19, %v239_v20  ;;  %v3859_v34 = vcombine.high %v243_v28, %v247_v29 }
  0x64   :  { %3079 = vmatpush1.bf16.msra.mxu1 %v4133_v33  ;;  %2791 = vmatprep.subr.bf16.mxu0 %v4148_v0  ;;  %v3852_v33 = vcombine.low %v236_v21, %v240_v22  ;;  %v292_v19 = vld [vmem:[%s5605_s0 + $0x488] sm:$0xff]  ;;  %v3900_v22 = vcombine.low %v284_v11, %v288_v12 }
  0x65   :  { %3080 = vmatprep.subr.bf16.mxu1 %v4148_v0  ;;  %v296_v20 = vld [vmem:[%s5605_s0 + $0x4a8] sm:$0xff] }
  0x67   :  { %2792 = vmatpush1.bf16.msra.mxu0 %v4134_v36  ;;  %v3861_v36 = vcombine.high %v244_v30, %v248_v31 }
  0x68   :  { %3081 = vmatpush1.bf16.msra.mxu1 %v4135_v39  ;;  %2793 = vmatprep.subr.bf16.mxu0 %v4148_v0  ;;  %v252_v39 = vld [vmem:[%s5605_s0 + $0x348] sm:$0xff] }
  0x69   :  { %2268 = vmatmul.mubr.bf16.gmra.mrb[20].mxu0 %v3802_v40  ;;  %3082 = vmatprep.subr.bf16.mxu1 %v4148_v0  ;;  %v256_v40 = vld [vmem:[%s5605_s0 + $0x368] sm:$0xff] }
  0x6a   :  { %2557 = vmatmul.mubr.bf16.gmra.mrb[20].mxu1 %v3804_v41  ;;  %2275 = vmatprep.mubr.bf16.mxu0 %v3811_v42  ;;  %v3858_v41 = vcombine.low %v243_v28, %v247_v29  ;;  %v3860_v42 = vcombine.low %v244_v30, %v248_v31  ;;  %v304_v28 = vld [vmem:[%s5605_s0 + $0x4e8] sm:$0xff]  ;;  %v3908_v30 = vcombine.low %v292_v19, %v296_v20 }
  0x6b   :  { %2564 = vmatprep.mubr.bf16.mxu1 %v3813_v43  ;;  %2794 = vmatpush1.bf16.msra.mxu0 %v4136_v44  ;;  %v3867_v43 = vcombine.high %v251_v37, %v255_v38  ;;  %v3869_v44 = vcombine.high %v252_v39, %v256_v40 }
  0x6c   :  { %3083 = vmatpush1.bf16.msra.mxu1 %v4137_v45  ;;  %2795 = vmatprep.subr.bf16.mxu0 %v4148_v0  ;;  %v4144_v45 = vld [vmem:[%s5604_s1 + $0x170] sm:$0xff]  }
  0x6d   :  { %3084 = vmatprep.subr.bf16.mxu1 %v4148_v0 }
  0x6f   :  { %2796 = vmatpush1.bf16.msra.mxu0 %v4138_v54  ;;  %v3877_v54 = vcombine.high %v260_v48, %v264_v49  ;;  %v323_v49 = vld [vmem:[%s5605_s0 + $0x580] sm:$0xff] }
  0x70   :  { %3085 = vmatpush1.bf16.msra.mxu1 %v4139_v55  ;;  %2797 = vmatprep.subr.bf16.mxu0 %v4148_v0  ;;  %v267_v55 = vld [vmem:[%s5605_s0 + $0x3c0] sm:$0xff] }
  0x71   :  { %2276 = vmatmul.mubr.bf16.gmra.mrb[24].mxu0 %v3810_v50  ;;  %3086 = vmatprep.subr.bf16.mxu1 %v4148_v0  ;;  %v3866_v50 = vcombine.low %v251_v37, %v255_v38  ;;  %v3882_v4 = vcombine.low %v267_v55, %v271_v56 }
  0x72   :  { %2565 = vmatmul.mubr.bf16.gmra.mrb[24].mxu1 %v3812_v51  ;;  %2283 = vmatprep.mubr.bf16.mxu0 %v3819_v52  ;;  %v3868_v51 = vcombine.low %v252_v39, %v256_v40  ;;  %v3875_v52 = vcombine.high %v259_v46, %v263_v47 }
  0x73   :  { %2572 = vmatprep.mubr.bf16.mxu1 %v3821_v53  ;;  %2798 = vmatpush1.bf16.msra.mxu0 %v4140_v9  ;;  %v4145_v53 = vld [vmem:[%s5604_s1 + $0x1f0] sm:$0xff]   ;;  %v283_v9 = vld [vmem:[%s5605_s0 + $0x440] sm:$0xff] }
  0x74   :  { %3087 = vmatpush1.bf16.msra.mxu1 %v4141_v10  ;;  %2799 = vmatprep.subr.bf16.mxu0 %v4148_v0  ;;  %v287_v10 = vld [vmem:[%s5605_s0 + $0x460] sm:$0xff] }
  0x75   :  { %3088 = vmatprep.subr.bf16.mxu1 %v4148_v0  ;;  %v3898_v21 = vcombine.low %v283_v9, %v287_v10 }
  0x77   :  { %2800 = vmatpush1.bf16.msra.mxu0 %v4142_v27  ;;  %v300_v27 = vld [vmem:[%s5605_s0 + $0x4c8] sm:$0xff] }
  0x78   :  { %2801 = vmatprep.subr.bf16.mxu0 %v4148_v0  ;;  %3089 = vmatpush1.bf16.msra.mxu1 %v4143_v35  ;;  %v308_v35 = vld [vmem:[%s5605_s0 + $0x508] sm:$0xff]  ;;  %v3916_v38 = vcombine.low %v300_v27, %v304_v28 }
  0x79   :  { %2284 = vmatmul.mubr.bf16.gmra.mrb[28].mxu0 %v3818_v60  ;;  %3090 = vmatprep.subr.bf16.mxu1 %v4148_v0  ;;  %v3883_v60 = vcombine.high %v267_v55, %v271_v56 }
  0x7a   :  { %2573 = vmatmul.mubr.bf16.gmra.mrb[28].mxu1 %v3820_v61  ;;  %2291 = vmatprep.mubr.bf16.mxu0 %v3827_v62  ;;  %v3885_v61 = vcombine.high %v268_v57, %v272_v58  ;;  %v4146_v62 = vld [vmem:[%s5604_s1 + $0x178] sm:$0xff]  }
  0x7b   :  { %2580 = vmatprep.mubr.bf16.mxu1 %v3829_v63  ;;  %2802 = vmatpush1.bf16.msra.mxu0 %v4144_v45  ;;  %v275_v63 = vld [vmem:[%s5605_s0 + $0x400] sm:$0xff] }
  0x7c   :  { %2803 = vmatprep.subr.bf16.mxu0 %v4148_v0  ;;  %3091 = vmatpush1.bf16.msra.mxu1 %v4145_v53  ;;  %v3890_v13 = vcombine.low %v275_v63, %v279_v1 }
  0x7d   :  { %3092 = vmatprep.subr.bf16.mxu1 %v4148_v0  ;;  %v3874_v0 = vcombine.low %v259_v46, %v263_v47 }
  0x7f   :  { %2804 = vmatpush1.bf16.msra.mxu0 %v4146_v62 }
  0x81   :  { %2292 = vmatmul.mubr.bf16.gmra.mrb[32].mxu0 %v3826_v5  ;;  %v3884_v5 = vcombine.low %v268_v57, %v272_v58  ;;  %v331_v57 = vld [vmem:[%s5605_s0 + $0x5c0] sm:$0xff] }
  0x82   :  { %2581 = vmatmul.mubr.bf16.gmra.mrb[32].mxu1 %v3828_v6  ;;  %2299 = vmatprep.mubr.bf16.mxu0 %v3835_v7  ;;  %v3891_v6 = vcombine.high %v275_v63, %v279_v1  ;;  %v4147_v7 = vld [vmem:[%s5604_s1 + $0x1f8] sm:$0xff]   ;;  %v335_v58 = vld [vmem:[%s5605_s0 + $0x5e0] sm:$0xff] }
  0x83   :  { %2588 = vmatprep.mubr.bf16.mxu1 %v3837_v8  ;;  %v3893_v8 = vcombine.high %v276_v2, %v280_v3  ;;  %3093 = vmatpush1.bf16.msra.mxu1 %v4147_v7  ;;  %v3947_v62 = vcombine.high %v331_v57, %v335_v58  ;;  %v339_v1 = vld [vmem:[%s5605_s0 + $0x600] sm:$0xff]  ;;  %v340_v3 = vld [vmem:[%s5605_s0 + $0x608] sm:$0xff] }
  0x84   :  { %v343_v2 = vld [vmem:[%s5605_s0 + $0x620] sm:$0xff] }
  0x85   :  { %v3955_v7 = vcombine.high %v339_v1, %v343_v2 }
  0x89   :  { %2300 = vmatmul.mubr.bf16.gmra.mrb[36].mxu0 %v3834_v15  ;;  %v3899_v15 = vcombine.high %v283_v9, %v287_v10  ;;  %v347_v9 = vld [vmem:[%s5605_s0 + $0x640] sm:$0xff] }
  0x8a   :  { %2589 = vmatmul.mubr.bf16.gmra.mrb[36].mxu1 %v3836_v16  ;;  %2307 = vmatprep.mubr.bf16.mxu0 %v3843_v17  ;;  %v3901_v16 = vcombine.high %v284_v11, %v288_v12  ;;  %v291_v17 = vld [vmem:[%s5605_s0 + $0x480] sm:$0xff]  ;;  %v348_v11 = vld [vmem:[%s5605_s0 + $0x648] sm:$0xff] }
  0x8b   :  { %2596 = vmatprep.mubr.bf16.mxu1 %v3845_v18  ;;  %v295_v18 = vld [vmem:[%s5605_s0 + $0x4a0] sm:$0xff]  ;;  %v352_v12 = vld [vmem:[%s5605_s0 + $0x668] sm:$0xff] }
  0x8c   :  { %v3906_v29 = vcombine.low %v291_v17, %v295_v18  ;;  %v351_v10 = vld [vmem:[%s5605_s0 + $0x660] sm:$0xff] }
  0x91   :  { %2308 = vmatmul.mubr.bf16.gmra.mrb[40].mxu0 %v3842_v23  ;;  %v3907_v23 = vcombine.high %v291_v17, %v295_v18  ;;  %v355_v17 = vld [vmem:[%s5605_s0 + $0x680] sm:$0xff] }
  0x92   :  { %2597 = vmatmul.mubr.bf16.gmra.mrb[40].mxu1 %v3844_v24  ;;  %2315 = vmatprep.mubr.bf16.mxu0 %v3851_v25  ;;  %v3909_v24 = vcombine.high %v292_v19, %v296_v20  ;;  %v299_v25 = vld [vmem:[%s5605_s0 + $0x4c0] sm:$0xff]  ;;  %v356_v19 = vld [vmem:[%s5605_s0 + $0x688] sm:$0xff] }
  0x93   :  { %2604 = vmatprep.mubr.bf16.mxu1 %v3853_v26  ;;  %v303_v26 = vld [vmem:[%s5605_s0 + $0x4e0] sm:$0xff]  ;;  %v360_v20 = vld [vmem:[%s5605_s0 + $0x6a8] sm:$0xff] }
  0x94   :  { %v3915_v31 = vcombine.high %v299_v25, %v303_v26  ;;  %v3914_v37 = vcombine.low %v299_v25, %v303_v26  ;;  %v359_v18 = vld [vmem:[%s5605_s0 + $0x6a0] sm:$0xff] }
  0x95   :  { %v363_v25 = vld [vmem:[%s5605_s0 + $0x6c0] sm:$0xff] }
  0x96   :  { %v367_v26 = vld [vmem:[%s5605_s0 + $0x6e0] sm:$0xff] }
  0x99   :  { %2316 = vmatmul.mubr.bf16.gmra.mrb[44].mxu0 %v3850_v32  ;;  %v3917_v32 = vcombine.high %v300_v27, %v304_v28  ;;  %v364_v27 = vld [vmem:[%s5605_s0 + $0x6c8] sm:$0xff] }
  0x9a   :  { %2605 = vmatmul.mubr.bf16.gmra.mrb[44].mxu1 %v3852_v33  ;;  %2323 = vmatprep.mubr.bf16.mxu0 %v3859_v34  ;;  %v307_v33 = vld [vmem:[%s5605_s0 + $0x500] sm:$0xff]  ;;  %v368_v28 = vld [vmem:[%s5605_s0 + $0x6e8] sm:$0xff] }
  0x9b   :  { %2612 = vmatprep.mubr.bf16.mxu1 %v3861_v36  ;;  %v311_v34 = vld [vmem:[%s5605_s0 + $0x520] sm:$0xff]  ;;  %v312_v36 = vld [vmem:[%s5605_s0 + $0x528] sm:$0xff] }
  0x9c   :  { %v3923_v39 = vcombine.high %v307_v33, %v311_v34  ;;  %v3925_v40 = vcombine.high %v308_v35, %v312_v36  ;;  %v3922_v45 = vcombine.low %v307_v33, %v311_v34  ;;  %v3924_v46 = vcombine.low %v308_v35, %v312_v36  ;;  %v371_v33 = vld [vmem:[%s5605_s0 + $0x700] sm:$0xff]  ;;  %v372_v36 = vld [vmem:[%s5605_s0 + $0x708] sm:$0xff] }
  0x9d   :  { %v375_v34 = vld [vmem:[%s5605_s0 + $0x720] sm:$0xff] }
  0xa1   :  { %2324 = vmatmul.mubr.bf16.gmra.mrb[48].mxu0 %v3858_v41  ;;  %v315_v41 = vld [vmem:[%s5605_s0 + $0x540] sm:$0xff] }
  0xa2   :  { %2613 = vmatmul.mubr.bf16.gmra.mrb[48].mxu1 %v3860_v42  ;;  %2331 = vmatprep.mubr.bf16.mxu0 %v3867_v43  ;;  %v319_v42 = vld [vmem:[%s5605_s0 + $0x560] sm:$0xff]  ;;  %v316_v43 = vld [vmem:[%s5605_s0 + $0x548] sm:$0xff] }
  0xa3   :  { %2620 = vmatprep.mubr.bf16.mxu1 %v3869_v44  ;;  %v320_v44 = vld [vmem:[%s5605_s0 + $0x568] sm:$0xff]  ;;  %v3931_v47 = vcombine.high %v315_v41, %v319_v42  ;;  %v3930_v53 = vcombine.low %v315_v41, %v319_v42 }
  0xa4   :  { %v3933_v48 = vcombine.high %v316_v43, %v320_v44 }
  0xa9   :  { %2332 = vmatmul.mubr.bf16.gmra.mrb[52].mxu0 %v3866_v50  ;;  %v327_v50 = vld [vmem:[%s5605_s0 + $0x5a0] sm:$0xff] }
  0xaa   :  { %2621 = vmatmul.mubr.bf16.gmra.mrb[52].mxu1 %v3868_v51  ;;  %2339 = vmatprep.mubr.bf16.mxu0 %v3875_v52  ;;  %v324_v51 = vld [vmem:[%s5605_s0 + $0x588] sm:$0xff]  ;;  %v3939_v55 = vcombine.high %v323_v49, %v327_v50 }
  0xab   :  { %2628 = vmatprep.mubr.bf16.mxu1 %v3877_v54  ;;  %v328_v52 = vld [vmem:[%s5605_s0 + $0x5a8] sm:$0xff]  ;;  %v3932_v54 = vcombine.low %v316_v43, %v320_v44  ;;  %v3980_v44 = vcombine.low %v364_v27, %v368_v28 }
  0xac   :  { %v3941_v56 = vcombine.high %v324_v51, %v328_v52 }
  0xb1   :  { %2340 = vmatmul.mubr.bf16.gmra.mrb[56].mxu0 %v3874_v0  ;;  %v332_v0 = vld [vmem:[%s5605_s0 + $0x5c8] sm:$0xff] }
  0xb2   :  { %2629 = vmatmul.mubr.bf16.gmra.mrb[56].mxu1 %v3876_v59  ;;  %2347 = vmatprep.mubr.bf16.mxu0 %v3883_v60  ;;  %v336_v59 = vld [vmem:[%s5605_s0 + $0x5e8] sm:$0xff]  ;;  %v3938_v60 = vcombine.low %v323_v49, %v327_v50 }
  0xb3   :  { %2636 = vmatprep.mubr.bf16.mxu1 %v3885_v61  ;;  %v3940_v61 = vcombine.low %v324_v51, %v328_v52  ;;  %v3949_v63 = vcombine.high %v332_v0, %v336_v59  ;;  %v379_v51 = vld [vmem:[%s5605_s0 + $0x740] sm:$0xff] }
  0xb4   :  { %v383_v52 = vld [vmem:[%s5605_s0 + $0x760] sm:$0xff] }
  0xb9   :  { %2348 = vmatmul.mubr.bf16.gmra.mrb[60].mxu0 %v3882_v4  ;;  %v344_v4 = vld [vmem:[%s5605_s0 + $0x628] sm:$0xff] }
  0xba   :  { %2637 = vmatmul.mubr.bf16.gmra.mrb[60].mxu1 %v3884_v5  ;;  %2355 = vmatprep.mubr.bf16.mxu0 %v3891_v6  ;;  %v3946_v5 = vcombine.low %v331_v57, %v335_v58  ;;  %v3948_v6 = vcombine.low %v332_v0, %v336_v59  ;;  %v3986_v58 = vcombine.low %v371_v33, %v375_v34 }
  0xbb   :  { %2644 = vmatprep.mubr.bf16.mxu1 %v3893_v8  ;;  %v3957_v8 = vcombine.high %v340_v3, %v344_v4 }
  0xc1   :  { %2356 = vmatmul.mubr.bf16.gmra.mrb[64].mxu0 %v3890_v13  ;;  %v3954_v13 = vcombine.low %v339_v1, %v343_v2 }
  0xc2   :  { %2645 = vmatmul.mubr.bf16.gmra.mrb[64].mxu1 %v3892_v14  ;;  %2363 = vmatprep.mubr.bf16.mxu0 %v3899_v15  ;;  %v3956_v14 = vcombine.low %v340_v3, %v344_v4  ;;  %v3963_v15 = vcombine.high %v347_v9, %v351_v10 }
  0xc3   :  { %2652 = vmatprep.mubr.bf16.mxu1 %v3901_v16  ;;  %v3965_v16 = vcombine.high %v348_v11, %v352_v12 }
  0xc9   :  { %2364 = vmatmul.mubr.bf16.gmra.mrb[68].mxu0 %v3898_v21  ;;  %v3962_v21 = vcombine.low %v347_v9, %v351_v10  ;;  %v392_v9 = vld [vmem:[%s5605_s0 + $0x7a8] sm:$0xff] }
  0xca   :  { %2653 = vmatmul.mubr.bf16.gmra.mrb[68].mxu1 %v3900_v22  ;;  %2371 = vmatprep.mubr.bf16.mxu0 %v3907_v23  ;;  %v3964_v22 = vcombine.low %v348_v11, %v352_v12  ;;  %v3971_v23 = vcombine.high %v355_v17, %v359_v18  ;;  %v3994_v12 = vcombine.low %v379_v51, %v383_v52 }
  0xcb   :  { %2660 = vmatprep.mubr.bf16.mxu1 %v3909_v24  ;;  %v3973_v24 = vcombine.high %v356_v19, %v360_v20 }
  0xd1   :  { %2372 = vmatmul.mubr.bf16.gmra.mrb[72].mxu0 %v3906_v29  ;;  %v3970_v29 = vcombine.low %v355_v17, %v359_v18 }
  0xd2   :  { %2661 = vmatmul.mubr.bf16.gmra.mrb[72].mxu1 %v3908_v30  ;;  %2379 = vmatprep.mubr.bf16.mxu0 %v3915_v31  ;;  %v3972_v30 = vcombine.low %v356_v19, %v360_v20  ;;  %v3979_v31 = vcombine.high %v363_v25, %v367_v26 }
  0xd3   :  { %2668 = vmatprep.mubr.bf16.mxu1 %v3917_v32  ;;  %v3981_v32 = vcombine.high %v364_v27, %v368_v28  ;;  %v400_v27 = vld [vmem:[%s5605_s0 + $0x7e8] sm:$0xff] }
  0xd9   :  { %2380 = vmatmul.mubr.bf16.gmra.mrb[76].mxu0 %v3914_v37  ;;  %v376_v37 = vld [vmem:[%s5605_s0 + $0x728] sm:$0xff] }
  0xda   :  { %2669 = vmatmul.mubr.bf16.gmra.mrb[76].mxu1 %v3916_v38  ;;  %2387 = vmatprep.mubr.bf16.mxu0 %v3923_v39 }
  0xdb   :  { %2676 = vmatprep.mubr.bf16.mxu1 %v3925_v40  ;;  %v3978_v40 = vcombine.low %v363_v25, %v367_v26  ;;  %v396_v26 = vld [vmem:[%s5605_s0 + $0x7c8] sm:$0xff] }
  0xe1   :  { %2388 = vmatmul.mubr.bf16.gmra.mrb[80].mxu0 %v3922_v45  ;;  %v3987_v45 = vcombine.high %v371_v33, %v375_v34 }
  0xe2   :  { %2677 = vmatmul.mubr.bf16.gmra.mrb[80].mxu1 %v3924_v46  ;;  %2395 = vmatprep.mubr.bf16.mxu0 %v3931_v47 }
  0xe3   :  { %2684 = vmatprep.mubr.bf16.mxu1 %v3933_v48  ;;  %v3989_v48 = vcombine.high %v372_v36, %v376_v37 }
  0xe9   :  { %2396 = vmatmul.mubr.bf16.gmra.mrb[84].mxu0 %v3930_v53 }
  0xea   :  { %2685 = vmatmul.mubr.bf16.gmra.mrb[84].mxu1 %v3932_v54  ;;  %2403 = vmatprep.mubr.bf16.mxu0 %v3939_v55  ;;  %v380_v54 = vld [vmem:[%s5605_s0 + $0x748] sm:$0xff] }
  0xeb   :  { %2692 = vmatprep.mubr.bf16.mxu1 %v3941_v56  ;;  %v384_v55 = vld [vmem:[%s5605_s0 + $0x768] sm:$0xff] }
  0xec   :  { %v3997_v2 = vcombine.high %v380_v54, %v384_v55 }
  0xf1   :  { %2404 = vmatmul.mubr.bf16.gmra.mrb[88].mxu0 %v3938_v60 }
  0xf2   :  { %2693 = vmatmul.mubr.bf16.gmra.mrb[88].mxu1 %v3940_v61  ;;  %2411 = vmatprep.mubr.bf16.mxu0 %v3947_v62  ;;  %v3988_v61 = vcombine.low %v372_v36, %v376_v37  ;;  %v3995_v62 = vcombine.high %v379_v51, %v383_v52 }
  0xf3   :  { %2700 = vmatprep.mubr.bf16.mxu1 %v3949_v63 }
  0xf9   :  { %2412 = vmatmul.mubr.bf16.gmra.mrb[92].mxu0 %v3946_v5  ;;  %v387_v5 = vld [vmem:[%s5605_s0 + $0x780] sm:$0xff] }
  0xfa   :  { %2701 = vmatmul.mubr.bf16.gmra.mrb[92].mxu1 %v3948_v6  ;;  %2419 = vmatprep.mubr.bf16.mxu0 %v3955_v7  ;;  %v391_v6 = vld [vmem:[%s5605_s0 + $0x7a0] sm:$0xff] }
  0xfb   :  { %2708 = vmatprep.mubr.bf16.mxu1 %v3957_v8  ;;  %v388_v8 = vld [vmem:[%s5605_s0 + $0x788] sm:$0xff]  ;;  %v4003_v17 = vcombine.high %v387_v5, %v391_v6 }
  0xfc   :  { %v4005_v20 = vcombine.high %v388_v8, %v392_v9  ;;  %v4004_v34 = vcombine.low %v388_v8, %v392_v9 }
 0x101   :  { %2420 = vmatmul.mubr.bf16.gmra.mrb[96].mxu0 %v3954_v13 }
 0x102   :  { %2709 = vmatmul.mubr.bf16.gmra.mrb[96].mxu1 %v3956_v14  ;;  %2427 = vmatprep.mubr.bf16.mxu0 %v3963_v15 }
 0x103   :  { %2716 = vmatprep.mubr.bf16.mxu1 %v3965_v16  ;;  %v3996_v16 = vcombine.low %v380_v54, %v384_v55  ;;  %v4012_v54 = vcombine.low %v396_v26, %v400_v27 }
 0x109   :  { %2428 = vmatmul.mubr.bf16.gmra.mrb[100].mxu0 %v3962_v21 }
 0x10a   :  { %2717 = vmatmul.mubr.bf16.gmra.mrb[100].mxu1 %v3964_v22  ;;  %2435 = vmatprep.mubr.bf16.mxu0 %v3971_v23  ;;  %v395_v23 = vld [vmem:[%s5605_s0 + $0x7c0] sm:$0xff] }
 0x10b   :  { %2724 = vmatprep.mubr.bf16.mxu1 %v3973_v24  ;;  %v399_v24 = vld [vmem:[%s5605_s0 + $0x7e0] sm:$0xff] }
 0x111   :  { %2436 = vmatmul.mubr.bf16.gmra.mrb[104].mxu0 %v3970_v29 }
 0x112   :  { %2725 = vmatmul.mubr.bf16.gmra.mrb[104].mxu1 %v3972_v30  ;;  %2443 = vmatprep.mubr.bf16.mxu0 %v3979_v31  ;;  %v4002_v30 = vcombine.low %v387_v5, %v391_v6 }
 0x113   :  { %2732 = vmatprep.mubr.bf16.mxu1 %v3981_v32 }
 0x114   :  { %v2229_v35 = vpop.f32.mrb[0].mxu0 }
 0x115   :  { %v2518_v38 = vpop.f32.mrb[0].mxu1  ;;  %v2231_v39 = vpop.f32.mrb[1].mxu0 }
 0x116   :  { %v4794_v41 = vadd.f32 %v2518_v38, %v2229_v35  ;;  %v2520_v42 = vpop.f32.mrb[1].mxu1  ;;  %v2232_v43 = vpop.f32.mrb[2].mxu0  ;;  %v4011_v35 = vcombine.high %v395_v23, %v399_v24  ;;  %v4013_v38 = vcombine.high %v396_v26, %v400_v27 }
 0x117   :  { %v2521_v46 = vpop.f32.mrb[2].mxu1  ;;  %v2234_v47 = vpop.f32.mrb[3].mxu0  ;;  %v149_v42 = vld [vmem:[%s5605_s0 + $0x10] sm:$0xff] }
 0x118   :  { %v4796_v49 = vadd.f32 %v2521_v46, %v2232_v43  ;;  %v2523_v50 = vpop.f32.mrb[3].mxu1  ;;  %v153_v43 = vld [vmem:[%s5605_s0 + $0x30] sm:$0xff]  ;;  %v154_v46 = vld [vmem:[%s5605_s0 + $0x38] sm:$0xff] }
 0x119   :  { %2444 = vmatmul.mubr.bf16.gmra.mrb[108].mxu0 %v3978_v40  ;;  %v4010_v50 = vcombine.low %v395_v23, %v399_v24  ;;  %v3767_v55 = vcombine.high %v149_v42, %v153_v43  ;;  %v3766_v6 = vcombine.low %v149_v42, %v153_v43  ;;  %v170_v23 = vld [vmem:[%s5605_s0 + $0xb8] sm:$0xff] }
 0x11a   :  { %2733 = vmatmul.mubr.bf16.gmra.mrb[108].mxu1 %v3980_v44  ;;  %2451 = vmatprep.mubr.bf16.mxu0 %v3987_v45  ;;  %v150_v45 = vld [vmem:[%s5605_s0 + $0x18] sm:$0xff] }
 0x11b   :  { %2740 = vmatprep.mubr.bf16.mxu1 %v3989_v48  ;;  %v174_v43 = vld [vmem:[%s5605_s0 + $0xd8] sm:$0xff] }
 0x11c   :  { %v2237_v53 = vpop.f32.mrb[4].mxu0 }
 0x11d   :  { %v2526_v56 = vpop.f32.mrb[4].mxu1  ;;  %v2239_v57 = vpop.f32.mrb[5].mxu0 }
 0x11e   :  { %v4810_v0 = vadd.f32 %v2526_v56, %v2237_v53  ;;  %v2528_v59 = vpop.f32.mrb[5].mxu1  ;;  %v2240_v60 = vpop.f32.mrb[6].mxu0 }
 0x11f   :  { %v2529_v63 = vpop.f32.mrb[6].mxu1  ;;  %v2242_v1 = vpop.f32.mrb[7].mxu0 }
 0x120   :  { %v4812_v3 = vadd.f32 %v2529_v63, %v2240_v60  ;;  %v2531_v4 = vpop.f32.mrb[7].mxu1  ;;  %v158_v1 = vld [vmem:[%s5605_s0 + $0x58] sm:$0xff] }
 0x121   :  { %2452 = vmatmul.mubr.bf16.gmra.mrb[112].mxu0 %v3986_v58  ;;  %v3769_v58 = vcombine.high %v150_v45, %v154_v46 }
 0x122   :  { %2741 = vmatmul.mubr.bf16.gmra.mrb[112].mxu1 %v3988_v61  ;;  %2459 = vmatprep.mubr.bf16.mxu0 %v3995_v62  ;;  %v157_v61 = vld [vmem:[%s5605_s0 + $0x50] sm:$0xff] }
 0x123   :  { %2748 = vmatprep.mubr.bf16.mxu1 %v3997_v2  ;;  %v161_v62 = vld [vmem:[%s5605_s0 + $0x70] sm:$0xff]  ;;  %v162_v2 = vld [vmem:[%s5605_s0 + $0x78] sm:$0xff] }
 0x124   :  { %v2245_v7 = vpop.f32.mrb[8].mxu0  ;;  %v3774_v26 = vcombine.low %v157_v61, %v161_v62 }
 0x125   :  { %v2534_v10 = vpop.f32.mrb[8].mxu1  ;;  %v2247_v11 = vpop.f32.mrb[9].mxu0 }
 0x126   :  { %v4826_v13 = vadd.f32 %v2534_v10, %v2245_v7  ;;  %v2536_v14 = vpop.f32.mrb[9].mxu1  ;;  %v2248_v15 = vpop.f32.mrb[10].mxu0  ;;  %v3768_v10 = vcombine.low %v150_v45, %v154_v46  ;;  %v3775_v11 = vcombine.high %v157_v61, %v161_v62  ;;  %v181_v61 = vld [vmem:[%s5605_s0 + $0x110] sm:$0xff] }
 0x127   :  { %v2537_v18 = vpop.f32.mrb[10].mxu1  ;;  %v2250_v19 = vpop.f32.mrb[11].mxu0  ;;  %v185_v62 = vld [vmem:[%s5605_s0 + $0x130] sm:$0xff] }
 0x128   :  { %v4828_v21 = vadd.f32 %v2537_v18, %v2248_v15  ;;  %v2539_v22 = vpop.f32.mrb[11].mxu1  ;;  %v3777_v15 = vcombine.high %v158_v1, %v162_v2  ;;  %v165_v18 = vld [vmem:[%s5605_s0 + $0x90] sm:$0xff] }
 0x129   :  { %2460 = vmatmul.mubr.bf16.gmra.mrb[116].mxu0 %v3994_v12  ;;  %v169_v19 = vld [vmem:[%s5605_s0 + $0xb0] sm:$0xff]  ;;  %v166_v22 = vld [vmem:[%s5605_s0 + $0x98] sm:$0xff] }
 0x12a   :  { %2749 = vmatmul.mubr.bf16.gmra.mrb[116].mxu1 %v3996_v16  ;;  %2467 = vmatprep.mubr.bf16.mxu0 %v4003_v17 }
 0x12b   :  { %2756 = vmatprep.mubr.bf16.mxu1 %v4005_v20 }
 0x12c   :  { %v2253_v25 = vpop.f32.mrb[12].mxu0 }
 0x12d   :  { %v2542_v28 = vpop.f32.mrb[12].mxu1  ;;  %v2255_v29 = vpop.f32.mrb[13].mxu0 }
 0x12e   :  { %v4842_v31 = vadd.f32 %v2542_v28, %v2253_v25  ;;  %v2544_v32 = vpop.f32.mrb[13].mxu1  ;;  %v2256_v33 = vpop.f32.mrb[14].mxu0 }
 0x12f   :  { %v2545_v36 = vpop.f32.mrb[14].mxu1  ;;  %v2258_v37 = vpop.f32.mrb[15].mxu0  ;;  %v3783_v32 = vcombine.high %v165_v18, %v169_v19 }
 0x130   :  { %v4844_v39 = vadd.f32 %v2545_v36, %v2256_v33  ;;  %v2547_v40 = vpop.f32.mrb[15].mxu1 }
 0x131   :  { %2468 = vmatmul.mubr.bf16.gmra.mrb[120].mxu0 %v4002_v30  ;;  %v3776_v30 = vcombine.low %v158_v1, %v162_v2  ;;  %v177_v40 = vld [vmem:[%s5605_s0 + $0xf0] sm:$0xff]  ;;  %v182_v1 = vld [vmem:[%s5605_s0 + $0x118] sm:$0xff] }
 0x132   :  { %2757 = vmatmul.mubr.bf16.gmra.mrb[120].mxu1 %v4004_v34  ;;  %2475 = vmatprep.mubr.bf16.mxu0 %v4011_v35  ;;  %v3785_v35 = vcombine.high %v166_v22, %v170_v23  ;;  %v186_v2 = vld [vmem:[%s5605_s0 + $0x138] sm:$0xff] }
 0x133   :  { %2764 = vmatprep.mubr.bf16.mxu1 %v4013_v38  ;;  %v173_v38 = vld [vmem:[%s5605_s0 + $0xd0] sm:$0xff] }
 0x134   :  { %v2261_v44 = vpop.f32.mrb[16].mxu0 }
 0x135   :  { %v2550_v47 = vpop.f32.mrb[16].mxu1  ;;  %v2263_v48 = vpop.f32.mrb[17].mxu0 }
 0x136   :  { %v4858_v51 = vadd.f32 %v2550_v47, %v2261_v44  ;;  %v2552_v52 = vpop.f32.mrb[17].mxu1  ;;  %v2264_v53 = vpop.f32.mrb[18].mxu0  ;;  %v178_v44 = vld [vmem:[%s5605_s0 + $0xf8] sm:$0xff]  ;;  %v3782_v47 = vcombine.low %v165_v18, %v169_v19 }
 0x137   :  { %v2553_v56 = vpop.f32.mrb[18].mxu1  ;;  %v2266_v57 = vpop.f32.mrb[19].mxu0 }
 0x138   :  { %v4860_v59 = vadd.f32 %v2553_v56, %v2264_v53  ;;  %v2555_v60 = vpop.f32.mrb[19].mxu1  ;;  %v3784_v53 = vcombine.low %v166_v22, %v170_v23  ;;  %v3793_v57 = vcombine.high %v174_v43, %v178_v44  ;;  %v193_v22 = vld [vmem:[%s5605_s0 + $0x170] sm:$0xff] }
 0x139   :  { %2476 = vmatmul.mubr.bf16.gmra.mrb[124].mxu0 %v4010_v50 }
 0x13a   :  { %2765 = vmatmul.mubr.bf16.gmra.mrb[124].mxu1 %v4012_v54  ;;  %2805 = vmatprep.mubr.bf16.mxu0 %v3767_v55  ;;  %v3791_v54 = vcombine.high %v173_v38, %v177_v40 }
 0x13b   :  { %3094 = vmatprep.mubr.bf16.mxu1 %v3769_v58 }
 0x13c   :  { %v2269_v63 = vpop.f32.mrb[20].mxu0 }
 0x13d   :  { %v2558_v4 = vpop.f32.mrb[20].mxu1  ;;  %v2271_v5 = vpop.f32.mrb[21].mxu0 }
 0x13e   :  { %v4874_v7 = vadd.f32 %v2558_v4, %v2269_v63  ;;  %v2560_v8 = vpop.f32.mrb[21].mxu1  ;;  %v2272_v9 = vpop.f32.mrb[22].mxu0 }
 0x13f   :  { %v2561_v12 = vpop.f32.mrb[22].mxu1  ;;  %v2274_v14 = vpop.f32.mrb[23].mxu0 }
 0x140   :  { %v4876_v16 = vadd.f32 %v2561_v12, %v2272_v9  ;;  %v2563_v17 = vpop.f32.mrb[23].mxu1  ;;  %v3799_v12 = vcombine.high %v181_v61, %v185_v62 }
 0x141   :  { %2806 = vmatmul.mubr.bf16.vlgmr.msra.gmra.mrb[128].mxu0 %v3766_v6  ;;  %v3790_v6 = vcombine.low %v173_v38, %v177_v40  ;;  %v3801_v17 = vcombine.high %v182_v1, %v186_v2 }
 0x142   :  { %3095 = vmatmul.mubr.bf16.vlgmr.msra.gmra.mrb[128].mxu1 %v3768_v10  ;;  %2813 = vmatprep.mubr.bf16.mxu0 %v3775_v11  ;;  %v3792_v11 = vcombine.low %v174_v43, %v178_v44  ;;  %v197_v44 = vld [vmem:[%s5605_s0 + $0x190] sm:$0xff] }
 0x143   :  { %3102 = vmatprep.mubr.bf16.mxu1 %v3777_v15 }
 0x144   :  { %v2277_v20 = vpop.f32.mrb[24].mxu0 }
 0x145   :  { %v2566_v24 = vpop.f32.mrb[24].mxu1  ;;  %v2279_v25 = vpop.f32.mrb[25].mxu0 }
 0x146   :  { %v4890_v27 = vadd.f32 %v2566_v24, %v2277_v20  ;;  %v2568_v28 = vpop.f32.mrb[25].mxu1  ;;  %v2280_v29 = vpop.f32.mrb[26].mxu0  ;;  %v189_v20 = vld [vmem:[%s5605_s0 + $0x150] sm:$0xff]  ;;  %v190_v24 = vld [vmem:[%s5605_s0 + $0x158] sm:$0xff] }
 0x147   :  { %v2569_v33 = vpop.f32.mrb[26].mxu1  ;;  %v2282_v34 = vpop.f32.mrb[27].mxu0  ;;  %v194_v25 = vld [vmem:[%s5605_s0 + $0x178] sm:$0xff] }
 0x148   :  { %v4892_v36 = vadd.f32 %v2569_v33, %v2280_v29  ;;  %v2571_v37 = vpop.f32.mrb[27].mxu1  ;;  %v3798_v29 = vcombine.low %v181_v61, %v185_v62  ;;  %v3800_v34 = vcombine.low %v182_v1, %v186_v2  ;;  %v3809_v40 = vcombine.high %v190_v24, %v194_v25 }
 0x149   :  { %2814 = vmatmul.mubr.bf16.gmra.mrb[132].mxu0 %v3774_v26 }
 0x14a   :  { %3103 = vmatmul.mubr.bf16.gmra.mrb[132].mxu1 %v3776_v30  ;;  %2821 = vmatprep.mubr.bf16.mxu0 %v3783_v32 }
 0x14b   :  { %3110 = vmatprep.mubr.bf16.mxu1 %v3785_v35  ;;  %v3807_v35 = vcombine.high %v189_v20, %v193_v22 }
 0x14c   :  { %v2285_v42 = vpop.f32.mrb[28].mxu0 }
 0x14d   :  { %v2574_v45 = vpop.f32.mrb[28].mxu1  ;;  %v2287_v46 = vpop.f32.mrb[29].mxu0 }
 0x14e   :  { %v4906_v48 = vadd.f32 %v2574_v45, %v2285_v42  ;;  %v2576_v50 = vpop.f32.mrb[29].mxu1  ;;  %v2288_v52 = vpop.f32.mrb[30].mxu0  ;;  %v201_v45 = vld [vmem:[%s5605_s0 + $0x1b0] sm:$0xff] }
 0x14f   :  { %v2577_v55 = vpop.f32.mrb[30].mxu1  ;;  %v2290_v56 = vpop.f32.mrb[31].mxu0  ;;  %v202_v50 = vld [vmem:[%s5605_s0 + $0x1b8] sm:$0xff]  ;;  %v3815_v61 = vcombine.high %v197_v44, %v201_v45 }
 0x150   :  { %v4908_v58 = vadd.f32 %v2577_v55, %v2288_v52  ;;  %v2579_v60 = vpop.f32.mrb[31].mxu1 }
 0x151   :  { %2822 = vmatmul.mubr.bf16.gmra.mrb[136].mxu0 %v3782_v47  ;;  %v198_v47 = vld [vmem:[%s5605_s0 + $0x198] sm:$0xff]  ;;  %v3808_v60 = vcombine.low %v190_v24, %v194_v25 }
 0x152   :  { %3111 = vmatmul.mubr.bf16.gmra.mrb[136].mxu1 %v3784_v53  ;;  %2829 = vmatprep.mubr.bf16.mxu0 %v3791_v54  ;;  %v3806_v54 = vcombine.low %v189_v20, %v193_v22  ;;  %v3817_v1 = vcombine.high %v198_v47, %v202_v50  ;;  %v3816_v22 = vcombine.low %v198_v47, %v202_v50 }
 0x153   :  { %3118 = vmatprep.mubr.bf16.mxu1 %v3793_v57 }
 0x154   :  { %v2293_v63 = vpop.f32.mrb[32].mxu0 }
 0x155   :  { %v2582_v4 = vpop.f32.mrb[32].mxu1  ;;  %v2295_v5 = vpop.f32.mrb[33].mxu0 }
 0x156   :  { %v4922_v8 = vadd.f32 %v2582_v4, %v2293_v63  ;;  %v2584_v9 = vpop.f32.mrb[33].mxu1  ;;  %v2296_v10 = vpop.f32.mrb[34].mxu0  ;;  %v205_v5 = vld [vmem:[%s5605_s0 + $0x1d0] sm:$0xff] }
 0x157   :  { %v2585_v14 = vpop.f32.mrb[34].mxu1  ;;  %v2298_v15 = vpop.f32.mrb[35].mxu0 }
 0x158   :  { %v4924_v18 = vadd.f32 %v2585_v14, %v2296_v10  ;;  %v2587_v19 = vpop.f32.mrb[35].mxu1  ;;  %v206_v10 = vld [vmem:[%s5605_s0 + $0x1d8] sm:$0xff]  ;;  %v3814_v15 = vcombine.low %v197_v44, %v201_v45 }
 0x159   :  { %2830 = vmatmul.mubr.bf16.gmra.mrb[140].mxu0 %v3790_v6  ;;  %v209_v6 = vld [vmem:[%s5605_s0 + $0x1f0] sm:$0xff] }
 0x15a   :  { %3119 = vmatmul.mubr.bf16.gmra.mrb[140].mxu1 %v3792_v11  ;;  %2837 = vmatprep.mubr.bf16.mxu0 %v3799_v12  ;;  %v210_v11 = vld [vmem:[%s5605_s0 + $0x1f8] sm:$0xff] }
 0x15b   :  { %3126 = vmatprep.mubr.bf16.mxu1 %v3801_v17  ;;  %v3824_v47 = vcombine.low %v206_v10, %v210_v11 }
 0x15c   :  { %v2301_v23 = vpop.f32.mrb[36].mxu0 }
 0x15d   :  { %v2590_v26 = vpop.f32.mrb[36].mxu1  ;;  %v2303_v28 = vpop.f32.mrb[37].mxu0 }
 0x15e   :  { %v4938_v30 = vadd.f32 %v2590_v26, %v2301_v23  ;;  %v2592_v32 = vpop.f32.mrb[37].mxu1  ;;  %v2304_v33 = vpop.f32.mrb[38].mxu0  ;;  %v3823_v23 = vcombine.high %v205_v5, %v209_v6  ;;  %v3825_v26 = vcombine.high %v206_v10, %v210_v11 }
 0x15f   :  { %v2593_v37 = vpop.f32.mrb[38].mxu1  ;;  %v2306_v38 = vpop.f32.mrb[39].mxu0  ;;  %v213_v32 = vld [vmem:[%s5605_s0 + $0x210] sm:$0xff] }
 0x160   :  { %v4940_v42 = vadd.f32 %v2593_v37, %v2304_v33  ;;  %v2595_v43 = vpop.f32.mrb[39].mxu1  ;;  %v217_v33 = vld [vmem:[%s5605_s0 + $0x230] sm:$0xff]  ;;  %v218_v37 = vld [vmem:[%s5605_s0 + $0x238] sm:$0xff] }
 0x161   :  { %2838 = vmatmul.mubr.bf16.gmra.mrb[144].mxu0 %v3798_v29  ;;  %v3822_v43 = vcombine.low %v205_v5, %v209_v6  ;;  %v3831_v50 = vcombine.high %v213_v32, %v217_v33  ;;  %v3830_v6 = vcombine.low %v213_v32, %v217_v33  ;;  %v234_v32 = vld [vmem:[%s5605_s0 + $0x2b8] sm:$0xff] }
 0x162   :  { %3127 = vmatmul.mubr.bf16.gmra.mrb[144].mxu1 %v3800_v34  ;;  %2845 = vmatprep.mubr.bf16.mxu0 %v3807_v35  ;;  %v214_v35 = vld [vmem:[%s5605_s0 + $0x218] sm:$0xff] }
 0x163   :  { %3134 = vmatprep.mubr.bf16.mxu1 %v3809_v40 }
 0x164   :  { %v2309_v46 = vpop.f32.mrb[40].mxu0 }
 0x165   :  { %v2598_v52 = vpop.f32.mrb[40].mxu1  ;;  %v2311_v53 = vpop.f32.mrb[41].mxu0 }
 0x166   :  { %v4954_v55 = vadd.f32 %v2598_v52, %v2309_v46  ;;  %v2600_v56 = vpop.f32.mrb[41].mxu1  ;;  %v2312_v57 = vpop.f32.mrb[42].mxu0 }
 0x167   :  { %v2601_v62 = vpop.f32.mrb[42].mxu1  ;;  %v2314_v63 = vpop.f32.mrb[43].mxu0 }
 0x168   :  { %v4956_v2 = vadd.f32 %v2601_v62, %v2312_v57  ;;  %v2603_v4 = vpop.f32.mrb[43].mxu1  ;;  %v222_v63 = vld [vmem:[%s5605_s0 + $0x258] sm:$0xff] }
 0x169   :  { %2846 = vmatmul.mubr.bf16.gmra.mrb[148].mxu0 %v3806_v54  ;;  %v3833_v54 = vcombine.high %v214_v35, %v218_v37 }
 0x16a   :  { %3135 = vmatmul.mubr.bf16.gmra.mrb[148].mxu1 %v3808_v60  ;;  %2853 = vmatprep.mubr.bf16.mxu0 %v3815_v61  ;;  %v221_v60 = vld [vmem:[%s5605_s0 + $0x250] sm:$0xff] }
 0x16b   :  { %3142 = vmatprep.mubr.bf16.mxu1 %v3817_v1  ;;  %v225_v61 = vld [vmem:[%s5605_s0 + $0x270] sm:$0xff]  ;;  %v226_v1 = vld [vmem:[%s5605_s0 + $0x278] sm:$0xff] }
 0x16c   :  { %v2317_v9 = vpop.f32.mrb[44].mxu0 }
 0x16d   :  { %v2606_v12 = vpop.f32.mrb[44].mxu1  ;;  %v2319_v14 = vpop.f32.mrb[45].mxu0 }
 0x16e   :  { %v4970_v17 = vadd.f32 %v2606_v12, %v2317_v9  ;;  %v2608_v19 = vpop.f32.mrb[45].mxu1  ;;  %v2320_v20 = vpop.f32.mrb[46].mxu0  ;;  %v3832_v12 = vcombine.low %v214_v35, %v218_v37  ;;  %v3839_v14 = vcombine.high %v221_v60, %v225_v61  ;;  %v3838_v35 = vcombine.low %v221_v60, %v225_v61  ;;  %v238_v61 = vld [vmem:[%s5605_s0 + $0x2d8] sm:$0xff] }
 0x16f   :  { %v2609_v24 = vpop.f32.mrb[46].mxu1  ;;  %v2322_v25 = vpop.f32.mrb[47].mxu0 }
 0x170   :  { %v4972_v28 = vadd.f32 %v2609_v24, %v2320_v20  ;;  %v2611_v29 = vpop.f32.mrb[47].mxu1  ;;  %v3841_v20 = vcombine.high %v222_v63, %v226_v1  ;;  %v229_v24 = vld [vmem:[%s5605_s0 + $0x290] sm:$0xff] }
 0x171   :  { %2854 = vmatmul.mubr.bf16.gmra.mrb[152].mxu0 %v3814_v15  ;;  %v233_v25 = vld [vmem:[%s5605_s0 + $0x2b0] sm:$0xff]  ;;  %v230_v29 = vld [vmem:[%s5605_s0 + $0x298] sm:$0xff] }
 0x172   :  { %3143 = vmatmul.mubr.bf16.gmra.mrb[152].mxu1 %v3816_v22  ;;  %2861 = vmatprep.mubr.bf16.mxu0 %v3823_v23 }
 0x173   :  { %3150 = vmatprep.mubr.bf16.mxu1 %v3825_v26 }
 0x174   :  { %v2325_v34 = vpop.f32.mrb[48].mxu0 }
 0x175   :  { %v2614_v38 = vpop.f32.mrb[48].mxu1  ;;  %v2327_v40 = vpop.f32.mrb[49].mxu0 }
 0x176   :  { %v4986_v44 = vadd.f32 %v2614_v38, %v2325_v34  ;;  %v2616_v45 = vpop.f32.mrb[49].mxu1  ;;  %v2328_v46 = vpop.f32.mrb[50].mxu0 }
 0x177   :  { %v2617_v52 = vpop.f32.mrb[50].mxu1  ;;  %v2330_v53 = vpop.f32.mrb[51].mxu0  ;;  %v3847_v45 = vcombine.high %v229_v24, %v233_v25 }
 0x178   :  { %v4988_v56 = vadd.f32 %v2617_v52, %v2328_v46  ;;  %v2619_v57 = vpop.f32.mrb[51].mxu1 }
 0x179   :  { %2862 = vmatmul.mubr.bf16.gmra.mrb[156].mxu0 %v3822_v43  ;;  %v3840_v43 = vcombine.low %v222_v63, %v226_v1  ;;  %v241_v57 = vld [vmem:[%s5605_s0 + $0x2f0] sm:$0xff] }
 0x17a   :  { %3151 = vmatmul.mubr.bf16.gmra.mrb[156].mxu1 %v3824_v47  ;;  %2869 = vmatprep.mubr.bf16.mxu0 %v3831_v50  ;;  %v3849_v50 = vcombine.high %v230_v29, %v234_v32 }
 0x17b   :  { %3158 = vmatprep.mubr.bf16.mxu1 %v3833_v54  ;;  %v237_v54 = vld [vmem:[%s5605_s0 + $0x2d0] sm:$0xff] }
 0x17c   :  { %v2333_v62 = vpop.f32.mrb[52].mxu0 }
 0x17d   :  { %v2622_v4 = vpop.f32.mrb[52].mxu1  ;;  %v2335_v5 = vpop.f32.mrb[53].mxu0 }
 0x17e   :  { %v5002_v9 = vadd.f32 %v2622_v4, %v2333_v62  ;;  %v2624_v10 = vpop.f32.mrb[53].mxu1  ;;  %v2336_v11 = vpop.f32.mrb[54].mxu0  ;;  %v242_v62 = vld [vmem:[%s5605_s0 + $0x2f8] sm:$0xff]  ;;  %v3846_v4 = vcombine.low %v229_v24, %v233_v25  ;;  %v245_v24 = vld [vmem:[%s5605_s0 + $0x310] sm:$0xff] }
 0x17f   :  { %v2625_v15 = vpop.f32.mrb[54].mxu1  ;;  %v2338_v19 = vpop.f32.mrb[55].mxu0  ;;  %v249_v25 = vld [vmem:[%s5605_s0 + $0x330] sm:$0xff] }
 0x180   :  { %v5004_v22 = vadd.f32 %v2625_v15, %v2336_v11  ;;  %v2627_v23 = vpop.f32.mrb[55].mxu1  ;;  %v3848_v11 = vcombine.low %v230_v29, %v234_v32  ;;  %v3857_v19 = vcombine.high %v238_v61, %v242_v62  ;;  %v246_v29 = vld [vmem:[%s5605_s0 + $0x318] sm:$0xff] }
 0x181   :  { %2870 = vmatmul.mubr.bf16.gmra.mrb[160].mxu0 %v3830_v6  ;;  %v250_v32 = vld [vmem:[%s5605_s0 + $0x338] sm:$0xff] }
 0x182   :  { %3159 = vmatmul.mubr.bf16.gmra.mrb[160].mxu1 %v3832_v12  ;;  %2877 = vmatprep.mubr.bf16.mxu0 %v3839_v14  ;;  %v3855_v12 = vcombine.high %v237_v54, %v241_v57 }
 0x183   :  { %3166 = vmatprep.mubr.bf16.mxu1 %v3841_v20 }
 0x184   :  { %v2341_v26 = vpop.f32.mrb[56].mxu0 }
 0x185   :  { %v2630_v33 = vpop.f32.mrb[56].mxu1  ;;  %v2343_v34 = vpop.f32.mrb[57].mxu0 }
 0x186   :  { %v5018_v37 = vadd.f32 %v2630_v33, %v2341_v26  ;;  %v2632_v38 = vpop.f32.mrb[57].mxu1  ;;  %v2344_v40 = vpop.f32.mrb[58].mxu0 }
 0x187   :  { %v2633_v46 = vpop.f32.mrb[58].mxu1  ;;  %v2346_v47 = vpop.f32.mrb[59].mxu0 }
 0x188   :  { %v5020_v52 = vadd.f32 %v2633_v46, %v2344_v40  ;;  %v2635_v53 = vpop.f32.mrb[59].mxu1  ;;  %v3863_v46 = vcombine.high %v245_v24, %v249_v25 }
 0x189   :  { %2878 = vmatmul.mubr.bf16.gmra.mrb[164].mxu0 %v3838_v35  ;;  %v3854_v35 = vcombine.low %v237_v54, %v241_v57  ;;  %v3865_v53 = vcombine.high %v246_v29, %v250_v32  ;;  %v253_v54 = vld [vmem:[%s5605_s0 + $0x350] sm:$0xff] }
 0x18a   :  { %3167 = vmatmul.mubr.bf16.gmra.mrb[164].mxu1 %v3840_v43  ;;  %2885 = vmatprep.mubr.bf16.mxu0 %v3847_v45  ;;  %v3856_v45 = vcombine.low %v238_v61, %v242_v62  ;;  %v257_v57 = vld [vmem:[%s5605_s0 + $0x370] sm:$0xff]  ;;  %v254_v62 = vld [vmem:[%s5605_s0 + $0x358] sm:$0xff] }
 0x18b   :  { %3174 = vmatprep.mubr.bf16.mxu1 %v3849_v50 }
 0x18c   :  { %v2349_v60 = vpop.f32.mrb[60].mxu0 }
 0x18d   :  { %v2638_v63 = vpop.f32.mrb[60].mxu1  ;;  %v2351_v1 = vpop.f32.mrb[61].mxu0 }
 0x18e   :  { %v5034_v5 = vadd.f32 %v2638_v63, %v2349_v60  ;;  %v2640_v6 = vpop.f32.mrb[61].mxu1  ;;  %v2352_v10 = vpop.f32.mrb[62].mxu0  ;;  %v258_v1 = vld [vmem:[%s5605_s0 + $0x378] sm:$0xff] }
 0x18f   :  { %v2641_v14 = vpop.f32.mrb[62].mxu1  ;;  %v2354_v15 = vpop.f32.mrb[63].mxu0 }
 0x190   :  { %v5036_v20 = vadd.f32 %v2641_v14, %v2352_v10  ;;  %v2643_v23 = vpop.f32.mrb[63].mxu1  ;;  %v3862_v10 = vcombine.low %v245_v24, %v249_v25  ;;  %v3864_v15 = vcombine.low %v246_v29, %v250_v32  ;;  %v261_v24 = vld [vmem:[%s5605_s0 + $0x390] sm:$0xff]  ;;  %v262_v32 = vld [vmem:[%s5605_s0 + $0x398] sm:$0xff] }
 0x191   :  { %2886 = vmatmul.mubr.bf16.gmra.mrb[168].mxu0 %v3846_v4  ;;  %v265_v25 = vld [vmem:[%s5605_s0 + $0x3b0] sm:$0xff] }
 0x192   :  { %3175 = vmatmul.mubr.bf16.gmra.mrb[168].mxu1 %v3848_v11  ;;  %2893 = vmatprep.mubr.bf16.mxu0 %v3855_v12 }
 0x193   :  { %3182 = vmatprep.mubr.bf16.mxu1 %v3857_v19  ;;  %v3871_v19 = vcombine.high %v253_v54, %v257_v57 }
 0x194   :  { %v2357_v26 = vpop.f32.mrb[64].mxu0 }
 0x195   :  { %v2646_v33 = vpop.f32.mrb[64].mxu1  ;;  %v2359_v34 = vpop.f32.mrb[65].mxu0 }
 0x196   :  { %v5050_v38 = vadd.f32 %v2646_v33, %v2357_v26  ;;  %v2648_v40 = vpop.f32.mrb[65].mxu1  ;;  %v2360_v43 = vpop.f32.mrb[66].mxu0  ;;  %v3873_v33 = vcombine.high %v254_v62, %v258_v1 }
 0x197   :  { %v2649_v47 = vpop.f32.mrb[66].mxu1  ;;  %v2362_v50 = vpop.f32.mrb[67].mxu0  ;;  %v266_v40 = vld [vmem:[%s5605_s0 + $0x3b8] sm:$0xff] }
 0x198   :  { %v5052_v60 = vadd.f32 %v2649_v47, %v2360_v43  ;;  %v2651_v63 = vpop.f32.mrb[67].mxu1 }
 0x199   :  { %2894 = vmatmul.mubr.bf16.gmra.mrb[172].mxu0 %v3854_v35  ;;  %v3872_v63 = vcombine.low %v254_v62, %v258_v1  ;;  %v270_v1 = vld [vmem:[%s5605_s0 + $0x3d8] sm:$0xff] }
 0x19a   :  { %3183 = vmatmul.mubr.bf16.gmra.mrb[172].mxu1 %v3856_v45  ;;  %2901 = vmatprep.mubr.bf16.mxu0 %v3863_v46  ;;  %v3870_v46 = vcombine.low %v253_v54, %v257_v57  ;;  %v269_v54 = vld [vmem:[%s5605_s0 + $0x3d0] sm:$0xff] }
 0x19b   :  { %3190 = vmatprep.mubr.bf16.mxu1 %v3865_v53  ;;  %v273_v57 = vld [vmem:[%s5605_s0 + $0x3f0] sm:$0xff] }
 0x19c   :  { %v2365_v61 = vpop.f32.mrb[68].mxu0 }
 0x19d   :  { %v2654_v4 = vpop.f32.mrb[68].mxu1  ;;  %v2367_v6 = vpop.f32.mrb[69].mxu0 }
 0x19e   :  { %v5066_v11 = vadd.f32 %v2654_v4, %v2365_v61  ;;  %v2656_v12 = vpop.f32.mrb[69].mxu1  ;;  %v2368_v14 = vpop.f32.mrb[70].mxu0  ;;  %v3879_v61 = vcombine.high %v261_v24, %v265_v25 }
 0x19f   :  { %v2657_v23 = vpop.f32.mrb[70].mxu1  ;;  %v2370_v26 = vpop.f32.mrb[71].mxu0 }
 0x1a0   :  { %v5068_v34 = vadd.f32 %v2657_v23, %v2368_v14  ;;  %v2659_v35 = vpop.f32.mrb[71].mxu1  ;;  %v3878_v26 = vcombine.low %v261_v24, %v265_v25  ;;  %v277_v24 = vld [vmem:[%s5605_s0 + $0x410] sm:$0xff] }
 0x1a1   :  { %2902 = vmatmul.mubr.bf16.gmra.mrb[176].mxu0 %v3862_v10  ;;  %v3881_v10 = vcombine.high %v262_v32, %v266_v40  ;;  %v281_v25 = vld [vmem:[%s5605_s0 + $0x430] sm:$0xff] }
 0x1a2   :  { %3191 = vmatmul.mubr.bf16.gmra.mrb[176].mxu1 %v3864_v15  ;;  %2909 = vmatprep.mubr.bf16.mxu0 %v3871_v19  ;;  %v274_v15 = vld [vmem:[%s5605_s0 + $0x3f8] sm:$0xff] }
 0x1a3   :  { %3198 = vmatprep.mubr.bf16.mxu1 %v3873_v33 }
 0x1a4   :  { %v2373_v29 = vpop.f32.mrb[72].mxu0 }
 0x1a5   :  { %v2662_v43 = vpop.f32.mrb[72].mxu1  ;;  %v2375_v45 = vpop.f32.mrb[73].mxu0 }
 0x1a6   :  { %v5082_v47 = vadd.f32 %v2662_v43, %v2373_v29  ;;  %v2664_v50 = vpop.f32.mrb[73].mxu1  ;;  %v2376_v53 = vpop.f32.mrb[74].mxu0  ;;  %v3880_v43 = vcombine.low %v262_v32, %v266_v40  ;;  %v3887_v45 = vcombine.high %v269_v54, %v273_v57  ;;  %v278_v40 = vld [vmem:[%s5605_s0 + $0x418] sm:$0xff] }
 0x1a7   :  { %v2665_v4 = vpop.f32.mrb[74].mxu1  ;;  %v2378_v6 = vpop.f32.mrb[75].mxu0 }
 0x1a8   :  { %v5084_v12 = vadd.f32 %v2665_v4, %v2376_v53  ;;  %v2667_v14 = vpop.f32.mrb[75].mxu1  ;;  %v3889_v53 = vcombine.high %v270_v1, %v274_v15  ;;  %v282_v4 = vld [vmem:[%s5605_s0 + $0x438] sm:$0xff] }
 0x1a9   :  { %2910 = vmatmul.mubr.bf16.gmra.mrb[180].mxu0 %v3870_v46  ;;  %v3886_v14 = vcombine.low %v269_v54, %v273_v57  ;;  %v285_v54 = vld [vmem:[%s5605_s0 + $0x450] sm:$0xff] }
 0x1aa   :  { %3199 = vmatmul.mubr.bf16.gmra.mrb[180].mxu1 %v3872_v63  ;;  %2917 = vmatprep.mubr.bf16.mxu0 %v3879_v61  ;;  %v289_v57 = vld [vmem:[%s5605_s0 + $0x470] sm:$0xff] }
 0x1ab   :  { %3206 = vmatprep.mubr.bf16.mxu1 %v3881_v10 }
 0x1ac   :  { %v2381_v62 = vpop.f32.mrb[76].mxu0 }
 0x1ad   :  { %v2670_v19 = vpop.f32.mrb[76].mxu1  ;;  %v2383_v23 = vpop.f32.mrb[77].mxu0 }
 0x1ae   :  { %v5098_v33 = vadd.f32 %v2670_v19, %v2381_v62  ;;  %v2672_v35 = vpop.f32.mrb[77].mxu1  ;;  %v2384_v29 = vpop.f32.mrb[78].mxu0 }
 0x1af   :  { %v2673_v46 = vpop.f32.mrb[78].mxu1  ;;  %v2386_v50 = vpop.f32.mrb[79].mxu0  ;;  %v3895_v35 = vcombine.high %v277_v24, %v281_v25 }
 0x1b0   :  { %5609 = vst [vmem:[#allocation2_spill] sm:$0xff] %v5098_v33  ;;  %v5100_v63 = vadd.f32 %v2673_v46, %v2384_v29  ;;  %v2675_v61 = vpop.f32.mrb[79].mxu1 }
 0x1b1   :  { %2918 = vmatmul.mubr.bf16.gmra.mrb[184].mxu0 %v3878_v26  ;;  %v3888_v26 = vcombine.low %v270_v1, %v274_v15  ;;  %v286_v15 = vld [vmem:[%s5605_s0 + $0x458] sm:$0xff] }
 0x1b2   :  { %5610 = vst [vmem:[#allocation3_spill] sm:$0xff] %v5100_v63  ;;  %3207 = vmatmul.mubr.bf16.gmra.mrb[184].mxu1 %v3880_v43  ;;  %2925 = vmatprep.mubr.bf16.mxu0 %v3887_v45  ;;  %v3897_v45 = vcombine.high %v278_v40, %v282_v4 }
 0x1b3   :  { %3214 = vmatprep.mubr.bf16.mxu1 %v3889_v53  ;;  %v290_v53 = vld [vmem:[%s5605_s0 + $0x478] sm:$0xff] }
 0x1b4   :  { %v2389_v32 = vpop.f32.mrb[80].mxu0 }
 0x1b5   :  { %v2678_v6 = vpop.f32.mrb[80].mxu1  ;;  %v2391_v10 = vpop.f32.mrb[81].mxu0 }
 0x1b6   :  { %v5114_v62 = vadd.f32 %v2678_v6, %v2389_v32  ;;  %v2680_v19 = vpop.f32.mrb[81].mxu1  ;;  %v2392_v23 = vpop.f32.mrb[82].mxu0  ;;  %v3894_v6 = vcombine.low %v277_v24, %v281_v25  ;;  %v293_v24 = vld [vmem:[%s5605_s0 + $0x490] sm:$0xff] }
 0x1b7   :  { %v2681_v29 = vpop.f32.mrb[82].mxu1  ;;  %v2394_v43 = vpop.f32.mrb[83].mxu0  ;;  %v297_v25 = vld [vmem:[%s5605_s0 + $0x4b0] sm:$0xff] }
 0x1b8   :  { %5611 = vst [vmem:[#allocation4_spill] sm:$0xff] %v5114_v62  ;;  %v5116_v46 = vadd.f32 %v2681_v29, %v2392_v23  ;;  %v2683_v50 = vpop.f32.mrb[83].mxu1  ;;  %v3896_v23 = vcombine.low %v278_v40, %v282_v4  ;;  %v3905_v43 = vcombine.high %v286_v15, %v290_v53  ;;  %v294_v4 = vld [vmem:[%s5605_s0 + $0x498] sm:$0xff] }
 0x1b9   :  { %2926 = vmatmul.mubr.bf16.gmra.mrb[188].mxu0 %v3886_v14 }
 0x1ba   :  { %5612 = vst [vmem:[#allocation5_spill] sm:$0xff] %v5116_v46  ;;  %3215 = vmatmul.mubr.bf16.gmra.mrb[188].mxu1 %v3888_v26  ;;  %2933 = vmatprep.mubr.bf16.mxu0 %v3895_v35  ;;  %v3903_v26 = vcombine.high %v285_v54, %v289_v57 }
 0x1bb   :  { %3222 = vmatprep.mubr.bf16.mxu1 %v3897_v45 }
 0x1bc   :  { %v2397_v1 = vpop.f32.mrb[84].mxu0 }
 0x1bd   :  { %v2686_v61 = vpop.f32.mrb[84].mxu1  ;;  %v2399_v32 = vpop.f32.mrb[85].mxu0 }
 0x1be   :  { %v5130_v10 = vadd.f32 %v2686_v61, %v2397_v1  ;;  %v2688_v14 = vpop.f32.mrb[85].mxu1  ;;  %v2400_v19 = vpop.f32.mrb[86].mxu0  ;;  %v298_v1 = vld [vmem:[%s5605_s0 + $0x4b8] sm:$0xff] }
 0x1bf   :  { %v2689_v35 = vpop.f32.mrb[86].mxu1  ;;  %v2402_v29 = vpop.f32.mrb[87].mxu0 }
 0x1c0   :  { %5613 = vst [vmem:[#allocation6_spill] sm:$0xff] %v5130_v10  ;;  %v5132_v45 = vadd.f32 %v2689_v35, %v2400_v19  ;;  %v2691_v50 = vpop.f32.mrb[87].mxu1  ;;  %v3911_v35 = vcombine.high %v293_v24, %v297_v25 }
 0x1c1   :  { %2934 = vmatmul.mubr.bf16.gmra.mrb[192].mxu0 %v3894_v6  ;;  %v3902_v6 = vcombine.low %v285_v54, %v289_v57  ;;  %v3913_v50 = vcombine.high %v294_v4, %v298_v1  ;;  %v301_v54 = vld [vmem:[%s5605_s0 + $0x4d0] sm:$0xff] }
 0x1c2   :  { %5614 = vst [vmem:[#allocation7_spill] sm:$0xff] %v5132_v45  ;;  %3223 = vmatmul.mubr.bf16.gmra.mrb[192].mxu1 %v3896_v23  ;;  %2941 = vmatprep.mubr.bf16.mxu0 %v3903_v26  ;;  %v3904_v26 = vcombine.low %v286_v15, %v290_v53  ;;  %v305_v57 = vld [vmem:[%s5605_s0 + $0x4f0] sm:$0xff]  ;;  %v302_v53 = vld [vmem:[%s5605_s0 + $0x4d8] sm:$0xff] }
 0x1c3   :  { %3230 = vmatprep.mubr.bf16.mxu1 %v3905_v43 }
 0x1c4   :  { %v2405_v40 = vpop.f32.mrb[88].mxu0 }
 0x1c5   :  { %v2694_v61 = vpop.f32.mrb[88].mxu1  ;;  %v2407_v32 = vpop.f32.mrb[89].mxu0 }
 0x1c6   :  { %v5146_v14 = vadd.f32 %v2694_v61, %v2405_v40  ;;  %v2696_v19 = vpop.f32.mrb[89].mxu1  ;;  %v2408_v23 = vpop.f32.mrb[90].mxu0  ;;  %v3910_v32 = vcombine.low %v293_v24, %v297_v25  ;;  %v309_v24 = vld [vmem:[%s5605_s0 + $0x510] sm:$0xff] }
 0x1c7   :  { %v2697_v29 = vpop.f32.mrb[90].mxu1  ;;  %v2410_v43 = vpop.f32.mrb[91].mxu0  ;;  %v313_v25 = vld [vmem:[%s5605_s0 + $0x530] sm:$0xff] }
 0x1c8   :  { %5615 = vst [vmem:[#allocation8_spill] sm:$0xff] %v5146_v14  ;;  %v5148_v45 = vadd.f32 %v2697_v29, %v2408_v23  ;;  %v2699_v10 = vpop.f32.mrb[91].mxu1 }
 0x1c9   :  { %2942 = vmatmul.mubr.bf16.gmra.mrb[196].mxu0 %v3902_v6  ;;  %v306_v10 = vld [vmem:[%s5605_s0 + $0x4f8] sm:$0xff] }
 0x1ca   :  { %5616 = vst [vmem:[#allocation9_spill] sm:$0xff] %v5148_v45  ;;  %3231 = vmatmul.mubr.bf16.gmra.mrb[196].mxu1 %v3904_v26  ;;  %2949 = vmatprep.mubr.bf16.mxu0 %v3911_v35  ;;  %v3912_v26 = vcombine.low %v294_v4, %v298_v1  ;;  %v3919_v35 = vcombine.high %v301_v54, %v305_v57  ;;  %v310_v1 = vld [vmem:[%s5605_s0 + $0x518] sm:$0xff] }
 0x1cb   :  { %3238 = vmatprep.mubr.bf16.mxu1 %v3913_v50  ;;  %v3921_v50 = vcombine.high %v302_v53, %v306_v10 }
 0x1cc   :  { %v2413_v15 = vpop.f32.mrb[92].mxu0 }
 0x1cd   :  { %v2702_v40 = vpop.f32.mrb[92].mxu1  ;;  %v2415_v61 = vpop.f32.mrb[93].mxu0 }
 0x1ce   :  { %v5162_v6 = vadd.f32 %v2702_v40, %v2413_v15  ;;  %v2704_v19 = vpop.f32.mrb[93].mxu1  ;;  %v2416_v23 = vpop.f32.mrb[94].mxu0  ;;  %v3918_v61 = vcombine.low %v301_v54, %v305_v57  ;;  %v317_v54 = vld [vmem:[%s5605_s0 + $0x550] sm:$0xff] }
 0x1cf   :  { %v2705_v29 = vpop.f32.mrb[94].mxu1  ;;  %v2418_v43 = vpop.f32.mrb[95].mxu0  ;;  %v321_v57 = vld [vmem:[%s5605_s0 + $0x570] sm:$0xff] }
 0x1d0   :  { %5617 = vst [vmem:[#allocation10_spill] sm:$0xff] %v5162_v6  ;;  %v5164_v45 = vadd.f32 %v2705_v29, %v2416_v23  ;;  %v2707_v14 = vpop.f32.mrb[95].mxu1 }
 0x1d1   :  { %2950 = vmatmul.mubr.bf16.gmra.mrb[200].mxu0 %v3910_v32  ;;  %v314_v14 = vld [vmem:[%s5605_s0 + $0x538] sm:$0xff] }
 0x1d2   :  { %5618 = vst [vmem:[#allocation11_spill] sm:$0xff] %v5164_v45  ;;  %3239 = vmatmul.mubr.bf16.gmra.mrb[200].mxu1 %v3912_v26  ;;  %2957 = vmatprep.mubr.bf16.mxu0 %v3919_v35  ;;  %v3920_v26 = vcombine.low %v302_v53, %v306_v10  ;;  %v3927_v35 = vcombine.high %v309_v24, %v313_v25  ;;  %v318_v10 = vld [vmem:[%s5605_s0 + $0x558] sm:$0xff] }
 0x1d3   :  { %3246 = vmatprep.mubr.bf16.mxu1 %v3921_v50  ;;  %v3929_v50 = vcombine.high %v310_v1, %v314_v14 }
 0x1d4   :  { %v2421_v4 = vpop.f32.mrb[96].mxu0 }
 0x1d5   :  { %v2710_v15 = vpop.f32.mrb[96].mxu1  ;;  %v2423_v40 = vpop.f32.mrb[97].mxu0 }
 0x1d6   :  { %v5178_v32 = vadd.f32 %v2710_v15, %v2421_v4  ;;  %v2712_v19 = vpop.f32.mrb[97].mxu1  ;;  %v2424_v23 = vpop.f32.mrb[98].mxu0  ;;  %v3926_v40 = vcombine.low %v309_v24, %v313_v25  ;;  %v325_v24 = vld [vmem:[%s5605_s0 + $0x590] sm:$0xff] }
 0x1d7   :  { %v2713_v29 = vpop.f32.mrb[98].mxu1  ;;  %v2426_v43 = vpop.f32.mrb[99].mxu0  ;;  %v329_v25 = vld [vmem:[%s5605_s0 + $0x5b0] sm:$0xff] }
 0x1d8   :  { %5619 = vst [vmem:[#allocation12_spill] sm:$0xff] %v5178_v32  ;;  %v5180_v45 = vadd.f32 %v2713_v29, %v2424_v23  ;;  %v2715_v6 = vpop.f32.mrb[99].mxu1 }
 0x1d9   :  { %2958 = vmatmul.mubr.bf16.gmra.mrb[204].mxu0 %v3918_v61  ;;  %v322_v6 = vld [vmem:[%s5605_s0 + $0x578] sm:$0xff] }
 0x1da   :  { %5620 = vst [vmem:[#allocation13_spill] sm:$0xff] %v5180_v45  ;;  %3247 = vmatmul.mubr.bf16.gmra.mrb[204].mxu1 %v3920_v26  ;;  %2965 = vmatprep.mubr.bf16.mxu0 %v3927_v35  ;;  %v3928_v26 = vcombine.low %v310_v1, %v314_v14  ;;  %v3935_v35 = vcombine.high %v317_v54, %v321_v57  ;;  %v326_v14 = vld [vmem:[%s5605_s0 + $0x598] sm:$0xff] }
 0x1db   :  { %3254 = vmatprep.mubr.bf16.mxu1 %v3929_v50  ;;  %v3937_v50 = vcombine.high %v318_v10, %v322_v6 }
 0x1dc   :  { %v2429_v53 = vpop.f32.mrb[100].mxu0 }
 0x1dd   :  { %v2718_v4 = vpop.f32.mrb[100].mxu1  ;;  %v2431_v15 = vpop.f32.mrb[101].mxu0 }
 0x1de   :  { %v5194_v61 = vadd.f32 %v2718_v4, %v2429_v53  ;;  %v2720_v19 = vpop.f32.mrb[101].mxu1  ;;  %v2432_v23 = vpop.f32.mrb[102].mxu0  ;;  %v3934_v15 = vcombine.low %v317_v54, %v321_v57  ;;  %v333_v54 = vld [vmem:[%s5605_s0 + $0x5d0] sm:$0xff] }
 0x1df   :  { %v2721_v29 = vpop.f32.mrb[102].mxu1  ;;  %v2434_v43 = vpop.f32.mrb[103].mxu0  ;;  %v337_v57 = vld [vmem:[%s5605_s0 + $0x5f0] sm:$0xff] }
 0x1e0   :  { %5621 = vst [vmem:[#allocation14_spill] sm:$0xff] %v5194_v61  ;;  %v5196_v45 = vadd.f32 %v2721_v29, %v2432_v23  ;;  %v2723_v32 = vpop.f32.mrb[103].mxu1 }
 0x1e1   :  { %2966 = vmatmul.mubr.bf16.gmra.mrb[208].mxu0 %v3926_v40  ;;  %v330_v32 = vld [vmem:[%s5605_s0 + $0x5b8] sm:$0xff] }
 0x1e2   :  { %5622 = vst [vmem:[#allocation15_spill] sm:$0xff] %v5196_v45  ;;  %3255 = vmatmul.mubr.bf16.gmra.mrb[208].mxu1 %v3928_v26  ;;  %2973 = vmatprep.mubr.bf16.mxu0 %v3935_v35  ;;  %v3936_v26 = vcombine.low %v318_v10, %v322_v6  ;;  %v3943_v35 = vcombine.high %v325_v24, %v329_v25  ;;  %v334_v6 = vld [vmem:[%s5605_s0 + $0x5d8] sm:$0xff] }
 0x1e3   :  { %3262 = vmatprep.mubr.bf16.mxu1 %v3937_v50  ;;  %v3945_v50 = vcombine.high %v326_v14, %v330_v32 }
 0x1e4   :  { %v2437_v1 = vpop.f32.mrb[104].mxu0 }
 0x1e5   :  { %v2726_v53 = vpop.f32.mrb[104].mxu1  ;;  %v2439_v4 = vpop.f32.mrb[105].mxu0 }
 0x1e6   :  { %v5210_v40 = vadd.f32 %v2726_v53, %v2437_v1  ;;  %v2728_v19 = vpop.f32.mrb[105].mxu1  ;;  %v2440_v23 = vpop.f32.mrb[106].mxu0  ;;  %v3942_v4 = vcombine.low %v325_v24, %v329_v25  ;;  %v341_v24 = vld [vmem:[%s5605_s0 + $0x610] sm:$0xff] }
 0x1e7   :  { %v2729_v29 = vpop.f32.mrb[106].mxu1  ;;  %v2442_v43 = vpop.f32.mrb[107].mxu0  ;;  %v345_v25 = vld [vmem:[%s5605_s0 + $0x630] sm:$0xff] }
 0x1e8   :  { %5623 = vst [vmem:[#allocation16_spill] sm:$0xff] %v5210_v40  ;;  %v5212_v45 = vadd.f32 %v2729_v29, %v2440_v23  ;;  %v2731_v61 = vpop.f32.mrb[107].mxu1 }
 0x1e9   :  { %2974 = vmatmul.mubr.bf16.gmra.mrb[212].mxu0 %v3934_v15  ;;  %v338_v61 = vld [vmem:[%s5605_s0 + $0x5f8] sm:$0xff] }
 0x1ea   :  { %5624 = vst [vmem:[#allocation17_spill] sm:$0xff] %v5212_v45  ;;  %3263 = vmatmul.mubr.bf16.gmra.mrb[212].mxu1 %v3936_v26  ;;  %2981 = vmatprep.mubr.bf16.mxu0 %v3943_v35  ;;  %v3944_v26 = vcombine.low %v326_v14, %v330_v32  ;;  %v3951_v35 = vcombine.high %v333_v54, %v337_v57  ;;  %v342_v32 = vld [vmem:[%s5605_s0 + $0x618] sm:$0xff] }
 0x1eb   :  { %3270 = vmatprep.mubr.bf16.mxu1 %v3945_v50  ;;  %v3953_v50 = vcombine.high %v334_v6, %v338_v61 }
 0x1ec   :  { %v2445_v10 = vpop.f32.mrb[108].mxu0 }
 0x1ed   :  { %v2734_v1 = vpop.f32.mrb[108].mxu1  ;;  %v2447_v53 = vpop.f32.mrb[109].mxu0 }
 0x1ee   :  { %v5226_v15 = vadd.f32 %v2734_v1, %v2445_v10  ;;  %v2736_v19 = vpop.f32.mrb[109].mxu1  ;;  %v2448_v23 = vpop.f32.mrb[110].mxu0  ;;  %v3950_v53 = vcombine.low %v333_v54, %v337_v57  ;;  %v349_v54 = vld [vmem:[%s5605_s0 + $0x650] sm:$0xff] }
 0x1ef   :  { %v2737_v29 = vpop.f32.mrb[110].mxu1  ;;  %v2450_v43 = vpop.f32.mrb[111].mxu0  ;;  %v353_v57 = vld [vmem:[%s5605_s0 + $0x670] sm:$0xff] }
 0x1f0   :  { %5625 = vst [vmem:[#allocation18_spill] sm:$0xff] %v5226_v15  ;;  %v5228_v45 = vadd.f32 %v2737_v29, %v2448_v23  ;;  %v2739_v40 = vpop.f32.mrb[111].mxu1 }
 0x1f1   :  { %2982 = vmatmul.mubr.bf16.gmra.mrb[216].mxu0 %v3942_v4  ;;  %v346_v40 = vld [vmem:[%s5605_s0 + $0x638] sm:$0xff] }
 0x1f2   :  { %5626 = vst [vmem:[#allocation19_spill] sm:$0xff] %v5228_v45  ;;  %3271 = vmatmul.mubr.bf16.gmra.mrb[216].mxu1 %v3944_v26  ;;  %2989 = vmatprep.mubr.bf16.mxu0 %v3951_v35  ;;  %v3952_v26 = vcombine.low %v334_v6, %v338_v61  ;;  %v3959_v35 = vcombine.high %v341_v24, %v345_v25  ;;  %v350_v61 = vld [vmem:[%s5605_s0 + $0x658] sm:$0xff] }
 0x1f3   :  { %3278 = vmatprep.mubr.bf16.mxu1 %v3953_v50  ;;  %v3961_v50 = vcombine.high %v342_v32, %v346_v40 }
 0x1f4   :  { %v2453_v14 = vpop.f32.mrb[112].mxu0 }
 0x1f5   :  { %v2742_v10 = vpop.f32.mrb[112].mxu1  ;;  %v2455_v1 = vpop.f32.mrb[113].mxu0 }
 0x1f6   :  { %v5242_v4 = vadd.f32 %v2742_v10, %v2453_v14  ;;  %v2744_v19 = vpop.f32.mrb[113].mxu1  ;;  %v2456_v23 = vpop.f32.mrb[114].mxu0  ;;  %v3958_v1 = vcombine.low %v341_v24, %v345_v25  ;;  %v357_v24 = vld [vmem:[%s5605_s0 + $0x690] sm:$0xff] }
 0x1f7   :  { %v2745_v29 = vpop.f32.mrb[114].mxu1  ;;  %v2458_v43 = vpop.f32.mrb[115].mxu0  ;;  %v361_v25 = vld [vmem:[%s5605_s0 + $0x6b0] sm:$0xff] }
 0x1f8   :  { %5627 = vst [vmem:[#allocation20_spill] sm:$0xff] %v5242_v4  ;;  %v5244_v45 = vadd.f32 %v2745_v29, %v2456_v23  ;;  %v2747_v15 = vpop.f32.mrb[115].mxu1 }
 0x1f9   :  { %2990 = vmatmul.mubr.bf16.gmra.mrb[220].mxu0 %v3950_v53  ;;  %v354_v15 = vld [vmem:[%s5605_s0 + $0x678] sm:$0xff] }
 0x1fa   :  { %5628 = vst [vmem:[#allocation21_spill] sm:$0xff] %v5244_v45  ;;  %3279 = vmatmul.mubr.bf16.gmra.mrb[220].mxu1 %v3952_v26  ;;  %2997 = vmatprep.mubr.bf16.mxu0 %v3959_v35  ;;  %v3960_v26 = vcombine.low %v342_v32, %v346_v40  ;;  %v3967_v35 = vcombine.high %v349_v54, %v353_v57  ;;  %v358_v40 = vld [vmem:[%s5605_s0 + $0x698] sm:$0xff] }
 0x1fb   :  { %3286 = vmatprep.mubr.bf16.mxu1 %v3961_v50  ;;  %v3969_v50 = vcombine.high %v350_v61, %v354_v15 }
 0x1fc   :  { %v2461_v6 = vpop.f32.mrb[116].mxu0 }
 0x1fd   :  { %v2750_v14 = vpop.f32.mrb[116].mxu1  ;;  %v2463_v10 = vpop.f32.mrb[117].mxu0 }
 0x1fe   :  { %v5258_v53 = vadd.f32 %v2750_v14, %v2461_v6  ;;  %v2752_v19 = vpop.f32.mrb[117].mxu1  ;;  %v2464_v23 = vpop.f32.mrb[118].mxu0  ;;  %v3966_v10 = vcombine.low %v349_v54, %v353_v57  ;;  %v365_v54 = vld [vmem:[%s5605_s0 + $0x6d0] sm:$0xff] }
 0x1ff   :  { %v2753_v29 = vpop.f32.mrb[118].mxu1  ;;  %v2466_v43 = vpop.f32.mrb[119].mxu0  ;;  %v369_v57 = vld [vmem:[%s5605_s0 + $0x6f0] sm:$0xff] }
 0x200   :  { %5629 = vst [vmem:[#allocation22_spill] sm:$0xff] %v5258_v53  ;;  %v5260_v45 = vadd.f32 %v2753_v29, %v2464_v23  ;;  %v2755_v4 = vpop.f32.mrb[119].mxu1 }
 0x201   :  { %2998 = vmatmul.mubr.bf16.gmra.mrb[224].mxu0 %v3958_v1  ;;  %v362_v4 = vld [vmem:[%s5605_s0 + $0x6b8] sm:$0xff] }
 0x202   :  { %5630 = vst [vmem:[#allocation23_spill] sm:$0xff] %v5260_v45  ;;  %3287 = vmatmul.mubr.bf16.gmra.mrb[224].mxu1 %v3960_v26  ;;  %3005 = vmatprep.mubr.bf16.mxu0 %v3967_v35  ;;  %v3968_v26 = vcombine.low %v350_v61, %v354_v15  ;;  %v3975_v35 = vcombine.high %v357_v24, %v361_v25  ;;  %v366_v15 = vld [vmem:[%s5605_s0 + $0x6d8] sm:$0xff] }
 0x203   :  { %3294 = vmatprep.mubr.bf16.mxu1 %v3969_v50  ;;  %v3977_v50 = vcombine.high %v358_v40, %v362_v4 }
 0x204   :  { %v2469_v32 = vpop.f32.mrb[120].mxu0 }
 0x205   :  { %v2758_v6 = vpop.f32.mrb[120].mxu1  ;;  %v2471_v14 = vpop.f32.mrb[121].mxu0 }
 0x206   :  { %v5274_v1 = vadd.f32 %v2758_v6, %v2469_v32  ;;  %v2760_v19 = vpop.f32.mrb[121].mxu1  ;;  %v2472_v23 = vpop.f32.mrb[122].mxu0  ;;  %v3974_v14 = vcombine.low %v357_v24, %v361_v25  ;;  %v373_v24 = vld [vmem:[%s5605_s0 + $0x710] sm:$0xff] }
 0x207   :  { %v2761_v29 = vpop.f32.mrb[122].mxu1  ;;  %v2474_v43 = vpop.f32.mrb[123].mxu0  ;;  %v377_v25 = vld [vmem:[%s5605_s0 + $0x730] sm:$0xff] }
 0x208   :  { %5631 = vst [vmem:[#allocation24_spill] sm:$0xff] %v5274_v1  ;;  %v5276_v45 = vadd.f32 %v2761_v29, %v2472_v23  ;;  %v2763_v53 = vpop.f32.mrb[123].mxu1 }
 0x209   :  { %3006 = vmatmul.mubr.bf16.gmra.mrb[228].mxu0 %v3966_v10  ;;  %v370_v53 = vld [vmem:[%s5605_s0 + $0x6f8] sm:$0xff] }
 0x20a   :  { %5632 = vst [vmem:[#allocation25_spill] sm:$0xff] %v5276_v45  ;;  %3295 = vmatmul.mubr.bf16.gmra.mrb[228].mxu1 %v3968_v26  ;;  %3013 = vmatprep.mubr.bf16.mxu0 %v3975_v35  ;;  %v3976_v26 = vcombine.low %v358_v40, %v362_v4  ;;  %v3983_v35 = vcombine.high %v365_v54, %v369_v57  ;;  %v374_v4 = vld [vmem:[%s5605_s0 + $0x718] sm:$0xff] }
 0x20b   :  { %3302 = vmatprep.mubr.bf16.mxu1 %v3977_v50  ;;  %v3985_v50 = vcombine.high %v366_v15, %v370_v53 }
 0x20c   :  { %v2477_v61 = vpop.f32.mrb[124].mxu0 }
 0x20d   :  { %v2766_v32 = vpop.f32.mrb[124].mxu1  ;;  %v2479_v6 = vpop.f32.mrb[125].mxu0 }
 0x20e   :  { %v5290_v10 = vadd.f32 %v2766_v32, %v2477_v61  ;;  %v2768_v19 = vpop.f32.mrb[125].mxu1  ;;  %v2480_v23 = vpop.f32.mrb[126].mxu0 }
 0x20f   :  { %v2769_v29 = vpop.f32.mrb[126].mxu1  ;;  %v2482_v43 = vpop.f32.mrb[127].mxu0 }
 0x210   :  { %5633 = vst [vmem:[#allocation26_spill] sm:$0xff] %v5290_v10  ;;  %v5292_v45 = vadd.f32 %v2769_v29, %v2480_v23  ;;  %v2771_v1 = vpop.f32.mrb[127].mxu1 }
 0x211   :  { %3014 = vmatmul.mubr.bf16.gmra.mrb[232].mxu0 %v3974_v14  ;;  %v378_v1 = vld [vmem:[%s5605_s0 + $0x738] sm:$0xff]  ;;  %v3982_v14 = vcombine.low %v365_v54, %v369_v57  ;;  %v3990_v54 = vcombine.low %v373_v24, %v377_v25 }
 0x212   :  { %5634 = vst [vmem:[#allocation27_spill] sm:$0xff] %v5292_v45  ;;  %3303 = vmatmul.mubr.bf16.gmra.mrb[232].mxu1 %v3976_v26  ;;  %3021 = vmatprep.mubr.bf16.mxu0 %v3983_v35  ;;  %v3984_v26 = vcombine.low %v366_v15, %v370_v53  ;;  %v3991_v35 = vcombine.high %v373_v24, %v377_v25  ;;  %v386_v57 = vld [vmem:[%s5605_s0 + $0x778] sm:$0xff] }
 0x213   :  { %3310 = vmatprep.mubr.bf16.mxu1 %v3985_v50  ;;  %v3993_v10 = vcombine.high %v374_v4, %v378_v1 }
 0x214   :  { %v2807_v40 = vpop.f32.mrb[128].mxu0 }
 0x215   :  { %v2808_v61 = vadd.f32 %v2807_v40, %v4794_v41  ;;  %v3096_v32 = vpop.f32.mrb[128].mxu1  ;;  %v2809_v6 = vpop.f32.mrb[129].mxu0  ;;  %v381_v41 = vld [vmem:[%s5605_s0 + $0x750] sm:$0xff] }
 0x216   :  { %v3098_v19 = vpop.f32.mrb[129].mxu1  ;;  %v2810_v23 = vpop.f32.mrb[130].mxu0  ;;  %v3992_v6 = vcombine.low %v374_v4, %v378_v1  ;;  %v389_v4 = vld [vmem:[%s5605_s0 + $0x790] sm:$0xff] }
 0x217   :  { %v3097_v29 = vadd.f32 %v3096_v32, %v2808_v61  ;;  %v2811_v43 = vadd.f32 %v2810_v23, %v4796_v49  ;;  %v3099_v50 = vpop.f32.mrb[130].mxu1  ;;  %v2812_v45 = vpop.f32.mrb[131].mxu0  ;;  %v385_v49 = vld [vmem:[%s5605_s0 + $0x770] sm:$0xff] }
 0x218   :  { %v3101_v46 = vpop.f32.mrb[131].mxu1  ;;  %v3998_v1 = vcombine.low %v381_v41, %v385_v49 }
 0x219   :  { %v3100_v62 = vadd.f32 %v3099_v50, %v2811_v43  ;;  %3022 = vmatmul.mubr.bf16.gmra.mrb[236].mxu0 %v3982_v14  ;;  %3415 = vst [vmem:[%s5606_s2] sm:$0xff] %v3097_v29  ;;  %v382_v46 = vld [vmem:[%s5605_s0 + $0x758] sm:$0xff]  ;;  %v3615_v15 = vmul.f32 %v3097_v29, %v3097_v29  ;;  %v3999_v14 = vcombine.high %v381_v41, %v385_v49 }
 0x21a   :  { %3311 = vmatmul.mubr.bf16.gmra.mrb[236].mxu1 %v3984_v26  ;;  %3029 = vmatprep.mubr.bf16.mxu0 %v3991_v35  ;;  %v4001_v50 = vcombine.high %v382_v46, %v386_v57 }
 0x21b   :  { %3318 = vmatprep.mubr.bf16.mxu1 %v3993_v10  ;;  %3416 = vst [vmem:[%s5606_s2 + $0x8] sm:$0xff] %v3100_v62  ;;  %v3546_v53 = vadd.f32 %v3100_v62, %v3097_v29  ;;  %v3616_v10 = vmul.f32 %v3100_v62, %v3100_v62  ;;  %v390_v29 = vld [vmem:[%s5605_s0 + $0x798] sm:$0xff] }
 0x21c   :  { %v2815_v45 = vpop.f32.mrb[132].mxu0 }
 0x21d   :  { %v2816_v40 = vadd.f32 %v2815_v45, %v4810_v0  ;;  %v3104_v61 = vpop.f32.mrb[132].mxu1  ;;  %v2817_v32 = vpop.f32.mrb[133].mxu0  ;;  %v3679_v19 = vadd.f32 %v3616_v10, %v3615_v15  ;;  %v394_v45 = vld [vmem:[%s5605_s0 + $0x7b8] sm:$0xff] }
 0x21e   :  { %v3106_v24 = vpop.f32.mrb[133].mxu1  ;;  %v2818_v25 = vpop.f32.mrb[134].mxu0  ;;  %v4000_v32 = vcombine.low %v382_v46, %v386_v57  ;;  %v397_v46 = vld [vmem:[%s5605_s0 + $0x7d0] sm:$0xff] }
 0x21f   :  { %v3105_v23 = vadd.f32 %v3104_v61, %v2816_v40  ;;  %v2819_v26 = vadd.f32 %v2818_v25, %v4812_v3  ;;  %v3107_v35 = vpop.f32.mrb[134].mxu1  ;;  %v2820_v43 = vpop.f32.mrb[135].mxu0  ;;  %v393_v3 = vld [vmem:[%s5605_s0 + $0x7b0] sm:$0xff] }
 0x220   :  { %v3109_v63 = vpop.f32.mrb[135].mxu1  ;;  %v4007_v24 = vcombine.high %v389_v4, %v393_v3 }
 0x221   :  { %v3108_v33 = vadd.f32 %v3107_v35, %v2819_v26  ;;  %3030 = vmatmul.mubr.bf16.gmra.mrb[240].mxu0 %v3990_v54  ;;  %3417 = vst [vmem:[%s5606_s2 + $0x10] sm:$0xff] %v3105_v23  ;;  %v3547_v0 = vadd.f32 %v3546_v53, %v3105_v23  ;;  %v3617_v62 = vmul.f32 %v3105_v23, %v3105_v23 }
 0x222   :  { %3319 = vmatmul.mubr.bf16.gmra.mrb[240].mxu1 %v3992_v6  ;;  %3037 = vmatprep.mubr.bf16.mxu0 %v3999_v14  ;;  %v4009_v26 = vcombine.high %v390_v29, %v394_v45 }
 0x223   :  { %3326 = vmatprep.mubr.bf16.mxu1 %v4001_v50  ;;  %v3680_v54 = vadd.f32 %v3679_v19, %v3617_v62  ;;  %3418 = vst [vmem:[%s5606_s2 + $0x18] sm:$0xff] %v3108_v33  ;;  %v3548_v15 = vadd.f32 %v3547_v0, %v3108_v33  ;;  %v3618_v53 = vmul.f32 %v3108_v33, %v3108_v33  ;;  %v398_v0 = vld [vmem:[%s5605_s0 + $0x7d8] sm:$0xff] }
 0x224   :  { %v2823_v63 = vpop.f32.mrb[136].mxu0  ;;  %v4006_v50 = vcombine.low %v389_v4, %v393_v3  ;;  %v402_v62 = vld [vmem:[%s5605_s0 + $0x7f8] sm:$0xff] }
 0x225   :  { %v2824_v10 = vadd.f32 %v2823_v63, %v4826_v13  ;;  %v3112_v40 = vpop.f32.mrb[136].mxu1  ;;  %v2825_v61 = vpop.f32.mrb[137].mxu0  ;;  %v3681_v25 = vadd.f32 %v3680_v54, %v3618_v53 }
 0x226   :  { %v3114_v41 = vpop.f32.mrb[137].mxu1  ;;  %v2826_v49 = vpop.f32.mrb[138].mxu0 }
 0x227   :  { %v3113_v6 = vadd.f32 %v3112_v40, %v2824_v10  ;;  %v2827_v14 = vadd.f32 %v2826_v49, %v4828_v21  ;;  %v3115_v23 = vpop.f32.mrb[138].mxu1  ;;  %v2828_v19 = vpop.f32.mrb[139].mxu0  ;;  %v401_v21 = vld [vmem:[%s5605_s0 + $0x7f0] sm:$0xff]  ;;  %v4008_v40 = vcombine.low %v390_v29, %v394_v45 }
 0x228   :  { %v3117_v35 = vpop.f32.mrb[139].mxu1  ;;  %v4015_v61 = vcombine.high %v397_v46, %v401_v21  ;;  %v4014_v45 = vcombine.low %v397_v46, %v401_v21 }
 0x229   :  { %v3116_v43 = vadd.f32 %v3115_v23, %v2827_v14  ;;  %3038 = vmatmul.mubr.bf16.gmra.mrb[244].mxu0 %v3998_v1  ;;  %3419 = vst [vmem:[%s5606_s2 + $0x20] sm:$0xff] %v3113_v6  ;;  %v3549_v13 = vadd.f32 %v3548_v15, %v3113_v6  ;;  %v3619_v33 = vmul.f32 %v3113_v6, %v3113_v6 }
 0x22a   :  { %3327 = vmatmul.mubr.bf16.gmra.mrb[244].mxu1 %v4000_v32  ;;  %3045 = vmatprep.mubr.bf16.mxu0 %v4007_v24  ;;  %v4017_v6 = vcombine.high %v398_v0, %v402_v62 }
 0x22b   :  { %3334 = vmatprep.mubr.bf16.mxu1 %v4009_v26  ;;  %v3682_v63 = vadd.f32 %v3681_v25, %v3619_v33  ;;  %3420 = vst [vmem:[%s5606_s2 + $0x28] sm:$0xff] %v3116_v43  ;;  %v3550_v1 = vadd.f32 %v3549_v13, %v3116_v43  ;;  %v3620_v54 = vmul.f32 %v3116_v43, %v3116_v43 }
 0x22c   :  { %v2831_v57 = vpop.f32.mrb[140].mxu0 }
 0x22d   :  { %v2832_v15 = vadd.f32 %v2831_v57, %v4842_v31  ;;  %v3120_v53 = vpop.f32.mrb[140].mxu1  ;;  %v2833_v10 = vpop.f32.mrb[141].mxu0  ;;  %v3683_v41 = vadd.f32 %v3682_v63, %v3620_v54  ;;  %v4016_v63 = vcombine.low %v398_v0, %v402_v62 }
 0x22e   :  { %v3122_v4 = vpop.f32.mrb[141].mxu1  ;;  %v2834_v3 = vpop.f32.mrb[142].mxu0 }
 0x22f   :  { %v3121_v49 = vadd.f32 %v3120_v53, %v2832_v15  ;;  %v2835_v32 = vadd.f32 %v2834_v3, %v4844_v39  ;;  %v3123_v24 = vpop.f32.mrb[142].mxu1  ;;  %v2836_v25 = vpop.f32.mrb[143].mxu0 }
 0x230   :  { %v3125_v14 = vpop.f32.mrb[143].mxu1 }
 0x231   :  { %v3124_v23 = vadd.f32 %v3123_v24, %v2835_v32  ;;  %3046 = vmatmul.mubr.bf16.gmra.mrb[248].mxu0 %v4006_v50  ;;  %3421 = vst [vmem:[%s5606_s2 + $0x30] sm:$0xff] %v3121_v49  ;;  %v3551_v31 = vadd.f32 %v3550_v1, %v3121_v49  ;;  %v3621_v19 = vmul.f32 %v3121_v49, %v3121_v49 }
 0x232   :  { %3335 = vmatmul.mubr.bf16.gmra.mrb[248].mxu1 %v4008_v40  ;;  %3053 = vmatprep.mubr.bf16.mxu0 %v4015_v61 }
 0x233   :  { %3342 = vmatprep.mubr.bf16.mxu1 %v4017_v6  ;;  %v3684_v26 = vadd.f32 %v3683_v41, %v3621_v19  ;;  %3422 = vst [vmem:[%s5606_s2 + $0x38] sm:$0xff] %v3124_v23  ;;  %v3552_v39 = vadd.f32 %v3551_v31, %v3124_v23  ;;  %v3622_v35 = vmul.f32 %v3124_v23, %v3124_v23 }
 0x234   :  { %v2839_v29 = vpop.f32.mrb[144].mxu0 }
 0x235   :  { %v2840_v43 = vadd.f32 %v2839_v29, %v4858_v51  ;;  %v3128_v13 = vpop.f32.mrb[144].mxu1  ;;  %v2841_v33 = vpop.f32.mrb[145].mxu0  ;;  %v3685_v54 = vadd.f32 %v3684_v26, %v3622_v35 }
 0x236   :  { %v3130_v57 = vpop.f32.mrb[145].mxu1  ;;  %v2842_v50 = vpop.f32.mrb[146].mxu0 }
 0x237   :  { %v3129_v1 = vadd.f32 %v3128_v13, %v2840_v43  ;;  %v2843_v15 = vadd.f32 %v2842_v50, %v4860_v59  ;;  %v3131_v53 = vpop.f32.mrb[146].mxu1  ;;  %v2844_v46 = vpop.f32.mrb[147].mxu0 }
 0x238   :  { %v3133_v21 = vpop.f32.mrb[147].mxu1 }
 0x239   :  { %v3132_v10 = vadd.f32 %v3131_v53, %v2843_v15  ;;  %3054 = vmatmul.mubr.bf16.gmra.mrb[252].mxu0 %v4014_v45  ;;  %3423 = vst [vmem:[%s5606_s2 + $0x40] sm:$0xff] %v3129_v1  ;;  %v3553_v51 = vadd.f32 %v3552_v39, %v3129_v1  ;;  %v3623_v4 = vmul.f32 %v3129_v1, %v3129_v1 }
 0x23a   :  { %3343 = vmatmul.mubr.bf16.gmra.mrb[252].mxu1 %v4016_v63 }
 0x23b   :  { %v3686_v40 = vadd.f32 %v3685_v54, %v3623_v4  ;;  %3424 = vst [vmem:[%s5606_s2 + $0x48] sm:$0xff] %v3132_v10  ;;  %v3554_v0 = vadd.f32 %v3553_v51, %v3132_v10  ;;  %v3624_v59 = vmul.f32 %v3132_v10, %v3132_v10 }
 0x23c   :  { %v2847_v3 = vpop.f32.mrb[148].mxu0 }
 0x23d   :  { %v2848_v62 = vadd.f32 %v2847_v3, %v4874_v7  ;;  %v3136_v61 = vpop.f32.mrb[148].mxu1  ;;  %v2849_v41 = vpop.f32.mrb[149].mxu0  ;;  %v3687_v24 = vadd.f32 %v3686_v40, %v3624_v59 }
 0x23e   :  { %v3138_v49 = vpop.f32.mrb[149].mxu1  ;;  %v2850_v32 = vpop.f32.mrb[150].mxu0 }
 0x23f   :  { %v3137_v25 = vadd.f32 %v3136_v61, %v2848_v62  ;;  %v2851_v6 = vadd.f32 %v2850_v32, %v4876_v16  ;;  %v3139_v14 = vpop.f32.mrb[150].mxu1  ;;  %v2852_v23 = vpop.f32.mrb[151].mxu0 }
 0x240   :  { %v3141_v31 = vpop.f32.mrb[151].mxu1 }
 0x241   :  { %v3140_v19 = vadd.f32 %v3139_v14, %v2851_v6  ;;  %3425 = vst [vmem:[%s5606_s2 + $0x50] sm:$0xff] %v3137_v25  ;;  %v3555_v29 = vadd.f32 %v3554_v0, %v3137_v25  ;;  %v3625_v45 = vmul.f32 %v3137_v25, %v3137_v25 }
 0x243   :  { %v3688_v7 = vadd.f32 %v3687_v24, %v3625_v45  ;;  %3426 = vst [vmem:[%s5606_s2 + $0x58] sm:$0xff] %v3140_v19  ;;  %v3556_v39 = vadd.f32 %v3555_v29, %v3140_v19  ;;  %v3626_v35 = vmul.f32 %v3140_v19, %v3140_v19 }
 0x244   :  { %v2855_v26 = vpop.f32.mrb[152].mxu0 }
 0x245   :  { %v2856_v16 = vadd.f32 %v2855_v26, %v4890_v27  ;;  %v3144_v43 = vpop.f32.mrb[152].mxu1  ;;  %v2857_v13 = vpop.f32.mrb[153].mxu0  ;;  %v3689_v50 = vadd.f32 %v3688_v7, %v3626_v35 }
 0x246   :  { %v3146_v33 = vpop.f32.mrb[153].mxu1  ;;  %v2858_v57 = vpop.f32.mrb[154].mxu0 }
 0x247   :  { %v3145_v63 = vadd.f32 %v3144_v43, %v2856_v16  ;;  %v2859_v54 = vadd.f32 %v2858_v57, %v4892_v36  ;;  %v3147_v1 = vpop.f32.mrb[154].mxu1  ;;  %v2860_v15 = vpop.f32.mrb[155].mxu0 }
 0x248   :  { %v3149_v53 = vpop.f32.mrb[155].mxu1 }
 0x249   :  { %v3148_v46 = vadd.f32 %v3147_v1, %v2859_v54  ;;  %3427 = vst [vmem:[%s5606_s2 + $0x60] sm:$0xff] %v3145_v63  ;;  %v3557_v21 = vadd.f32 %v3556_v39, %v3145_v63  ;;  %v3627_v10 = vmul.f32 %v3145_v63, %v3145_v63 }
 0x24b   :  { %v3690_v27 = vadd.f32 %v3689_v50, %v3627_v10  ;;  %3428 = vst [vmem:[%s5606_s2 + $0x68] sm:$0xff] %v3148_v46  ;;  %v3558_v4 = vadd.f32 %v3557_v21, %v3148_v46  ;;  %v3628_v3 = vmul.f32 %v3148_v46, %v3148_v46 }
 0x24c   :  { %v2863_v51 = vpop.f32.mrb[156].mxu0 }
 0x24d   :  { %v2864_v36 = vadd.f32 %v2863_v51, %v4906_v48  ;;  %v3152_v40 = vpop.f32.mrb[156].mxu1  ;;  %v2865_v0 = vpop.f32.mrb[157].mxu0  ;;  %v3691_v61 = vadd.f32 %v3690_v27, %v3628_v3 }
 0x24e   :  { %v3154_v59 = vpop.f32.mrb[157].mxu1  ;;  %v2866_v62 = vpop.f32.mrb[158].mxu0 }
 0x24f   :  { %v3153_v41 = vadd.f32 %v3152_v40, %v2864_v36  ;;  %v2867_v49 = vadd.f32 %v2866_v62, %v4908_v58  ;;  %v3155_v32 = vpop.f32.mrb[158].mxu1  ;;  %v2868_v24 = vpop.f32.mrb[159].mxu0 }
 0x250   :  { %v3157_v25 = vpop.f32.mrb[159].mxu1 }
 0x251   :  { %v3156_v6 = vadd.f32 %v3155_v32, %v2867_v49  ;;  %3429 = vst [vmem:[%s5606_s2 + $0x70] sm:$0xff] %v3153_v41  ;;  %v3559_v14 = vadd.f32 %v3558_v4, %v3153_v41  ;;  %v3629_v23 = vmul.f32 %v3153_v41, %v3153_v41 }
 0x253   :  { %v3692_v48 = vadd.f32 %v3691_v61, %v3629_v23  ;;  %3430 = vst [vmem:[%s5606_s2 + $0x78] sm:$0xff] %v3156_v6  ;;  %v3560_v19 = vadd.f32 %v3559_v14, %v3156_v6  ;;  %v3630_v29 = vmul.f32 %v3156_v6, %v3156_v6 }
 0x254   :  { %v2871_v31 = vpop.f32.mrb[160].mxu0 }
 0x255   :  { %v2872_v58 = vadd.f32 %v2871_v31, %v4922_v8  ;;  %v3160_v45 = vpop.f32.mrb[160].mxu1  ;;  %v2873_v26 = vpop.f32.mrb[161].mxu0  ;;  %v3693_v35 = vadd.f32 %v3692_v48, %v3630_v29 }
 0x256   :  { %v3162_v7 = vpop.f32.mrb[161].mxu1  ;;  %v2874_v39 = vpop.f32.mrb[162].mxu0 }
 0x257   :  { %v3161_v16 = vadd.f32 %v3160_v45, %v2872_v58  ;;  %v2875_v43 = vadd.f32 %v2874_v39, %v4924_v18  ;;  %v3163_v13 = vpop.f32.mrb[162].mxu1  ;;  %v2876_v33 = vpop.f32.mrb[163].mxu0 }
 0x258   :  { %v3165_v57 = vpop.f32.mrb[163].mxu1 }
 0x259   :  { %v3164_v50 = vadd.f32 %v3163_v13, %v2875_v43  ;;  %3431 = vst [vmem:[%s5606_s2 + $0x80] sm:$0xff] %v3161_v16  ;;  %v3561_v63 = vadd.f32 %v3560_v19, %v3161_v16  ;;  %v3631_v54 = vmul.f32 %v3161_v16, %v3161_v16 }
 0x25b   :  { %v3694_v8 = vadd.f32 %v3693_v35, %v3631_v54  ;;  %3432 = vst [vmem:[%s5606_s2 + $0x88] sm:$0xff] %v3164_v50  ;;  %v3562_v15 = vadd.f32 %v3561_v63, %v3164_v50  ;;  %v3632_v53 = vmul.f32 %v3164_v50, %v3164_v50 }
 0x25c   :  { %v2879_v1 = vpop.f32.mrb[164].mxu0 }
 0x25d   :  { %v2880_v18 = vadd.f32 %v2879_v1, %v4938_v30  ;;  %v3168_v46 = vpop.f32.mrb[164].mxu1  ;;  %v2881_v21 = vpop.f32.mrb[165].mxu0  ;;  %v3695_v27 = vadd.f32 %v3694_v8, %v3632_v53 }
 0x25e   :  { %v3170_v10 = vpop.f32.mrb[165].mxu1  ;;  %v2882_v51 = vpop.f32.mrb[166].mxu0 }
 0x25f   :  { %v3169_v4 = vadd.f32 %v3168_v46, %v2880_v18  ;;  %v2883_v3 = vadd.f32 %v2882_v51, %v4940_v42  ;;  %v3171_v36 = vpop.f32.mrb[166].mxu1  ;;  %v2884_v40 = vpop.f32.mrb[167].mxu0 }
 0x260   :  { %v3173_v0 = vpop.f32.mrb[167].mxu1 }
 0x261   :  { %v3172_v59 = vadd.f32 %v3171_v36, %v2883_v3  ;;  %3433 = vst [vmem:[%s5606_s2 + $0x90] sm:$0xff] %v3169_v4  ;;  %v3563_v62 = vadd.f32 %v3562_v15, %v3169_v4  ;;  %v3633_v61 = vmul.f32 %v3169_v4, %v3169_v4 }
 0x263   :  { %v3696_v30 = vadd.f32 %v3695_v27, %v3633_v61  ;;  %3434 = vst [vmem:[%s5606_s2 + $0x98] sm:$0xff] %v3172_v59  ;;  %v3564_v49 = vadd.f32 %v3563_v62, %v3172_v59  ;;  %v3634_v32 = vmul.f32 %v3172_v59, %v3172_v59 }
 0x264   :  { %v2887_v41 = vpop.f32.mrb[168].mxu0 }
 0x265   :  { %v2888_v42 = vadd.f32 %v2887_v41, %v4954_v55  ;;  %v3176_v24 = vpop.f32.mrb[168].mxu1  ;;  %v2889_v25 = vpop.f32.mrb[169].mxu0  ;;  %v3697_v23 = vadd.f32 %v3696_v30, %v3634_v32 }
 0x266   :  { %v3178_v6 = vpop.f32.mrb[169].mxu1  ;;  %v2890_v14 = vpop.f32.mrb[170].mxu0 }
 0x267   :  { %v3177_v31 = vadd.f32 %v3176_v24, %v2888_v42  ;;  %v2891_v48 = vadd.f32 %v2890_v14, %v4956_v2  ;;  %v3179_v19 = vpop.f32.mrb[170].mxu1  ;;  %v2892_v29 = vpop.f32.mrb[171].mxu0 }
 0x268   :  { %v3181_v58 = vpop.f32.mrb[171].mxu1 }
 0x269   :  { %v3180_v45 = vadd.f32 %v3179_v19, %v2891_v48  ;;  %3435 = vst [vmem:[%s5606_s2 + $0xa0] sm:$0xff] %v3177_v31  ;;  %v3565_v26 = vadd.f32 %v3564_v49, %v3177_v31  ;;  %v3635_v7 = vmul.f32 %v3177_v31, %v3177_v31 }
 0x26b   :  { %v3698_v55 = vadd.f32 %v3697_v23, %v3635_v7  ;;  %3436 = vst [vmem:[%s5606_s2 + $0xa8] sm:$0xff] %v3180_v45  ;;  %v3566_v35 = vadd.f32 %v3565_v26, %v3180_v45  ;;  %v3636_v16 = vmul.f32 %v3180_v45, %v3180_v45 }
 0x26c   :  { %v2895_v39 = vpop.f32.mrb[172].mxu0 }
 0x26d   :  { %v2896_v2 = vadd.f32 %v2895_v39, %v4970_v17  ;;  %v3184_v43 = vpop.f32.mrb[172].mxu1  ;;  %v2897_v13 = vpop.f32.mrb[173].mxu0  ;;  %v3699_v50 = vadd.f32 %v3698_v55, %v3636_v16 }
 0x26e   :  { %v3186_v33 = vpop.f32.mrb[173].mxu1  ;;  %v2898_v57 = vpop.f32.mrb[174].mxu0 }
 0x26f   :  { %v3185_v63 = vadd.f32 %v3184_v43, %v2896_v2  ;;  %v2899_v54 = vadd.f32 %v2898_v57, %v4972_v28  ;;  %v3187_v1 = vpop.f32.mrb[174].mxu1  ;;  %v2900_v8 = vpop.f32.mrb[175].mxu0 }
 0x270   :  { %v3189_v15 = vpop.f32.mrb[175].mxu1 }
 0x271   :  { %v3188_v53 = vadd.f32 %v3187_v1, %v2899_v54  ;;  %3437 = vst [vmem:[%s5606_s2 + $0xb0] sm:$0xff] %v3185_v63  ;;  %v3567_v18 = vadd.f32 %v3566_v35, %v3185_v63  ;;  %v3637_v46 = vmul.f32 %v3185_v63, %v3185_v63 }
 0x273   :  { %v3700_v17 = vadd.f32 %v3699_v50, %v3637_v46  ;;  %3438 = vst [vmem:[%s5606_s2 + $0xb8] sm:$0xff] %v3188_v53  ;;  %v3568_v10 = vadd.f32 %v3567_v18, %v3188_v53  ;;  %v3638_v51 = vmul.f32 %v3188_v53, %v3188_v53 }
 0x274   :  { %v2903_v21 = vpop.f32.mrb[176].mxu0 }
 0x275   :  { %v2904_v28 = vadd.f32 %v2903_v21, %v4986_v44  ;;  %v3192_v27 = vpop.f32.mrb[176].mxu1  ;;  %v2905_v4 = vpop.f32.mrb[177].mxu0  ;;  %v3701_v40 = vadd.f32 %v3700_v17, %v3638_v51 }
 0x276   :  { %v3194_v3 = vpop.f32.mrb[177].mxu1  ;;  %v2906_v36 = vpop.f32.mrb[178].mxu0 }
 0x277   :  { %v3193_v0 = vadd.f32 %v3192_v27, %v2904_v28  ;;  %v2907_v59 = vadd.f32 %v2906_v36, %v4988_v56  ;;  %v3195_v62 = vpop.f32.mrb[178].mxu1  ;;  %v2908_v61 = vpop.f32.mrb[179].mxu0 }
 0x278   :  { %v3197_v41 = vpop.f32.mrb[179].mxu1 }
 0x279   :  { %v3196_v30 = vadd.f32 %v3195_v62, %v2907_v59  ;;  %3439 = vst [vmem:[%s5606_s2 + $0xc0] sm:$0xff] %v3193_v0  ;;  %v3569_v49 = vadd.f32 %v3568_v10, %v3193_v0  ;;  %v3639_v32 = vmul.f32 %v3193_v0, %v3193_v0 }
 0x27b   :  { %v3702_v44 = vadd.f32 %v3701_v40, %v3639_v32  ;;  %3440 = vst [vmem:[%s5606_s2 + $0xc8] sm:$0xff] %v3196_v30  ;;  %v3570_v24 = vadd.f32 %v3569_v49, %v3196_v30  ;;  %v3640_v25 = vmul.f32 %v3196_v30, %v3196_v30 }
 0x27c   :  { %v2911_v42 = vpop.f32.mrb[180].mxu0 }
 0x27d   :  { %v2912_v56 = vadd.f32 %v2911_v42, %v5002_v9  ;;  %v3200_v6 = vpop.f32.mrb[180].mxu1  ;;  %v2913_v14 = vpop.f32.mrb[181].mxu0  ;;  %v3703_v48 = vadd.f32 %v3702_v44, %v3640_v25 }
 0x27e   :  { %v3202_v23 = vpop.f32.mrb[181].mxu1  ;;  %v2914_v31 = vpop.f32.mrb[182].mxu0 }
 0x27f   :  { %v3201_v19 = vadd.f32 %v3200_v6, %v2912_v56  ;;  %v2915_v29 = vadd.f32 %v2914_v31, %v5004_v22  ;;  %v3203_v58 = vpop.f32.mrb[182].mxu1  ;;  %v2916_v45 = vpop.f32.mrb[183].mxu0 }
 0x280   :  { %v3205_v26 = vpop.f32.mrb[183].mxu1 }
 0x281   :  { %v3204_v7 = vadd.f32 %v3203_v58, %v2915_v29  ;;  %3441 = vst [vmem:[%s5606_s2 + $0xd0] sm:$0xff] %v3201_v19  ;;  %v3571_v39 = vadd.f32 %v3570_v24, %v3201_v19  ;;  %v3641_v55 = vmul.f32 %v3201_v19, %v3201_v19 }
 0x283   :  { %v3704_v9 = vadd.f32 %v3703_v48, %v3641_v55  ;;  %3442 = vst [vmem:[%s5606_s2 + $0xd8] sm:$0xff] %v3204_v7  ;;  %v3572_v16 = vadd.f32 %v3571_v39, %v3204_v7  ;;  %v3642_v2 = vmul.f32 %v3204_v7, %v3204_v7 }
 0x284   :  { %v2919_v35 = vpop.f32.mrb[184].mxu0 }
 0x285   :  { %v2920_v22 = vadd.f32 %v2919_v35, %v5018_v37  ;;  %v3208_v43 = vpop.f32.mrb[184].mxu1  ;;  %v2921_v13 = vpop.f32.mrb[185].mxu0  ;;  %v3705_v50 = vadd.f32 %v3704_v9, %v3642_v2 }
 0x286   :  { %v3210_v33 = vpop.f32.mrb[185].mxu1  ;;  %v2922_v57 = vpop.f32.mrb[186].mxu0 }
 0x287   :  { %v3209_v63 = vadd.f32 %v3208_v43, %v2920_v22  ;;  %v2923_v54 = vadd.f32 %v2922_v57, %v5020_v52  ;;  %v3211_v1 = vpop.f32.mrb[186].mxu1  ;;  %v2924_v8 = vpop.f32.mrb[187].mxu0 }
 0x288   :  { %v3213_v15 = vpop.f32.mrb[187].mxu1 }
 0x289   :  { %v3212_v53 = vadd.f32 %v3211_v1, %v2923_v54  ;;  %3443 = vst [vmem:[%s5606_s2 + $0xe0] sm:$0xff] %v3209_v63  ;;  %v3573_v18 = vadd.f32 %v3572_v16, %v3209_v63  ;;  %v3643_v46 = vmul.f32 %v3209_v63, %v3209_v63 }
 0x28b   :  { %v3706_v37 = vadd.f32 %v3705_v50, %v3643_v46  ;;  %3444 = vst [vmem:[%s5606_s2 + $0xe8] sm:$0xff] %v3212_v53  ;;  %v3574_v17 = vadd.f32 %v3573_v18, %v3212_v53  ;;  %v3644_v10 = vmul.f32 %v3212_v53, %v3212_v53 }
 0x28c   :  { %v2927_v21 = vpop.f32.mrb[188].mxu0 }
 0x28d   :  { %v2928_v52 = vadd.f32 %v2927_v21, %v5034_v5  ;;  %v3216_v51 = vpop.f32.mrb[188].mxu1  ;;  %v2929_v28 = vpop.f32.mrb[189].mxu0  ;;  %v3707_v3 = vadd.f32 %v3706_v37, %v3644_v10 }
 0x28e   :  { %v3218_v27 = vpop.f32.mrb[189].mxu1  ;;  %v2930_v4 = vpop.f32.mrb[190].mxu0 }
 0x28f   :  { %v3217_v36 = vadd.f32 %v3216_v51, %v2928_v52  ;;  %v2931_v40 = vadd.f32 %v2930_v4, %v5036_v20  ;;  %v3219_v0 = vpop.f32.mrb[190].mxu1  ;;  %v2932_v59 = vpop.f32.mrb[191].mxu0 }
 0x290   :  { %v3221_v62 = vpop.f32.mrb[191].mxu1  ;;  %v5635_v59 = vld [vmem:[#allocation2_spill] sm:$0xff] }
 0x291   :  { %v3220_v61 = vadd.f32 %v3219_v0, %v2931_v40  ;;  %3445 = vst [vmem:[%s5606_s2 + $0xf0] sm:$0xff] %v3217_v36  ;;  %v3575_v41 = vadd.f32 %v3574_v17, %v3217_v36  ;;  %v3645_v30 = vmul.f32 %v3217_v36, %v3217_v36 }
 0x293   :  { %v3708_v5 = vadd.f32 %v3707_v3, %v3645_v30  ;;  %3446 = vst [vmem:[%s5606_s2 + $0xf8] sm:$0xff] %v3220_v61  ;;  %v3576_v32 = vadd.f32 %v3575_v41, %v3220_v61  ;;  %v3646_v42 = vmul.f32 %v3220_v61, %v3220_v61 }
 0x294   :  { %v2935_v49 = vpop.f32.mrb[192].mxu0 }
 0x295   :  { %v2936_v20 = vadd.f32 %v2935_v49, %v5050_v38  ;;  %v3224_v44 = vpop.f32.mrb[192].mxu1  ;;  %v2937_v24 = vpop.f32.mrb[193].mxu0  ;;  %v3709_v6 = vadd.f32 %v3708_v5, %v3646_v42 }
 0x296   :  { %v3226_v25 = vpop.f32.mrb[193].mxu1  ;;  %v2938_v56 = vpop.f32.mrb[194].mxu0 }
 0x297   :  { %v3225_v14 = vadd.f32 %v3224_v44, %v2936_v20  ;;  %v2939_v23 = vadd.f32 %v2938_v56, %v5052_v60  ;;  %v3227_v31 = vpop.f32.mrb[194].mxu1  ;;  %v2940_v48 = vpop.f32.mrb[195].mxu0 }
 0x298   :  { %v3229_v19 = vpop.f32.mrb[195].mxu1 }
 0x299   :  { %v3228_v29 = vadd.f32 %v3227_v31, %v2939_v23  ;;  %3447 = vst [vmem:[%s5606_s2 + $0x100] sm:$0xff] %v3225_v14  ;;  %v3577_v58 = vadd.f32 %v3576_v32, %v3225_v14  ;;  %v3647_v45 = vmul.f32 %v3225_v14, %v3225_v14  ;;  %v5636_v32 = vld [vmem:[#allocation3_spill] sm:$0xff]  ;;  %v5637_v19 = vld [vmem:[#allocation4_spill] sm:$0xff] }
 0x29b   :  { %v3710_v38 = vadd.f32 %v3709_v6, %v3647_v45  ;;  %3448 = vst [vmem:[%s5606_s2 + $0x108] sm:$0xff] %v3228_v29  ;;  %v3578_v7 = vadd.f32 %v3577_v58, %v3228_v29  ;;  %v3648_v39 = vmul.f32 %v3228_v29, %v3228_v29 }
 0x29c   :  { %v2943_v26 = vpop.f32.mrb[196].mxu0 }
 0x29d   :  { %v2944_v60 = vadd.f32 %v2943_v26, %v5066_v11  ;;  %v3232_v55 = vpop.f32.mrb[196].mxu1  ;;  %v2945_v35 = vpop.f32.mrb[197].mxu0  ;;  %v3711_v2 = vadd.f32 %v3710_v38, %v3648_v39 }
 0x29e   :  { %v3234_v9 = vpop.f32.mrb[197].mxu1  ;;  %v2946_v16 = vpop.f32.mrb[198].mxu0 }
 0x29f   :  { %v3233_v22 = vadd.f32 %v3232_v55, %v2944_v60  ;;  %v2947_v43 = vadd.f32 %v2946_v16, %v5068_v34  ;;  %v3235_v13 = vpop.f32.mrb[198].mxu1  ;;  %v2948_v33 = vpop.f32.mrb[199].mxu0  ;;  %v5638_v60 = vld [vmem:[#allocation5_spill] sm:$0xff] }
 0x2a0   :  { %v3237_v57 = vpop.f32.mrb[199].mxu1 }
 0x2a1   :  { %v3236_v50 = vadd.f32 %v3235_v13, %v2947_v43  ;;  %3449 = vst [vmem:[%s5606_s2 + $0x110] sm:$0xff] %v3233_v22  ;;  %v3579_v63 = vadd.f32 %v3578_v7, %v3233_v22  ;;  %v3649_v54 = vmul.f32 %v3233_v22, %v3233_v22 }
 0x2a3   :  { %v3712_v11 = vadd.f32 %v3711_v2, %v3649_v54  ;;  %3450 = vst [vmem:[%s5606_s2 + $0x118] sm:$0xff] %v3236_v50  ;;  %v3580_v8 = vadd.f32 %v3579_v63, %v3236_v50  ;;  %v3650_v15 = vmul.f32 %v3236_v50, %v3236_v50  ;;  %v5639_v63 = vld [vmem:[#allocation6_spill] sm:$0xff] }
 0x2a4   :  { %v2951_v1 = vpop.f32.mrb[200].mxu0 }
 0x2a5   :  { %v2952_v34 = vadd.f32 %v2951_v1, %v5082_v47  ;;  %v3240_v53 = vpop.f32.mrb[200].mxu1  ;;  %v2953_v18 = vpop.f32.mrb[201].mxu0  ;;  %v3713_v37 = vadd.f32 %v3712_v11, %v3650_v15 }
 0x2a6   :  { %v3242_v46 = vpop.f32.mrb[201].mxu1  ;;  %v2954_v21 = vpop.f32.mrb[202].mxu0  ;;  %v5640_v18 = vld [vmem:[#allocation7_spill] sm:$0xff] }
 0x2a7   :  { %v3241_v17 = vadd.f32 %v3240_v53, %v2952_v34  ;;  %v2955_v10 = vadd.f32 %v2954_v21, %v5084_v12  ;;  %v3243_v52 = vpop.f32.mrb[202].mxu1  ;;  %v2956_v51 = vpop.f32.mrb[203].mxu0 }
 0x2a8   :  { %v3245_v28 = vpop.f32.mrb[203].mxu1 }
 0x2a9   :  { %v3244_v27 = vadd.f32 %v3243_v52, %v2955_v10  ;;  %3451 = vst [vmem:[%s5606_s2 + $0x120] sm:$0xff] %v3241_v17  ;;  %v3581_v4 = vadd.f32 %v3580_v8, %v3241_v17  ;;  %v3651_v3 = vmul.f32 %v3241_v17, %v3241_v17 }
 0x2ab   :  { %v3714_v47 = vadd.f32 %v3713_v37, %v3651_v3  ;;  %3452 = vst [vmem:[%s5606_s2 + $0x128] sm:$0xff] %v3244_v27  ;;  %v3582_v40 = vadd.f32 %v3581_v4, %v3244_v27  ;;  %v3652_v0 = vmul.f32 %v3244_v27, %v3244_v27 }
 0x2ac   :  { %v2959_v36 = vpop.f32.mrb[204].mxu0 }
 0x2ad   :  { %v2960_v12 = vadd.f32 %v2959_v36, %v5635_v59  ;;  %v3248_v62 = vpop.f32.mrb[204].mxu1  ;;  %v2961_v61 = vpop.f32.mrb[205].mxu0  ;;  %v3715_v49 = vadd.f32 %v3714_v47, %v3652_v0  ;;  %v5641_v36 = vld [vmem:[#allocation8_spill] sm:$0xff] }
 0x2ae   :  { %v3250_v41 = vpop.f32.mrb[205].mxu1  ;;  %v2962_v30 = vpop.f32.mrb[206].mxu0 }
 0x2af   :  { %v3249_v5 = vadd.f32 %v3248_v62, %v2960_v12  ;;  %v2963_v42 = vadd.f32 %v2962_v30, %v5636_v32  ;;  %v3251_v20 = vpop.f32.mrb[206].mxu1  ;;  %v2964_v44 = vpop.f32.mrb[207].mxu0  ;;  %v5642_v41 = vld [vmem:[#allocation9_spill] sm:$0xff] }
 0x2b0   :  { %v3253_v24 = vpop.f32.mrb[207].mxu1 }
 0x2b1   :  { %v3252_v25 = vadd.f32 %v3251_v20, %v2963_v42  ;;  %3453 = vst [vmem:[%s5606_s2 + $0x130] sm:$0xff] %v3249_v5  ;;  %v3583_v56 = vadd.f32 %v3582_v40, %v3249_v5  ;;  %v3653_v6 = vmul.f32 %v3249_v5, %v3249_v5 }
 0x2b3   :  { %v3716_v23 = vadd.f32 %v3715_v49, %v3653_v6  ;;  %3454 = vst [vmem:[%s5606_s2 + $0x138] sm:$0xff] %v3252_v25  ;;  %v3584_v31 = vadd.f32 %v3583_v56, %v3252_v25  ;;  %v3654_v48 = vmul.f32 %v3252_v25, %v3252_v25 }
 0x2b4   :  { %v2967_v14 = vpop.f32.mrb[208].mxu0 }
 0x2b5   :  { %v2968_v29 = vadd.f32 %v2967_v14, %v5637_v19  ;;  %v3256_v58 = vpop.f32.mrb[208].mxu1  ;;  %v2969_v45 = vpop.f32.mrb[209].mxu0  ;;  %v3717_v7 = vadd.f32 %v3716_v23, %v3654_v48  ;;  %v5643_v14 = vld [vmem:[#allocation10_spill] sm:$0xff] }
 0x2b6   :  { %v3258_v26 = vpop.f32.mrb[209].mxu1  ;;  %v2970_v38 = vpop.f32.mrb[210].mxu0 }
 0x2b7   :  { %v3257_v39 = vadd.f32 %v3256_v58, %v2968_v29  ;;  %v2971_v55 = vadd.f32 %v2970_v38, %v5638_v60  ;;  %v3259_v35 = vpop.f32.mrb[210].mxu1  ;;  %v2972_v9 = vpop.f32.mrb[211].mxu0  ;;  %v5644_v26 = vld [vmem:[#allocation11_spill] sm:$0xff] }
 0x2b8   :  { %v3261_v16 = vpop.f32.mrb[211].mxu1 }
 0x2b9   :  { %v3260_v2 = vadd.f32 %v3259_v35, %v2971_v55  ;;  %3455 = vst [vmem:[%s5606_s2 + $0x140] sm:$0xff] %v3257_v39  ;;  %v3585_v22 = vadd.f32 %v3584_v31, %v3257_v39  ;;  %v3655_v43 = vmul.f32 %v3257_v39, %v3257_v39 }
 0x2bb   :  { %v3718_v33 = vadd.f32 %v3717_v7, %v3655_v43  ;;  %3456 = vst [vmem:[%s5606_s2 + $0x148] sm:$0xff] %v3260_v2  ;;  %v3586_v57 = vadd.f32 %v3585_v22, %v3260_v2  ;;  %v3656_v50 = vmul.f32 %v3260_v2, %v3260_v2 }
 0x2bc   :  { %v2975_v13 = vpop.f32.mrb[212].mxu0 }
 0x2bd   :  { %v2976_v54 = vadd.f32 %v2975_v13, %v5639_v63  ;;  %v3264_v1 = vpop.f32.mrb[212].mxu1  ;;  %v2977_v11 = vpop.f32.mrb[213].mxu0  ;;  %v3719_v34 = vadd.f32 %v3718_v33, %v3656_v50  ;;  %v5645_v13 = vld [vmem:[#allocation12_spill] sm:$0xff] }
 0x2be   :  { %v3266_v8 = vpop.f32.mrb[213].mxu1  ;;  %v2978_v15 = vpop.f32.mrb[214].mxu0 }
 0x2bf   :  { %v3265_v53 = vadd.f32 %v3264_v1, %v2976_v54  ;;  %v2979_v46 = vadd.f32 %v2978_v15, %v5640_v18  ;;  %v3267_v21 = vpop.f32.mrb[214].mxu1  ;;  %v2980_v37 = vpop.f32.mrb[215].mxu0  ;;  %v5646_v8 = vld [vmem:[#allocation13_spill] sm:$0xff] }
 0x2c0   :  { %v3269_v17 = vpop.f32.mrb[215].mxu1 }
 0x2c1   :  { %v3268_v10 = vadd.f32 %v3267_v21, %v2979_v46  ;;  %3457 = vst [vmem:[%s5606_s2 + $0x150] sm:$0xff] %v3265_v53  ;;  %v3587_v52 = vadd.f32 %v3586_v57, %v3265_v53  ;;  %v3657_v51 = vmul.f32 %v3265_v53, %v3265_v53 }
 0x2c3   :  { %v3720_v27 = vadd.f32 %v3719_v34, %v3657_v51  ;;  %3458 = vst [vmem:[%s5606_s2 + $0x158] sm:$0xff] %v3268_v10  ;;  %v3588_v4 = vadd.f32 %v3587_v52, %v3268_v10  ;;  %v3658_v3 = vmul.f32 %v3268_v10, %v3268_v10 }
 0x2c4   :  { %v2983_v28 = vpop.f32.mrb[216].mxu0 }
 0x2c5   :  { %v2984_v47 = vadd.f32 %v2983_v28, %v5641_v36  ;;  %v3272_v40 = vpop.f32.mrb[216].mxu1  ;;  %v2985_v0 = vpop.f32.mrb[217].mxu0  ;;  %v3721_v62 = vadd.f32 %v3720_v27, %v3658_v3  ;;  %v5647_v28 = vld [vmem:[#allocation14_spill] sm:$0xff] }
 0x2c6   :  { %v3274_v59 = vpop.f32.mrb[217].mxu1  ;;  %v2986_v12 = vpop.f32.mrb[218].mxu0 }
 0x2c7   :  { %v3273_v61 = vadd.f32 %v3272_v40, %v2984_v47  ;;  %v2987_v30 = vadd.f32 %v2986_v12, %v5642_v41  ;;  %v3275_v49 = vpop.f32.mrb[218].mxu1  ;;  %v2988_v5 = vpop.f32.mrb[219].mxu0  ;;  %v5648_v59 = vld [vmem:[#allocation15_spill] sm:$0xff] }
 0x2c8   :  { %v3277_v32 = vpop.f32.mrb[219].mxu1 }
 0x2c9   :  { %v3276_v42 = vadd.f32 %v3275_v49, %v2987_v30  ;;  %3459 = vst [vmem:[%s5606_s2 + $0x160] sm:$0xff] %v3273_v61  ;;  %v3589_v20 = vadd.f32 %v3588_v4, %v3273_v61  ;;  %v3659_v44 = vmul.f32 %v3273_v61, %v3273_v61 }
 0x2cb   :  { %v3722_v25 = vadd.f32 %v3721_v62, %v3659_v44  ;;  %3460 = vst [vmem:[%s5606_s2 + $0x168] sm:$0xff] %v3276_v42  ;;  %v3590_v56 = vadd.f32 %v3589_v20, %v3276_v42  ;;  %v3660_v6 = vmul.f32 %v3276_v42, %v3276_v42 }
 0x2cc   :  { %v2991_v24 = vpop.f32.mrb[220].mxu0 }
 0x2cd   :  { %v2992_v23 = vadd.f32 %v2991_v24, %v5643_v14  ;;  %v3280_v31 = vpop.f32.mrb[220].mxu1  ;;  %v2993_v48 = vpop.f32.mrb[221].mxu0  ;;  %v3723_v58 = vadd.f32 %v3722_v25, %v3660_v6  ;;  %v5649_v24 = vld [vmem:[#allocation16_spill] sm:$0xff] }
 0x2ce   :  { %v3282_v19 = vpop.f32.mrb[221].mxu1  ;;  %v2994_v29 = vpop.f32.mrb[222].mxu0 }
 0x2cf   :  { %v3281_v45 = vadd.f32 %v3280_v31, %v2992_v23  ;;  %v2995_v38 = vadd.f32 %v2994_v29, %v5644_v26  ;;  %v3283_v7 = vpop.f32.mrb[222].mxu1  ;;  %v2996_v39 = vpop.f32.mrb[223].mxu0  ;;  %v5650_v19 = vld [vmem:[#allocation17_spill] sm:$0xff] }
 0x2d0   :  { %v3285_v60 = vpop.f32.mrb[223].mxu1 }
 0x2d1   :  { %v3284_v55 = vadd.f32 %v3283_v7, %v2995_v38  ;;  %3461 = vst [vmem:[%s5606_s2 + $0x170] sm:$0xff] %v3281_v45  ;;  %v3591_v35 = vadd.f32 %v3590_v56, %v3281_v45  ;;  %v3661_v9 = vmul.f32 %v3281_v45, %v3281_v45 }
 0x2d3   :  { %v3724_v2 = vadd.f32 %v3723_v58, %v3661_v9  ;;  %3462 = vst [vmem:[%s5606_s2 + $0x178] sm:$0xff] %v3284_v55  ;;  %v3592_v22 = vadd.f32 %v3591_v35, %v3284_v55  ;;  %v3662_v43 = vmul.f32 %v3284_v55, %v3284_v55 }
 0x2d4   :  { %v2999_v16 = vpop.f32.mrb[224].mxu0 }
 0x2d5   :  { %v3000_v33 = vadd.f32 %v2999_v16, %v5645_v13  ;;  %v3288_v57 = vpop.f32.mrb[224].mxu1  ;;  %v3001_v50 = vpop.f32.mrb[225].mxu0  ;;  %v3725_v1 = vadd.f32 %v3724_v2, %v3662_v43  ;;  %v5651_v16 = vld [vmem:[#allocation18_spill] sm:$0xff] }
 0x2d6   :  { %v3290_v63 = vpop.f32.mrb[225].mxu1  ;;  %v3002_v54 = vpop.f32.mrb[226].mxu0 }
 0x2d7   :  { %v3289_v11 = vadd.f32 %v3288_v57, %v3000_v33  ;;  %v3003_v15 = vadd.f32 %v3002_v54, %v5646_v8  ;;  %v3291_v34 = vpop.f32.mrb[226].mxu1  ;;  %v3004_v53 = vpop.f32.mrb[227].mxu0  ;;  %v5652_v63 = vld [vmem:[#allocation19_spill] sm:$0xff] }
 0x2d8   :  { %v3293_v18 = vpop.f32.mrb[227].mxu1 }
 0x2d9   :  { %v3292_v46 = vadd.f32 %v3291_v34, %v3003_v15  ;;  %3463 = vst [vmem:[%s5606_s2 + $0x180] sm:$0xff] %v3289_v11  ;;  %v3593_v21 = vadd.f32 %v3592_v22, %v3289_v11  ;;  %v3663_v37 = vmul.f32 %v3289_v11, %v3289_v11 }
 0x2db   :  { %v3726_v10 = vadd.f32 %v3725_v1, %v3663_v37  ;;  %3464 = vst [vmem:[%s5606_s2 + $0x188] sm:$0xff] %v3292_v46  ;;  %v3594_v52 = vadd.f32 %v3593_v21, %v3292_v46  ;;  %v3664_v51 = vmul.f32 %v3292_v46, %v3292_v46 }
 0x2dc   :  { %v3007_v17 = vpop.f32.mrb[228].mxu0 }
 0x2dd   :  { %v3008_v27 = vadd.f32 %v3007_v17, %v5647_v28  ;;  %v3296_v4 = vpop.f32.mrb[228].mxu1  ;;  %v3009_v3 = vpop.f32.mrb[229].mxu0  ;;  %v3727_v40 = vadd.f32 %v3726_v10, %v3664_v51  ;;  %v5653_v17 = vld [vmem:[#allocation20_spill] sm:$0xff] }
 0x2de   :  { %v3298_v36 = vpop.f32.mrb[229].mxu1  ;;  %v3010_v47 = vpop.f32.mrb[230].mxu0 }
 0x2df   :  { %v3297_v0 = vadd.f32 %v3296_v4, %v3008_v27  ;;  %v3011_v12 = vadd.f32 %v3010_v47, %v5648_v59  ;;  %v3299_v62 = vpop.f32.mrb[230].mxu1  ;;  %v3012_v61 = vpop.f32.mrb[231].mxu0  ;;  %v5654_v36 = vld [vmem:[#allocation21_spill] sm:$0xff] }
 0x2e0   :  { %v3301_v41 = vpop.f32.mrb[231].mxu1 }
 0x2e1   :  { %v3300_v30 = vadd.f32 %v3299_v62, %v3011_v12  ;;  %3465 = vst [vmem:[%s5606_s2 + $0x190] sm:$0xff] %v3297_v0  ;;  %v3595_v49 = vadd.f32 %v3594_v52, %v3297_v0  ;;  %v3665_v5 = vmul.f32 %v3297_v0, %v3297_v0 }
 0x2e3   :  { %v3728_v42 = vadd.f32 %v3727_v40, %v3665_v5  ;;  %3466 = vst [vmem:[%s5606_s2 + $0x198] sm:$0xff] %v3300_v30  ;;  %v3596_v20 = vadd.f32 %v3595_v49, %v3300_v30  ;;  %v3666_v44 = vmul.f32 %v3300_v30, %v3300_v30 }
 0x2e4   :  { %v3015_v32 = vpop.f32.mrb[232].mxu0 }
 0x2e5   :  { %v3016_v25 = vadd.f32 %v3015_v32, %v5649_v24  ;;  %v3304_v56 = vpop.f32.mrb[232].mxu1  ;;  %v3017_v6 = vpop.f32.mrb[233].mxu0  ;;  %v3729_v31 = vadd.f32 %v3728_v42, %v3666_v44  ;;  %v5655_v32 = vld [vmem:[#allocation22_spill] sm:$0xff] }
 0x2e6   :  { %v3306_v14 = vpop.f32.mrb[233].mxu1  ;;  %v3018_v23 = vpop.f32.mrb[234].mxu0 }
 0x2e7   :  { %v3305_v48 = vadd.f32 %v3304_v56, %v3016_v25  ;;  %v3019_v29 = vadd.f32 %v3018_v23, %v5650_v19  ;;  %v3307_v58 = vpop.f32.mrb[234].mxu1  ;;  %v3020_v45 = vpop.f32.mrb[235].mxu0  ;;  %v5656_v14 = vld [vmem:[#allocation23_spill] sm:$0xff] }
 0x2e8   :  { %v3309_v26 = vpop.f32.mrb[235].mxu1 }
 0x2e9   :  { %v3308_v38 = vadd.f32 %v3307_v58, %v3019_v29  ;;  %3467 = vst [vmem:[%s5606_s2 + $0x1a0] sm:$0xff] %v3305_v48  ;;  %v3597_v7 = vadd.f32 %v3596_v20, %v3305_v48  ;;  %v3667_v39 = vmul.f32 %v3305_v48, %v3305_v48 }
 0x2eb   :  { %v3730_v55 = vadd.f32 %v3729_v31, %v3667_v39  ;;  %3468 = vst [vmem:[%s5606_s2 + $0x1a8] sm:$0xff] %v3308_v38  ;;  %v3598_v35 = vadd.f32 %v3597_v7, %v3308_v38  ;;  %v3668_v9 = vmul.f32 %v3308_v38, %v3308_v38 }
 0x2ec   :  { %v3023_v60 = vpop.f32.mrb[236].mxu0 }
 0x2ed   :  { %v3024_v2 = vadd.f32 %v3023_v60, %v5651_v16  ;;  %v3312_v22 = vpop.f32.mrb[236].mxu1  ;;  %v3025_v43 = vpop.f32.mrb[237].mxu0  ;;  %v3731_v57 = vadd.f32 %v3730_v55, %v3668_v9  ;;  %v5657_v60 = vld [vmem:[#allocation24_spill] sm:$0xff] }
 0x2ee   :  { %v3314_v13 = vpop.f32.mrb[237].mxu1  ;;  %v3026_v33 = vpop.f32.mrb[238].mxu0 }
 0x2ef   :  { %v3313_v50 = vadd.f32 %v3312_v22, %v3024_v2  ;;  %v3027_v54 = vadd.f32 %v3026_v33, %v5652_v63  ;;  %v3315_v1 = vpop.f32.mrb[238].mxu1  ;;  %v3028_v11 = vpop.f32.mrb[239].mxu0  ;;  %v5658_v13 = vld [vmem:[#allocation25_spill] sm:$0xff] }
 0x2f0   :  { %v3317_v8 = vpop.f32.mrb[239].mxu1 }
 0x2f1   :  { %v3316_v15 = vadd.f32 %v3315_v1, %v3027_v54  ;;  %3469 = vst [vmem:[%s5606_s2 + $0x1b0] sm:$0xff] %v3313_v50  ;;  %v3599_v34 = vadd.f32 %v3598_v35, %v3313_v50  ;;  %v3669_v53 = vmul.f32 %v3313_v50, %v3313_v50 }
 0x2f3   :  { %v3732_v46 = vadd.f32 %v3731_v57, %v3669_v53  ;;  %3470 = vst [vmem:[%s5606_s2 + $0x1b8] sm:$0xff] %v3316_v15  ;;  %v3600_v21 = vadd.f32 %v3599_v34, %v3316_v15  ;;  %v3670_v37 = vmul.f32 %v3316_v15, %v3316_v15 }
 0x2f4   :  { %v3031_v18 = vpop.f32.mrb[240].mxu0 }
 0x2f5   :  { %v3032_v10 = vadd.f32 %v3031_v18, %v5653_v17  ;;  %v3320_v52 = vpop.f32.mrb[240].mxu1  ;;  %v3033_v51 = vpop.f32.mrb[241].mxu0  ;;  %v3733_v4 = vadd.f32 %v3732_v46, %v3670_v37  ;;  %v5659_v18 = vld [vmem:[#allocation26_spill] sm:$0xff] }
 0x2f6   :  { %v3322_v28 = vpop.f32.mrb[241].mxu1  ;;  %v3034_v27 = vpop.f32.mrb[242].mxu0 }
 0x2f7   :  { %v3321_v3 = vadd.f32 %v3320_v52, %v3032_v10  ;;  %v3035_v47 = vadd.f32 %v3034_v27, %v5654_v36  ;;  %v3323_v40 = vpop.f32.mrb[242].mxu1  ;;  %v3036_v0 = vpop.f32.mrb[243].mxu0  ;;  %v5660_v28 = vld [vmem:[#allocation27_spill] sm:$0xff] }
 0x2f8   :  { %v3325_v59 = vpop.f32.mrb[243].mxu1 }
 0x2f9   :  { %v3324_v12 = vadd.f32 %v3323_v40, %v3035_v47  ;;  %3471 = vst [vmem:[%s5606_s2 + $0x1c0] sm:$0xff] %v3321_v3  ;;  %v3601_v62 = vadd.f32 %v3600_v21, %v3321_v3  ;;  %v3671_v61 = vmul.f32 %v3321_v3, %v3321_v3 }
 0x2fb   :  { %v3734_v30 = vadd.f32 %v3733_v4, %v3671_v61  ;;  %3472 = vst [vmem:[%s5606_s2 + $0x1c8] sm:$0xff] %v3324_v12  ;;  %v3602_v49 = vadd.f32 %v3601_v62, %v3324_v12  ;;  %v3672_v5 = vmul.f32 %v3324_v12, %v3324_v12 }
 0x2fc   :  { %v3039_v41 = vpop.f32.mrb[244].mxu0 }
 0x2fd   :  { %v3040_v42 = vadd.f32 %v3039_v41, %v5655_v32  ;;  %v3328_v20 = vpop.f32.mrb[244].mxu1  ;;  %v3041_v44 = vpop.f32.mrb[245].mxu0  ;;  %v3735_v56 = vadd.f32 %v3734_v30, %v3672_v5 }
 0x2fe   :  { %v3330_v24 = vpop.f32.mrb[245].mxu1  ;;  %v3042_v25 = vpop.f32.mrb[246].mxu0 }
 0x2ff   :  { %v3329_v6 = vadd.f32 %v3328_v20, %v3040_v42  ;;  %v3043_v23 = vadd.f32 %v3042_v25, %v5656_v14  ;;  %v3331_v31 = vpop.f32.mrb[246].mxu1  ;;  %v3044_v48 = vpop.f32.mrb[247].mxu0 }
 0x300   :  { %v3333_v19 = vpop.f32.mrb[247].mxu1 }
 0x301   :  { %v3332_v29 = vadd.f32 %v3331_v31, %v3043_v23  ;;  %3473 = vst [vmem:[%s5606_s2 + $0x1d0] sm:$0xff] %v3329_v6  ;;  %v3603_v58 = vadd.f32 %v3602_v49, %v3329_v6  ;;  %v3673_v45 = vmul.f32 %v3329_v6, %v3329_v6 }
 0x303   :  { %v3736_v38 = vadd.f32 %v3735_v56, %v3673_v45  ;;  %3474 = vst [vmem:[%s5606_s2 + $0x1d8] sm:$0xff] %v3332_v29  ;;  %v3604_v7 = vadd.f32 %v3603_v58, %v3332_v29  ;;  %v3674_v39 = vmul.f32 %v3332_v29, %v3332_v29 }
 0x304   :  { %v3047_v26 = vpop.f32.mrb[248].mxu0 }
 0x305   :  { %v3048_v55 = vadd.f32 %v3047_v26, %v5657_v60  ;;  %v3336_v35 = vpop.f32.mrb[248].mxu1  ;;  %v3049_v9 = vpop.f32.mrb[249].mxu0  ;;  %v3737_v22 = vadd.f32 %v3736_v38, %v3674_v39 }
 0x306   :  { %v3338_v16 = vpop.f32.mrb[249].mxu1  ;;  %v3050_v2 = vpop.f32.mrb[250].mxu0 }
 0x307   :  { %v3337_v43 = vadd.f32 %v3336_v35, %v3048_v55  ;;  %v3051_v33 = vadd.f32 %v3050_v2, %v5658_v13  ;;  %v3339_v57 = vpop.f32.mrb[250].mxu1  ;;  %v3052_v50 = vpop.f32.mrb[251].mxu0 }
 0x308   :  { %v3341_v63 = vpop.f32.mrb[251].mxu1 }
 0x309   :  { %v3340_v54 = vadd.f32 %v3339_v57, %v3051_v33  ;;  %3475 = vst [vmem:[%s5606_s2 + $0x1e0] sm:$0xff] %v3337_v43  ;;  %v3605_v1 = vadd.f32 %v3604_v7, %v3337_v43  ;;  %v3675_v11 = vmul.f32 %v3337_v43, %v3337_v43 }
 0x30b   :  { %v3738_v15 = vadd.f32 %v3737_v22, %v3675_v11  ;;  %3476 = vst [vmem:[%s5606_s2 + $0x1e8] sm:$0xff] %v3340_v54  ;;  %v3606_v34 = vadd.f32 %v3605_v1, %v3340_v54  ;;  %v3676_v53 = vmul.f32 %v3340_v54, %v3340_v54 }
 0x30c   :  { %v3055_v8 = vpop.f32.mrb[252].mxu0 }
 0x30d   :  { %v3056_v46 = vadd.f32 %v3055_v8, %v5659_v18  ;;  %v3344_v21 = vpop.f32.mrb[252].mxu1  ;;  %v3057_v37 = vpop.f32.mrb[253].mxu0  ;;  %v3739_v52 = vadd.f32 %v3738_v15, %v3676_v53 }
 0x30e   :  { %v3346_v17 = vpop.f32.mrb[253].mxu1  ;;  %v3058_v10 = vpop.f32.mrb[254].mxu0 }
 0x30f   :  { %v3345_v51 = vadd.f32 %v3344_v21, %v3056_v46  ;;  %v3059_v27 = vadd.f32 %v3058_v10, %v5660_v28  ;;  %v3347_v4 = vpop.f32.mrb[254].mxu1  ;;  %v3060_v3 = vpop.f32.mrb[255].mxu0 }
 0x310   :  { %v3349_v36 = vpop.f32.mrb[255].mxu1 }
 0x311   :  { %v3348_v47 = vadd.f32 %v3347_v4, %v3059_v27  ;;  %3477 = vst [vmem:[%s5606_s2 + $0x1f0] sm:$0xff] %v3345_v51  ;;  %v3607_v40 = vadd.f32 %v3606_v34, %v3345_v51  ;;  %v3677_v0 = vmul.f32 %v3345_v51, %v3345_v51 }
 0x313   :  { %v3740_v59 = vadd.f32 %v3739_v52, %v3677_v0  ;;  %3478 = vst [vmem:[%s5606_s2 + $0x1f8] sm:$0xff] %v3348_v47  ;;  %v3608_v12 = vadd.f32 %v3607_v40, %v3348_v47  ;;  %v3678_v62 = vmul.f32 %v3348_v47, %v3348_v47 }
 0x315   :  { %v3609_v61 = vrot.slane %v3608_v12, 4  ;;  %v3741_v41 = vadd.f32 %v3740_v59, %v3678_v62 }
 0x317   :  { %v3610_v30 = vadd.f32 %v3609_v61, %v3608_v12  ;;  %v3742_v49 = vrot.slane %v3741_v41, 4 }
 0x319   :  { %v3611_v5 = vrot.slane %v3610_v30, 2  ;;  %v3743_v32 = vadd.f32 %v3742_v49, %v3741_v41 }
 0x31b   :  { %v3612_v42 = vadd.f32 %v3611_v5, %v3610_v30  ;;  %v3744_v20 = vrot.slane %v3743_v32, 2 }
 0x31d   :  { %v3613_v44 = vrot.slane %v3612_v42, 1  ;;  %v3745_v24 = vadd.f32 %v3744_v20, %v3743_v32 }
 0x31f   :  { %v3614_v25 = vadd.f32 %v3613_v44, %v3612_v42  ;;  %v3746_v56 = vrot.slane %v3745_v24, 1 }
 0x321   :  { %v3747_v6 = vadd.f32 %v3746_v56, %v3745_v24  ;;  %3748 = vst [vmem:[%s5607_s3] sm:$0xff] %v3614_v25 }
 0x323   :  { %3749 = vst [vmem:[%s5608_s4] sm:$0xff] %v3747_v6 }

// kernel: discriminator_forward.12
= control target key start
LH: loop header
LB: loop body
LE: loop exit
PB: predicated region body
PF: predicated region fallthrough
CT: control target
= control target key end

     0   :  { %s1503_s0 = inlined_call_operand.vmem [shape: f32[512,128], index: 0, kind: input, shape index: {}]   ;;  %s1504_s1 = inlined_call_operand.vmem [shape: f32[1,128], index: 1, kind: input, shape index: {}]   ;;  %s1505_s2 = inlined_call_operand.vmem [shape: f32[1,128], index: 2, kind: input, shape index: {}]   ;;  %s1506_s3 = inlined_call_operand.vmem [shape: bf16[512,128], index: 3, kind: output, shape index: {}]  }
   0x1   :  { %v14_v0 = vld [vmem:[%s1503_s0] sm:$0xff]  ;;  %v15_v1 = vld [vmem:[%s1503_s0 + $0x8] sm:$0xff]  ;;  %v16_v6 = vld [vmem:[%s1503_s0 + $0x10] sm:$0xff] }
   0x2   :  { %v1086_v2 = vld [vmem:[%s1504_s1] ss:$0 sm:$0xff]  ;;  %v17_v7 = vld [vmem:[%s1503_s0 + $0x18] sm:$0xff]  ;;  %v19_v11 = vld [vmem:[%s1503_s0 + $0x28] sm:$0xff] }
   0x3   :  { %v85_v3 = vmul.f32 %v1086_v2, %v14_v0  ;;  %v86_v4 = vmul.f32 %v1086_v2, %v15_v1  ;;  %v1093_v5 = vld [vmem:[%s1505_s2] ss:$0 sm:$0xff]  ;;  %v87_v8 = vmul.f32 %v1086_v2, %v16_v6  ;;  %v88_v9 = vmul.f32 %v1086_v2, %v17_v7  ;;  %v20_v12 = vld [vmem:[%s1503_s0 + $0x30] sm:$0xff]  ;;  %v21_v17 = vld [vmem:[%s1503_s0 + $0x38] sm:$0xff] }
   0x4   :  { %v18_v10 = vld [vmem:[%s1503_s0 + $0x20] sm:$0xff]  ;;  %v90_v16 = vmul.f32 %v1086_v2, %v19_v11  ;;  %v91_v20 = vmul.f32 %v1086_v2, %v20_v12  ;;  %v92_v21 = vmul.f32 %v1086_v2, %v21_v17  ;;  %v23_v35 = vld [vmem:[%s1503_s0 + $0x48] sm:$0xff]  ;;  %v24_v36 = vld [vmem:[%s1503_s0 + $0x50] sm:$0xff] }
   0x5   :  { %v156_v13 = vadd.f32 %v1093_v5, %v85_v3  ;;  %v157_v14 = vadd.f32 %v1093_v5, %v86_v4  ;;  %v89_v15 = vmul.f32 %v1086_v2, %v18_v10  ;;  %v158_v18 = vadd.f32 %v1093_v5, %v87_v8  ;;  %v22_v34 = vld [vmem:[%s1503_s0 + $0x40] sm:$0xff]  ;;  %v25_v42 = vld [vmem:[%s1503_s0 + $0x58] sm:$0xff]  ;;  %v27_v48 = vld [vmem:[%s1503_s0 + $0x68] sm:$0xff] }
   0x6   :  { %v159_v19 = vadd.f32 %v1093_v5, %v88_v9  ;;  %v161_v29 = vadd.f32 %v1093_v5, %v90_v16  ;;  %v162_v33 = vadd.f32 %v1093_v5, %v91_v20  ;;  %v163_v40 = vadd.f32 %v1093_v5, %v92_v21  ;;  %v26_v47 = vld [vmem:[%s1503_s0 + $0x60] sm:$0xff]  ;;  %v28_v60 = vld [vmem:[%s1503_s0 + $0x70] sm:$0xff]  ;;  %v29_v7 = vld [vmem:[%s1503_s0 + $0x78] sm:$0xff] }
   0x7   :  { %vm220_vm0 = vcmp.ge.f32.partialorder %v156_v13, 0.0  ;;  %vm221_vm1 = vcmp.ge.f32.partialorder %v157_v14, 0.0  ;;  %v284_v22 = vmul.f32 0.2, %v156_v13  ;;  %v285_v23 = vmul.f32 0.2, %v157_v14 }
   0x8   :  { %vm222_vm2 = vcmp.ge.f32.partialorder %v158_v18, 0.0  ;;  %vm223_vm3 = vcmp.ge.f32.partialorder %v159_v19, 0.0  ;;  %v286_v24 = vmul.f32 0.2, %v158_v18  ;;  %v287_v25 = vmul.f32 0.2, %v159_v19 }
   0x9   :  { %v348_v26 = vsel %vm220_vm0, %v156_v13, %v284_v22  ;;  %v349_v27 = vsel %vm221_vm1, %v157_v14, %v285_v23  ;;  %v160_v28 = vadd.f32 %v1093_v5, %v89_v15  ;;  %vm225_vm5 = vcmp.ge.f32.partialorder %v161_v29, 0.0  ;;  %v30_v12 = vld [vmem:[%s1503_s0 + $0x80] sm:$0xff]  ;;  %v31_v13 = vld [vmem:[%s1503_s0 + $0x88] sm:$0xff]  ;;  %v32_v20 = vld [vmem:[%s1503_s0 + $0x90] sm:$0xff] }
   0xa   :  { %v869_v30 = vpack.c.bf16 %v349_v27, %v348_v26  ;;  %v350_v31 = vsel %vm222_vm2, %v158_v18, %v286_v24  ;;  %v351_v32 = vsel %vm223_vm3, %v159_v19, %v287_v25  ;;  %v289_v39 = vmul.f32 0.2, %v161_v29  ;;  %v33_v25 = vld [vmem:[%s1503_s0 + $0x98] sm:$0xff] }
   0xb   :  { %v874_v37 = vpack.c.bf16 %v351_v32, %v350_v31  ;;  %vm224_vm4 = vcmp.ge.f32.partialorder %v160_v28, 0.0  ;;  %v288_v38 = vmul.f32 0.2, %v160_v28  ;;  %vm226_vm6 = vcmp.ge.f32.partialorder %v162_v33, 0.0 }
   0xc   :  { %870 = vst [vmem:[%s1506_s3] sm:$0xff] %v869_v30   ;;  %v290_v41 = vmul.f32 0.2, %v162_v33  ;;  %v93_v44 = vmul.f32 %v1086_v2, %v22_v34  ;;  %v94_v45 = vmul.f32 %v1086_v2, %v23_v35  ;;  %v95_v46 = vmul.f32 %v1086_v2, %v24_v36 }
   0xd   :  { %1026 = vst [vmem:[%s1506_s3 + $0x8] sm:$0xff] %v874_v37   ;;  %v352_v43 = vsel %vm224_vm4, %v160_v28, %v288_v38  ;;  %v353_v49 = vsel %vm225_vm5, %v161_v29, %v289_v39  ;;  %vm227_vm7 = vcmp.ge.f32.partialorder %v163_v40, 0.0  ;;  %v291_v50 = vmul.f32 0.2, %v163_v40  ;;  %v35_v37 = vld [vmem:[%s1503_s0 + $0xa8] sm:$0xff] }
   0xe   :  { %v354_v51 = vsel %vm226_vm6, %v162_v33, %v290_v41  ;;  %v879_v52 = vpack.c.bf16 %v353_v49, %v352_v43  ;;  %v164_v53 = vadd.f32 %v1093_v5, %v93_v44  ;;  %v165_v54 = vadd.f32 %v1093_v5, %v94_v45  ;;  %v34_v33 = vld [vmem:[%s1503_s0 + $0xa0] sm:$0xff]  ;;  %v36_v44 = vld [vmem:[%s1503_s0 + $0xb0] sm:$0xff]  ;;  %v37_v49 = vld [vmem:[%s1503_s0 + $0xb8] sm:$0xff] }
   0xf   :  { %v96_v55 = vmul.f32 %v1086_v2, %v25_v42  ;;  %v355_v56 = vsel %vm227_vm7, %v163_v40, %v291_v50  ;;  %v166_v57 = vadd.f32 %v1093_v5, %v95_v46  ;;  %v97_v58 = vmul.f32 %v1086_v2, %v26_v47  ;;  %v38_v50 = vld [vmem:[%s1503_s0 + $0xc0] sm:$0xff] }
  0x10   :  { %v98_v59 = vmul.f32 %v1086_v2, %v27_v48  ;;  %1027 = vst [vmem:[%s1506_s3 + $0x10] sm:$0xff] %v879_v52   ;;  %v884_v61 = vpack.c.bf16 %v355_v56, %v354_v51  ;;  %vm228_vm8 = vcmp.ge.f32.partialorder %v164_v53, 0.0  ;;  %vm229_vm9 = vcmp.ge.f32.partialorder %v165_v54, 0.0  ;;  %v39_v51 = vld [vmem:[%s1503_s0 + $0xc8] sm:$0xff] }
  0x11   :  { %v292_v62 = vmul.f32 0.2, %v164_v53  ;;  %v293_v63 = vmul.f32 0.2, %v165_v54  ;;  %v167_v0 = vadd.f32 %v1093_v5, %v96_v55  ;;  %vm230_vm10 = vcmp.ge.f32.partialorder %v166_v57, 0.0 }
  0x12   :  { %v294_v1 = vmul.f32 0.2, %v166_v57  ;;  %1028 = vst [vmem:[%s1506_s3 + $0x18] sm:$0xff] %v884_v61   ;;  %v168_v4 = vadd.f32 %v1093_v5, %v97_v58  ;;  %v169_v6 = vadd.f32 %v1093_v5, %v98_v59  ;;  %v99_v8 = vmul.f32 %v1086_v2, %v28_v60 }
  0x13   :  { %v356_v3 = vsel %vm228_vm8, %v164_v53, %v292_v62  ;;  %v357_v9 = vsel %vm229_vm9, %v165_v54, %v293_v63  ;;  %vm231_vm11 = vcmp.ge.f32.partialorder %v167_v0, 0.0  ;;  %v295_v10 = vmul.f32 0.2, %v167_v0  ;;  %v40_v62 = vld [vmem:[%s1503_s0 + $0xd0] sm:$0xff] }
  0x14   :  { %v358_v11 = vsel %vm230_vm10, %v166_v57, %v294_v1  ;;  %v889_v14 = vpack.c.bf16 %v357_v9, %v356_v3  ;;  %vm232_vm12 = vcmp.ge.f32.partialorder %v168_v4, 0.0  ;;  %vm233_vm13 = vcmp.ge.f32.partialorder %v169_v6, 0.0 }
  0x15   :  { %v296_v15 = vmul.f32 0.2, %v168_v4  ;;  %v359_v16 = vsel %vm231_vm11, %v167_v0, %v295_v10  ;;  %v297_v17 = vmul.f32 0.2, %v169_v6  ;;  %v100_v18 = vmul.f32 %v1086_v2, %v29_v7  ;;  %v41_v10 = vld [vmem:[%s1503_s0 + $0xd8] sm:$0xff] }
  0x16   :  { %v170_v19 = vadd.f32 %v1093_v5, %v99_v8  ;;  %1029 = vst [vmem:[%s1506_s3 + $0x20] sm:$0xff] %v889_v14   ;;  %v894_v21 = vpack.c.bf16 %v359_v16, %v358_v11  ;;  %v101_v23 = vmul.f32 %v1086_v2, %v30_v12  ;;  %v102_v24 = vmul.f32 %v1086_v2, %v31_v13  ;;  %v42_v14 = vld [vmem:[%s1503_s0 + $0xe0] sm:$0xff] }
  0x17   :  { %v360_v22 = vsel %vm232_vm12, %v168_v4, %v296_v15  ;;  %v361_v26 = vsel %vm233_vm13, %v169_v6, %v297_v17  ;;  %v171_v27 = vadd.f32 %v1093_v5, %v100_v18  ;;  %v103_v32 = vmul.f32 %v1086_v2, %v32_v20  ;;  %v43_v15 = vld [vmem:[%s1503_s0 + $0xe8] sm:$0xff] }
  0x18   :  { %vm234_vm14 = vcmp.ge.f32.partialorder %v170_v19, 0.0  ;;  %v298_v28 = vmul.f32 0.2, %v170_v19  ;;  %1030 = vst [vmem:[%s1506_s3 + $0x28] sm:$0xff] %v894_v21   ;;  %v899_v29 = vpack.c.bf16 %v361_v26, %v360_v22  ;;  %v172_v30 = vadd.f32 %v1093_v5, %v101_v23  ;;  %v44_v26 = vld [vmem:[%s1503_s0 + $0xf0] sm:$0xff] }
  0x19   :  { %v173_v31 = vadd.f32 %v1093_v5, %v102_v24  ;;  %vm235_vm15 = vcmp.ge.f32.partialorder %v171_v27, 0.0  ;;  %v299_v34 = vmul.f32 0.2, %v171_v27  ;;  %v104_v36 = vmul.f32 %v1086_v2, %v33_v25 }
  0x1a   :  { %v362_v35 = vsel %vm234_vm14, %v170_v19, %v298_v28  ;;  %1031 = vst [vmem:[%s1506_s3 + $0x30] sm:$0xff] %v899_v29   ;;  %vm236_vm0 = vcmp.ge.f32.partialorder %v172_v30, 0.0  ;;  %v300_v38 = vmul.f32 0.2, %v172_v30  ;;  %v174_v41 = vadd.f32 %v1093_v5, %v103_v32 }
  0x1b   :  { %vm237_vm1 = vcmp.ge.f32.partialorder %v173_v31, 0.0  ;;  %v301_v39 = vmul.f32 0.2, %v173_v31  ;;  %v363_v40 = vsel %vm235_vm15, %v171_v27, %v299_v34  ;;  %v175_v42 = vadd.f32 %v1093_v5, %v104_v36 }
  0x1c   :  { %v105_v43 = vmul.f32 %v1086_v2, %v34_v33  ;;  %v904_v45 = vpack.c.bf16 %v363_v40, %v362_v35  ;;  %v364_v46 = vsel %vm236_vm0, %v172_v30, %v300_v38  ;;  %v106_v48 = vmul.f32 %v1086_v2, %v35_v37  ;;  %v46_v38 = vld [vmem:[%s1503_s0 + $0x100] sm:$0xff] }
  0x1d   :  { %v365_v47 = vsel %vm237_vm1, %v173_v31, %v301_v39  ;;  %vm238_vm2 = vcmp.ge.f32.partialorder %v174_v41, 0.0  ;;  %vm239_vm3 = vcmp.ge.f32.partialorder %v175_v42, 0.0  ;;  %v302_v53 = vmul.f32 0.2, %v174_v41  ;;  %v45_v31 = vld [vmem:[%s1503_s0 + $0xf8] sm:$0xff] }
  0x1e   :  { %v909_v52 = vpack.c.bf16 %v365_v47, %v364_v46  ;;  %1032 = vst [vmem:[%s1506_s3 + $0x38] sm:$0xff] %v904_v45   ;;  %v303_v54 = vmul.f32 0.2, %v175_v42  ;;  %v176_v55 = vadd.f32 %v1093_v5, %v105_v43  ;;  %v177_v56 = vadd.f32 %v1093_v5, %v106_v48 }
  0x1f   :  { %v107_v57 = vmul.f32 %v1086_v2, %v36_v44  ;;  %v366_v58 = vsel %vm238_vm2, %v174_v41, %v302_v53  ;;  %v108_v59 = vmul.f32 %v1086_v2, %v37_v49  ;;  %v109_v60 = vmul.f32 %v1086_v2, %v38_v50  ;;  %v48_v50 = vld [vmem:[%s1503_s0 + $0x110] sm:$0xff] }
  0x20   :  { %1033 = vst [vmem:[%s1506_s3 + $0x40] sm:$0xff] %v909_v52   ;;  %v110_v61 = vmul.f32 %v1086_v2, %v39_v51  ;;  %v367_v63 = vsel %vm239_vm3, %v175_v42, %v303_v54  ;;  %vm240_vm4 = vcmp.ge.f32.partialorder %v176_v55, 0.0  ;;  %vm241_vm5 = vcmp.ge.f32.partialorder %v177_v56, 0.0  ;;  %v47_v42 = vld [vmem:[%s1503_s0 + $0x108] sm:$0xff]  ;;  %v49_v51 = vld [vmem:[%s1503_s0 + $0x118] sm:$0xff] }
  0x21   :  { %v304_v0 = vmul.f32 0.2, %v176_v55  ;;  %v914_v1 = vpack.c.bf16 %v367_v63, %v366_v58  ;;  %v305_v3 = vmul.f32 0.2, %v177_v56  ;;  %v178_v4 = vadd.f32 %v1093_v5, %v107_v57  ;;  %v51_v63 = vld [vmem:[%s1503_s0 + $0x128] sm:$0xff] }
  0x22   :  { %v179_v6 = vadd.f32 %v1093_v5, %v108_v59  ;;  %v180_v8 = vadd.f32 %v1093_v5, %v109_v60  ;;  %v181_v9 = vadd.f32 %v1093_v5, %v110_v61  ;;  %v111_v11 = vmul.f32 %v1086_v2, %v40_v62 }
  0x23   :  { %v368_v7 = vsel %vm240_vm4, %v176_v55, %v304_v0  ;;  %1034 = vst [vmem:[%s1506_s3 + $0x48] sm:$0xff] %v914_v1   ;;  %v369_v12 = vsel %vm241_vm5, %v177_v56, %v305_v3  ;;  %vm242_vm6 = vcmp.ge.f32.partialorder %v178_v4, 0.0  ;;  %v306_v13 = vmul.f32 0.2, %v178_v4  ;;  %v50_v55 = vld [vmem:[%s1503_s0 + $0x120] sm:$0xff] }
  0x24   :  { %vm243_vm7 = vcmp.ge.f32.partialorder %v179_v6, 0.0  ;;  %v919_v16 = vpack.c.bf16 %v369_v12, %v368_v7  ;;  %v307_v17 = vmul.f32 0.2, %v179_v6  ;;  %vm244_vm8 = vcmp.ge.f32.partialorder %v180_v8, 0.0 }
  0x25   :  { %vm245_vm9 = vcmp.ge.f32.partialorder %v181_v9, 0.0  ;;  %v370_v18 = vsel %vm242_vm6, %v178_v4, %v306_v13  ;;  %v308_v19 = vmul.f32 0.2, %v180_v8  ;;  %v309_v20 = vmul.f32 0.2, %v181_v9  ;;  %v52_v4 = vld [vmem:[%s1503_s0 + $0x130] sm:$0xff] }
  0x26   :  { %v112_v21 = vmul.f32 %v1086_v2, %v41_v10  ;;  %1035 = vst [vmem:[%s1506_s3 + $0x50] sm:$0xff] %v919_v16   ;;  %v371_v22 = vsel %vm243_vm7, %v179_v6, %v307_v17  ;;  %v182_v23 = vadd.f32 %v1093_v5, %v111_v11  ;;  %v113_v24 = vmul.f32 %v1086_v2, %v42_v14  ;;  %v53_v13 = vld [vmem:[%s1503_s0 + $0x138] sm:$0xff] }
  0x27   :  { %v114_v25 = vmul.f32 %v1086_v2, %v43_v15  ;;  %v924_v27 = vpack.c.bf16 %v371_v22, %v370_v18  ;;  %v372_v28 = vsel %vm244_vm8, %v180_v8, %v308_v19  ;;  %v373_v29 = vsel %vm245_vm9, %v181_v9, %v309_v20  ;;  %v54_v20 = vld [vmem:[%s1503_s0 + $0x140] sm:$0xff] }
  0x28   :  { %v183_v30 = vadd.f32 %v1093_v5, %v112_v21  ;;  %v929_v32 = vpack.c.bf16 %v373_v29, %v372_v28  ;;  %vm246_vm10 = vcmp.ge.f32.partialorder %v182_v23, 0.0  ;;  %v310_v33 = vmul.f32 0.2, %v182_v23 }
  0x29   :  { %v184_v34 = vadd.f32 %v1093_v5, %v113_v24  ;;  %1036 = vst [vmem:[%s1506_s3 + $0x58] sm:$0xff] %v924_v27   ;;  %v185_v36 = vadd.f32 %v1093_v5, %v114_v25  ;;  %v115_v37 = vmul.f32 %v1086_v2, %v44_v26  ;;  %v116_v41 = vmul.f32 %v1086_v2, %v45_v31  ;;  %v55_v24 = vld [vmem:[%s1503_s0 + $0x148] sm:$0xff] }
  0x2a   :  { %vm247_vm11 = vcmp.ge.f32.partialorder %v183_v30, 0.0  ;;  %v311_v35 = vmul.f32 0.2, %v183_v30  ;;  %1037 = vst [vmem:[%s1506_s3 + $0x60] sm:$0xff] %v929_v32   ;;  %v374_v39 = vsel %vm246_vm10, %v182_v23, %v310_v33  ;;  %v117_v49 = vmul.f32 %v1086_v2, %v46_v38  ;;  %v56_v32 = vld [vmem:[%s1503_s0 + $0x150] sm:$0xff]  ;;  %v57_v33 = vld [vmem:[%s1503_s0 + $0x158] sm:$0xff] }
  0x2b   :  { %vm248_vm12 = vcmp.ge.f32.partialorder %v184_v34, 0.0  ;;  %v312_v40 = vmul.f32 0.2, %v184_v34  ;;  %vm249_vm13 = vcmp.ge.f32.partialorder %v185_v36, 0.0  ;;  %v313_v44 = vmul.f32 0.2, %v185_v36 }
  0x2c   :  { %v375_v43 = vsel %vm247_vm11, %v183_v30, %v311_v35  ;;  %v186_v45 = vadd.f32 %v1093_v5, %v115_v37  ;;  %v187_v48 = vadd.f32 %v1093_v5, %v116_v41  ;;  %v118_v54 = vmul.f32 %v1086_v2, %v47_v42  ;;  %v58_v37 = vld [vmem:[%s1503_s0 + $0x160] sm:$0xff] }
  0x2d   :  { %v934_v46 = vpack.c.bf16 %v375_v43, %v374_v39  ;;  %v376_v47 = vsel %vm248_vm12, %v184_v34, %v312_v40  ;;  %v377_v52 = vsel %vm249_vm13, %v185_v36, %v313_v44  ;;  %v188_v58 = vadd.f32 %v1093_v5, %v117_v49  ;;  %v60_v49 = vld [vmem:[%s1503_s0 + $0x170] sm:$0xff] }
  0x2e   :  { %vm250_vm14 = vcmp.ge.f32.partialorder %v186_v45, 0.0  ;;  %v314_v53 = vmul.f32 0.2, %v186_v45  ;;  %v939_v56 = vpack.c.bf16 %v377_v52, %v376_v47  ;;  %vm251_vm15 = vcmp.ge.f32.partialorder %v187_v48, 0.0 }
  0x2f   :  { %1038 = vst [vmem:[%s1506_s3 + $0x68] sm:$0xff] %v934_v46   ;;  %v315_v57 = vmul.f32 0.2, %v187_v48  ;;  %v189_v60 = vadd.f32 %v1093_v5, %v118_v54  ;;  %v119_v61 = vmul.f32 %v1086_v2, %v48_v50  ;;  %v120_v62 = vmul.f32 %v1086_v2, %v49_v51 }
  0x30   :  { %v378_v59 = vsel %vm250_vm14, %v186_v45, %v314_v53  ;;  %1039 = vst [vmem:[%s1506_s3 + $0x70] sm:$0xff] %v939_v56   ;;  %vm252_vm0 = vcmp.ge.f32.partialorder %v188_v58, 0.0  ;;  %v316_v1 = vmul.f32 0.2, %v188_v58  ;;  %v121_v3 = vmul.f32 %v1086_v2, %v50_v55  ;;  %v59_v45 = vld [vmem:[%s1503_s0 + $0x168] sm:$0xff] }
  0x31   :  { %v379_v0 = vsel %vm251_vm15, %v187_v48, %v315_v57  ;;  %vm253_vm1 = vcmp.ge.f32.partialorder %v189_v60, 0.0  ;;  %v317_v7 = vmul.f32 0.2, %v189_v60  ;;  %v190_v8 = vadd.f32 %v1093_v5, %v119_v61  ;;  %v61_v57 = vld [vmem:[%s1503_s0 + $0x178] sm:$0xff] }
  0x32   :  { %v944_v6 = vpack.c.bf16 %v379_v0, %v378_v59  ;;  %v380_v9 = vsel %vm252_vm0, %v188_v58, %v316_v1  ;;  %v191_v10 = vadd.f32 %v1093_v5, %v120_v62  ;;  %v122_v11 = vmul.f32 %v1086_v2, %v51_v63  ;;  %v62_v0 = vld [vmem:[%s1503_s0 + $0x180] sm:$0xff] }
  0x33   :  { %v192_v12 = vadd.f32 %v1093_v5, %v121_v3  ;;  %v381_v14 = vsel %vm253_vm1, %v189_v60, %v317_v7  ;;  %vm254_vm2 = vcmp.ge.f32.partialorder %v190_v8, 0.0  ;;  %v318_v15 = vmul.f32 0.2, %v190_v8 }
  0x34   :  { %1040 = vst [vmem:[%s1506_s3 + $0x78] sm:$0xff] %v944_v6   ;;  %v123_v16 = vmul.f32 %v1086_v2, %v52_v4  ;;  %v949_v17 = vpack.c.bf16 %v381_v14, %v380_v9  ;;  %vm255_vm3 = vcmp.ge.f32.partialorder %v191_v10, 0.0  ;;  %v319_v18 = vmul.f32 0.2, %v191_v10  ;;  %v63_v6 = vld [vmem:[%s1503_s0 + $0x188] sm:$0xff]  ;;  %v64_v14 = vld [vmem:[%s1503_s0 + $0x190] sm:$0xff] }
  0x35   :  { %v193_v19 = vadd.f32 %v1093_v5, %v122_v11  ;;  %v382_v21 = vsel %vm254_vm2, %v190_v8, %v318_v15  ;;  %vm256_vm4 = vcmp.ge.f32.partialorder %v192_v12, 0.0  ;;  %v320_v22 = vmul.f32 0.2, %v192_v12  ;;  %v65_v15 = vld [vmem:[%s1503_s0 + $0x198] sm:$0xff] }
  0x36   :  { %v124_v23 = vmul.f32 %v1086_v2, %v53_v13  ;;  %1041 = vst [vmem:[%s1506_s3 + $0x80] sm:$0xff] %v949_v17   ;;  %v383_v25 = vsel %vm255_vm3, %v191_v10, %v319_v18  ;;  %v194_v27 = vadd.f32 %v1093_v5, %v123_v16  ;;  %v125_v31 = vmul.f32 %v1086_v2, %v54_v20 }
  0x37   :  { %vm257_vm5 = vcmp.ge.f32.partialorder %v193_v19, 0.0  ;;  %v321_v26 = vmul.f32 0.2, %v193_v19  ;;  %v954_v28 = vpack.c.bf16 %v383_v25, %v382_v21  ;;  %v384_v29 = vsel %vm256_vm4, %v192_v12, %v320_v22 }
  0x38   :  { %v195_v30 = vadd.f32 %v1093_v5, %v124_v23  ;;  %vm258_vm6 = vcmp.ge.f32.partialorder %v194_v27, 0.0  ;;  %v322_v35 = vmul.f32 0.2, %v194_v27  ;;  %v126_v36 = vmul.f32 %v1086_v2, %v55_v24 }
  0x39   :  { %v385_v34 = vsel %vm257_vm5, %v193_v19, %v321_v26  ;;  %1042 = vst [vmem:[%s1506_s3 + $0x88] sm:$0xff] %v954_v28   ;;  %v196_v40 = vadd.f32 %v1093_v5, %v125_v31  ;;  %v127_v43 = vmul.f32 %v1086_v2, %v56_v32  ;;  %v128_v44 = vmul.f32 %v1086_v2, %v57_v33  ;;  %v66_v19 = vld [vmem:[%s1503_s0 + $0x1a0] sm:$0xff]  ;;  %v68_v31 = vld [vmem:[%s1503_s0 + $0x1b0] sm:$0xff] }
  0x3a   :  { %v959_v38 = vpack.c.bf16 %v385_v34, %v384_v29  ;;  %vm259_vm7 = vcmp.ge.f32.partialorder %v195_v30, 0.0  ;;  %v323_v39 = vmul.f32 0.2, %v195_v30  ;;  %v386_v41 = vsel %vm258_vm6, %v194_v27, %v322_v35  ;;  %v67_v27 = vld [vmem:[%s1503_s0 + $0x1a8] sm:$0xff] }
  0x3b   :  { %v197_v42 = vadd.f32 %v1093_v5, %v126_v36  ;;  %vm260_vm8 = vcmp.ge.f32.partialorder %v196_v40, 0.0  ;;  %v324_v47 = vmul.f32 0.2, %v196_v40  ;;  %v129_v48 = vmul.f32 %v1086_v2, %v58_v37 }
  0x3c   :  { %1043 = vst [vmem:[%s1506_s3 + $0x90] sm:$0xff] %v959_v38   ;;  %v387_v46 = vsel %vm259_vm7, %v195_v30, %v323_v39  ;;  %v198_v52 = vadd.f32 %v1093_v5, %v127_v43  ;;  %v199_v54 = vadd.f32 %v1093_v5, %v128_v44  ;;  %v130_v55 = vmul.f32 %v1086_v2, %v59_v45  ;;  %v69_v39 = vld [vmem:[%s1503_s0 + $0x1b8] sm:$0xff] }
  0x3d   :  { %v964_v50 = vpack.c.bf16 %v387_v46, %v386_v41  ;;  %vm261_vm9 = vcmp.ge.f32.partialorder %v197_v42, 0.0  ;;  %v325_v51 = vmul.f32 0.2, %v197_v42  ;;  %v388_v53 = vsel %vm260_vm8, %v196_v40, %v324_v47  ;;  %v70_v46 = vld [vmem:[%s1503_s0 + $0x1c0] sm:$0xff] }
  0x3e   :  { %v200_v56 = vadd.f32 %v1093_v5, %v129_v48  ;;  %vm262_vm10 = vcmp.ge.f32.partialorder %v198_v52, 0.0  ;;  %v326_v59 = vmul.f32 0.2, %v198_v52  ;;  %v131_v60 = vmul.f32 %v1086_v2, %v60_v49 }
  0x3f   :  { %1044 = vst [vmem:[%s1506_s3 + $0x98] sm:$0xff] %v964_v50   ;;  %v389_v58 = vsel %vm261_vm9, %v197_v42, %v325_v51  ;;  %vm263_vm11 = vcmp.ge.f32.partialorder %v199_v54, 0.0  ;;  %v327_v62 = vmul.f32 0.2, %v199_v54  ;;  %v201_v63 = vadd.f32 %v1093_v5, %v130_v55  ;;  %v71_v50 = vld [vmem:[%s1503_s0 + $0x1c8] sm:$0xff] }
  0x40   :  { %v969_v61 = vpack.c.bf16 %v389_v58, %v388_v53  ;;  %v390_v1 = vsel %vm262_vm10, %v198_v52, %v326_v59  ;;  %vm264_vm12 = vcmp.ge.f32.partialorder %v200_v56, 0.0  ;;  %v328_v3 = vmul.f32 0.2, %v200_v56  ;;  %v72_v58 = vld [vmem:[%s1503_s0 + $0x1d0] sm:$0xff]  ;;  %v73_v59 = vld [vmem:[%s1503_s0 + $0x1d8] sm:$0xff] }
  0x41   :  { %v132_v4 = vmul.f32 %v1086_v2, %v61_v57  ;;  %v391_v7 = vsel %vm263_vm11, %v199_v54, %v327_v62  ;;  %vm265_vm13 = vcmp.ge.f32.partialorder %v201_v63, 0.0  ;;  %v329_v8 = vmul.f32 0.2, %v201_v63 }
  0x42   :  { %1045 = vst [vmem:[%s1506_s3 + $0xa0] sm:$0xff] %v969_v61   ;;  %v202_v9 = vadd.f32 %v1093_v5, %v131_v60  ;;  %v974_v10 = vpack.c.bf16 %v391_v7, %v390_v1  ;;  %v392_v11 = vsel %vm264_vm12, %v200_v56, %v328_v3  ;;  %v133_v13 = vmul.f32 %v1086_v2, %v62_v0 }
  0x43   :  { %v203_v12 = vadd.f32 %v1093_v5, %v132_v4  ;;  %v393_v16 = vsel %vm265_vm13, %v201_v63, %v329_v8  ;;  %v134_v18 = vmul.f32 %v1086_v2, %v63_v6  ;;  %v135_v25 = vmul.f32 %v1086_v2, %v64_v14  ;;  %v74_v63 = vld [vmem:[%s1503_s0 + $0x1e0] sm:$0xff] }
  0x44   :  { %vm266_vm14 = vcmp.ge.f32.partialorder %v202_v9, 0.0  ;;  %v330_v17 = vmul.f32 0.2, %v202_v9  ;;  %1046 = vst [vmem:[%s1506_s3 + $0xa8] sm:$0xff] %v974_v10   ;;  %v979_v20 = vpack.c.bf16 %v393_v16, %v392_v11  ;;  %v204_v22 = vadd.f32 %v1093_v5, %v133_v13  ;;  %v76_v13 = vld [vmem:[%s1503_s0 + $0x1f0] sm:$0xff] }
  0x45   :  { %vm267_vm15 = vcmp.ge.f32.partialorder %v203_v12, 0.0  ;;  %v331_v21 = vmul.f32 0.2, %v203_v12  ;;  %v205_v24 = vadd.f32 %v1093_v5, %v134_v18  ;;  %v136_v26 = vmul.f32 %v1086_v2, %v65_v15 }
  0x46   :  { %v394_v23 = vsel %vm266_vm14, %v202_v9, %v330_v17  ;;  %1047 = vst [vmem:[%s1506_s3 + $0xb0] sm:$0xff] %v979_v20   ;;  %vm268_vm0 = vcmp.ge.f32.partialorder %v204_v22, 0.0  ;;  %v332_v29 = vmul.f32 0.2, %v204_v22  ;;  %v137_v30 = vmul.f32 %v1086_v2, %v66_v19  ;;  %v75_v9 = vld [vmem:[%s1503_s0 + $0x1e8] sm:$0xff] }
  0x47   :  { %v395_v28 = vsel %vm267_vm15, %v203_v12, %v331_v21  ;;  %vm269_vm1 = vcmp.ge.f32.partialorder %v205_v24, 0.0  ;;  %v333_v33 = vmul.f32 0.2, %v205_v24  ;;  %v206_v34 = vadd.f32 %v1093_v5, %v135_v25  ;;  %v77_v21 = vld [vmem:[%s1503_s0 + $0x1f8] sm:$0xff] }
  0x48   :  { %v984_v32 = vpack.c.bf16 %v395_v28, %v394_v23  ;;  %v396_v35 = vsel %vm268_vm0, %v204_v22, %v332_v29  ;;  %v207_v36 = vadd.f32 %v1093_v5, %v136_v26  ;;  %v138_v37 = vmul.f32 %v1086_v2, %v67_v27 }
  0x49   :  { %v208_v38 = vadd.f32 %v1093_v5, %v137_v30  ;;  %v397_v40 = vsel %vm269_vm1, %v205_v24, %v333_v33  ;;  %vm270_vm2 = vcmp.ge.f32.partialorder %v206_v34, 0.0  ;;  %v334_v41 = vmul.f32 0.2, %v206_v34 }
  0x4a   :  { %1048 = vst [vmem:[%s1506_s3 + $0xb8] sm:$0xff] %v984_v32   ;;  %v139_v42 = vmul.f32 %v1086_v2, %v68_v31  ;;  %v989_v43 = vpack.c.bf16 %v397_v40, %v396_v35  ;;  %vm271_vm3 = vcmp.ge.f32.partialorder %v207_v36, 0.0  ;;  %v335_v44 = vmul.f32 0.2, %v207_v36 }
  0x4b   :  { %v209_v45 = vadd.f32 %v1093_v5, %v138_v37  ;;  %v398_v47 = vsel %vm270_vm2, %v206_v34, %v334_v41  ;;  %vm272_vm4 = vcmp.ge.f32.partialorder %v208_v38, 0.0  ;;  %v336_v48 = vmul.f32 0.2, %v208_v38 }
  0x4c   :  { %v140_v49 = vmul.f32 %v1086_v2, %v69_v39  ;;  %1049 = vst [vmem:[%s1506_s3 + $0xc0] sm:$0xff] %v989_v43   ;;  %v399_v51 = vsel %vm271_vm3, %v207_v36, %v335_v44  ;;  %v210_v53 = vadd.f32 %v1093_v5, %v139_v42  ;;  %v141_v57 = vmul.f32 %v1086_v2, %v70_v46 }
  0x4d   :  { %vm273_vm5 = vcmp.ge.f32.partialorder %v209_v45, 0.0  ;;  %v337_v52 = vmul.f32 0.2, %v209_v45  ;;  %v994_v54 = vpack.c.bf16 %v399_v51, %v398_v47  ;;  %v400_v55 = vsel %vm272_vm4, %v208_v38, %v336_v48 }
  0x4e   :  { %v211_v56 = vadd.f32 %v1093_v5, %v140_v49  ;;  %vm274_vm6 = vcmp.ge.f32.partialorder %v210_v53, 0.0  ;;  %v338_v61 = vmul.f32 0.2, %v210_v53  ;;  %v142_v62 = vmul.f32 %v1086_v2, %v71_v50 }
  0x4f   :  { %v401_v60 = vsel %vm273_vm5, %v209_v45, %v337_v52  ;;  %1050 = vst [vmem:[%s1506_s3 + $0xc8] sm:$0xff] %v994_v54   ;;  %v212_v3 = vadd.f32 %v1093_v5, %v141_v57  ;;  %v143_v7 = vmul.f32 %v1086_v2, %v72_v58  ;;  %v144_v8 = vmul.f32 %v1086_v2, %v73_v59 }
  0x50   :  { %v999_v0 = vpack.c.bf16 %v401_v60, %v400_v55  ;;  %vm275_vm7 = vcmp.ge.f32.partialorder %v211_v56, 0.0  ;;  %v339_v1 = vmul.f32 0.2, %v211_v56  ;;  %v402_v4 = vsel %vm274_vm6, %v210_v53, %v338_v61 }
  0x51   :  { %v213_v6 = vadd.f32 %v1093_v5, %v142_v62  ;;  %vm276_vm8 = vcmp.ge.f32.partialorder %v212_v3, 0.0  ;;  %v340_v11 = vmul.f32 0.2, %v212_v3  ;;  %v145_v12 = vmul.f32 %v1086_v2, %v74_v63 }
  0x52   :  { %1051 = vst [vmem:[%s1506_s3 + $0xd0] sm:$0xff] %v999_v0   ;;  %v403_v10 = vsel %vm275_vm7, %v211_v56, %v339_v1  ;;  %v214_v16 = vadd.f32 %v1093_v5, %v143_v7  ;;  %v215_v18 = vadd.f32 %v1093_v5, %v144_v8  ;;  %v146_v19 = vmul.f32 %v1086_v2, %v75_v9 }
  0x53   :  { %v1004_v14 = vpack.c.bf16 %v403_v10, %v402_v4  ;;  %vm277_vm9 = vcmp.ge.f32.partialorder %v213_v6, 0.0  ;;  %v341_v15 = vmul.f32 0.2, %v213_v6  ;;  %v404_v17 = vsel %vm276_vm8, %v212_v3, %v340_v11 }
  0x54   :  { %v216_v20 = vadd.f32 %v1093_v5, %v145_v12  ;;  %vm278_vm10 = vcmp.ge.f32.partialorder %v214_v16, 0.0  ;;  %v342_v23 = vmul.f32 0.2, %v214_v16  ;;  %v147_v24 = vmul.f32 %v1086_v2, %v76_v13 }
  0x55   :  { %1052 = vst [vmem:[%s1506_s3 + $0xd8] sm:$0xff] %v1004_v14   ;;  %v405_v22 = vsel %vm277_vm9, %v213_v6, %v341_v15  ;;  %vm279_vm11 = vcmp.ge.f32.partialorder %v215_v18, 0.0  ;;  %v343_v26 = vmul.f32 0.2, %v215_v18  ;;  %v217_v27 = vadd.f32 %v1093_v5, %v146_v19 }
  0x56   :  { %v1009_v25 = vpack.c.bf16 %v405_v22, %v404_v17  ;;  %v406_v28 = vsel %vm278_vm10, %v214_v16, %v342_v23  ;;  %vm280_vm12 = vcmp.ge.f32.partialorder %v216_v20, 0.0  ;;  %v344_v29 = vmul.f32 0.2, %v216_v20 }
  0x57   :  { %v148_v30 = vmul.f32 %v1086_v2, %v77_v21  ;;  %v407_v31 = vsel %vm279_vm11, %v215_v18, %v343_v26  ;;  %vm281_vm13 = vcmp.ge.f32.partialorder %v217_v27, 0.0  ;;  %v345_v32 = vmul.f32 0.2, %v217_v27 }
  0x58   :  { %1053 = vst [vmem:[%s1506_s3 + $0xe0] sm:$0xff] %v1009_v25   ;;  %v218_v33 = vadd.f32 %v1093_v5, %v147_v24  ;;  %v1014_v34 = vpack.c.bf16 %v407_v31, %v406_v28  ;;  %v408_v35 = vsel %vm280_vm12, %v216_v20, %v344_v29 }
  0x59   :  { %v219_v36 = vadd.f32 %v1093_v5, %v148_v30  ;;  %v409_v37 = vsel %vm281_vm13, %v217_v27, %v345_v32 }
  0x5a   :  { %vm282_vm14 = vcmp.ge.f32.partialorder %v218_v33, 0.0  ;;  %v346_v38 = vmul.f32 0.2, %v218_v33  ;;  %1054 = vst [vmem:[%s1506_s3 + $0xe8] sm:$0xff] %v1014_v34   ;;  %v1019_v2 = vpack.c.bf16 %v409_v37, %v408_v35 }
  0x5b   :  { %vm283_vm15 = vcmp.ge.f32.partialorder %v219_v36, 0.0  ;;  %v347_v39 = vmul.f32 0.2, %v219_v36 }
  0x5c   :  { %v410_v40 = vsel %vm282_vm14, %v218_v33, %v346_v38  ;;  %1055 = vst [vmem:[%s1506_s3 + $0xf0] sm:$0xff] %v1019_v2  }
  0x5d   :  { %v411_v41 = vsel %vm283_vm15, %v219_v36, %v347_v39 }
  0x5e   :  { %v1024_v42 = vpack.c.bf16 %v411_v41, %v410_v40 }
  0x60   :  { %1056 = vst [vmem:[%s1506_s3 + $0xf8] sm:$0xff] %v1024_v42  }

// kernel: discriminator_forward.14
= control target key start
LH: loop header
LB: loop body
LE: loop exit
PB: predicated region body
PF: predicated region fallthrough
CT: control target
= control target key end

     0   :  { %s423_s0 = inlined_call_operand.vmem [shape: f32[128,128], index: 0, kind: input, shape index: {}]   ;;  %s424_s1 = inlined_call_operand.vmem [shape: f32[1,128], index: 1, kind: input, shape index: {}]   ;;  %s425_s2 = inlined_call_operand.vmem [shape: f32[1,128], index: 2, kind: input, shape index: {}]   ;;  %s426_s3 = inlined_call_operand.vmem [shape: bf16[128,128], index: 3, kind: output, shape index: {}]  }
   0x1   :  { %v14_v0 = vld [vmem:[%s423_s0] sm:$0xff]  ;;  %v15_v1 = vld [vmem:[%s423_s0 + $0x8] sm:$0xff]  ;;  %v16_v6 = vld [vmem:[%s423_s0 + $0x10] sm:$0xff] }
   0x2   :  { %v318_v2 = vld [vmem:[%s424_s1] ss:$0 sm:$0xff]  ;;  %v17_v7 = vld [vmem:[%s423_s0 + $0x18] sm:$0xff]  ;;  %v19_v11 = vld [vmem:[%s423_s0 + $0x28] sm:$0xff] }
   0x3   :  { %v37_v3 = vmul.f32 %v318_v2, %v14_v0  ;;  %v38_v4 = vmul.f32 %v318_v2, %v15_v1  ;;  %v325_v5 = vld [vmem:[%s425_s2] ss:$0 sm:$0xff]  ;;  %v39_v8 = vmul.f32 %v318_v2, %v16_v6  ;;  %v40_v9 = vmul.f32 %v318_v2, %v17_v7  ;;  %v20_v12 = vld [vmem:[%s423_s0 + $0x30] sm:$0xff]  ;;  %v21_v17 = vld [vmem:[%s423_s0 + $0x38] sm:$0xff] }
   0x4   :  { %v18_v10 = vld [vmem:[%s423_s0 + $0x20] sm:$0xff]  ;;  %v42_v16 = vmul.f32 %v318_v2, %v19_v11  ;;  %v43_v20 = vmul.f32 %v318_v2, %v20_v12  ;;  %v44_v21 = vmul.f32 %v318_v2, %v21_v17  ;;  %v23_v35 = vld [vmem:[%s423_s0 + $0x48] sm:$0xff]  ;;  %v24_v36 = vld [vmem:[%s423_s0 + $0x50] sm:$0xff] }
   0x5   :  { %v60_v13 = vadd.f32 %v325_v5, %v37_v3  ;;  %v61_v14 = vadd.f32 %v325_v5, %v38_v4  ;;  %v41_v15 = vmul.f32 %v318_v2, %v18_v10  ;;  %v62_v18 = vadd.f32 %v325_v5, %v39_v8  ;;  %v22_v34 = vld [vmem:[%s423_s0 + $0x40] sm:$0xff]  ;;  %v25_v42 = vld [vmem:[%s423_s0 + $0x58] sm:$0xff]  ;;  %v27_v48 = vld [vmem:[%s423_s0 + $0x68] sm:$0xff] }
   0x6   :  { %v63_v19 = vadd.f32 %v325_v5, %v40_v9  ;;  %v65_v29 = vadd.f32 %v325_v5, %v42_v16  ;;  %v66_v33 = vadd.f32 %v325_v5, %v43_v20  ;;  %v67_v40 = vadd.f32 %v325_v5, %v44_v21  ;;  %v26_v47 = vld [vmem:[%s423_s0 + $0x60] sm:$0xff]  ;;  %v28_v60 = vld [vmem:[%s423_s0 + $0x70] sm:$0xff]  ;;  %v29_v7 = vld [vmem:[%s423_s0 + $0x78] sm:$0xff] }
   0x7   :  { %vm76_vm0 = vcmp.ge.f32.partialorder %v60_v13, 0.0  ;;  %vm77_vm1 = vcmp.ge.f32.partialorder %v61_v14, 0.0  ;;  %v92_v22 = vmul.f32 0.2, %v60_v13  ;;  %v93_v23 = vmul.f32 0.2, %v61_v14 }
   0x8   :  { %vm78_vm2 = vcmp.ge.f32.partialorder %v62_v18, 0.0  ;;  %vm79_vm3 = vcmp.ge.f32.partialorder %v63_v19, 0.0  ;;  %v94_v24 = vmul.f32 0.2, %v62_v18  ;;  %v95_v25 = vmul.f32 0.2, %v63_v19 }
   0x9   :  { %v108_v26 = vsel %vm76_vm0, %v60_v13, %v92_v22  ;;  %v109_v27 = vsel %vm77_vm1, %v61_v14, %v93_v23  ;;  %v64_v28 = vadd.f32 %v325_v5, %v41_v15  ;;  %vm81_vm5 = vcmp.ge.f32.partialorder %v65_v29, 0.0 }
   0xa   :  { %v245_v30 = vpack.c.bf16 %v109_v27, %v108_v26  ;;  %v110_v31 = vsel %vm78_vm2, %v62_v18, %v94_v24  ;;  %v111_v32 = vsel %vm79_vm3, %v63_v19, %v95_v25  ;;  %v97_v39 = vmul.f32 0.2, %v65_v29 }
   0xb   :  { %v250_v37 = vpack.c.bf16 %v111_v32, %v110_v31  ;;  %vm80_vm4 = vcmp.ge.f32.partialorder %v64_v28, 0.0  ;;  %v96_v38 = vmul.f32 0.2, %v64_v28  ;;  %vm82_vm6 = vcmp.ge.f32.partialorder %v66_v33, 0.0 }
   0xc   :  { %246 = vst [vmem:[%s426_s3] sm:$0xff] %v245_v30   ;;  %v98_v41 = vmul.f32 0.2, %v66_v33  ;;  %v45_v44 = vmul.f32 %v318_v2, %v22_v34  ;;  %v46_v45 = vmul.f32 %v318_v2, %v23_v35  ;;  %v47_v46 = vmul.f32 %v318_v2, %v24_v36 }
   0xd   :  { %282 = vst [vmem:[%s426_s3 + $0x8] sm:$0xff] %v250_v37   ;;  %v112_v43 = vsel %vm80_vm4, %v64_v28, %v96_v38  ;;  %v113_v49 = vsel %vm81_vm5, %v65_v29, %v97_v39  ;;  %vm83_vm7 = vcmp.ge.f32.partialorder %v67_v40, 0.0  ;;  %v99_v50 = vmul.f32 0.2, %v67_v40 }
   0xe   :  { %v114_v51 = vsel %vm82_vm6, %v66_v33, %v98_v41  ;;  %v255_v52 = vpack.c.bf16 %v113_v49, %v112_v43  ;;  %v68_v53 = vadd.f32 %v325_v5, %v45_v44  ;;  %v69_v54 = vadd.f32 %v325_v5, %v46_v45 }
   0xf   :  { %v48_v55 = vmul.f32 %v318_v2, %v25_v42  ;;  %v115_v56 = vsel %vm83_vm7, %v67_v40, %v99_v50  ;;  %v70_v57 = vadd.f32 %v325_v5, %v47_v46  ;;  %v49_v58 = vmul.f32 %v318_v2, %v26_v47 }
  0x10   :  { %v50_v59 = vmul.f32 %v318_v2, %v27_v48  ;;  %283 = vst [vmem:[%s426_s3 + $0x10] sm:$0xff] %v255_v52   ;;  %v260_v61 = vpack.c.bf16 %v115_v56, %v114_v51  ;;  %vm84_vm8 = vcmp.ge.f32.partialorder %v68_v53, 0.0  ;;  %vm85_vm9 = vcmp.ge.f32.partialorder %v69_v54, 0.0 }
  0x11   :  { %v100_v62 = vmul.f32 0.2, %v68_v53  ;;  %v101_v63 = vmul.f32 0.2, %v69_v54  ;;  %v71_v0 = vadd.f32 %v325_v5, %v48_v55  ;;  %vm86_vm10 = vcmp.ge.f32.partialorder %v70_v57, 0.0 }
  0x12   :  { %v102_v1 = vmul.f32 0.2, %v70_v57  ;;  %284 = vst [vmem:[%s426_s3 + $0x18] sm:$0xff] %v260_v61   ;;  %v72_v4 = vadd.f32 %v325_v5, %v49_v58  ;;  %v73_v6 = vadd.f32 %v325_v5, %v50_v59  ;;  %v51_v8 = vmul.f32 %v318_v2, %v28_v60 }
  0x13   :  { %v116_v3 = vsel %vm84_vm8, %v68_v53, %v100_v62  ;;  %v117_v9 = vsel %vm85_vm9, %v69_v54, %v101_v63  ;;  %vm87_vm11 = vcmp.ge.f32.partialorder %v71_v0, 0.0  ;;  %v103_v10 = vmul.f32 0.2, %v71_v0 }
  0x14   :  { %v118_v11 = vsel %vm86_vm10, %v70_v57, %v102_v1  ;;  %v265_v12 = vpack.c.bf16 %v117_v9, %v116_v3  ;;  %vm88_vm12 = vcmp.ge.f32.partialorder %v72_v4, 0.0  ;;  %vm89_vm13 = vcmp.ge.f32.partialorder %v73_v6, 0.0 }
  0x15   :  { %v104_v13 = vmul.f32 0.2, %v72_v4  ;;  %v119_v14 = vsel %vm87_vm11, %v71_v0, %v103_v10  ;;  %v105_v15 = vmul.f32 0.2, %v73_v6  ;;  %v52_v16 = vmul.f32 %v318_v2, %v29_v7 }
  0x16   :  { %v74_v17 = vadd.f32 %v325_v5, %v51_v8  ;;  %285 = vst [vmem:[%s426_s3 + $0x20] sm:$0xff] %v265_v12   ;;  %v270_v18 = vpack.c.bf16 %v119_v14, %v118_v11 }
  0x17   :  { %v120_v19 = vsel %vm88_vm12, %v72_v4, %v104_v13  ;;  %v121_v20 = vsel %vm89_vm13, %v73_v6, %v105_v15  ;;  %v75_v21 = vadd.f32 %v325_v5, %v52_v16 }
  0x18   :  { %vm90_vm14 = vcmp.ge.f32.partialorder %v74_v17, 0.0  ;;  %v106_v22 = vmul.f32 0.2, %v74_v17  ;;  %286 = vst [vmem:[%s426_s3 + $0x28] sm:$0xff] %v270_v18   ;;  %v275_v23 = vpack.c.bf16 %v121_v20, %v120_v19 }
  0x19   :  { %vm91_vm15 = vcmp.ge.f32.partialorder %v75_v21, 0.0  ;;  %v107_v2 = vmul.f32 0.2, %v75_v21 }
  0x1a   :  { %v122_v24 = vsel %vm90_vm14, %v74_v17, %v106_v22  ;;  %287 = vst [vmem:[%s426_s3 + $0x30] sm:$0xff] %v275_v23  }
  0x1b   :  { %v123_v25 = vsel %vm91_vm15, %v75_v21, %v107_v2 }
  0x1c   :  { %v280_v26 = vpack.c.bf16 %v123_v25, %v122_v24 }
  0x1e   :  { %288 = vst [vmem:[%s426_s3 + $0x38] sm:$0xff] %v280_v26  }

// kernel: discriminator_forward.13
= control target key start
LH: loop header
LB: loop body
LE: loop exit
PB: predicated region body
PF: predicated region fallthrough
CT: control target
= control target key end

     0   :  { %s4630_s1 = inlined_call_operand.vmem [shape: bf16[2048,128], index: 1, kind: input, shape index: {}]   ;;  %s4631_s0 = inlined_call_operand.vmem [shape: bf16[128,2048], index: 0, kind: input, shape index: {}]   ;;  %s4632_s2 = inlined_call_operand.vmem [shape: f32[128,128], index: 2, kind: output, shape index: {0}]   ;;  %s4633_s3 = inlined_call_operand.vmem [shape: f32[8,128], index: 3, kind: output, shape index: {1}]   ;;  %s4634_s4 = inlined_call_operand.vmem [shape: f32[8,128], index: 4, kind: output, shape index: {2}]  }
   0x1   :  { %v3511_v0 = vld [vmem:[%s4630_s1 + $0x40] sm:$0xff]   ;;  %v3515_v4 = vld [vmem:[%s4630_s1 + $0x48] sm:$0xff]   ;;  %v3519_v8 = vld [vmem:[%s4630_s1 + $0x50] sm:$0xff]  }
   0x2   :  { %v3512_v1 = vld [vmem:[%s4630_s1 + $0xc0] sm:$0xff]   ;;  %2998 = vmatprep.subr.bf16.mxu0 %v3511_v0  ;;  %v3516_v5 = vld [vmem:[%s4630_s1 + $0xc8] sm:$0xff]   ;;  %v3520_v9 = vld [vmem:[%s4630_s1 + $0xd0] sm:$0xff]  }
   0x3   :  { %v3513_v2 = vld [vmem:[%s4630_s1] sm:$0xff]   ;;  %3062 = vmatprep.subr.bf16.mxu1 %v3512_v1  ;;  %v3517_v6 = vld [vmem:[%s4630_s1 + $0x8] sm:$0xff]   ;;  %v3521_v10 = vld [vmem:[%s4630_s1 + $0x10] sm:$0xff]  }
   0x4   :  { %v3514_v3 = vld [vmem:[%s4630_s1 + $0x80] sm:$0xff]   ;;  %2999 = vmatpush3.bf16.msra.mxu0 %v3513_v2  ;;  %v3518_v7 = vld [vmem:[%s4630_s1 + $0x88] sm:$0xff]   ;;  %v3522_v11 = vld [vmem:[%s4630_s1 + $0x90] sm:$0xff]  }
   0x5   :  { %3063 = vmatpush3.bf16.msra.mxu1 %v3514_v3  ;;  %3000 = vmatprep.subr.bf16.mxu0 %v3515_v4  ;;  %v3523_v12 = vld [vmem:[%s4630_s1 + $0x58] sm:$0xff]   ;;  %v3527_v16 = vld [vmem:[%s4630_s1 + $0x60] sm:$0xff]   ;;  %v3531_v20 = vld [vmem:[%s4630_s1 + $0x68] sm:$0xff]  }
   0x6   :  { %3064 = vmatprep.subr.bf16.mxu1 %v3516_v5  ;;  %v3524_v13 = vld [vmem:[%s4630_s1 + $0xd8] sm:$0xff]   ;;  %v3528_v17 = vld [vmem:[%s4630_s1 + $0xe0] sm:$0xff]   ;;  %v3532_v21 = vld [vmem:[%s4630_s1 + $0xe8] sm:$0xff]  }
   0x7   :  { %v3525_v14 = vld [vmem:[%s4630_s1 + $0x18] sm:$0xff]   ;;  %v3529_v18 = vld [vmem:[%s4630_s1 + $0x20] sm:$0xff]   ;;  %v3533_v22 = vld [vmem:[%s4630_s1 + $0x28] sm:$0xff]  }
   0x8   :  { %3001 = vmatpush3.bf16.msra.mxu0 %v3517_v6  ;;  %v3526_v15 = vld [vmem:[%s4630_s1 + $0x98] sm:$0xff]   ;;  %v3530_v19 = vld [vmem:[%s4630_s1 + $0xa0] sm:$0xff]   ;;  %v3534_v23 = vld [vmem:[%s4630_s1 + $0xa8] sm:$0xff]  }
   0x9   :  { %3065 = vmatpush3.bf16.msra.mxu1 %v3518_v7  ;;  %3002 = vmatprep.subr.bf16.mxu0 %v3519_v8  ;;  %v3535_v24 = vld [vmem:[%s4630_s1 + $0x70] sm:$0xff]   ;;  %v3539_v28 = vld [vmem:[%s4630_s1 + $0x78] sm:$0xff]   ;;  %v51_v32 = vld [vmem:[%s4631_s0] sm:$0xff] }
   0xa   :  { %3066 = vmatprep.subr.bf16.mxu1 %v3520_v9  ;;  %v3536_v25 = vld [vmem:[%s4630_s1 + $0xf0] sm:$0xff]   ;;  %v3540_v29 = vld [vmem:[%s4630_s1 + $0xf8] sm:$0xff]   ;;  %v59_v33 = vld [vmem:[%s4631_s0 + $0x40] sm:$0xff] }
   0xb   :  { %v3537_v26 = vld [vmem:[%s4630_s1 + $0x30] sm:$0xff]   ;;  %v3541_v30 = vld [vmem:[%s4630_s1 + $0x38] sm:$0xff]   ;;  %v52_v34 = vld [vmem:[%s4631_s0 + $0x8] sm:$0xff]  ;;  %v2742_v35 = vcombine.low %v51_v32, %v59_v33  ;;  %v2743_v36 = vcombine.high %v51_v32, %v59_v33 }
   0xc   :  { %3003 = vmatpush3.bf16.msra.mxu0 %v3521_v10  ;;  %v3538_v27 = vld [vmem:[%s4630_s1 + $0xb0] sm:$0xff]   ;;  %v3542_v31 = vld [vmem:[%s4630_s1 + $0xb8] sm:$0xff]   ;;  %v60_v37 = vld [vmem:[%s4631_s0 + $0x48] sm:$0xff] }
   0xd   :  { %3067 = vmatpush3.bf16.msra.mxu1 %v3522_v11  ;;  %3004 = vmatprep.subr.bf16.mxu0 %v3523_v12  ;;  %v2744_v38 = vcombine.low %v52_v34, %v60_v37  ;;  %v2745_v39 = vcombine.high %v52_v34, %v60_v37  ;;  %v3543_v40 = vld [vmem:[%s4630_s1 + $0x140] sm:$0xff]   ;;  %v68_v47 = vld [vmem:[%s4631_s0 + $0x88] sm:$0xff]  ;;  %v3551_v62 = vld [vmem:[%s4630_s1 + $0x150] sm:$0xff]  }
   0xe   :  { %3068 = vmatprep.subr.bf16.mxu1 %v3524_v13  ;;  %1875 = vmatprep.mubr.bf16.mxu0 %v2743_v36  ;;  %v3544_v41 = vld [vmem:[%s4630_s1 + $0x100] sm:$0xff]   ;;  %v76_v48 = vld [vmem:[%s4631_s0 + $0xc8] sm:$0xff]  ;;  %v3552_v63 = vld [vmem:[%s4630_s1 + $0x110] sm:$0xff]  }
   0xf   :  { %1972 = vmatprep.mubr.bf16.mxu1 %v2745_v39  ;;  %v3545_v42 = vld [vmem:[%s4630_s1 + $0x1c0] sm:$0xff]   ;;  %v2761_v49 = vcombine.high %v68_v47, %v76_v48  ;;  %v3547_v50 = vld [vmem:[%s4630_s1 + $0x148] sm:$0xff]   ;;  %v2760_v53 = vcombine.low %v68_v47, %v76_v48  ;;  %v3553_v0 = vld [vmem:[%s4630_s1 + $0x1d0] sm:$0xff]  }
  0x10   :  { %3005 = vmatpush3.bf16.msra.mxu0 %v3525_v14  ;;  %v3546_v43 = vld [vmem:[%s4630_s1 + $0x180] sm:$0xff]   ;;  %v3548_v52 = vld [vmem:[%s4630_s1 + $0x108] sm:$0xff]   ;;  %v3554_v1 = vld [vmem:[%s4630_s1 + $0x190] sm:$0xff]  }
  0x11   :  { %3069 = vmatpush3.bf16.msra.mxu1 %v3526_v15  ;;  %3006 = vmatprep.subr.bf16.mxu0 %v3527_v16  ;;  %v67_v44 = vld [vmem:[%s4631_s0 + $0x80] sm:$0xff]  ;;  %v3549_v54 = vld [vmem:[%s4630_s1 + $0x1c8] sm:$0xff]   ;;  %v3555_v10 = vld [vmem:[%s4630_s1 + $0x158] sm:$0xff]  }
  0x12   :  { %3070 = vmatprep.subr.bf16.mxu1 %v3528_v17  ;;  %v75_v45 = vld [vmem:[%s4631_s0 + $0xc0] sm:$0xff]  ;;  %v3550_v55 = vld [vmem:[%s4630_s1 + $0x188] sm:$0xff]   ;;  %v3556_v11 = vld [vmem:[%s4630_s1 + $0x118] sm:$0xff]  }
  0x13   :  { %v2759_v46 = vcombine.high %v67_v44, %v75_v45  ;;  %v2758_v51 = vcombine.low %v67_v44, %v75_v45  ;;  %v83_v56 = vld [vmem:[%s4631_s0 + $0x100] sm:$0xff]  ;;  %v84_v58 = vld [vmem:[%s4631_s0 + $0x108] sm:$0xff]  ;;  %v3557_v12 = vld [vmem:[%s4630_s1 + $0x1d8] sm:$0xff]  }
  0x14   :  { %3007 = vmatpush3.bf16.msra.mxu0 %v3529_v18  ;;  %v91_v57 = vld [vmem:[%s4631_s0 + $0x140] sm:$0xff]  ;;  %v92_v59 = vld [vmem:[%s4631_s0 + $0x148] sm:$0xff]  ;;  %v3558_v13 = vld [vmem:[%s4630_s1 + $0x198] sm:$0xff]  }
  0x15   :  { %3071 = vmatpush3.bf16.msra.mxu1 %v3530_v19  ;;  %3008 = vmatprep.subr.bf16.mxu0 %v3531_v20  ;;  %v2775_v60 = vcombine.high %v83_v56, %v91_v57  ;;  %v2777_v61 = vcombine.high %v84_v58, %v92_v59  ;;  %v2774_v2 = vcombine.low %v83_v56, %v91_v57  ;;  %v99_v3 = vld [vmem:[%s4631_s0 + $0x180] sm:$0xff]  ;;  %v100_v5 = vld [vmem:[%s4631_s0 + $0x188] sm:$0xff]  ;;  %v3568_v39 = vld [vmem:[%s4630_s1 + $0x130] sm:$0xff]  }
  0x16   :  { %3072 = vmatprep.subr.bf16.mxu1 %v3532_v21  ;;  %v107_v4 = vld [vmem:[%s4631_s0 + $0x1c0] sm:$0xff]  ;;  %v2776_v6 = vcombine.low %v84_v58, %v92_v59  ;;  %v108_v8 = vld [vmem:[%s4631_s0 + $0x1c8] sm:$0xff]  ;;  %v3572_v48 = vld [vmem:[%s4630_s1 + $0x138] sm:$0xff]  }
  0x17   :  { %v2791_v7 = vcombine.high %v99_v3, %v107_v4  ;;  %v2793_v9 = vcombine.high %v100_v5, %v108_v8  ;;  %v115_v14 = vld [vmem:[%s4631_s0 + $0x200] sm:$0xff]  ;;  %v116_v16 = vld [vmem:[%s4631_s0 + $0x208] sm:$0xff]  ;;  %v2790_v19 = vcombine.low %v99_v3, %v107_v4  ;;  %v2792_v21 = vcombine.low %v100_v5, %v108_v8  ;;  %v62_v3 = vld [vmem:[%s4631_s0 + $0x58] sm:$0xff] }
  0x18   :  { %3009 = vmatpush3.bf16.msra.mxu0 %v3533_v22  ;;  %v123_v15 = vld [vmem:[%s4631_s0 + $0x240] sm:$0xff]  ;;  %v124_v17 = vld [vmem:[%s4631_s0 + $0x248] sm:$0xff]  ;;  %v69_v8 = vld [vmem:[%s4631_s0 + $0x90] sm:$0xff] }
  0x19   :  { %3073 = vmatpush3.bf16.msra.mxu1 %v3534_v23  ;;  %3010 = vmatprep.subr.bf16.mxu0 %v3535_v24  ;;  %v3559_v18 = vld [vmem:[%s4630_s1 + $0x160] sm:$0xff]   ;;  %v2807_v22 = vcombine.high %v115_v14, %v123_v15  ;;  %v2809_v24 = vcombine.high %v116_v16, %v124_v17  ;;  %v3565_v32 = vld [vmem:[%s4630_s1 + $0x1e8] sm:$0xff]   ;;  %v2806_v34 = vcombine.low %v115_v14, %v123_v15 }
  0x1a   :  { %3074 = vmatprep.subr.bf16.mxu1 %v3536_v25  ;;  %v3560_v20 = vld [vmem:[%s4630_s1 + $0x120] sm:$0xff]   ;;  %v3566_v33 = vld [vmem:[%s4630_s1 + $0x1a8] sm:$0xff]  }
  0x1b   :  { %v3561_v23 = vld [vmem:[%s4630_s1 + $0x1e0] sm:$0xff]   ;;  %v148_v44 = vld [vmem:[%s4631_s0 + $0x308] sm:$0xff] }
  0x1c   :  { %3011 = vmatpush3.bf16.msra.mxu0 %v3537_v26  ;;  %v3562_v25 = vld [vmem:[%s4630_s1 + $0x1a0] sm:$0xff]   ;;  %v156_v45 = vld [vmem:[%s4631_s0 + $0x348] sm:$0xff] }
  0x1d   :  { %3075 = vmatpush3.bf16.msra.mxu1 %v3538_v27  ;;  %3012 = vmatprep.subr.bf16.mxu0 %v3539_v28  ;;  %v131_v26 = vld [vmem:[%s4631_s0 + $0x280] sm:$0xff]  ;;  %v3563_v28 = vld [vmem:[%s4630_s1 + $0x168] sm:$0xff]  }
  0x1e   :  { %3076 = vmatprep.subr.bf16.mxu1 %v3540_v29  ;;  %v139_v27 = vld [vmem:[%s4631_s0 + $0x2c0] sm:$0xff]  ;;  %v132_v29 = vld [vmem:[%s4631_s0 + $0x288] sm:$0xff] }
  0x1f   :  { %v2823_v36 = vcombine.high %v131_v26, %v139_v27  ;;  %v2822_v47 = vcombine.low %v131_v26, %v139_v27  ;;  %v3575_v56 = vld [vmem:[%s4630_s1 + $0x240] sm:$0xff]   ;;  %v164_v57 = vld [vmem:[%s4631_s0 + $0x388] sm:$0xff]  ;;  %v3583_v26 = vld [vmem:[%s4630_s1 + $0x250] sm:$0xff]  }
  0x20   :  { %3013 = vmatpush3.bf16.msra.mxu0 %v3541_v30  ;;  %v140_v30 = vld [vmem:[%s4631_s0 + $0x2c8] sm:$0xff]  ;;  %v3577_v58 = vld [vmem:[%s4630_s1 + $0x2c0] sm:$0xff]   ;;  %v3585_v27 = vld [vmem:[%s4630_s1 + $0x2d0] sm:$0xff]  }
  0x21   :  { %3077 = vmatpush3.bf16.msra.mxu1 %v3542_v31  ;;  %3126 = vmatprep.subr.bf16.mxu0 %v3543_v40  ;;  %v3564_v31 = vld [vmem:[%s4630_s1 + $0x128] sm:$0xff]   ;;  %v2825_v37 = vcombine.high %v132_v29, %v140_v30  ;;  %v3569_v40 = vld [vmem:[%s4630_s1 + $0x1f0] sm:$0xff]   ;;  %v3578_v15 = vld [vmem:[%s4630_s1 + $0x280] sm:$0xff]  }
  0x22   :  { %3190 = vmatprep.subr.bf16.mxu1 %v3545_v42  ;;  %v155_v42 = vld [vmem:[%s4631_s0 + $0x340] sm:$0xff]  ;;  %v172_v59 = vld [vmem:[%s4631_s0 + $0x3c8] sm:$0xff] }
  0x23   :  { %1876 = vmatmul.mubr.bf16.vlgmr.msra.gmra.mrb[0].mxu0 %v2742_v35  ;;  %v2808_v35 = vcombine.low %v116_v16, %v124_v17  ;;  %v2856_v5 = vcombine.low %v164_v57, %v172_v59  ;;  %v3579_v17 = vld [vmem:[%s4630_s1 + $0x248] sm:$0xff]  }
  0x24   :  { %1973 = vmatmul.mubr.bf16.vlgmr.msra.gmra.mrb[0].mxu1 %v2744_v38  ;;  %3127 = vmatpush3.bf16.msra.mxu0 %v3544_v41  ;;  %v3567_v38 = vld [vmem:[%s4630_s1 + $0x170] sm:$0xff]   ;;  %v147_v41 = vld [vmem:[%s4631_s0 + $0x300] sm:$0xff] }
  0x25   :  { %3191 = vmatpush3.bf16.msra.mxu1 %v3546_v43  ;;  %1883 = vmatprep.mubr.bf16.mxu0 %v2759_v46  ;;  %v3570_v43 = vld [vmem:[%s4630_s1 + $0x1b0] sm:$0xff]   ;;  %v3571_v46 = vld [vmem:[%s4630_s1 + $0x178] sm:$0xff]  }
  0x26   :  { %1980 = vmatprep.mubr.bf16.mxu1 %v2761_v49  ;;  %3128 = vmatprep.subr.bf16.mxu0 %v3547_v50  ;;  %v2824_v49 = vcombine.low %v132_v29, %v140_v30  ;;  %v2839_v50 = vcombine.high %v147_v41, %v155_v42 }
  0x27   :  { %3192 = vmatprep.subr.bf16.mxu1 %v3549_v54  ;;  %v163_v54 = vld [vmem:[%s4631_s0 + $0x380] sm:$0xff] }
  0x28   :  { %3129 = vmatpush3.bf16.msra.mxu0 %v3548_v52  ;;  %v2841_v52 = vcombine.high %v148_v44, %v156_v45 }
  0x29   :  { %3193 = vmatpush3.bf16.msra.mxu1 %v3550_v55  ;;  %3130 = vmatprep.subr.bf16.mxu0 %v3551_v62  ;;  %v171_v55 = vld [vmem:[%s4631_s0 + $0x3c0] sm:$0xff] }
  0x2a   :  { %3194 = vmatprep.subr.bf16.mxu1 %v3553_v0  ;;  %v2855_v62 = vcombine.high %v163_v54, %v171_v55  ;;  %v53_v0 = vld [vmem:[%s4631_s0 + $0x10] sm:$0xff]  ;;  %v2854_v4 = vcombine.low %v163_v54, %v171_v55  ;;  %v118_v54 = vld [vmem:[%s4631_s0 + $0x218] sm:$0xff] }
  0x2b   :  { %1884 = vmatmul.mubr.bf16.gmra.mrb[4].mxu0 %v2758_v51  ;;  %v3573_v51 = vld [vmem:[%s4630_s1 + $0x1f8] sm:$0xff]  }
  0x2c   :  { %1981 = vmatmul.mubr.bf16.gmra.mrb[4].mxu1 %v2760_v53  ;;  %1891 = vmatprep.mubr.bf16.mxu0 %v2775_v60  ;;  %v3574_v53 = vld [vmem:[%s4630_s1 + $0x1b8] sm:$0xff]   ;;  %v2838_v60 = vcombine.low %v147_v41, %v155_v42  ;;  %v3591_v42 = vld [vmem:[%s4630_s1 + $0x260] sm:$0xff]  }
  0x2d   :  { %1988 = vmatprep.mubr.bf16.mxu1 %v2777_v61  ;;  %3131 = vmatpush3.bf16.msra.mxu0 %v3552_v63  ;;  %v2840_v61 = vcombine.low %v148_v44, %v156_v45  ;;  %v2857_v63 = vcombine.high %v164_v57, %v172_v59  ;;  %v3590_v41 = vld [vmem:[%s4630_s1 + $0x298] sm:$0xff]   ;;  %v3593_v44 = vld [vmem:[%s4630_s1 + $0x2e0] sm:$0xff]   ;;  %v3598_v57 = vld [vmem:[%s4630_s1 + $0x2a8] sm:$0xff]  }
  0x2e   :  { %3195 = vmatpush3.bf16.msra.mxu1 %v3554_v1  ;;  %3132 = vmatprep.subr.bf16.mxu0 %v3555_v10  ;;  %v61_v1 = vld [vmem:[%s4631_s0 + $0x50] sm:$0xff]  ;;  %v126_v55 = vld [vmem:[%s4631_s0 + $0x258] sm:$0xff] }
  0x2f   :  { %3196 = vmatprep.subr.bf16.mxu1 %v3557_v12  ;;  %v2746_v10 = vcombine.low %v53_v0, %v61_v1  ;;  %v70_v12 = vld [vmem:[%s4631_s0 + $0x98] sm:$0xff] }
  0x31   :  { %3133 = vmatpush3.bf16.msra.mxu0 %v3556_v11  ;;  %v3576_v11 = vld [vmem:[%s4630_s1 + $0x200] sm:$0xff]  }
  0x32   :  { %3197 = vmatpush3.bf16.msra.mxu1 %v3558_v13  ;;  %3134 = vmatprep.subr.bf16.mxu0 %v3559_v18  ;;  %v78_v13 = vld [vmem:[%s4631_s0 + $0xd8] sm:$0xff] }
  0x33   :  { %1892 = vmatmul.mubr.bf16.gmra.mrb[8].mxu0 %v2774_v2  ;;  %3198 = vmatprep.subr.bf16.mxu1 %v3561_v23  ;;  %v54_v2 = vld [vmem:[%s4631_s0 + $0x18] sm:$0xff]  ;;  %v2765_v18 = vcombine.high %v70_v12, %v78_v13  ;;  %v93_v23 = vld [vmem:[%s4631_s0 + $0x150] sm:$0xff]  ;;  %v2764_v29 = vcombine.low %v70_v12, %v78_v13  ;;  %v3609_v12 = vld [vmem:[%s4630_s1 + $0x3c0] sm:$0xff]   ;;  %v2812_v13 = vcombine.low %v118_v54, %v126_v55 }
  0x34   :  { %1989 = vmatmul.mubr.bf16.gmra.mrb[8].mxu1 %v2776_v6  ;;  %1899 = vmatprep.mubr.bf16.mxu0 %v2791_v7  ;;  %v2747_v6 = vcombine.high %v53_v0, %v61_v1  ;;  %v2749_v7 = vcombine.high %v54_v2, %v62_v3  ;;  %v2748_v14 = vcombine.low %v54_v2, %v62_v3  ;;  %v3600_v0 = vld [vmem:[%s4630_s1 + $0x230] sm:$0xff]   ;;  %v3603_v2 = vld [vmem:[%s4630_s1 + $0x278] sm:$0xff]  }
  0x35   :  { %1996 = vmatprep.mubr.bf16.mxu1 %v2793_v9  ;;  %3135 = vmatpush3.bf16.msra.mxu0 %v3560_v20  ;;  %v77_v9 = vld [vmem:[%s4631_s0 + $0xd0] sm:$0xff]  ;;  %v3581_v20 = vld [vmem:[%s4630_s1 + $0x2c8] sm:$0xff]  }
  0x36   :  { %3199 = vmatpush3.bf16.msra.mxu1 %v3562_v25  ;;  %3136 = vmatprep.subr.bf16.mxu0 %v3563_v28  ;;  %v2763_v16 = vcombine.high %v69_v8, %v77_v9  ;;  %v94_v25 = vld [vmem:[%s4631_s0 + $0x158] sm:$0xff]  ;;  %v2762_v28 = vcombine.low %v69_v8, %v77_v9  ;;  %v3602_v1 = vld [vmem:[%s4630_s1 + $0x2b0] sm:$0xff]  }
  0x37   :  { %3200 = vmatprep.subr.bf16.mxu1 %v3565_v32  ;;  %v3584_v32 = vld [vmem:[%s4630_s1 + $0x210] sm:$0xff]   ;;  %v3604_v8 = vld [vmem:[%s4630_s1 + $0x238] sm:$0xff]  }
  0x38   :  { %v133_v3 = vld [vmem:[%s4631_s0 + $0x290] sm:$0xff]  ;;  %v3606_v9 = vld [vmem:[%s4630_s1 + $0x2b8] sm:$0xff]  }
  0x39   :  { %3137 = vmatpush3.bf16.msra.mxu0 %v3564_v31 }
  0x3a   :  { %3201 = vmatpush3.bf16.msra.mxu1 %v3566_v33  ;;  %3138 = vmatprep.subr.bf16.mxu0 %v3567_v38  ;;  %v3586_v33 = vld [vmem:[%s4630_s1 + $0x290] sm:$0xff]   ;;  %v102_v38 = vld [vmem:[%s4631_s0 + $0x198] sm:$0xff] }
  0x3b   :  { %1900 = vmatmul.mubr.bf16.gmra.mrb[12].mxu0 %v2790_v19  ;;  %3202 = vmatprep.subr.bf16.mxu1 %v3569_v40  ;;  %v3580_v19 = vld [vmem:[%s4630_s1 + $0x208] sm:$0xff]   ;;  %v3588_v40 = vld [vmem:[%s4630_s1 + $0x218] sm:$0xff]  }
  0x3c   :  { %1997 = vmatmul.mubr.bf16.gmra.mrb[12].mxu1 %v2792_v21  ;;  %1907 = vmatprep.mubr.bf16.mxu0 %v2807_v22  ;;  %v3582_v21 = vld [vmem:[%s4630_s1 + $0x288] sm:$0xff]   ;;  %v85_v22 = vld [vmem:[%s4631_s0 + $0x110] sm:$0xff] }
  0x3d   :  { %2004 = vmatprep.mubr.bf16.mxu1 %v2809_v24  ;;  %3139 = vmatpush3.bf16.msra.mxu0 %v3568_v39  ;;  %v86_v24 = vld [vmem:[%s4631_s0 + $0x118] sm:$0xff]  ;;  %v2779_v30 = vcombine.high %v85_v22, %v93_v23 }
  0x3e   :  { %3203 = vmatpush3.bf16.msra.mxu1 %v3570_v43  ;;  %3140 = vmatprep.subr.bf16.mxu0 %v3571_v46  ;;  %v2781_v31 = vcombine.high %v86_v24, %v94_v25  ;;  %v110_v39 = vld [vmem:[%s4631_s0 + $0x1d8] sm:$0xff]  ;;  %v2778_v43 = vcombine.low %v85_v22, %v93_v23  ;;  %v2780_v45 = vcombine.low %v86_v24, %v94_v25  ;;  %v165_v24 = vld [vmem:[%s4631_s0 + $0x390] sm:$0xff] }
  0x3f   :  { %3204 = vmatprep.subr.bf16.mxu1 %v3573_v51  ;;  %v117_v51 = vld [vmem:[%s4631_s0 + $0x210] sm:$0xff] }
  0x40   :  { %v173_v25 = vld [vmem:[%s4631_s0 + $0x3d0] sm:$0xff] }
  0x41   :  { %3141 = vmatpush3.bf16.msra.mxu0 %v3572_v48  ;;  %v2797_v48 = vcombine.high %v102_v38, %v110_v39 }
  0x42   :  { %3205 = vmatpush3.bf16.msra.mxu1 %v3574_v53  ;;  %3254 = vmatprep.subr.bf16.mxu0 %v3575_v56  ;;  %v125_v53 = vld [vmem:[%s4631_s0 + $0x250] sm:$0xff]  ;;  %v3596_v56 = vld [vmem:[%s4630_s1 + $0x228] sm:$0xff]  }
  0x43   :  { %1908 = vmatmul.mubr.bf16.gmra.mrb[16].mxu0 %v2806_v34  ;;  %3318 = vmatprep.subr.bf16.mxu1 %v3577_v58  ;;  %v3587_v34 = vld [vmem:[%s4630_s1 + $0x258] sm:$0xff]   ;;  %v3599_v58 = vld [vmem:[%s4630_s1 + $0x270] sm:$0xff]  }
  0x44   :  { %2005 = vmatmul.mubr.bf16.gmra.mrb[16].mxu1 %v2808_v35  ;;  %1915 = vmatprep.mubr.bf16.mxu0 %v2823_v36  ;;  %v101_v35 = vld [vmem:[%s4631_s0 + $0x190] sm:$0xff] }
  0x45   :  { %2012 = vmatprep.mubr.bf16.mxu1 %v2825_v37  ;;  %v109_v36 = vld [vmem:[%s4631_s0 + $0x1d0] sm:$0xff]  ;;  %v3589_v37 = vld [vmem:[%s4630_s1 + $0x2d8] sm:$0xff]  }
  0x46   :  { %v2795_v46 = vcombine.high %v101_v35, %v109_v36  ;;  %v2794_v59 = vcombine.low %v101_v35, %v109_v36  ;;  %v64_v35 = vld [vmem:[%s4631_s0 + $0x68] sm:$0xff]  ;;  %v2858_v36 = vcombine.low %v165_v24, %v173_v25 }
  0x4b   :  { %1916 = vmatmul.mubr.bf16.gmra.mrb[20].mxu0 %v2822_v47  ;;  %v3592_v47 = vld [vmem:[%s4630_s1 + $0x220] sm:$0xff]  }
  0x4c   :  { %2013 = vmatmul.mubr.bf16.gmra.mrb[20].mxu1 %v2824_v49  ;;  %1923 = vmatprep.mubr.bf16.mxu0 %v2839_v50  ;;  %v3594_v49 = vld [vmem:[%s4630_s1 + $0x2a0] sm:$0xff]   ;;  %v3595_v50 = vld [vmem:[%s4630_s1 + $0x268] sm:$0xff]  }
  0x4d   :  { %2020 = vmatprep.mubr.bf16.mxu1 %v2841_v52  ;;  %v3597_v52 = vld [vmem:[%s4630_s1 + $0x2e8] sm:$0xff]  }
  0x53   :  { %1924 = vmatmul.mubr.bf16.gmra.mrb[24].mxu0 %v2838_v60  ;;  %v3601_v60 = vld [vmem:[%s4630_s1 + $0x2f0] sm:$0xff]  }
  0x54   :  { %2021 = vmatmul.mubr.bf16.gmra.mrb[24].mxu1 %v2840_v61  ;;  %1931 = vmatprep.mubr.bf16.mxu0 %v2855_v62  ;;  %v2796_v61 = vcombine.low %v102_v38, %v110_v39  ;;  %v2811_v62 = vcombine.high %v117_v51, %v125_v53 }
  0x55   :  { %2028 = vmatprep.mubr.bf16.mxu1 %v2857_v63  ;;  %v2813_v63 = vcombine.high %v118_v54, %v126_v55  ;;  %v87_v54 = vld [vmem:[%s4631_s0 + $0x120] sm:$0xff] }
  0x56   :  { %v95_v55 = vld [vmem:[%s4631_s0 + $0x160] sm:$0xff] }
  0x5b   :  { %1932 = vmatmul.mubr.bf16.gmra.mrb[28].mxu0 %v2854_v4  ;;  %v141_v4 = vld [vmem:[%s4631_s0 + $0x2d0] sm:$0xff] }
  0x5c   :  { %2029 = vmatmul.mubr.bf16.gmra.mrb[28].mxu1 %v2856_v5  ;;  %2069 = vmatprep.mubr.bf16.mxu0 %v2747_v6  ;;  %v3605_v5 = vld [vmem:[%s4630_s1 + $0x2f8] sm:$0xff]  }
  0x5d   :  { %2166 = vmatprep.mubr.bf16.mxu1 %v2749_v7  ;;  %v134_v6 = vld [vmem:[%s4631_s0 + $0x298] sm:$0xff] }
  0x5e   :  { %v142_v7 = vld [vmem:[%s4631_s0 + $0x2d8] sm:$0xff] }
  0x63   :  { %2070 = vmatmul.mubr.bf16.vlgmr.msra.gmra.mrb[32].mxu0 %v2746_v10  ;;  %v3607_v10 = vld [vmem:[%s4630_s1 + $0x340] sm:$0xff]  }
  0x64   :  { %2167 = vmatmul.mubr.bf16.vlgmr.msra.gmra.mrb[32].mxu1 %v2748_v14  ;;  %3255 = vmatpush3.bf16.msra.mxu0 %v3576_v11  ;;  %v2810_v11 = vcombine.low %v117_v51, %v125_v53  ;;  %v2827_v14 = vcombine.high %v133_v3, %v141_v4  ;;  %v3613_v51 = vld [vmem:[%s4630_s1 + $0x3c8] sm:$0xff]  }
  0x65   :  { %3319 = vmatpush3.bf16.msra.mxu1 %v3578_v15  ;;  %2077 = vmatprep.mubr.bf16.mxu0 %v2763_v16  ;;  %v2829_v15 = vcombine.high %v134_v6, %v142_v7  ;;  %v149_v16 = vld [vmem:[%s4631_s0 + $0x310] sm:$0xff]  ;;  %v3614_v53 = vld [vmem:[%s4630_s1 + $0x388] sm:$0xff]  }
  0x66   :  { %2174 = vmatprep.mubr.bf16.mxu1 %v2765_v18  ;;  %3256 = vmatprep.subr.bf16.mxu0 %v3579_v17  ;;  %v157_v17 = vld [vmem:[%s4631_s0 + $0x350] sm:$0xff]  ;;  %v150_v18 = vld [vmem:[%s4631_s0 + $0x318] sm:$0xff] }
  0x67   :  { %3320 = vmatprep.subr.bf16.mxu1 %v3581_v20  ;;  %v2826_v20 = vcombine.low %v133_v3, %v141_v4  ;;  %v2843_v22 = vcombine.high %v149_v16, %v157_v17  ;;  %v3621_v3 = vld [vmem:[%s4630_s1 + $0x3d8] sm:$0xff]   ;;  %v103_v4 = vld [vmem:[%s4631_s0 + $0x1a0] sm:$0xff] }
  0x68   :  { %3257 = vmatpush3.bf16.msra.mxu0 %v3580_v19  ;;  %v158_v19 = vld [vmem:[%s4631_s0 + $0x358] sm:$0xff] }
  0x69   :  { %3321 = vmatpush3.bf16.msra.mxu1 %v3582_v21  ;;  %3258 = vmatprep.subr.bf16.mxu0 %v3583_v26  ;;  %v2828_v21 = vcombine.low %v134_v6, %v142_v7  ;;  %v2845_v23 = vcombine.high %v150_v18, %v158_v19  ;;  %v166_v26 = vld [vmem:[%s4631_s0 + $0x398] sm:$0xff]  ;;  %v104_v6 = vld [vmem:[%s4631_s0 + $0x1a8] sm:$0xff] }
  0x6a   :  { %3322 = vmatprep.subr.bf16.mxu1 %v3585_v27  ;;  %v174_v27 = vld [vmem:[%s4631_s0 + $0x3d8] sm:$0xff] }
  0x6b   :  { %2078 = vmatmul.mubr.bf16.gmra.mrb[36].mxu0 %v2762_v28  ;;  %v2842_v28 = vcombine.low %v149_v16, %v157_v17  ;;  %v3620_v7 = vld [vmem:[%s4630_s1 + $0x318] sm:$0xff]   ;;  %v3624_v16 = vld [vmem:[%s4630_s1 + $0x320] sm:$0xff]  }
  0x6c   :  { %2175 = vmatmul.mubr.bf16.gmra.mrb[36].mxu1 %v2764_v29  ;;  %2085 = vmatprep.mubr.bf16.mxu0 %v2779_v30  ;;  %v2844_v29 = vcombine.low %v150_v18, %v158_v19  ;;  %v2859_v30 = vcombine.high %v165_v24, %v173_v25  ;;  %v3626_v17 = vld [vmem:[%s4630_s1 + $0x3a0] sm:$0xff]   ;;  %v3627_v18 = vld [vmem:[%s4630_s1 + $0x368] sm:$0xff]  }
  0x6d   :  { %2182 = vmatprep.mubr.bf16.mxu1 %v2781_v31  ;;  %3259 = vmatpush3.bf16.msra.mxu0 %v3584_v32  ;;  %v2861_v31 = vcombine.high %v166_v26, %v174_v27  ;;  %v55_v32 = vld [vmem:[%s4631_s0 + $0x20] sm:$0xff]  ;;  %v3629_v19 = vld [vmem:[%s4630_s1 + $0x3e8] sm:$0xff]  }
  0x6e   :  { %3323 = vmatpush3.bf16.msra.mxu1 %v3586_v33  ;;  %3260 = vmatprep.subr.bf16.mxu0 %v3587_v34  ;;  %v63_v33 = vld [vmem:[%s4631_s0 + $0x60] sm:$0xff]  ;;  %v56_v34 = vld [vmem:[%s4631_s0 + $0x28] sm:$0xff] }
  0x6f   :  { %3324 = vmatprep.subr.bf16.mxu1 %v3589_v37  ;;  %v2860_v37 = vcombine.low %v166_v26, %v174_v27  ;;  %v2751_v38 = vcombine.high %v55_v32, %v63_v33  ;;  %v2753_v39 = vcombine.high %v56_v34, %v64_v35  ;;  %v128_v24 = vld [vmem:[%s4631_s0 + $0x268] sm:$0xff]  ;;  %v3631_v26 = vld [vmem:[%s4630_s1 + $0x370] sm:$0xff]  }
  0x70   :  { %v3630_v25 = vld [vmem:[%s4630_s1 + $0x3a8] sm:$0xff]  }
  0x71   :  { %3261 = vmatpush3.bf16.msra.mxu0 %v3588_v40  ;;  %v71_v40 = vld [vmem:[%s4631_s0 + $0xa0] sm:$0xff] }
  0x72   :  { %3325 = vmatpush3.bf16.msra.mxu1 %v3590_v41  ;;  %3262 = vmatprep.subr.bf16.mxu0 %v3591_v42  ;;  %v79_v41 = vld [vmem:[%s4631_s0 + $0xe0] sm:$0xff]  ;;  %v2750_v42 = vcombine.low %v55_v32, %v63_v33  ;;  %v3632_v32 = vld [vmem:[%s4630_s1 + $0x330] sm:$0xff]  }
  0x73   :  { %2086 = vmatmul.mubr.bf16.gmra.mrb[40].mxu0 %v2778_v43  ;;  %3326 = vmatprep.subr.bf16.mxu1 %v3593_v44  ;;  %v72_v43 = vld [vmem:[%s4631_s0 + $0xa8] sm:$0xff]  ;;  %v3634_v33 = vld [vmem:[%s4630_s1 + $0x3b0] sm:$0xff]  }
  0x74   :  { %2183 = vmatmul.mubr.bf16.gmra.mrb[40].mxu1 %v2780_v45  ;;  %2093 = vmatprep.mubr.bf16.mxu0 %v2795_v46  ;;  %v80_v44 = vld [vmem:[%s4631_s0 + $0xe8] sm:$0xff]  ;;  %v2752_v45 = vcombine.low %v56_v34, %v64_v35  ;;  %v3608_v46 = vld [vmem:[%s4630_s1 + $0x300] sm:$0xff]   ;;  %v3635_v34 = vld [vmem:[%s4630_s1 + $0x378] sm:$0xff]  }
  0x75   :  { %2190 = vmatprep.mubr.bf16.mxu1 %v2797_v48  ;;  %3263 = vmatpush3.bf16.msra.mxu0 %v3592_v47  ;;  %v3610_v47 = vld [vmem:[%s4630_s1 + $0x380] sm:$0xff]   ;;  %v2767_v48 = vcombine.high %v71_v40, %v79_v41  ;;  %v3637_v35 = vld [vmem:[%s4630_s1 + $0x3f8] sm:$0xff]  }
  0x76   :  { %3327 = vmatpush3.bf16.msra.mxu1 %v3594_v49  ;;  %3264 = vmatprep.subr.bf16.mxu0 %v3595_v50  ;;  %v2769_v49 = vcombine.high %v72_v43, %v80_v44  ;;  %v3611_v50 = vld [vmem:[%s4630_s1 + $0x348] sm:$0xff]  }
  0x77   :  { %3328 = vmatprep.subr.bf16.mxu1 %v3597_v52  ;;  %v3612_v52 = vld [vmem:[%s4630_s1 + $0x308] sm:$0xff]  }
  0x79   :  { %3265 = vmatpush3.bf16.msra.mxu0 %v3596_v56  ;;  %v3615_v56 = vld [vmem:[%s4630_s1 + $0x350] sm:$0xff]  }
  0x7a   :  { %3329 = vmatpush3.bf16.msra.mxu1 %v3598_v57  ;;  %3266 = vmatprep.subr.bf16.mxu0 %v3599_v58  ;;  %v88_v57 = vld [vmem:[%s4631_s0 + $0x128] sm:$0xff] }
  0x7b   :  { %2094 = vmatmul.mubr.bf16.gmra.mrb[44].mxu0 %v2794_v59  ;;  %3330 = vmatprep.subr.bf16.mxu1 %v3601_v60  ;;  %v96_v58 = vld [vmem:[%s4631_s0 + $0x168] sm:$0xff]  ;;  %v3617_v59 = vld [vmem:[%s4630_s1 + $0x3d0] sm:$0xff]   ;;  %v2766_v60 = vcombine.low %v71_v40, %v79_v41  ;;  %v3638_v41 = vld [vmem:[%s4630_s1 + $0x3b8] sm:$0xff]  }
  0x7c   :  { %2191 = vmatmul.mubr.bf16.gmra.mrb[44].mxu1 %v2796_v61  ;;  %2101 = vmatprep.mubr.bf16.mxu0 %v2811_v62  ;;  %v2768_v61 = vcombine.low %v72_v43, %v80_v44  ;;  %v2783_v62 = vcombine.high %v87_v54, %v95_v55  ;;  %v144_v40 = vld [vmem:[%s4631_s0 + $0x2e8] sm:$0xff] }
  0x7d   :  { %2198 = vmatprep.mubr.bf16.mxu1 %v2813_v63  ;;  %3267 = vmatpush3.bf16.msra.mxu0 %v3600_v0  ;;  %v2785_v63 = vcombine.high %v88_v57, %v96_v58  ;;  %v3616_v0 = vld [vmem:[%s4630_s1 + $0x310] sm:$0xff]  }
  0x7e   :  { %3331 = vmatpush3.bf16.msra.mxu1 %v3602_v1  ;;  %3268 = vmatprep.subr.bf16.mxu0 %v3603_v2  ;;  %v3618_v1 = vld [vmem:[%s4630_s1 + $0x390] sm:$0xff]   ;;  %v3619_v2 = vld [vmem:[%s4630_s1 + $0x358] sm:$0xff]  }
  0x7f   :  { %3332 = vmatprep.subr.bf16.mxu1 %v3605_v5  ;;  %v111_v5 = vld [vmem:[%s4631_s0 + $0x1e0] sm:$0xff] }
  0x80   :  { %v2798_v27 = vcombine.low %v103_v4, %v111_v5 }
  0x81   :  { %3269 = vmatpush3.bf16.msra.mxu0 %v3604_v8  ;;  %v112_v8 = vld [vmem:[%s4631_s0 + $0x1e8] sm:$0xff] }
  0x82   :  { %3333 = vmatpush3.bf16.msra.mxu1 %v3606_v9  ;;  %3382 = vmatprep.subr.bf16.mxu0 %v3607_v10  ;;  %v3622_v9 = vld [vmem:[%s4630_s1 + $0x398] sm:$0xff]   ;;  %v3623_v10 = vld [vmem:[%s4630_s1 + $0x360] sm:$0xff]  }
  0x83   :  { %2102 = vmatmul.mubr.bf16.gmra.mrb[48].mxu0 %v2810_v11  ;;  %3446 = vmatprep.subr.bf16.mxu1 %v3609_v12  ;;  %v2782_v11 = vcombine.low %v87_v54, %v95_v55  ;;  %v3625_v12 = vld [vmem:[%s4630_s1 + $0x3e0] sm:$0xff]  }
  0x84   :  { %2199 = vmatmul.mubr.bf16.gmra.mrb[48].mxu1 %v2812_v13  ;;  %2109 = vmatprep.mubr.bf16.mxu0 %v2827_v14  ;;  %v2784_v13 = vcombine.low %v88_v57, %v96_v58  ;;  %v2799_v14 = vcombine.high %v103_v4, %v111_v5  ;;  %v167_v54 = vld [vmem:[%s4631_s0 + $0x3a0] sm:$0xff]  ;;  %v176_v57 = vld [vmem:[%s4631_s0 + $0x3e8] sm:$0xff] }
  0x85   :  { %2206 = vmatprep.mubr.bf16.mxu1 %v2829_v15  ;;  %v2801_v15 = vcombine.high %v104_v6, %v112_v8  ;;  %v175_v55 = vld [vmem:[%s4631_s0 + $0x3e0] sm:$0xff] }
  0x8b   :  { %2110 = vmatmul.mubr.bf16.gmra.mrb[52].mxu0 %v2826_v20  ;;  %v119_v20 = vld [vmem:[%s4631_s0 + $0x220] sm:$0xff] }
  0x8c   :  { %2207 = vmatmul.mubr.bf16.gmra.mrb[52].mxu1 %v2828_v21  ;;  %2117 = vmatprep.mubr.bf16.mxu0 %v2843_v22  ;;  %v127_v21 = vld [vmem:[%s4631_s0 + $0x260] sm:$0xff]  ;;  %v120_v22 = vld [vmem:[%s4631_s0 + $0x228] sm:$0xff] }
  0x8d   :  { %2214 = vmatprep.mubr.bf16.mxu1 %v2845_v23  ;;  %v3628_v23 = vld [vmem:[%s4630_s1 + $0x328] sm:$0xff]   ;;  %v2816_v43 = vcombine.low %v120_v22, %v128_v24 }
  0x93   :  { %2118 = vmatmul.mubr.bf16.gmra.mrb[56].mxu0 %v2842_v28  ;;  %v3633_v28 = vld [vmem:[%s4630_s1 + $0x3f0] sm:$0xff]  }
  0x94   :  { %2215 = vmatmul.mubr.bf16.gmra.mrb[56].mxu1 %v2844_v29  ;;  %2125 = vmatprep.mubr.bf16.mxu0 %v2859_v30  ;;  %v2800_v29 = vcombine.low %v104_v6, %v112_v8  ;;  %v2815_v30 = vcombine.high %v119_v20, %v127_v21  ;;  %v73_v6 = vld [vmem:[%s4631_s0 + $0xb0] sm:$0xff]  ;;  %v74_v8 = vld [vmem:[%s4631_s0 + $0xb8] sm:$0xff] }
  0x95   :  { %2222 = vmatprep.mubr.bf16.mxu1 %v2861_v31  ;;  %v2817_v31 = vcombine.high %v120_v22, %v128_v24  ;;  %v105_v22 = vld [vmem:[%s4631_s0 + $0x1b0] sm:$0xff]  ;;  %v106_v24 = vld [vmem:[%s4631_s0 + $0x1b8] sm:$0xff] }
  0x9b   :  { %2126 = vmatmul.mubr.bf16.gmra.mrb[60].mxu0 %v2858_v36  ;;  %v135_v36 = vld [vmem:[%s4631_s0 + $0x2a0] sm:$0xff] }
  0x9c   :  { %2223 = vmatmul.mubr.bf16.gmra.mrb[60].mxu1 %v2860_v37  ;;  %2263 = vmatprep.mubr.bf16.mxu0 %v2751_v38  ;;  %v143_v37 = vld [vmem:[%s4631_s0 + $0x2e0] sm:$0xff]  ;;  %v3636_v38 = vld [vmem:[%s4630_s1 + $0x338] sm:$0xff]  }
  0x9d   :  { %2360 = vmatprep.mubr.bf16.mxu1 %v2753_v39  ;;  %v136_v39 = vld [vmem:[%s4631_s0 + $0x2a8] sm:$0xff]  ;;  %v2831_v44 = vcombine.high %v135_v36, %v143_v37 }
  0xa3   :  { %2264 = vmatmul.mubr.bf16.vlgmr.msra.gmra.mrb[64].mxu0 %v2750_v42  ;;  %v2814_v42 = vcombine.low %v119_v20, %v127_v21 }
  0xa4   :  { %2361 = vmatmul.mubr.bf16.vlgmr.msra.gmra.mrb[64].mxu1 %v2752_v45  ;;  %3383 = vmatpush3.bf16.msra.mxu0 %v3608_v46  ;;  %v2833_v45 = vcombine.high %v136_v39, %v144_v40  ;;  %v151_v46 = vld [vmem:[%s4631_s0 + $0x320] sm:$0xff] }
  0xa5   :  { %3447 = vmatpush3.bf16.msra.mxu1 %v3610_v47  ;;  %2271 = vmatprep.mubr.bf16.mxu0 %v2767_v48  ;;  %v159_v47 = vld [vmem:[%s4631_s0 + $0x360] sm:$0xff]  ;;  %v152_v48 = vld [vmem:[%s4631_s0 + $0x328] sm:$0xff] }
  0xa6   :  { %2368 = vmatprep.mubr.bf16.mxu1 %v2769_v49  ;;  %3384 = vmatprep.subr.bf16.mxu0 %v3611_v50  ;;  %v160_v49 = vld [vmem:[%s4631_s0 + $0x368] sm:$0xff]  ;;  %v2830_v50 = vcombine.low %v135_v36, %v143_v37  ;;  %v2846_v58 = vcombine.low %v151_v46, %v159_v47 }
  0xa7   :  { %3448 = vmatprep.subr.bf16.mxu1 %v3613_v51  ;;  %v2832_v51 = vcombine.low %v136_v39, %v144_v40 }
  0xa8   :  { %3385 = vmatpush3.bf16.msra.mxu0 %v3612_v52  ;;  %v2847_v52 = vcombine.high %v151_v46, %v159_v47 }
  0xa9   :  { %3449 = vmatpush3.bf16.msra.mxu1 %v3614_v53  ;;  %3386 = vmatprep.subr.bf16.mxu0 %v3615_v56  ;;  %v2849_v53 = vcombine.high %v152_v48, %v160_v49  ;;  %v168_v56 = vld [vmem:[%s4631_s0 + $0x3a8] sm:$0xff] }
  0xaa   :  { %3450 = vmatprep.subr.bf16.mxu1 %v3617_v59  ;;  %v2848_v59 = vcombine.low %v152_v48, %v160_v49 }
  0xab   :  { %2272 = vmatmul.mubr.bf16.gmra.mrb[68].mxu0 %v2766_v60  ;;  %v2863_v60 = vcombine.high %v167_v54, %v175_v55 }
  0xac   :  { %2369 = vmatmul.mubr.bf16.gmra.mrb[68].mxu1 %v2768_v61  ;;  %2279 = vmatprep.mubr.bf16.mxu0 %v2783_v62  ;;  %v2865_v61 = vcombine.high %v168_v56, %v176_v57  ;;  %v57_v62 = vld [vmem:[%s4631_s0 + $0x30] sm:$0xff] }
  0xad   :  { %2376 = vmatprep.mubr.bf16.mxu1 %v2785_v63  ;;  %3387 = vmatpush3.bf16.msra.mxu0 %v3616_v0  ;;  %v65_v63 = vld [vmem:[%s4631_s0 + $0x70] sm:$0xff]  ;;  %v58_v0 = vld [vmem:[%s4631_s0 + $0x38] sm:$0xff] }
  0xae   :  { %3451 = vmatpush3.bf16.msra.mxu1 %v3618_v1  ;;  %3388 = vmatprep.subr.bf16.mxu0 %v3619_v2  ;;  %v66_v1 = vld [vmem:[%s4631_s0 + $0x78] sm:$0xff]  ;;  %v2862_v2 = vcombine.low %v167_v54, %v175_v55  ;;  %v2755_v4 = vcombine.high %v57_v62, %v65_v63 }
  0xaf   :  { %3452 = vmatprep.subr.bf16.mxu1 %v3621_v3  ;;  %v2864_v3 = vcombine.low %v168_v56, %v176_v57  ;;  %v2757_v5 = vcombine.high %v58_v0, %v66_v1  ;;  %v138_v55 = vld [vmem:[%s4631_s0 + $0x2b8] sm:$0xff] }
  0xb0   :  { %v146_v56 = vld [vmem:[%s4631_s0 + $0x2f8] sm:$0xff] }
  0xb1   :  { %3389 = vmatpush3.bf16.msra.mxu0 %v3620_v7  ;;  %v81_v7 = vld [vmem:[%s4631_s0 + $0xf0] sm:$0xff] }
  0xb2   :  { %3453 = vmatpush3.bf16.msra.mxu1 %v3622_v9  ;;  %3390 = vmatprep.subr.bf16.mxu0 %v3623_v10  ;;  %v82_v9 = vld [vmem:[%s4631_s0 + $0xf8] sm:$0xff]  ;;  %v2754_v10 = vcombine.low %v57_v62, %v65_v63 }
  0xb3   :  { %2280 = vmatmul.mubr.bf16.gmra.mrb[72].mxu0 %v2782_v11  ;;  %3454 = vmatprep.subr.bf16.mxu1 %v3625_v12  ;;  %v2756_v11 = vcombine.low %v58_v0, %v66_v1  ;;  %v2771_v12 = vcombine.high %v73_v6, %v81_v7 }
  0xb4   :  { %2377 = vmatmul.mubr.bf16.gmra.mrb[72].mxu1 %v2784_v13  ;;  %2287 = vmatprep.mubr.bf16.mxu0 %v2799_v14  ;;  %v2773_v13 = vcombine.high %v74_v8, %v82_v9  ;;  %v89_v14 = vld [vmem:[%s4631_s0 + $0x130] sm:$0xff] }
  0xb5   :  { %2384 = vmatprep.mubr.bf16.mxu1 %v2801_v15  ;;  %3391 = vmatpush3.bf16.msra.mxu0 %v3624_v16  ;;  %v97_v15 = vld [vmem:[%s4631_s0 + $0x170] sm:$0xff]  ;;  %v90_v16 = vld [vmem:[%s4631_s0 + $0x138] sm:$0xff] }
  0xb6   :  { %3455 = vmatpush3.bf16.msra.mxu1 %v3626_v17  ;;  %3392 = vmatprep.subr.bf16.mxu0 %v3627_v18  ;;  %v98_v17 = vld [vmem:[%s4631_s0 + $0x178] sm:$0xff]  ;;  %v2770_v18 = vcombine.low %v73_v6, %v81_v7  ;;  %v2787_v20 = vcombine.high %v89_v14, %v97_v15 }
  0xb7   :  { %3456 = vmatprep.subr.bf16.mxu1 %v3629_v19  ;;  %v2772_v19 = vcombine.low %v74_v8, %v82_v9  ;;  %v2789_v21 = vcombine.high %v90_v16, %v98_v17 }
  0xb9   :  { %3393 = vmatpush3.bf16.msra.mxu0 %v3628_v23  ;;  %v113_v23 = vld [vmem:[%s4631_s0 + $0x1f0] sm:$0xff] }
  0xba   :  { %3457 = vmatpush3.bf16.msra.mxu1 %v3630_v25  ;;  %3394 = vmatprep.subr.bf16.mxu0 %v3631_v26  ;;  %v114_v25 = vld [vmem:[%s4631_s0 + $0x1f8] sm:$0xff]  ;;  %v2786_v26 = vcombine.low %v89_v14, %v97_v15  ;;  %v2802_v37 = vcombine.low %v105_v22, %v113_v23 }
  0xbb   :  { %2288 = vmatmul.mubr.bf16.gmra.mrb[76].mxu0 %v2798_v27  ;;  %3458 = vmatprep.subr.bf16.mxu1 %v3633_v28  ;;  %v2788_v27 = vcombine.low %v90_v16, %v98_v17  ;;  %v2803_v28 = vcombine.high %v105_v22, %v113_v23  ;;  %v162_v14 = vld [vmem:[%s4631_s0 + $0x378] sm:$0xff] }
  0xbc   :  { %2385 = vmatmul.mubr.bf16.gmra.mrb[76].mxu1 %v2800_v29  ;;  %2295 = vmatprep.mubr.bf16.mxu0 %v2815_v30  ;;  %v2805_v29 = vcombine.high %v106_v24, %v114_v25  ;;  %v121_v30 = vld [vmem:[%s4631_s0 + $0x230] sm:$0xff] }
  0xbd   :  { %2392 = vmatprep.mubr.bf16.mxu1 %v2817_v31  ;;  %3395 = vmatpush3.bf16.msra.mxu0 %v3632_v32  ;;  %v129_v31 = vld [vmem:[%s4631_s0 + $0x270] sm:$0xff] }
  0xbe   :  { %3459 = vmatpush3.bf16.msra.mxu1 %v3634_v33  ;;  %3396 = vmatprep.subr.bf16.mxu0 %v3635_v34  ;;  %v122_v33 = vld [vmem:[%s4631_s0 + $0x238] sm:$0xff] }
  0xbf   :  { %3460 = vmatprep.subr.bf16.mxu1 %v3637_v35  ;;  %v130_v34 = vld [vmem:[%s4631_s0 + $0x278] sm:$0xff] }
  0xc0   :  { %v2821_v46 = vcombine.high %v122_v33, %v130_v34  ;;  %v2820_v63 = vcombine.low %v122_v33, %v130_v34  ;;  %v177_v33 = vld [vmem:[%s4631_s0 + $0x3f0] sm:$0xff] }
  0xc1   :  { %3397 = vmatpush3.bf16.msra.mxu0 %v3636_v38 }
  0xc2   :  { %3461 = vmatpush3.bf16.msra.mxu1 %v3638_v41  ;;  %v2804_v41 = vcombine.low %v106_v24, %v114_v25 }
  0xc3   :  { %2296 = vmatmul.mubr.bf16.gmra.mrb[80].mxu0 %v2814_v42  ;;  %v2819_v42 = vcombine.high %v121_v30, %v129_v31 }
  0xc4   :  { %2393 = vmatmul.mubr.bf16.gmra.mrb[80].mxu1 %v2816_v43  ;;  %2303 = vmatprep.mubr.bf16.mxu0 %v2831_v44 }
  0xc5   :  { %2400 = vmatprep.mubr.bf16.mxu1 %v2833_v45 }
  0xcb   :  { %2304 = vmatmul.mubr.bf16.gmra.mrb[84].mxu0 %v2830_v50 }
  0xcc   :  { %2401 = vmatmul.mubr.bf16.gmra.mrb[84].mxu1 %v2832_v51  ;;  %2311 = vmatprep.mubr.bf16.mxu0 %v2847_v52  ;;  %v137_v52 = vld [vmem:[%s4631_s0 + $0x2b0] sm:$0xff] }
  0xcd   :  { %2408 = vmatprep.mubr.bf16.mxu1 %v2849_v53  ;;  %v145_v53 = vld [vmem:[%s4631_s0 + $0x2f0] sm:$0xff] }
  0xce   :  { %v2835_v0 = vcombine.high %v137_v52, %v145_v53  ;;  %v2834_v17 = vcombine.low %v137_v52, %v145_v53 }
  0xd3   :  { %2312 = vmatmul.mubr.bf16.gmra.mrb[88].mxu0 %v2846_v58 }
  0xd4   :  { %2409 = vmatmul.mubr.bf16.gmra.mrb[88].mxu1 %v2848_v59  ;;  %2319 = vmatprep.mubr.bf16.mxu0 %v2863_v60  ;;  %v2818_v59 = vcombine.low %v121_v30, %v129_v31 }
  0xd5   :  { %2416 = vmatprep.mubr.bf16.mxu1 %v2865_v61 }
  0xdb   :  { %2320 = vmatmul.mubr.bf16.gmra.mrb[92].mxu0 %v2862_v2 }
  0xdc   :  { %2417 = vmatmul.mubr.bf16.gmra.mrb[92].mxu1 %v2864_v3  ;;  %2457 = vmatprep.mubr.bf16.mxu0 %v2755_v4  ;;  %v2837_v4 = vcombine.high %v138_v55, %v146_v56 }
  0xdd   :  { %2554 = vmatprep.mubr.bf16.mxu1 %v2757_v5 }
  0xe3   :  { %2458 = vmatmul.mubr.bf16.vlgmr.msra.gmra.mrb[96].mxu0 %v2754_v10  ;;  %v153_v10 = vld [vmem:[%s4631_s0 + $0x330] sm:$0xff] }
  0xe4   :  { %2555 = vmatmul.mubr.bf16.vlgmr.msra.gmra.mrb[96].mxu1 %v2756_v11  ;;  %2465 = vmatprep.mubr.bf16.mxu0 %v2771_v12  ;;  %v161_v11 = vld [vmem:[%s4631_s0 + $0x370] sm:$0xff] }
  0xe5   :  { %2562 = vmatprep.mubr.bf16.mxu1 %v2773_v13  ;;  %v154_v13 = vld [vmem:[%s4631_s0 + $0x338] sm:$0xff]  ;;  %v2851_v22 = vcombine.high %v153_v10, %v161_v11 }
  0xeb   :  { %2466 = vmatmul.mubr.bf16.gmra.mrb[100].mxu0 %v2770_v18 }
  0xec   :  { %2563 = vmatmul.mubr.bf16.gmra.mrb[100].mxu1 %v2772_v19  ;;  %2473 = vmatprep.mubr.bf16.mxu0 %v2787_v20 }
  0xed   :  { %2570 = vmatprep.mubr.bf16.mxu1 %v2789_v21  ;;  %v2836_v21 = vcombine.low %v138_v55, %v146_v56 }
  0xf3   :  { %2474 = vmatmul.mubr.bf16.gmra.mrb[104].mxu0 %v2786_v26  ;;  %v2853_v26 = vcombine.high %v154_v13, %v162_v14 }
  0xf4   :  { %2571 = vmatmul.mubr.bf16.gmra.mrb[104].mxu1 %v2788_v27  ;;  %2481 = vmatprep.mubr.bf16.mxu0 %v2803_v28 }
  0xf5   :  { %2578 = vmatprep.mubr.bf16.mxu1 %v2805_v29 }
  0xf6   :  { %v3014_v32 = vpop.f32.mrb[0].mxu0 }
  0xf7   :  { %v3078_v35 = vpop.f32.mrb[0].mxu1  ;;  %v3015_v36 = vpop.f32.mrb[1].mxu0 }
  0xf8   :  { %v3016_v38 = vadd.f32 %v3015_v36, %v3014_v32  ;;  %v3079_v39 = vpop.f32.mrb[1].mxu1  ;;  %v3017_v40 = vpop.f32.mrb[2].mxu0  ;;  %v169_v32 = vld [vmem:[%s4631_s0 + $0x3b0] sm:$0xff]  ;;  %v178_v36 = vld [vmem:[%s4631_s0 + $0x3f8] sm:$0xff] }
  0xf9   :  { %v3080_v43 = vadd.f32 %v3079_v39, %v3078_v35  ;;  %v3081_v44 = vpop.f32.mrb[2].mxu1  ;;  %v3018_v45 = vpop.f32.mrb[3].mxu0  ;;  %v170_v35 = vld [vmem:[%s4631_s0 + $0x3b8] sm:$0xff]  ;;  %v2850_v39 = vcombine.low %v153_v10, %v161_v11 }
  0xfa   :  { %v3019_v47 = vadd.f32 %v3018_v45, %v3017_v40  ;;  %v3082_v48 = vpop.f32.mrb[3].mxu1 }
  0xfb   :  { %v4396_v49 = vadd.f32 %v3080_v43, %v3016_v38  ;;  %v3083_v50 = vadd.f32 %v3082_v48, %v3081_v44  ;;  %2482 = vmatmul.mubr.bf16.gmra.mrb[108].mxu0 %v2802_v37  ;;  %v2852_v43 = vcombine.low %v154_v13, %v162_v14  ;;  %v2867_v44 = vcombine.high %v169_v32, %v177_v33 }
  0xfc   :  { %2579 = vmatmul.mubr.bf16.gmra.mrb[108].mxu1 %v2804_v41  ;;  %2489 = vmatprep.mubr.bf16.mxu0 %v2819_v42  ;;  %v2869_v48 = vcombine.high %v170_v35, %v178_v36 }
  0xfd   :  { %v4398_v51 = vadd.f32 %v3083_v50, %v3019_v47  ;;  %2586 = vmatprep.mubr.bf16.mxu1 %v2821_v46 }
  0xfe   :  { %v3020_v54 = vpop.f32.mrb[4].mxu0 }
  0xff   :  { %v3084_v57 = vpop.f32.mrb[4].mxu1  ;;  %v3021_v58 = vpop.f32.mrb[5].mxu0 }
 0x100   :  { %v3022_v60 = vadd.f32 %v3021_v58, %v3020_v54  ;;  %v3085_v61 = vpop.f32.mrb[5].mxu1  ;;  %v3023_v62 = vpop.f32.mrb[6].mxu0 }
 0x101   :  { %v3086_v1 = vadd.f32 %v3085_v61, %v3084_v57  ;;  %v3087_v2 = vpop.f32.mrb[6].mxu1  ;;  %v3024_v3 = vpop.f32.mrb[7].mxu0 }
 0x102   :  { %v3025_v5 = vadd.f32 %v3024_v3, %v3023_v62  ;;  %v3088_v6 = vpop.f32.mrb[7].mxu1 }
 0x103   :  { %v4412_v7 = vadd.f32 %v3086_v1, %v3022_v60  ;;  %v3089_v8 = vadd.f32 %v3088_v6, %v3087_v2  ;;  %2490 = vmatmul.mubr.bf16.gmra.mrb[112].mxu0 %v2818_v59  ;;  %v2866_v59 = vcombine.low %v169_v32, %v177_v33 }
 0x104   :  { %2587 = vmatmul.mubr.bf16.gmra.mrb[112].mxu1 %v2820_v63  ;;  %2497 = vmatprep.mubr.bf16.mxu0 %v2835_v0  ;;  %v2868_v63 = vcombine.low %v170_v35, %v178_v36 }
 0x105   :  { %v4414_v9 = vadd.f32 %v3089_v8, %v3025_v5  ;;  %2594 = vmatprep.mubr.bf16.mxu1 %v2837_v4 }
 0x106   :  { %v3026_v12 = vpop.f32.mrb[8].mxu0 }
 0x107   :  { %v3090_v15 = vpop.f32.mrb[8].mxu1  ;;  %v3027_v16 = vpop.f32.mrb[9].mxu0 }
 0x108   :  { %v3028_v18 = vadd.f32 %v3027_v16, %v3026_v12  ;;  %v3091_v19 = vpop.f32.mrb[9].mxu1  ;;  %v3029_v20 = vpop.f32.mrb[10].mxu0 }
 0x109   :  { %v3092_v23 = vadd.f32 %v3091_v19, %v3090_v15  ;;  %v3093_v24 = vpop.f32.mrb[10].mxu1  ;;  %v3030_v25 = vpop.f32.mrb[11].mxu0 }
 0x10a   :  { %v3031_v27 = vadd.f32 %v3030_v25, %v3029_v20  ;;  %v3094_v28 = vpop.f32.mrb[11].mxu1 }
 0x10b   :  { %v4428_v29 = vadd.f32 %v3092_v23, %v3028_v18  ;;  %v3095_v30 = vadd.f32 %v3094_v28, %v3093_v24  ;;  %2498 = vmatmul.mubr.bf16.gmra.mrb[116].mxu0 %v2834_v17 }
 0x10c   :  { %2595 = vmatmul.mubr.bf16.gmra.mrb[116].mxu1 %v2836_v21  ;;  %2505 = vmatprep.mubr.bf16.mxu0 %v2851_v22 }
 0x10d   :  { %v4430_v31 = vadd.f32 %v3095_v30, %v3031_v27  ;;  %2602 = vmatprep.mubr.bf16.mxu1 %v2853_v26 }
 0x10e   :  { %v3032_v34 = vpop.f32.mrb[12].mxu0 }
 0x10f   :  { %v3096_v37 = vpop.f32.mrb[12].mxu1  ;;  %v3033_v38 = vpop.f32.mrb[13].mxu0 }
 0x110   :  { %v3034_v40 = vadd.f32 %v3033_v38, %v3032_v34  ;;  %v3097_v41 = vpop.f32.mrb[13].mxu1  ;;  %v3035_v42 = vpop.f32.mrb[14].mxu0 }
 0x111   :  { %v3098_v45 = vadd.f32 %v3097_v41, %v3096_v37  ;;  %v3099_v46 = vpop.f32.mrb[14].mxu1  ;;  %v3036_v47 = vpop.f32.mrb[15].mxu0 }
 0x112   :  { %v3037_v50 = vadd.f32 %v3036_v47, %v3035_v42  ;;  %v3100_v52 = vpop.f32.mrb[15].mxu1 }
 0x113   :  { %v4444_v53 = vadd.f32 %v3098_v45, %v3034_v40  ;;  %v3101_v54 = vadd.f32 %v3100_v52, %v3099_v46  ;;  %2506 = vmatmul.mubr.bf16.gmra.mrb[120].mxu0 %v2850_v39 }
 0x114   :  { %2603 = vmatmul.mubr.bf16.gmra.mrb[120].mxu1 %v2852_v43  ;;  %2513 = vmatprep.mubr.bf16.mxu0 %v2867_v44 }
 0x115   :  { %v4446_v55 = vadd.f32 %v3101_v54, %v3037_v50  ;;  %2610 = vmatprep.mubr.bf16.mxu1 %v2869_v48 }
 0x116   :  { %v3038_v56 = vpop.f32.mrb[16].mxu0 }
 0x117   :  { %v3102_v57 = vpop.f32.mrb[16].mxu1  ;;  %v3039_v58 = vpop.f32.mrb[17].mxu0 }
 0x118   :  { %v3040_v60 = vadd.f32 %v3039_v58, %v3038_v56  ;;  %v3103_v61 = vpop.f32.mrb[17].mxu1  ;;  %v3041_v62 = vpop.f32.mrb[18].mxu0 }
 0x119   :  { %v3104_v0 = vadd.f32 %v3103_v61, %v3102_v57  ;;  %v3105_v1 = vpop.f32.mrb[18].mxu1  ;;  %v3042_v2 = vpop.f32.mrb[19].mxu0 }
 0x11a   :  { %v3043_v3 = vadd.f32 %v3042_v2, %v3041_v62  ;;  %v3106_v4 = vpop.f32.mrb[19].mxu1 }
 0x11b   :  { %v4448_v5 = vadd.f32 %v3104_v0, %v3040_v60  ;;  %v3107_v6 = vadd.f32 %v3106_v4, %v3105_v1  ;;  %2514 = vmatmul.mubr.bf16.gmra.mrb[124].mxu0 %v2866_v59 }
 0x11c   :  { %2611 = vmatmul.mubr.bf16.gmra.mrb[124].mxu1 %v2868_v63 }
 0x11d   :  { %v4450_v8 = vadd.f32 %v3107_v6, %v3043_v3 }
 0x11e   :  { %v3044_v10 = vpop.f32.mrb[20].mxu0 }
 0x11f   :  { %v3108_v11 = vpop.f32.mrb[20].mxu1  ;;  %v3045_v12 = vpop.f32.mrb[21].mxu0 }
 0x120   :  { %v3046_v13 = vadd.f32 %v3045_v12, %v3044_v10  ;;  %v3109_v14 = vpop.f32.mrb[21].mxu1  ;;  %v3047_v15 = vpop.f32.mrb[22].mxu0 }
 0x121   :  { %v3110_v16 = vadd.f32 %v3109_v14, %v3108_v11  ;;  %v3111_v17 = vpop.f32.mrb[22].mxu1  ;;  %v3048_v18 = vpop.f32.mrb[23].mxu0 }
 0x122   :  { %v3049_v19 = vadd.f32 %v3048_v18, %v3047_v15  ;;  %v3112_v20 = vpop.f32.mrb[23].mxu1 }
 0x123   :  { %v4452_v21 = vadd.f32 %v3110_v16, %v3046_v13  ;;  %v3113_v22 = vadd.f32 %v3112_v20, %v3111_v17 }
 0x125   :  { %v4454_v23 = vadd.f32 %v3113_v22, %v3049_v19 }
 0x126   :  { %v3050_v24 = vpop.f32.mrb[24].mxu0 }
 0x127   :  { %v3114_v25 = vpop.f32.mrb[24].mxu1  ;;  %v3051_v26 = vpop.f32.mrb[25].mxu0 }
 0x128   :  { %v3052_v27 = vadd.f32 %v3051_v26, %v3050_v24  ;;  %v3115_v28 = vpop.f32.mrb[25].mxu1  ;;  %v3053_v30 = vpop.f32.mrb[26].mxu0 }
 0x129   :  { %v3116_v32 = vadd.f32 %v3115_v28, %v3114_v25  ;;  %v3117_v33 = vpop.f32.mrb[26].mxu1  ;;  %v3054_v34 = vpop.f32.mrb[27].mxu0 }
 0x12a   :  { %v3055_v35 = vadd.f32 %v3054_v34, %v3053_v30  ;;  %v3118_v36 = vpop.f32.mrb[27].mxu1 }
 0x12b   :  { %v4456_v37 = vadd.f32 %v3116_v32, %v3052_v27  ;;  %v3119_v38 = vadd.f32 %v3118_v36, %v3117_v33 }
 0x12d   :  { %v4458_v39 = vadd.f32 %v3119_v38, %v3055_v35 }
 0x12e   :  { %v3056_v40 = vpop.f32.mrb[28].mxu0 }
 0x12f   :  { %v3120_v41 = vpop.f32.mrb[28].mxu1  ;;  %v3057_v42 = vpop.f32.mrb[29].mxu0 }
 0x130   :  { %v3058_v43 = vadd.f32 %v3057_v42, %v3056_v40  ;;  %v3121_v44 = vpop.f32.mrb[29].mxu1  ;;  %v3059_v45 = vpop.f32.mrb[30].mxu0 }
 0x131   :  { %v3122_v46 = vadd.f32 %v3121_v44, %v3120_v41  ;;  %v3123_v47 = vpop.f32.mrb[30].mxu1  ;;  %v3060_v48 = vpop.f32.mrb[31].mxu0 }
 0x132   :  { %v3061_v50 = vadd.f32 %v3060_v48, %v3059_v45  ;;  %v3124_v52 = vpop.f32.mrb[31].mxu1 }
 0x133   :  { %v4460_v54 = vadd.f32 %v3122_v46, %v3058_v43  ;;  %v3125_v56 = vadd.f32 %v3124_v52, %v3123_v47 }
 0x135   :  { %v4462_v57 = vadd.f32 %v3125_v56, %v3061_v50 }
 0x136   :  { %v3142_v58 = vpop.f32.mrb[32].mxu0 }
 0x137   :  { %v3206_v59 = vpop.f32.mrb[32].mxu1  ;;  %v3143_v60 = vpop.f32.mrb[33].mxu0 }
 0x138   :  { %v3144_v61 = vadd.f32 %v3143_v60, %v3142_v58  ;;  %v3207_v62 = vpop.f32.mrb[33].mxu1  ;;  %v3145_v63 = vpop.f32.mrb[34].mxu0 }
 0x139   :  { %v3208_v0 = vadd.f32 %v3207_v62, %v3206_v59  ;;  %v3209_v1 = vpop.f32.mrb[34].mxu1  ;;  %v3146_v2 = vpop.f32.mrb[35].mxu0 }
 0x13a   :  { %v2072_v3 = vadd.f32 %v3144_v61, %v4396_v49  ;;  %v3147_v4 = vadd.f32 %v3146_v2, %v3145_v63  ;;  %v3210_v6 = vpop.f32.mrb[35].mxu1 }
 0x13b   :  { %v3211_v10 = vadd.f32 %v3210_v6, %v3209_v1 }
 0x13c   :  { %v4465_v11 = vadd.f32 %v3208_v0, %v2072_v3  ;;  %v2075_v12 = vadd.f32 %v3147_v4, %v4398_v51 }
 0x13e   :  { %v4468_v13 = vadd.f32 %v3211_v10, %v2075_v12  ;;  %v3148_v14 = vpop.f32.mrb[36].mxu0 }
 0x13f   :  { %v3212_v15 = vpop.f32.mrb[36].mxu1  ;;  %v3149_v16 = vpop.f32.mrb[37].mxu0 }
 0x140   :  { %v3150_v17 = vadd.f32 %v3149_v16, %v3148_v14  ;;  %v3213_v18 = vpop.f32.mrb[37].mxu1  ;;  %v3151_v19 = vpop.f32.mrb[38].mxu0 }
 0x141   :  { %v3214_v20 = vadd.f32 %v3213_v18, %v3212_v15  ;;  %v3215_v22 = vpop.f32.mrb[38].mxu1  ;;  %v3152_v24 = vpop.f32.mrb[39].mxu0 }
 0x142   :  { %v2080_v49 = vadd.f32 %v3150_v17, %v4412_v7  ;;  %v3153_v25 = vadd.f32 %v3152_v24, %v3151_v19  ;;  %v3216_v26 = vpop.f32.mrb[39].mxu1 }
 0x143   :  { %v3217_v27 = vadd.f32 %v3216_v26, %v3215_v22 }
 0x144   :  { %v4471_v28 = vadd.f32 %v3214_v20, %v2080_v49  ;;  %v2083_v51 = vadd.f32 %v3153_v25, %v4414_v9 }
 0x146   :  { %v4474_v30 = vadd.f32 %v3217_v27, %v2083_v51  ;;  %v3154_v32 = vpop.f32.mrb[40].mxu0 }
 0x147   :  { %v3218_v33 = vpop.f32.mrb[40].mxu1  ;;  %v3155_v34 = vpop.f32.mrb[41].mxu0 }
 0x148   :  { %v3156_v35 = vadd.f32 %v3155_v34, %v3154_v32  ;;  %v3219_v36 = vpop.f32.mrb[41].mxu1  ;;  %v3157_v38 = vpop.f32.mrb[42].mxu0 }
 0x149   :  { %v3220_v40 = vadd.f32 %v3219_v36, %v3218_v33  ;;  %v3221_v41 = vpop.f32.mrb[42].mxu1  ;;  %v3158_v42 = vpop.f32.mrb[43].mxu0 }
 0x14a   :  { %v2088_v7 = vadd.f32 %v3156_v35, %v4428_v29  ;;  %v3159_v43 = vadd.f32 %v3158_v42, %v3157_v38  ;;  %v3222_v44 = vpop.f32.mrb[43].mxu1 }
 0x14b   :  { %v3223_v45 = vadd.f32 %v3222_v44, %v3221_v41 }
 0x14c   :  { %v4477_v46 = vadd.f32 %v3220_v40, %v2088_v7  ;;  %v2091_v9 = vadd.f32 %v3159_v43, %v4430_v31 }
 0x14e   :  { %v4480_v47 = vadd.f32 %v3223_v45, %v2091_v9  ;;  %v3160_v48 = vpop.f32.mrb[44].mxu0 }
 0x14f   :  { %v3224_v50 = vpop.f32.mrb[44].mxu1  ;;  %v3161_v52 = vpop.f32.mrb[45].mxu0 }
 0x150   :  { %v3162_v56 = vadd.f32 %v3161_v52, %v3160_v48  ;;  %v3225_v58 = vpop.f32.mrb[45].mxu1  ;;  %v3163_v59 = vpop.f32.mrb[46].mxu0 }
 0x151   :  { %v3226_v60 = vadd.f32 %v3225_v58, %v3224_v50  ;;  %v3227_v61 = vpop.f32.mrb[46].mxu1  ;;  %v3164_v62 = vpop.f32.mrb[47].mxu0 }
 0x152   :  { %v2096_v29 = vadd.f32 %v3162_v56, %v4444_v53  ;;  %v3165_v63 = vadd.f32 %v3164_v62, %v3163_v59  ;;  %v3228_v0 = vpop.f32.mrb[47].mxu1 }
 0x153   :  { %v3229_v1 = vadd.f32 %v3228_v0, %v3227_v61 }
 0x154   :  { %v4483_v2 = vadd.f32 %v3226_v60, %v2096_v29  ;;  %v2099_v31 = vadd.f32 %v3165_v63, %v4446_v55 }
 0x156   :  { %v4486_v3 = vadd.f32 %v3229_v1, %v2099_v31  ;;  %v3166_v4 = vpop.f32.mrb[48].mxu0 }
 0x157   :  { %v3230_v6 = vpop.f32.mrb[48].mxu1  ;;  %v3167_v10 = vpop.f32.mrb[49].mxu0 }
 0x158   :  { %v3168_v12 = vadd.f32 %v3167_v10, %v3166_v4  ;;  %v3231_v14 = vpop.f32.mrb[49].mxu1  ;;  %v3169_v15 = vpop.f32.mrb[50].mxu0 }
 0x159   :  { %v3232_v16 = vadd.f32 %v3231_v14, %v3230_v6  ;;  %v3233_v17 = vpop.f32.mrb[50].mxu1  ;;  %v3170_v18 = vpop.f32.mrb[51].mxu0 }
 0x15a   :  { %v2104_v53 = vadd.f32 %v3168_v12, %v4448_v5  ;;  %v3171_v19 = vadd.f32 %v3170_v18, %v3169_v15  ;;  %v3234_v20 = vpop.f32.mrb[51].mxu1 }
 0x15b   :  { %v3235_v22 = vadd.f32 %v3234_v20, %v3233_v17 }
 0x15c   :  { %v4489_v24 = vadd.f32 %v3232_v16, %v2104_v53  ;;  %v2107_v55 = vadd.f32 %v3171_v19, %v4450_v8 }
 0x15e   :  { %v4492_v49 = vadd.f32 %v3235_v22, %v2107_v55  ;;  %v3172_v25 = vpop.f32.mrb[52].mxu0 }
 0x15f   :  { %v3236_v26 = vpop.f32.mrb[52].mxu1  ;;  %v3173_v27 = vpop.f32.mrb[53].mxu0 }
 0x160   :  { %v3174_v51 = vadd.f32 %v3173_v27, %v3172_v25  ;;  %v3237_v32 = vpop.f32.mrb[53].mxu1  ;;  %v3175_v33 = vpop.f32.mrb[54].mxu0 }
 0x161   :  { %v3238_v34 = vadd.f32 %v3237_v32, %v3236_v26  ;;  %v3239_v35 = vpop.f32.mrb[54].mxu1  ;;  %v3176_v36 = vpop.f32.mrb[55].mxu0 }
 0x162   :  { %v2112_v5 = vadd.f32 %v3174_v51, %v4452_v21  ;;  %v3177_v38 = vadd.f32 %v3176_v36, %v3175_v33  ;;  %v3240_v40 = vpop.f32.mrb[55].mxu1 }
 0x163   :  { %v3241_v41 = vadd.f32 %v3240_v40, %v3239_v35 }
 0x164   :  { %v4495_v42 = vadd.f32 %v3238_v34, %v2112_v5  ;;  %v2115_v8 = vadd.f32 %v3177_v38, %v4454_v23 }
 0x166   :  { %v4498_v7 = vadd.f32 %v3241_v41, %v2115_v8  ;;  %v3178_v43 = vpop.f32.mrb[56].mxu0 }
 0x167   :  { %v3242_v44 = vpop.f32.mrb[56].mxu1  ;;  %v3179_v45 = vpop.f32.mrb[57].mxu0 }
 0x168   :  { %v3180_v9 = vadd.f32 %v3179_v45, %v3178_v43  ;;  %v3243_v48 = vpop.f32.mrb[57].mxu1  ;;  %v3181_v50 = vpop.f32.mrb[58].mxu0 }
 0x169   :  { %v3244_v52 = vadd.f32 %v3243_v48, %v3242_v44  ;;  %v3245_v56 = vpop.f32.mrb[58].mxu1  ;;  %v3182_v58 = vpop.f32.mrb[59].mxu0 }
 0x16a   :  { %v2120_v21 = vadd.f32 %v3180_v9, %v4456_v37  ;;  %v3183_v59 = vadd.f32 %v3182_v58, %v3181_v50  ;;  %v3246_v60 = vpop.f32.mrb[59].mxu1 }
 0x16b   :  { %v3247_v61 = vadd.f32 %v3246_v60, %v3245_v56 }
 0x16c   :  { %v4501_v62 = vadd.f32 %v3244_v52, %v2120_v21  ;;  %v2123_v23 = vadd.f32 %v3183_v59, %v4458_v39 }
 0x16e   :  { %v4504_v29 = vadd.f32 %v3247_v61, %v2123_v23  ;;  %v3184_v63 = vpop.f32.mrb[60].mxu0 }
 0x16f   :  { %v3248_v0 = vpop.f32.mrb[60].mxu1  ;;  %v3185_v1 = vpop.f32.mrb[61].mxu0 }
 0x170   :  { %v3186_v31 = vadd.f32 %v3185_v1, %v3184_v63  ;;  %v3249_v4 = vpop.f32.mrb[61].mxu1  ;;  %v3187_v6 = vpop.f32.mrb[62].mxu0 }
 0x171   :  { %v3250_v10 = vadd.f32 %v3249_v4, %v3248_v0  ;;  %v3251_v12 = vpop.f32.mrb[62].mxu1  ;;  %v3188_v14 = vpop.f32.mrb[63].mxu0 }
 0x172   :  { %v2128_v37 = vadd.f32 %v3186_v31, %v4460_v54  ;;  %v3189_v15 = vadd.f32 %v3188_v14, %v3187_v6  ;;  %v3252_v16 = vpop.f32.mrb[63].mxu1 }
 0x173   :  { %v3253_v17 = vadd.f32 %v3252_v16, %v3251_v12 }
 0x174   :  { %v4507_v18 = vadd.f32 %v3250_v10, %v2128_v37  ;;  %v2131_v39 = vadd.f32 %v3189_v15, %v4462_v57 }
 0x176   :  { %v4510_v53 = vadd.f32 %v3253_v17, %v2131_v39  ;;  %v3270_v19 = vpop.f32.mrb[64].mxu0 }
 0x177   :  { %v3334_v20 = vpop.f32.mrb[64].mxu1  ;;  %v3271_v22 = vpop.f32.mrb[65].mxu0 }
 0x178   :  { %v3272_v55 = vadd.f32 %v3271_v22, %v3270_v19  ;;  %v3335_v25 = vpop.f32.mrb[65].mxu1  ;;  %v3273_v26 = vpop.f32.mrb[66].mxu0 }
 0x179   :  { %v3336_v27 = vadd.f32 %v3335_v25, %v3334_v20  ;;  %v3337_v51 = vpop.f32.mrb[66].mxu1  ;;  %v3274_v32 = vpop.f32.mrb[67].mxu0 }
 0x17a   :  { %v2266_v54 = vadd.f32 %v3272_v55, %v4465_v11  ;;  %v3275_v33 = vadd.f32 %v3274_v32, %v3273_v26  ;;  %v3338_v34 = vpop.f32.mrb[67].mxu1 }
 0x17b   :  { %v3339_v35 = vadd.f32 %v3338_v34, %v3337_v51 }
 0x17c   :  { %v4513_v36 = vadd.f32 %v3336_v27, %v2266_v54  ;;  %v2269_v57 = vadd.f32 %v3275_v33, %v4468_v13 }
 0x17e   :  { %v4516_v5 = vadd.f32 %v3339_v35, %v2269_v57  ;;  %v3276_v38 = vpop.f32.mrb[68].mxu0 }
 0x17f   :  { %v3340_v40 = vpop.f32.mrb[68].mxu1  ;;  %v3277_v41 = vpop.f32.mrb[69].mxu0 }
 0x180   :  { %v3278_v8 = vadd.f32 %v3277_v41, %v3276_v38  ;;  %v3341_v43 = vpop.f32.mrb[69].mxu1  ;;  %v3279_v44 = vpop.f32.mrb[70].mxu0 }
 0x181   :  { %v3342_v45 = vadd.f32 %v3341_v43, %v3340_v40  ;;  %v3343_v9 = vpop.f32.mrb[70].mxu1  ;;  %v3280_v48 = vpop.f32.mrb[71].mxu0 }
 0x182   :  { %v2274_v11 = vadd.f32 %v3278_v8, %v4471_v28  ;;  %v3281_v50 = vadd.f32 %v3280_v48, %v3279_v44  ;;  %v3344_v52 = vpop.f32.mrb[71].mxu1 }
 0x183   :  { %v3345_v56 = vadd.f32 %v3344_v52, %v3343_v9 }
 0x184   :  { %v4519_v58 = vadd.f32 %v3342_v45, %v2274_v11  ;;  %v2277_v13 = vadd.f32 %v3281_v50, %v4474_v30 }
 0x186   :  { %v4522_v21 = vadd.f32 %v3345_v56, %v2277_v13  ;;  %v3282_v59 = vpop.f32.mrb[72].mxu0 }
 0x187   :  { %v3346_v60 = vpop.f32.mrb[72].mxu1  ;;  %v3283_v61 = vpop.f32.mrb[73].mxu0 }
 0x188   :  { %v3284_v23 = vadd.f32 %v3283_v61, %v3282_v59  ;;  %v3347_v63 = vpop.f32.mrb[73].mxu1  ;;  %v3285_v0 = vpop.f32.mrb[74].mxu0 }
 0x189   :  { %v3348_v1 = vadd.f32 %v3347_v63, %v3346_v60  ;;  %v3349_v31 = vpop.f32.mrb[74].mxu1  ;;  %v3286_v4 = vpop.f32.mrb[75].mxu0 }
 0x18a   :  { %v2282_v28 = vadd.f32 %v3284_v23, %v4477_v46  ;;  %v3287_v6 = vadd.f32 %v3286_v4, %v3285_v0  ;;  %v3350_v10 = vpop.f32.mrb[75].mxu1 }
 0x18b   :  { %v3351_v12 = vadd.f32 %v3350_v10, %v3349_v31 }
 0x18c   :  { %v4525_v14 = vadd.f32 %v3348_v1, %v2282_v28  ;;  %v2285_v30 = vadd.f32 %v3287_v6, %v4480_v47 }
 0x18e   :  { %v4528_v37 = vadd.f32 %v3351_v12, %v2285_v30  ;;  %v3288_v15 = vpop.f32.mrb[76].mxu0 }
 0x18f   :  { %v3352_v16 = vpop.f32.mrb[76].mxu1  ;;  %v3289_v17 = vpop.f32.mrb[77].mxu0 }
 0x190   :  { %v3290_v39 = vadd.f32 %v3289_v17, %v3288_v15  ;;  %v3353_v19 = vpop.f32.mrb[77].mxu1  ;;  %v3291_v20 = vpop.f32.mrb[78].mxu0 }
 0x191   :  { %v3354_v22 = vadd.f32 %v3353_v19, %v3352_v16  ;;  %v3355_v55 = vpop.f32.mrb[78].mxu1  ;;  %v3292_v25 = vpop.f32.mrb[79].mxu0 }
 0x192   :  { %v2290_v46 = vadd.f32 %v3290_v39, %v4483_v2  ;;  %v3293_v26 = vadd.f32 %v3292_v25, %v3291_v20  ;;  %v3356_v27 = vpop.f32.mrb[79].mxu1 }
 0x193   :  { %v3357_v51 = vadd.f32 %v3356_v27, %v3355_v55 }
 0x194   :  { %v4531_v32 = vadd.f32 %v3354_v22, %v2290_v46  ;;  %v2293_v47 = vadd.f32 %v3293_v26, %v4486_v3 }
 0x196   :  { %v4534_v54 = vadd.f32 %v3357_v51, %v2293_v47  ;;  %v3294_v33 = vpop.f32.mrb[80].mxu0 }
 0x197   :  { %v3358_v34 = vpop.f32.mrb[80].mxu1  ;;  %v3295_v35 = vpop.f32.mrb[81].mxu0 }
 0x198   :  { %v3296_v57 = vadd.f32 %v3295_v35, %v3294_v33  ;;  %v3359_v38 = vpop.f32.mrb[81].mxu1  ;;  %v3297_v40 = vpop.f32.mrb[82].mxu0 }
 0x199   :  { %v3360_v41 = vadd.f32 %v3359_v38, %v3358_v34  ;;  %v3361_v8 = vpop.f32.mrb[82].mxu1  ;;  %v3298_v43 = vpop.f32.mrb[83].mxu0 }
 0x19a   :  { %v2298_v2 = vadd.f32 %v3296_v57, %v4489_v24  ;;  %v3299_v44 = vadd.f32 %v3298_v43, %v3297_v40  ;;  %v3362_v45 = vpop.f32.mrb[83].mxu1 }
 0x19b   :  { %v3363_v9 = vadd.f32 %v3362_v45, %v3361_v8 }
 0x19c   :  { %v4537_v48 = vadd.f32 %v3360_v41, %v2298_v2  ;;  %v2301_v3 = vadd.f32 %v3299_v44, %v4492_v49 }
 0x19e   :  { %v4540_v11 = vadd.f32 %v3363_v9, %v2301_v3  ;;  %v3300_v50 = vpop.f32.mrb[84].mxu0 }
 0x19f   :  { %v3364_v52 = vpop.f32.mrb[84].mxu1  ;;  %v3301_v56 = vpop.f32.mrb[85].mxu0 }
 0x1a0   :  { %v3302_v13 = vadd.f32 %v3301_v56, %v3300_v50  ;;  %v3365_v59 = vpop.f32.mrb[85].mxu1  ;;  %v3303_v60 = vpop.f32.mrb[86].mxu0 }
 0x1a1   :  { %v3366_v61 = vadd.f32 %v3365_v59, %v3364_v52  ;;  %v3367_v23 = vpop.f32.mrb[86].mxu1  ;;  %v3304_v63 = vpop.f32.mrb[87].mxu0 }
 0x1a2   :  { %v2306_v24 = vadd.f32 %v3302_v13, %v4495_v42  ;;  %v3305_v0 = vadd.f32 %v3304_v63, %v3303_v60  ;;  %v3368_v1 = vpop.f32.mrb[87].mxu1 }
 0x1a3   :  { %v3369_v31 = vadd.f32 %v3368_v1, %v3367_v23 }
 0x1a4   :  { %v4543_v4 = vadd.f32 %v3366_v61, %v2306_v24  ;;  %v2309_v49 = vadd.f32 %v3305_v0, %v4498_v7 }
 0x1a6   :  { %v4546_v28 = vadd.f32 %v3369_v31, %v2309_v49  ;;  %v3306_v6 = vpop.f32.mrb[88].mxu0 }
 0x1a7   :  { %v3370_v10 = vpop.f32.mrb[88].mxu1  ;;  %v3307_v12 = vpop.f32.mrb[89].mxu0 }
 0x1a8   :  { %v3308_v30 = vadd.f32 %v3307_v12, %v3306_v6  ;;  %v3371_v15 = vpop.f32.mrb[89].mxu1  ;;  %v3309_v16 = vpop.f32.mrb[90].mxu0 }
 0x1a9   :  { %v3372_v17 = vadd.f32 %v3371_v15, %v3370_v10  ;;  %v3373_v39 = vpop.f32.mrb[90].mxu1  ;;  %v3310_v19 = vpop.f32.mrb[91].mxu0 }
 0x1aa   :  { %v2314_v42 = vadd.f32 %v3308_v30, %v4501_v62  ;;  %v3311_v20 = vadd.f32 %v3310_v19, %v3309_v16  ;;  %v3374_v22 = vpop.f32.mrb[91].mxu1 }
 0x1ab   :  { %v3375_v55 = vadd.f32 %v3374_v22, %v3373_v39 }
 0x1ac   :  { %v4549_v25 = vadd.f32 %v3372_v17, %v2314_v42  ;;  %v2317_v7 = vadd.f32 %v3311_v20, %v4504_v29 }
 0x1ae   :  { %v4552_v46 = vadd.f32 %v3375_v55, %v2317_v7  ;;  %v3312_v26 = vpop.f32.mrb[92].mxu0 }
 0x1af   :  { %v3376_v27 = vpop.f32.mrb[92].mxu1  ;;  %v3313_v51 = vpop.f32.mrb[93].mxu0 }
 0x1b0   :  { %v3314_v47 = vadd.f32 %v3313_v51, %v3312_v26  ;;  %v3377_v33 = vpop.f32.mrb[93].mxu1  ;;  %v3315_v34 = vpop.f32.mrb[94].mxu0 }
 0x1b1   :  { %v3378_v35 = vadd.f32 %v3377_v33, %v3376_v27  ;;  %v3379_v57 = vpop.f32.mrb[94].mxu1  ;;  %v3316_v38 = vpop.f32.mrb[95].mxu0 }
 0x1b2   :  { %v2322_v62 = vadd.f32 %v3314_v47, %v4507_v18  ;;  %v3317_v40 = vadd.f32 %v3316_v38, %v3315_v34  ;;  %v3380_v41 = vpop.f32.mrb[95].mxu1 }
 0x1b3   :  { %v3381_v8 = vadd.f32 %v3380_v41, %v3379_v57 }
 0x1b4   :  { %v4555_v43 = vadd.f32 %v3378_v35, %v2322_v62  ;;  %v2325_v29 = vadd.f32 %v3317_v40, %v4510_v53 }
 0x1b6   :  { %v4558_v2 = vadd.f32 %v3381_v8, %v2325_v29  ;;  %v3398_v44 = vpop.f32.mrb[96].mxu0 }
 0x1b7   :  { %v3462_v45 = vpop.f32.mrb[96].mxu1  ;;  %v3399_v9 = vpop.f32.mrb[97].mxu0 }
 0x1b8   :  { %v3400_v3 = vadd.f32 %v3399_v9, %v3398_v44  ;;  %v3463_v50 = vpop.f32.mrb[97].mxu1  ;;  %v3401_v52 = vpop.f32.mrb[98].mxu0 }
 0x1b9   :  { %v3464_v56 = vadd.f32 %v3463_v50, %v3462_v45  ;;  %v3465_v13 = vpop.f32.mrb[98].mxu1  ;;  %v3402_v59 = vpop.f32.mrb[99].mxu0 }
 0x1ba   :  { %v2460_v18 = vadd.f32 %v3400_v3, %v4513_v36  ;;  %v3403_v60 = vadd.f32 %v3402_v59, %v3401_v52  ;;  %v3466_v61 = vpop.f32.mrb[99].mxu1 }
 0x1bb   :  { %v3467_v23 = vadd.f32 %v3466_v61, %v3465_v13 }
 0x1bc   :  { %v2557_v63 = vadd.f32 %v3464_v56, %v2460_v18  ;;  %v2463_v24 = vadd.f32 %v3403_v60, %v4516_v5 }
 0x1be   :  { %v2560_v53 = vadd.f32 %v3467_v23, %v2463_v24  ;;  %v3404_v0 = vpop.f32.mrb[100].mxu0  ;;  %2635 = vst [vmem:[%s4632_s2] sm:$0xff] %v2557_v63  ;;  %v2691_v12 = vmul.f32 %v2557_v63, %v2557_v63 }
 0x1bf   :  { %v3468_v1 = vpop.f32.mrb[100].mxu1  ;;  %v3405_v31 = vpop.f32.mrb[101].mxu0 }
 0x1c0   :  { %v3406_v49 = vadd.f32 %v3405_v31, %v3404_v0  ;;  %v3469_v6 = vpop.f32.mrb[101].mxu1  ;;  %v3407_v10 = vpop.f32.mrb[102].mxu0  ;;  %2636 = vst [vmem:[%s4632_s2 + $0x8] sm:$0xff] %v2560_v53  ;;  %v2670_v5 = vadd.f32 %v2560_v53, %v2557_v63  ;;  %v2692_v16 = vmul.f32 %v2560_v53, %v2560_v53 }
 0x1c1   :  { %v3470_v30 = vadd.f32 %v3469_v6, %v3468_v1  ;;  %v3471_v36 = vpop.f32.mrb[102].mxu1  ;;  %v3408_v15 = vpop.f32.mrb[103].mxu0 }
 0x1c2   :  { %v2468_v17 = vadd.f32 %v3406_v49, %v4519_v58  ;;  %v3409_v39 = vadd.f32 %v3408_v15, %v3407_v10  ;;  %v3472_v19 = vpop.f32.mrb[103].mxu1  ;;  %v2707_v20 = vadd.f32 %v2692_v16, %v2691_v12 }
 0x1c3   :  { %v3473_v42 = vadd.f32 %v3472_v19, %v3471_v36 }
 0x1c4   :  { %v2565_v22 = vadd.f32 %v3470_v30, %v2468_v17  ;;  %v2471_v55 = vadd.f32 %v3409_v39, %v4522_v21 }
 0x1c6   :  { %v2568_v7 = vadd.f32 %v3473_v42, %v2471_v55  ;;  %v3410_v26 = vpop.f32.mrb[104].mxu0  ;;  %2637 = vst [vmem:[%s4632_s2 + $0x10] sm:$0xff] %v2565_v22  ;;  %v2671_v47 = vadd.f32 %v2670_v5, %v2565_v22  ;;  %v2693_v33 = vmul.f32 %v2565_v22, %v2565_v22 }
 0x1c7   :  { %v3474_v27 = vpop.f32.mrb[104].mxu1  ;;  %v3411_v51 = vpop.f32.mrb[105].mxu0 }
 0x1c8   :  { %v3412_v34 = vadd.f32 %v3411_v51, %v3410_v26  ;;  %v3475_v35 = vpop.f32.mrb[105].mxu1  ;;  %v3413_v58 = vpop.f32.mrb[106].mxu0  ;;  %v2708_v40 = vadd.f32 %v2707_v20, %v2693_v33  ;;  %2638 = vst [vmem:[%s4632_s2 + $0x18] sm:$0xff] %v2568_v7  ;;  %v2672_v21 = vadd.f32 %v2671_v47, %v2568_v7  ;;  %v2694_v41 = vmul.f32 %v2568_v7, %v2568_v7 }
 0x1c9   :  { %v3476_v57 = vadd.f32 %v3475_v35, %v3474_v27  ;;  %v3477_v38 = vpop.f32.mrb[106].mxu1  ;;  %v3414_v62 = vpop.f32.mrb[107].mxu0 }
 0x1ca   :  { %v2476_v8 = vadd.f32 %v3412_v34, %v4525_v14  ;;  %v3478_v29 = vpop.f32.mrb[107].mxu1  ;;  %v3415_v44 = vadd.f32 %v3414_v62, %v3413_v58  ;;  %v2709_v9 = vadd.f32 %v2708_v40, %v2694_v41 }
 0x1cb   :  { %v3479_v45 = vadd.f32 %v3478_v29, %v3477_v38 }
 0x1cc   :  { %v2573_v3 = vadd.f32 %v3476_v57, %v2476_v8  ;;  %v2479_v50 = vadd.f32 %v3415_v44, %v4528_v37 }
 0x1ce   :  { %v3416_v52 = vpop.f32.mrb[108].mxu0  ;;  %v2576_v56 = vadd.f32 %v3479_v45, %v2479_v50  ;;  %2639 = vst [vmem:[%s4632_s2 + $0x20] sm:$0xff] %v2573_v3  ;;  %v2673_v18 = vadd.f32 %v2672_v21, %v2573_v3  ;;  %v2695_v60 = vmul.f32 %v2573_v3, %v2573_v3 }
 0x1cf   :  { %v3480_v13 = vpop.f32.mrb[108].mxu1  ;;  %v3417_v59 = vpop.f32.mrb[109].mxu0 }
 0x1d0   :  { %v3418_v61 = vadd.f32 %v3417_v59, %v3416_v52  ;;  %v3481_v23 = vpop.f32.mrb[109].mxu1  ;;  %v3419_v14 = vpop.f32.mrb[110].mxu0  ;;  %v2710_v0 = vadd.f32 %v2709_v9, %v2695_v60  ;;  %2640 = vst [vmem:[%s4632_s2 + $0x28] sm:$0xff] %v2576_v56  ;;  %v2674_v49 = vadd.f32 %v2673_v18, %v2576_v56  ;;  %v2696_v6 = vmul.f32 %v2576_v56, %v2576_v56 }
 0x1d1   :  { %v3482_v63 = vadd.f32 %v3481_v23, %v3480_v13  ;;  %v3483_v24 = vpop.f32.mrb[110].mxu1  ;;  %v3420_v53 = vpop.f32.mrb[111].mxu0 }
 0x1d2   :  { %v2484_v1 = vadd.f32 %v3418_v61, %v4531_v32  ;;  %v3421_v37 = vadd.f32 %v3420_v53, %v3419_v14  ;;  %v3484_v31 = vpop.f32.mrb[111].mxu1  ;;  %v2711_v36 = vadd.f32 %v2710_v0, %v2696_v6 }
 0x1d3   :  { %v3485_v10 = vadd.f32 %v3484_v31, %v3483_v24 }
 0x1d4   :  { %v2581_v12 = vadd.f32 %v3482_v63, %v2484_v1  ;;  %v2487_v30 = vadd.f32 %v3421_v37, %v4534_v54 }
 0x1d6   :  { %v2584_v15 = vadd.f32 %v3485_v10, %v2487_v30  ;;  %v3422_v5 = vpop.f32.mrb[112].mxu0  ;;  %2641 = vst [vmem:[%s4632_s2 + $0x30] sm:$0xff] %v2581_v12  ;;  %v2675_v32 = vadd.f32 %v2674_v49, %v2581_v12  ;;  %v2697_v39 = vmul.f32 %v2581_v12, %v2581_v12 }
 0x1d7   :  { %v3486_v16 = vpop.f32.mrb[112].mxu1  ;;  %v3423_v17 = vpop.f32.mrb[113].mxu0 }
 0x1d8   :  { %v3424_v19 = vadd.f32 %v3423_v17, %v3422_v5  ;;  %v3487_v42 = vpop.f32.mrb[113].mxu1  ;;  %v3425_v20 = vpop.f32.mrb[114].mxu0  ;;  %v2712_v26 = vadd.f32 %v2711_v36, %v2697_v39  ;;  %2642 = vst [vmem:[%s4632_s2 + $0x38] sm:$0xff] %v2584_v15  ;;  %v2676_v54 = vadd.f32 %v2675_v32, %v2584_v15  ;;  %v2698_v27 = vmul.f32 %v2584_v15, %v2584_v15 }
 0x1d9   :  { %v3488_v22 = vadd.f32 %v3487_v42, %v3486_v16  ;;  %v3489_v55 = vpop.f32.mrb[114].mxu1  ;;  %v3426_v7 = vpop.f32.mrb[115].mxu0 }
 0x1da   :  { %v2492_v51 = vadd.f32 %v3424_v19, %v4537_v48  ;;  %v3490_v47 = vpop.f32.mrb[115].mxu1  ;;  %v3427_v33 = vadd.f32 %v3426_v7, %v3425_v20  ;;  %v2713_v35 = vadd.f32 %v2712_v26, %v2698_v27 }
 0x1db   :  { %v3491_v34 = vadd.f32 %v3490_v47, %v3489_v55 }
 0x1dc   :  { %v2589_v58 = vadd.f32 %v3488_v22, %v2492_v51  ;;  %v2495_v57 = vadd.f32 %v3427_v33, %v4540_v11 }
 0x1de   :  { %v3428_v38 = vpop.f32.mrb[116].mxu0  ;;  %v2592_v62 = vadd.f32 %v3491_v34, %v2495_v57  ;;  %2643 = vst [vmem:[%s4632_s2 + $0x40] sm:$0xff] %v2589_v58  ;;  %v2677_v41 = vadd.f32 %v2676_v54, %v2589_v58  ;;  %v2699_v8 = vmul.f32 %v2589_v58, %v2589_v58 }
 0x1df   :  { %v3492_v40 = vpop.f32.mrb[116].mxu1  ;;  %v3429_v21 = vpop.f32.mrb[117].mxu0 }
 0x1e0   :  { %v3430_v29 = vadd.f32 %v3429_v21, %v3428_v38  ;;  %v3493_v44 = vpop.f32.mrb[117].mxu1  ;;  %v3431_v48 = vpop.f32.mrb[118].mxu0  ;;  %v2714_v50 = vadd.f32 %v2713_v35, %v2699_v8  ;;  %2644 = vst [vmem:[%s4632_s2 + $0x48] sm:$0xff] %v2592_v62  ;;  %v2678_v13 = vadd.f32 %v2677_v41, %v2592_v62  ;;  %v2700_v59 = vmul.f32 %v2592_v62, %v2592_v62 }
 0x1e1   :  { %v3494_v45 = vadd.f32 %v3493_v44, %v3492_v40  ;;  %v3495_v9 = vpop.f32.mrb[118].mxu1  ;;  %v3432_v3 = vpop.f32.mrb[119].mxu0 }
 0x1e2   :  { %v2500_v52 = vadd.f32 %v3430_v29, %v4543_v4  ;;  %v3433_v11 = vadd.f32 %v3432_v3, %v3431_v48  ;;  %v3496_v56 = vpop.f32.mrb[119].mxu1  ;;  %v2715_v23 = vadd.f32 %v2714_v50, %v2700_v59 }
 0x1e3   :  { %v3497_v18 = vadd.f32 %v3496_v56, %v3495_v9 }
 0x1e4   :  { %v2597_v60 = vadd.f32 %v3494_v45, %v2500_v52  ;;  %v2503_v61 = vadd.f32 %v3433_v11, %v4546_v28 }
 0x1e6   :  { %v2600_v14 = vadd.f32 %v3497_v18, %v2503_v61  ;;  %v3434_v63 = vpop.f32.mrb[120].mxu0  ;;  %2645 = vst [vmem:[%s4632_s2 + $0x50] sm:$0xff] %v2597_v60  ;;  %v2679_v4 = vadd.f32 %v2678_v13, %v2597_v60  ;;  %v2701_v0 = vmul.f32 %v2597_v60, %v2597_v60 }
 0x1e7   :  { %v3498_v24 = vpop.f32.mrb[120].mxu1  ;;  %v3435_v53 = vpop.f32.mrb[121].mxu0 }
 0x1e8   :  { %v3436_v1 = vadd.f32 %v3435_v53, %v3434_v63  ;;  %v3499_v37 = vpop.f32.mrb[121].mxu1  ;;  %v3437_v31 = vpop.f32.mrb[122].mxu0  ;;  %v2716_v12 = vadd.f32 %v2715_v23, %v2701_v0  ;;  %2646 = vst [vmem:[%s4632_s2 + $0x58] sm:$0xff] %v2600_v14  ;;  %v2680_v28 = vadd.f32 %v2679_v4, %v2600_v14  ;;  %v2702_v30 = vmul.f32 %v2600_v14, %v2600_v14 }
 0x1e9   :  { %v3500_v49 = vadd.f32 %v3499_v37, %v3498_v24  ;;  %v3501_v6 = vpop.f32.mrb[122].mxu1  ;;  %v3438_v10 = vpop.f32.mrb[123].mxu0 }
 0x1ea   :  { %v2508_v36 = vadd.f32 %v3436_v1, %v4549_v25  ;;  %v3502_v15 = vpop.f32.mrb[123].mxu1  ;;  %v3439_v5 = vadd.f32 %v3438_v10, %v3437_v31  ;;  %v2717_v17 = vadd.f32 %v2716_v12, %v2702_v30 }
 0x1eb   :  { %v3503_v16 = vadd.f32 %v3502_v15, %v3501_v6 }
 0x1ec   :  { %v2605_v32 = vadd.f32 %v3500_v49, %v2508_v36  ;;  %v2511_v39 = vadd.f32 %v3439_v5, %v4552_v46 }
 0x1ee   :  { %v3440_v19 = vpop.f32.mrb[124].mxu0  ;;  %v2608_v42 = vadd.f32 %v3503_v16, %v2511_v39  ;;  %2647 = vst [vmem:[%s4632_s2 + $0x60] sm:$0xff] %v2605_v32  ;;  %v2681_v55 = vadd.f32 %v2680_v28, %v2605_v32  ;;  %v2703_v7 = vmul.f32 %v2605_v32, %v2605_v32 }
 0x1ef   :  { %v3504_v20 = vpop.f32.mrb[124].mxu1  ;;  %v3441_v22 = vpop.f32.mrb[125].mxu0 }
 0x1f0   :  { %v3442_v26 = vadd.f32 %v3441_v22, %v3440_v19  ;;  %v3505_v54 = vpop.f32.mrb[125].mxu1  ;;  %v3443_v25 = vpop.f32.mrb[126].mxu0  ;;  %v2718_v33 = vadd.f32 %v2717_v17, %v2703_v7  ;;  %2648 = vst [vmem:[%s4632_s2 + $0x68] sm:$0xff] %v2608_v42  ;;  %v2682_v58 = vadd.f32 %v2681_v55, %v2608_v42  ;;  %v2704_v57 = vmul.f32 %v2608_v42, %v2608_v42 }
 0x1f1   :  { %v3506_v27 = vadd.f32 %v3505_v54, %v3504_v20  ;;  %v3507_v51 = vpop.f32.mrb[126].mxu1  ;;  %v3444_v47 = vpop.f32.mrb[127].mxu0 }
 0x1f2   :  { %v2516_v34 = vadd.f32 %v3442_v26, %v4555_v43  ;;  %v3445_v46 = vadd.f32 %v3444_v47, %v3443_v25  ;;  %v3508_v35 = vpop.f32.mrb[127].mxu1  ;;  %v2719_v21 = vadd.f32 %v2718_v33, %v2704_v57 }
 0x1f3   :  { %v3509_v38 = vadd.f32 %v3508_v35, %v3507_v51 }
 0x1f4   :  { %v2613_v62 = vadd.f32 %v3506_v27, %v2516_v34  ;;  %v2519_v40 = vadd.f32 %v3445_v46, %v4558_v2 }
 0x1f6   :  { %v2616_v41 = vadd.f32 %v3509_v38, %v2519_v40  ;;  %2649 = vst [vmem:[%s4632_s2 + $0x70] sm:$0xff] %v2613_v62  ;;  %v2683_v8 = vadd.f32 %v2682_v58, %v2613_v62  ;;  %v2705_v43 = vmul.f32 %v2613_v62, %v2613_v62 }
 0x1f8   :  { %v2720_v29 = vadd.f32 %v2719_v21, %v2705_v43  ;;  %2650 = vst [vmem:[%s4632_s2 + $0x78] sm:$0xff] %v2616_v41  ;;  %v2684_v44 = vadd.f32 %v2683_v8, %v2616_v41  ;;  %v2706_v48 = vmul.f32 %v2616_v41, %v2616_v41 }
 0x1fa   :  { %v2685_v45 = vrot.slane %v2684_v44, 4  ;;  %v2721_v9 = vadd.f32 %v2720_v29, %v2706_v48 }
 0x1fc   :  { %v2686_v3 = vadd.f32 %v2685_v45, %v2684_v44  ;;  %v2722_v50 = vrot.slane %v2721_v9, 4 }
 0x1fe   :  { %v2687_v2 = vrot.slane %v2686_v3, 2  ;;  %v2723_v52 = vadd.f32 %v2722_v50, %v2721_v9 }
 0x200   :  { %v2688_v11 = vadd.f32 %v2687_v2, %v2686_v3  ;;  %v2724_v56 = vrot.slane %v2723_v52, 2 }
 0x202   :  { %v2689_v13 = vrot.slane %v2688_v11, 1  ;;  %v2725_v59 = vadd.f32 %v2724_v56, %v2723_v52 }
 0x204   :  { %v2690_v18 = vadd.f32 %v2689_v13, %v2688_v11  ;;  %v2726_v60 = vrot.slane %v2725_v59, 1 }
 0x206   :  { %v2727_v61 = vadd.f32 %v2726_v60, %v2725_v59  ;;  %2728 = vst [vmem:[%s4633_s3] sm:$0xff] %v2690_v18 }
 0x208   :  { %2729 = vst [vmem:[%s4634_s4] sm:$0xff] %v2727_v61 }

// kernel: discriminator_forward.16
= control target key start
LH: loop header
LB: loop body
LE: loop exit
PB: predicated region body
PF: predicated region fallthrough
CT: control target
= control target key end

     0   :  { %s141_s0 = inlined_call_operand.vmem [shape: f32[32,128], index: 0, kind: input, shape index: {}]   ;;  %s142_s1 = inlined_call_operand.vmem [shape: f32[1,128], index: 1, kind: input, shape index: {}]   ;;  %s143_s2 = inlined_call_operand.vmem [shape: f32[1,128], index: 2, kind: input, shape index: {}]   ;;  %s144_s3 = inlined_call_operand.vmem [shape: bf16[32,128], index: 3, kind: output, shape index: {}]  }
   0x1   :  { %v14_v0 = vld [vmem:[%s141_s0] sm:$0xff]  ;;  %v15_v1 = vld [vmem:[%s141_s0 + $0x8] sm:$0xff]  ;;  %v16_v6 = vld [vmem:[%s141_s0 + $0x10] sm:$0xff] }
   0x2   :  { %v76_v2 = vld [vmem:[%s142_s1] ss:$0 sm:$0xff]  ;;  %v17_v7 = vld [vmem:[%s141_s0 + $0x18] sm:$0xff] }
   0x3   :  { %v25_v3 = vmul.f32 %v76_v2, %v14_v0  ;;  %v26_v4 = vmul.f32 %v76_v2, %v15_v1  ;;  %v77_v5 = vld [vmem:[%s143_s2] ss:$0 sm:$0xff]  ;;  %v27_v8 = vmul.f32 %v76_v2, %v16_v6  ;;  %v28_v9 = vmul.f32 %v76_v2, %v17_v7 }
   0x5   :  { %v36_v10 = vadd.f32 %v77_v5, %v25_v3  ;;  %v37_v11 = vadd.f32 %v77_v5, %v26_v4  ;;  %v38_v12 = vadd.f32 %v77_v5, %v27_v8  ;;  %v39_v13 = vadd.f32 %v77_v5, %v28_v9 }
   0x7   :  { %vm40_vm0 = vcmp.ge.f32.partialorder %v36_v10, 0.0  ;;  %vm41_vm1 = vcmp.ge.f32.partialorder %v37_v11, 0.0  ;;  %v44_v14 = vmul.f32 0.2, %v36_v10  ;;  %v45_v15 = vmul.f32 0.2, %v37_v11 }
   0x8   :  { %vm42_vm2 = vcmp.ge.f32.partialorder %v38_v12, 0.0  ;;  %vm43_vm3 = vcmp.ge.f32.partialorder %v39_v13, 0.0  ;;  %v46_v16 = vmul.f32 0.2, %v38_v12  ;;  %v47_v17 = vmul.f32 0.2, %v39_v13 }
   0x9   :  { %v48_v18 = vsel %vm40_vm0, %v36_v10, %v44_v14  ;;  %v49_v19 = vsel %vm41_vm1, %v37_v11, %v45_v15 }
   0xa   :  { %v89_v20 = vpack.c.bf16 %v49_v19, %v48_v18  ;;  %v50_v21 = vsel %vm42_vm2, %v38_v12, %v46_v16  ;;  %v51_v22 = vsel %vm43_vm3, %v39_v13, %v47_v17 }
   0xb   :  { %v94_v23 = vpack.c.bf16 %v51_v22, %v50_v21 }
   0xc   :  { %90 = vst [vmem:[%s144_s3] sm:$0xff] %v89_v20  }
   0xd   :  { %96 = vst [vmem:[%s144_s3 + $0x8] sm:$0xff] %v94_v23  }

// kernel: discriminator_forward.15
= control target key start
LH: loop header
LB: loop body
LE: loop exit
PB: predicated region body
PF: predicated region fallthrough
CT: control target
= control target key end

     0   :  { %s2722_s1 = inlined_call_operand.vmem [shape: bf16[2048,128], index: 1, kind: input, shape index: {}]   ;;  %s2723_s0 = inlined_call_operand.vmem [shape: bf16[32,2048], index: 0, kind: input, shape index: {}]   ;;  %s2724_s2 = inlined_call_operand.vmem [shape: f32[32,128], index: 2, kind: output, shape index: {0}]   ;;  %s2725_s3 = inlined_call_operand.vmem [shape: f32[8,128], index: 3, kind: output, shape index: {1}]   ;;  %s2726_s4 = inlined_call_operand.vmem [shape: f32[8,128], index: 4, kind: output, shape index: {2}]  }
   0x1   :  { %v2071_v0 = vld [vmem:[%s2722_s1 + $0x40] sm:$0xff]   ;;  %v2075_v4 = vld [vmem:[%s2722_s1 + $0x48] sm:$0xff]   ;;  %v2079_v8 = vld [vmem:[%s2722_s1 + $0x50] sm:$0xff]  }
   0x2   :  { %v2072_v1 = vld [vmem:[%s2722_s1 + $0xc0] sm:$0xff]   ;;  %1846 = vmatprep.subr.bf16.mxu0 %v2071_v0  ;;  %v2076_v5 = vld [vmem:[%s2722_s1 + $0xc8] sm:$0xff]   ;;  %v2080_v9 = vld [vmem:[%s2722_s1 + $0xd0] sm:$0xff]  }
   0x3   :  { %v2073_v2 = vld [vmem:[%s2722_s1] sm:$0xff]   ;;  %1874 = vmatprep.subr.bf16.mxu1 %v2072_v1  ;;  %v2077_v6 = vld [vmem:[%s2722_s1 + $0x8] sm:$0xff]   ;;  %v2081_v10 = vld [vmem:[%s2722_s1 + $0x10] sm:$0xff]  }
   0x4   :  { %v2074_v3 = vld [vmem:[%s2722_s1 + $0x80] sm:$0xff]   ;;  %1847 = vmatpush3.bf16.msra.mxu0 %v2073_v2  ;;  %v2078_v7 = vld [vmem:[%s2722_s1 + $0x88] sm:$0xff]   ;;  %v2082_v11 = vld [vmem:[%s2722_s1 + $0x90] sm:$0xff]  }
   0x5   :  { %1875 = vmatpush3.bf16.msra.mxu1 %v2074_v3  ;;  %1848 = vmatprep.subr.bf16.mxu0 %v2075_v4  ;;  %v2083_v12 = vld [vmem:[%s2722_s1 + $0x58] sm:$0xff]   ;;  %v2087_v16 = vld [vmem:[%s2722_s1 + $0x60] sm:$0xff]   ;;  %v2091_v20 = vld [vmem:[%s2722_s1 + $0x68] sm:$0xff]  }
   0x6   :  { %1876 = vmatprep.subr.bf16.mxu1 %v2076_v5  ;;  %v2084_v13 = vld [vmem:[%s2722_s1 + $0xd8] sm:$0xff]   ;;  %v2088_v17 = vld [vmem:[%s2722_s1 + $0xe0] sm:$0xff]   ;;  %v2092_v21 = vld [vmem:[%s2722_s1 + $0xe8] sm:$0xff]  }
   0x7   :  { %v2085_v14 = vld [vmem:[%s2722_s1 + $0x18] sm:$0xff]   ;;  %v2089_v18 = vld [vmem:[%s2722_s1 + $0x20] sm:$0xff]   ;;  %v2093_v22 = vld [vmem:[%s2722_s1 + $0x28] sm:$0xff]  }
   0x8   :  { %1849 = vmatpush3.bf16.msra.mxu0 %v2077_v6  ;;  %v2086_v15 = vld [vmem:[%s2722_s1 + $0x98] sm:$0xff]   ;;  %v2090_v19 = vld [vmem:[%s2722_s1 + $0xa0] sm:$0xff]   ;;  %v2094_v23 = vld [vmem:[%s2722_s1 + $0xa8] sm:$0xff]  }
   0x9   :  { %1877 = vmatpush3.bf16.msra.mxu1 %v2078_v7  ;;  %1850 = vmatprep.subr.bf16.mxu0 %v2079_v8  ;;  %v2095_v24 = vld [vmem:[%s2722_s1 + $0x70] sm:$0xff]   ;;  %v2099_v28 = vld [vmem:[%s2722_s1 + $0x78] sm:$0xff]   ;;  %v27_v32 = vld [vmem:[%s2723_s0] sm:$0xff] }
   0xa   :  { %1878 = vmatprep.subr.bf16.mxu1 %v2080_v9  ;;  %v2096_v25 = vld [vmem:[%s2722_s1 + $0xf0] sm:$0xff]   ;;  %v2100_v29 = vld [vmem:[%s2722_s1 + $0xf8] sm:$0xff]   ;;  %v35_v33 = vld [vmem:[%s2723_s0 + $0x40] sm:$0xff] }
   0xb   :  { %v2097_v26 = vld [vmem:[%s2722_s1 + $0x30] sm:$0xff]   ;;  %v2101_v30 = vld [vmem:[%s2722_s1 + $0x38] sm:$0xff]   ;;  %v28_v34 = vld [vmem:[%s2723_s0 + $0x8] sm:$0xff]  ;;  %v1686_v35 = vcombine.low %v27_v32, %v35_v33  ;;  %v1687_v36 = vcombine.high %v27_v32, %v35_v33 }
   0xc   :  { %1851 = vmatpush3.bf16.msra.mxu0 %v2081_v10  ;;  %v2098_v27 = vld [vmem:[%s2722_s1 + $0xb0] sm:$0xff]   ;;  %v2102_v31 = vld [vmem:[%s2722_s1 + $0xb8] sm:$0xff]   ;;  %v36_v37 = vld [vmem:[%s2723_s0 + $0x48] sm:$0xff] }
   0xd   :  { %1879 = vmatpush3.bf16.msra.mxu1 %v2082_v11  ;;  %1852 = vmatprep.subr.bf16.mxu0 %v2083_v12  ;;  %v1688_v38 = vcombine.low %v28_v34, %v36_v37  ;;  %v1689_v39 = vcombine.high %v28_v34, %v36_v37  ;;  %v2103_v40 = vld [vmem:[%s2722_s1 + $0x140] sm:$0xff]   ;;  %v2107_v44 = vld [vmem:[%s2722_s1 + $0x148] sm:$0xff]   ;;  %v2111_v48 = vld [vmem:[%s2722_s1 + $0x150] sm:$0xff]  }
   0xe   :  { %1880 = vmatprep.subr.bf16.mxu1 %v2084_v13  ;;  %1275 = vmatprep.mubr.bf16.mxu0 %v1687_v36  ;;  %v2104_v41 = vld [vmem:[%s2722_s1 + $0x1c0] sm:$0xff]   ;;  %v2108_v45 = vld [vmem:[%s2722_s1 + $0x1c8] sm:$0xff]   ;;  %v2112_v49 = vld [vmem:[%s2722_s1 + $0x1d0] sm:$0xff]  }
   0xf   :  { %1324 = vmatprep.mubr.bf16.mxu1 %v1689_v39  ;;  %v2105_v42 = vld [vmem:[%s2722_s1 + $0x100] sm:$0xff]   ;;  %v2109_v46 = vld [vmem:[%s2722_s1 + $0x108] sm:$0xff]   ;;  %v2113_v50 = vld [vmem:[%s2722_s1 + $0x110] sm:$0xff]  }
  0x10   :  { %1853 = vmatpush3.bf16.msra.mxu0 %v2085_v14  ;;  %v2106_v43 = vld [vmem:[%s2722_s1 + $0x180] sm:$0xff]   ;;  %v2110_v47 = vld [vmem:[%s2722_s1 + $0x188] sm:$0xff]   ;;  %v2114_v51 = vld [vmem:[%s2722_s1 + $0x190] sm:$0xff]  }
  0x11   :  { %1881 = vmatpush3.bf16.msra.mxu1 %v2086_v15  ;;  %1854 = vmatprep.subr.bf16.mxu0 %v2087_v16  ;;  %v2115_v52 = vld [vmem:[%s2722_s1 + $0x158] sm:$0xff]   ;;  %v2119_v56 = vld [vmem:[%s2722_s1 + $0x160] sm:$0xff]   ;;  %v2123_v60 = vld [vmem:[%s2722_s1 + $0x168] sm:$0xff]  }
  0x12   :  { %1882 = vmatprep.subr.bf16.mxu1 %v2088_v17  ;;  %v2116_v53 = vld [vmem:[%s2722_s1 + $0x1d8] sm:$0xff]   ;;  %v2120_v57 = vld [vmem:[%s2722_s1 + $0x1e0] sm:$0xff]   ;;  %v2124_v61 = vld [vmem:[%s2722_s1 + $0x1e8] sm:$0xff]  }
  0x13   :  { %v2117_v54 = vld [vmem:[%s2722_s1 + $0x118] sm:$0xff]   ;;  %v2121_v58 = vld [vmem:[%s2722_s1 + $0x120] sm:$0xff]   ;;  %v44_v1 = vld [vmem:[%s2723_s0 + $0x88] sm:$0xff] }
  0x14   :  { %1855 = vmatpush3.bf16.msra.mxu0 %v2089_v18  ;;  %v2118_v55 = vld [vmem:[%s2722_s1 + $0x198] sm:$0xff]   ;;  %v2122_v59 = vld [vmem:[%s2722_s1 + $0x1a0] sm:$0xff]   ;;  %v52_v2 = vld [vmem:[%s2723_s0 + $0xc8] sm:$0xff] }
  0x15   :  { %1883 = vmatpush3.bf16.msra.mxu1 %v2090_v19  ;;  %1856 = vmatprep.subr.bf16.mxu0 %v2091_v20  ;;  %v43_v62 = vld [vmem:[%s2723_s0 + $0x80] sm:$0xff]  ;;  %v1705_v4 = vcombine.high %v44_v1, %v52_v2  ;;  %v2125_v5 = vld [vmem:[%s2722_s1 + $0x128] sm:$0xff]   ;;  %v1704_v6 = vcombine.low %v44_v1, %v52_v2  ;;  %v2127_v8 = vld [vmem:[%s2722_s1 + $0x170] sm:$0xff]  }
  0x16   :  { %1884 = vmatprep.subr.bf16.mxu1 %v2092_v21  ;;  %v51_v63 = vld [vmem:[%s2723_s0 + $0xc0] sm:$0xff]  ;;  %v2126_v7 = vld [vmem:[%s2722_s1 + $0x1a8] sm:$0xff]   ;;  %v2128_v9 = vld [vmem:[%s2722_s1 + $0x1f0] sm:$0xff]  }
  0x17   :  { %v1703_v0 = vcombine.high %v43_v62, %v51_v63  ;;  %v1702_v3 = vcombine.low %v43_v62, %v51_v63  ;;  %v2129_v10 = vld [vmem:[%s2722_s1 + $0x130] sm:$0xff]   ;;  %v2131_v12 = vld [vmem:[%s2722_s1 + $0x178] sm:$0xff]   ;;  %v39_v1 = vld [vmem:[%s2723_s0 + $0x60] sm:$0xff] }
  0x18   :  { %1857 = vmatpush3.bf16.msra.mxu0 %v2093_v22  ;;  %v2130_v11 = vld [vmem:[%s2722_s1 + $0x1b0] sm:$0xff]   ;;  %v2132_v13 = vld [vmem:[%s2722_s1 + $0x1f8] sm:$0xff]  }
  0x19   :  { %1885 = vmatpush3.bf16.msra.mxu1 %v2094_v23  ;;  %1858 = vmatprep.subr.bf16.mxu0 %v2095_v24  ;;  %v2133_v14 = vld [vmem:[%s2722_s1 + $0x138] sm:$0xff]   ;;  %v29_v16 = vld [vmem:[%s2723_s0 + $0x10] sm:$0xff]  ;;  %v2135_v24 = vld [vmem:[%s2722_s1 + $0x240] sm:$0xff]  }
  0x1a   :  { %1886 = vmatprep.subr.bf16.mxu1 %v2096_v25  ;;  %v2134_v15 = vld [vmem:[%s2722_s1 + $0x1b8] sm:$0xff]   ;;  %v37_v17 = vld [vmem:[%s2723_s0 + $0x50] sm:$0xff]  ;;  %v2136_v25 = vld [vmem:[%s2722_s1 + $0x2c0] sm:$0xff]  }
  0x1b   :  { %v30_v18 = vld [vmem:[%s2723_s0 + $0x18] sm:$0xff]  ;;  %v1690_v20 = vcombine.low %v29_v16, %v37_v17  ;;  %v1691_v21 = vcombine.high %v29_v16, %v37_v17  ;;  %v45_v32 = vld [vmem:[%s2723_s0 + $0x90] sm:$0xff]  ;;  %v47_v16 = vld [vmem:[%s2723_s0 + $0xa0] sm:$0xff] }
  0x1c   :  { %1859 = vmatpush3.bf16.msra.mxu0 %v2097_v26  ;;  %v38_v19 = vld [vmem:[%s2723_s0 + $0x58] sm:$0xff]  ;;  %v2137_v26 = vld [vmem:[%s2722_s1 + $0x200] sm:$0xff]   ;;  %v53_v33 = vld [vmem:[%s2723_s0 + $0xd0] sm:$0xff] }
  0x1d   :  { %1887 = vmatpush3.bf16.msra.mxu1 %v2098_v27  ;;  %1860 = vmatprep.subr.bf16.mxu0 %v2099_v28  ;;  %v1692_v22 = vcombine.low %v30_v18, %v38_v19  ;;  %v1693_v23 = vcombine.high %v30_v18, %v38_v19  ;;  %v2138_v27 = vld [vmem:[%s2722_s1 + $0x280] sm:$0xff]   ;;  %v2139_v28 = vld [vmem:[%s2722_s1 + $0x248] sm:$0xff]   ;;  %v1707_v34 = vcombine.high %v45_v32, %v53_v33  ;;  %v2143_v36 = vld [vmem:[%s2722_s1 + $0x250] sm:$0xff]  }
  0x1e   :  { %1888 = vmatprep.subr.bf16.mxu1 %v2100_v29  ;;  %v2140_v29 = vld [vmem:[%s2722_s1 + $0x2c8] sm:$0xff]   ;;  %v2144_v37 = vld [vmem:[%s2722_s1 + $0x2d0] sm:$0xff]   ;;  %v54_v39 = vld [vmem:[%s2723_s0 + $0xd8] sm:$0xff] }
  0x1f   :  { %v2165_v62 = vld [vmem:[%s2722_s1 + $0x238] sm:$0xff]   ;;  %v55_v17 = vld [vmem:[%s2723_s0 + $0xe0] sm:$0xff] }
  0x20   :  { %1861 = vmatpush3.bf16.msra.mxu0 %v2101_v30  ;;  %v2141_v30 = vld [vmem:[%s2722_s1 + $0x208] sm:$0xff]   ;;  %v2166_v63 = vld [vmem:[%s2722_s1 + $0x2b8] sm:$0xff]   ;;  %v1711_v18 = vcombine.high %v47_v16, %v55_v17  ;;  %v1710_v19 = vcombine.low %v47_v16, %v55_v17 }
  0x21   :  { %1889 = vmatpush3.bf16.msra.mxu1 %v2102_v31  ;;  %1902 = vmatprep.subr.bf16.mxu0 %v2103_v40  ;;  %v2142_v31 = vld [vmem:[%s2722_s1 + $0x288] sm:$0xff]  }
  0x22   :  { %1930 = vmatprep.subr.bf16.mxu1 %v2104_v41  ;;  %v2145_v41 = vld [vmem:[%s2722_s1 + $0x210] sm:$0xff]  }
  0x23   :  { %1276 = vmatmul.mubr.bf16.vlgmr.msra.gmra.mrb[0].mxu0 %v1686_v35  ;;  %v1706_v35 = vcombine.low %v45_v32, %v53_v33  ;;  %v2183_v32 = vld [vmem:[%s2722_s1 + $0x360] sm:$0xff]  }
  0x24   :  { %1325 = vmatmul.mubr.bf16.vlgmr.msra.gmra.mrb[0].mxu1 %v1688_v38  ;;  %1903 = vmatpush3.bf16.msra.mxu0 %v2105_v42  ;;  %v46_v38 = vld [vmem:[%s2723_s0 + $0x98] sm:$0xff]  ;;  %v2184_v33 = vld [vmem:[%s2722_s1 + $0x3e0] sm:$0xff]  }
  0x25   :  { %1931 = vmatpush3.bf16.msra.mxu1 %v2106_v43  ;;  %1904 = vmatprep.subr.bf16.mxu0 %v2107_v44  ;;  %v1709_v40 = vcombine.high %v46_v38, %v54_v39  ;;  %v1708_v42 = vcombine.low %v46_v38, %v54_v39  ;;  %v2146_v43 = vld [vmem:[%s2722_s1 + $0x290] sm:$0xff]   ;;  %v2147_v44 = vld [vmem:[%s2722_s1 + $0x258] sm:$0xff]   ;;  %v2189_v38 = vld [vmem:[%s2722_s1 + $0x328] sm:$0xff]  }
  0x26   :  { %1932 = vmatprep.subr.bf16.mxu1 %v2108_v45  ;;  %1283 = vmatprep.mubr.bf16.mxu0 %v1703_v0  ;;  %v2148_v45 = vld [vmem:[%s2722_s1 + $0x2d8] sm:$0xff]   ;;  %v31_v0 = vld [vmem:[%s2723_s0 + $0x20] sm:$0xff]  ;;  %v2190_v39 = vld [vmem:[%s2722_s1 + $0x3a8] sm:$0xff]  }
  0x27   :  { %1332 = vmatprep.mubr.bf16.mxu1 %v1705_v4  ;;  %v1694_v2 = vcombine.low %v31_v0, %v39_v1  ;;  %v32_v4 = vld [vmem:[%s2723_s0 + $0x28] sm:$0xff] }
  0x28   :  { %1905 = vmatpush3.bf16.msra.mxu0 %v2109_v46  ;;  %v2149_v46 = vld [vmem:[%s2722_s1 + $0x218] sm:$0xff]  }
  0x29   :  { %1933 = vmatpush3.bf16.msra.mxu1 %v2110_v47  ;;  %1906 = vmatprep.subr.bf16.mxu0 %v2111_v48  ;;  %v2150_v47 = vld [vmem:[%s2722_s1 + $0x298] sm:$0xff]   ;;  %v2151_v48 = vld [vmem:[%s2722_s1 + $0x260] sm:$0xff]  }
  0x2a   :  { %1934 = vmatprep.subr.bf16.mxu1 %v2112_v49  ;;  %v2152_v49 = vld [vmem:[%s2722_s1 + $0x2e0] sm:$0xff]  }
  0x2b   :  { %1284 = vmatmul.mubr.bf16.gmra.mrb[4].mxu0 %v1702_v3  ;;  %v1695_v3 = vcombine.high %v31_v0, %v39_v1 }
  0x2c   :  { %1907 = vmatpush3.bf16.msra.mxu0 %v2113_v50  ;;  %1333 = vmatmul.mubr.bf16.gmra.mrb[4].mxu1 %v1704_v6  ;;  %v2153_v50 = vld [vmem:[%s2722_s1 + $0x220] sm:$0xff]  }
  0x2d   :  { %1935 = vmatpush3.bf16.msra.mxu1 %v2114_v51  ;;  %1908 = vmatprep.subr.bf16.mxu0 %v2115_v52  ;;  %v2154_v51 = vld [vmem:[%s2722_s1 + $0x2a0] sm:$0xff]   ;;  %v2155_v52 = vld [vmem:[%s2722_s1 + $0x268] sm:$0xff]  }
  0x2e   :  { %1936 = vmatprep.subr.bf16.mxu1 %v2116_v53  ;;  %1373 = vmatprep.mubr.bf16.mxu0 %v1691_v21  ;;  %v2156_v53 = vld [vmem:[%s2722_s1 + $0x2e8] sm:$0xff]   ;;  %v2176_v21 = vld [vmem:[%s2722_s1 + $0x3d0] sm:$0xff]  }
  0x2f   :  { %1422 = vmatprep.mubr.bf16.mxu1 %v1693_v23  ;;  %v56_v23 = vld [vmem:[%s2723_s0 + $0xe8] sm:$0xff] }
  0x30   :  { %1909 = vmatpush3.bf16.msra.mxu0 %v2117_v54  ;;  %v2157_v54 = vld [vmem:[%s2722_s1 + $0x228] sm:$0xff]  }
  0x31   :  { %1937 = vmatpush3.bf16.msra.mxu1 %v2118_v55  ;;  %1910 = vmatprep.subr.bf16.mxu0 %v2119_v56  ;;  %v2158_v55 = vld [vmem:[%s2722_s1 + $0x2a8] sm:$0xff]   ;;  %v2159_v56 = vld [vmem:[%s2722_s1 + $0x270] sm:$0xff]  }
  0x32   :  { %1938 = vmatprep.subr.bf16.mxu1 %v2120_v57  ;;  %v2160_v57 = vld [vmem:[%s2722_s1 + $0x2f0] sm:$0xff]  }
  0x34   :  { %1911 = vmatpush3.bf16.msra.mxu0 %v2121_v58  ;;  %v2161_v58 = vld [vmem:[%s2722_s1 + $0x230] sm:$0xff]  }
  0x35   :  { %1939 = vmatpush3.bf16.msra.mxu1 %v2122_v59  ;;  %1912 = vmatprep.subr.bf16.mxu0 %v2123_v60  ;;  %v2162_v59 = vld [vmem:[%s2722_s1 + $0x2b0] sm:$0xff]   ;;  %v2163_v60 = vld [vmem:[%s2722_s1 + $0x278] sm:$0xff]  }
  0x36   :  { %1940 = vmatprep.subr.bf16.mxu1 %v2124_v61  ;;  %v2164_v61 = vld [vmem:[%s2722_s1 + $0x2f8] sm:$0xff]  }
  0x38   :  { %1913 = vmatpush3.bf16.msra.mxu0 %v2125_v5  ;;  %v40_v5 = vld [vmem:[%s2723_s0 + $0x68] sm:$0xff] }
  0x39   :  { %1941 = vmatpush3.bf16.msra.mxu1 %v2126_v7  ;;  %1914 = vmatprep.subr.bf16.mxu0 %v2127_v8  ;;  %v1696_v6 = vcombine.low %v32_v4, %v40_v5  ;;  %v1697_v7 = vcombine.high %v32_v4, %v40_v5  ;;  %v2167_v8 = vld [vmem:[%s2722_s1 + $0x340] sm:$0xff]  }
  0x3a   :  { %1942 = vmatprep.subr.bf16.mxu1 %v2128_v9  ;;  %v2168_v9 = vld [vmem:[%s2722_s1 + $0x3c0] sm:$0xff]  }
  0x3c   :  { %1915 = vmatpush3.bf16.msra.mxu0 %v2129_v10  ;;  %v2169_v10 = vld [vmem:[%s2722_s1 + $0x300] sm:$0xff]  }
  0x3d   :  { %1943 = vmatpush3.bf16.msra.mxu1 %v2130_v11  ;;  %1916 = vmatprep.subr.bf16.mxu0 %v2131_v12  ;;  %v2170_v11 = vld [vmem:[%s2722_s1 + $0x380] sm:$0xff]   ;;  %v2171_v12 = vld [vmem:[%s2722_s1 + $0x348] sm:$0xff]  }
  0x3e   :  { %1944 = vmatprep.subr.bf16.mxu1 %v2132_v13  ;;  %v2172_v13 = vld [vmem:[%s2722_s1 + $0x3c8] sm:$0xff]  }
  0x40   :  { %1917 = vmatpush3.bf16.msra.mxu0 %v2133_v14  ;;  %v2173_v14 = vld [vmem:[%s2722_s1 + $0x308] sm:$0xff]  }
  0x41   :  { %1945 = vmatpush3.bf16.msra.mxu1 %v2134_v15  ;;  %1958 = vmatprep.subr.bf16.mxu0 %v2135_v24  ;;  %v2174_v15 = vld [vmem:[%s2722_s1 + $0x388] sm:$0xff]  }
  0x42   :  { %1986 = vmatprep.subr.bf16.mxu1 %v2136_v25  ;;  %v2177_v25 = vld [vmem:[%s2722_s1 + $0x310] sm:$0xff]  }
  0x43   :  { %1374 = vmatmul.mubr.bf16.vlgmr.msra.gmra.mrb[8].mxu0 %v1690_v20  ;;  %v2175_v20 = vld [vmem:[%s2722_s1 + $0x350] sm:$0xff]  }
  0x44   :  { %1423 = vmatmul.mubr.bf16.vlgmr.msra.gmra.mrb[8].mxu1 %v1692_v22  ;;  %1959 = vmatpush3.bf16.msra.mxu0 %v2137_v26  ;;  %v48_v22 = vld [vmem:[%s2723_s0 + $0xa8] sm:$0xff] }
  0x45   :  { %1987 = vmatpush3.bf16.msra.mxu1 %v2138_v27  ;;  %1960 = vmatprep.subr.bf16.mxu0 %v2139_v28  ;;  %v1713_v24 = vcombine.high %v48_v22, %v56_v23  ;;  %v1712_v26 = vcombine.low %v48_v22, %v56_v23  ;;  %v2178_v27 = vld [vmem:[%s2722_s1 + $0x390] sm:$0xff]   ;;  %v2179_v28 = vld [vmem:[%s2722_s1 + $0x358] sm:$0xff]  }
  0x46   :  { %1988 = vmatprep.subr.bf16.mxu1 %v2140_v29  ;;  %1381 = vmatprep.mubr.bf16.mxu0 %v1707_v34  ;;  %v2180_v29 = vld [vmem:[%s2722_s1 + $0x3d8] sm:$0xff]   ;;  %v2185_v34 = vld [vmem:[%s2722_s1 + $0x320] sm:$0xff]  }
  0x47   :  { %1430 = vmatprep.mubr.bf16.mxu1 %v1709_v40  ;;  %v2191_v40 = vld [vmem:[%s2722_s1 + $0x370] sm:$0xff]  }
  0x48   :  { %1961 = vmatpush3.bf16.msra.mxu0 %v2141_v30  ;;  %v2181_v30 = vld [vmem:[%s2722_s1 + $0x318] sm:$0xff]  }
  0x49   :  { %1989 = vmatpush3.bf16.msra.mxu1 %v2142_v31  ;;  %1962 = vmatprep.subr.bf16.mxu0 %v2143_v36  ;;  %v2182_v31 = vld [vmem:[%s2722_s1 + $0x398] sm:$0xff]   ;;  %v2187_v36 = vld [vmem:[%s2722_s1 + $0x368] sm:$0xff]  }
  0x4a   :  { %1990 = vmatprep.subr.bf16.mxu1 %v2144_v37  ;;  %v2188_v37 = vld [vmem:[%s2722_s1 + $0x3e8] sm:$0xff]  }
  0x4b   :  { %1382 = vmatmul.mubr.bf16.gmra.mrb[12].mxu0 %v1706_v35  ;;  %v2186_v35 = vld [vmem:[%s2722_s1 + $0x3a0] sm:$0xff]  }
  0x4c   :  { %1963 = vmatpush3.bf16.msra.mxu0 %v2145_v41  ;;  %1431 = vmatmul.mubr.bf16.gmra.mrb[12].mxu1 %v1708_v42  ;;  %v2192_v41 = vld [vmem:[%s2722_s1 + $0x3f0] sm:$0xff]  }
  0x4d   :  { %1991 = vmatpush3.bf16.msra.mxu1 %v2146_v43  ;;  %1964 = vmatprep.subr.bf16.mxu0 %v2147_v44  ;;  %v2193_v42 = vld [vmem:[%s2722_s1 + $0x330] sm:$0xff]   ;;  %v2195_v44 = vld [vmem:[%s2722_s1 + $0x378] sm:$0xff]  }
  0x4e   :  { %1992 = vmatprep.subr.bf16.mxu1 %v2148_v45  ;;  %1471 = vmatprep.mubr.bf16.mxu0 %v1695_v3  ;;  %v2194_v43 = vld [vmem:[%s2722_s1 + $0x3b0] sm:$0xff]   ;;  %v2196_v45 = vld [vmem:[%s2722_s1 + $0x3f8] sm:$0xff]  }
  0x4f   :  { %1520 = vmatprep.mubr.bf16.mxu1 %v1697_v7 }
  0x50   :  { %1965 = vmatpush3.bf16.msra.mxu0 %v2149_v46  ;;  %v2197_v46 = vld [vmem:[%s2722_s1 + $0x338] sm:$0xff]  }
  0x51   :  { %1993 = vmatpush3.bf16.msra.mxu1 %v2150_v47  ;;  %1966 = vmatprep.subr.bf16.mxu0 %v2151_v48  ;;  %v2198_v47 = vld [vmem:[%s2722_s1 + $0x3b8] sm:$0xff]   ;;  %v33_v48 = vld [vmem:[%s2723_s0 + $0x30] sm:$0xff] }
  0x52   :  { %1994 = vmatprep.subr.bf16.mxu1 %v2152_v49  ;;  %v41_v49 = vld [vmem:[%s2723_s0 + $0x70] sm:$0xff] }
  0x54   :  { %1967 = vmatpush3.bf16.msra.mxu0 %v2153_v50  ;;  %v34_v50 = vld [vmem:[%s2723_s0 + $0x38] sm:$0xff] }
  0x55   :  { %1995 = vmatpush3.bf16.msra.mxu1 %v2154_v51  ;;  %1968 = vmatprep.subr.bf16.mxu0 %v2155_v52  ;;  %v1698_v51 = vcombine.low %v33_v48, %v41_v49  ;;  %v1699_v52 = vcombine.high %v33_v48, %v41_v49 }
  0x56   :  { %1996 = vmatprep.subr.bf16.mxu1 %v2156_v53  ;;  %v42_v53 = vld [vmem:[%s2723_s0 + $0x78] sm:$0xff] }
  0x58   :  { %1969 = vmatpush3.bf16.msra.mxu0 %v2157_v54  ;;  %v49_v54 = vld [vmem:[%s2723_s0 + $0xb0] sm:$0xff] }
  0x59   :  { %1997 = vmatpush3.bf16.msra.mxu1 %v2158_v55  ;;  %1970 = vmatprep.subr.bf16.mxu0 %v2159_v56  ;;  %v57_v55 = vld [vmem:[%s2723_s0 + $0xf0] sm:$0xff]  ;;  %v1700_v56 = vcombine.low %v34_v50, %v42_v53 }
  0x5a   :  { %1998 = vmatprep.subr.bf16.mxu1 %v2160_v57  ;;  %v1701_v57 = vcombine.high %v34_v50, %v42_v53 }
  0x5c   :  { %1971 = vmatpush3.bf16.msra.mxu0 %v2161_v58  ;;  %v1715_v58 = vcombine.high %v49_v54, %v57_v55 }
  0x5d   :  { %1999 = vmatpush3.bf16.msra.mxu1 %v2162_v59  ;;  %1972 = vmatprep.subr.bf16.mxu0 %v2163_v60  ;;  %v50_v59 = vld [vmem:[%s2723_s0 + $0xb8] sm:$0xff] }
  0x5e   :  { %2000 = vmatprep.subr.bf16.mxu1 %v2164_v61  ;;  %v58_v60 = vld [vmem:[%s2723_s0 + $0xf8] sm:$0xff] }
  0x5f   :  { %v1717_v61 = vcombine.high %v50_v59, %v58_v60 }
  0x60   :  { %1973 = vmatpush3.bf16.msra.mxu0 %v2165_v62  ;;  %v1714_v62 = vcombine.low %v49_v54, %v57_v55 }
  0x61   :  { %2001 = vmatpush3.bf16.msra.mxu1 %v2166_v63  ;;  %2014 = vmatprep.subr.bf16.mxu0 %v2167_v8  ;;  %v1716_v63 = vcombine.low %v50_v59, %v58_v60 }
  0x62   :  { %2042 = vmatprep.subr.bf16.mxu1 %v2168_v9 }
  0x63   :  { %1472 = vmatmul.mubr.bf16.vlgmr.msra.gmra.mrb[16].mxu0 %v1694_v2 }
  0x64   :  { %1521 = vmatmul.mubr.bf16.vlgmr.msra.gmra.mrb[16].mxu1 %v1696_v6  ;;  %2015 = vmatpush3.bf16.msra.mxu0 %v2169_v10 }
  0x65   :  { %2043 = vmatpush3.bf16.msra.mxu1 %v2170_v11  ;;  %2016 = vmatprep.subr.bf16.mxu0 %v2171_v12 }
  0x66   :  { %2044 = vmatprep.subr.bf16.mxu1 %v2172_v13  ;;  %1479 = vmatprep.mubr.bf16.mxu0 %v1711_v18 }
  0x67   :  { %1528 = vmatprep.mubr.bf16.mxu1 %v1713_v24 }
  0x68   :  { %2017 = vmatpush3.bf16.msra.mxu0 %v2173_v14 }
  0x69   :  { %2045 = vmatpush3.bf16.msra.mxu1 %v2174_v15  ;;  %2018 = vmatprep.subr.bf16.mxu0 %v2175_v20 }
  0x6a   :  { %2046 = vmatprep.subr.bf16.mxu1 %v2176_v21 }
  0x6b   :  { %1480 = vmatmul.mubr.bf16.gmra.mrb[20].mxu0 %v1710_v19 }
  0x6c   :  { %2019 = vmatpush3.bf16.msra.mxu0 %v2177_v25  ;;  %1529 = vmatmul.mubr.bf16.gmra.mrb[20].mxu1 %v1712_v26 }
  0x6d   :  { %2047 = vmatpush3.bf16.msra.mxu1 %v2178_v27  ;;  %2020 = vmatprep.subr.bf16.mxu0 %v2179_v28 }
  0x6e   :  { %2048 = vmatprep.subr.bf16.mxu1 %v2180_v29  ;;  %1569 = vmatprep.mubr.bf16.mxu0 %v1699_v52 }
  0x6f   :  { %1618 = vmatprep.mubr.bf16.mxu1 %v1701_v57 }
  0x70   :  { %2021 = vmatpush3.bf16.msra.mxu0 %v2181_v30 }
  0x71   :  { %2049 = vmatpush3.bf16.msra.mxu1 %v2182_v31  ;;  %2022 = vmatprep.subr.bf16.mxu0 %v2183_v32 }
  0x72   :  { %2050 = vmatprep.subr.bf16.mxu1 %v2184_v33 }
  0x74   :  { %2023 = vmatpush3.bf16.msra.mxu0 %v2185_v34 }
  0x75   :  { %2051 = vmatpush3.bf16.msra.mxu1 %v2186_v35  ;;  %2024 = vmatprep.subr.bf16.mxu0 %v2187_v36 }
  0x76   :  { %2052 = vmatprep.subr.bf16.mxu1 %v2188_v37 }
  0x78   :  { %2025 = vmatpush3.bf16.msra.mxu0 %v2189_v38 }
  0x79   :  { %2053 = vmatpush3.bf16.msra.mxu1 %v2190_v39  ;;  %2026 = vmatprep.subr.bf16.mxu0 %v2191_v40 }
  0x7a   :  { %2054 = vmatprep.subr.bf16.mxu1 %v2192_v41 }
  0x7c   :  { %2027 = vmatpush3.bf16.msra.mxu0 %v2193_v42 }
  0x7d   :  { %2055 = vmatpush3.bf16.msra.mxu1 %v2194_v43  ;;  %2028 = vmatprep.subr.bf16.mxu0 %v2195_v44 }
  0x7e   :  { %2056 = vmatprep.subr.bf16.mxu1 %v2196_v45 }
  0x80   :  { %2029 = vmatpush3.bf16.msra.mxu0 %v2197_v46 }
  0x81   :  { %2057 = vmatpush3.bf16.msra.mxu1 %v2198_v47 }
  0x83   :  { %1570 = vmatmul.mubr.bf16.vlgmr.msra.gmra.mrb[24].mxu0 %v1698_v51 }
  0x84   :  { %1619 = vmatmul.mubr.bf16.vlgmr.msra.gmra.mrb[24].mxu1 %v1700_v56  ;;  %1577 = vmatprep.mubr.bf16.mxu0 %v1715_v58 }
  0x85   :  { %1626 = vmatprep.mubr.bf16.mxu1 %v1717_v61 }
  0x8b   :  { %1578 = vmatmul.mubr.bf16.gmra.mrb[28].mxu0 %v1714_v62 }
  0x8c   :  { %1627 = vmatmul.mubr.bf16.gmra.mrb[28].mxu1 %v1716_v63 }
  0xf6   :  { %v1862_v0 = vpop.f32.mrb[0].mxu0 }
  0xf7   :  { %v1890_v1 = vpop.f32.mrb[0].mxu1  ;;  %v1863_v2 = vpop.f32.mrb[1].mxu0 }
  0xf8   :  { %v1864_v3 = vadd.f32 %v1863_v2, %v1862_v0  ;;  %v1891_v4 = vpop.f32.mrb[1].mxu1  ;;  %v1865_v5 = vpop.f32.mrb[2].mxu0 }
  0xf9   :  { %v1892_v6 = vadd.f32 %v1891_v4, %v1890_v1  ;;  %v1893_v7 = vpop.f32.mrb[2].mxu1  ;;  %v1866_v8 = vpop.f32.mrb[3].mxu0 }
  0xfa   :  { %v1867_v9 = vadd.f32 %v1866_v8, %v1865_v5  ;;  %v1894_v10 = vpop.f32.mrb[3].mxu1 }
  0xfb   :  { %v1327_v11 = vadd.f32 %v1892_v6, %v1864_v3  ;;  %v1895_v12 = vadd.f32 %v1894_v10, %v1893_v7 }
  0xfd   :  { %v1330_v13 = vadd.f32 %v1895_v12, %v1867_v9 }
  0xfe   :  { %v1868_v14 = vpop.f32.mrb[4].mxu0 }
  0xff   :  { %v1896_v15 = vpop.f32.mrb[4].mxu1  ;;  %v1869_v16 = vpop.f32.mrb[5].mxu0 }
 0x100   :  { %v1870_v17 = vadd.f32 %v1869_v16, %v1868_v14  ;;  %v1897_v18 = vpop.f32.mrb[5].mxu1  ;;  %v1871_v19 = vpop.f32.mrb[6].mxu0 }
 0x101   :  { %v1898_v20 = vadd.f32 %v1897_v18, %v1896_v15  ;;  %v1899_v21 = vpop.f32.mrb[6].mxu1  ;;  %v1872_v22 = vpop.f32.mrb[7].mxu0 }
 0x102   :  { %v1873_v23 = vadd.f32 %v1872_v22, %v1871_v19  ;;  %v1900_v24 = vpop.f32.mrb[7].mxu1 }
 0x103   :  { %v1335_v25 = vadd.f32 %v1898_v20, %v1870_v17  ;;  %v1901_v26 = vadd.f32 %v1900_v24, %v1899_v21 }
 0x105   :  { %v1338_v27 = vadd.f32 %v1901_v26, %v1873_v23 }
 0x116   :  { %v1918_v28 = vpop.f32.mrb[8].mxu0 }
 0x117   :  { %v1946_v29 = vpop.f32.mrb[8].mxu1  ;;  %v1919_v30 = vpop.f32.mrb[9].mxu0 }
 0x118   :  { %v1947_v31 = vpop.f32.mrb[9].mxu1  ;;  %v1920_v32 = vadd.f32 %v1919_v30, %v1918_v28  ;;  %v1921_v34 = vpop.f32.mrb[10].mxu0 }
 0x119   :  { %v1948_v33 = vadd.f32 %v1947_v31, %v1946_v29  ;;  %v1949_v35 = vpop.f32.mrb[10].mxu1  ;;  %v1922_v36 = vpop.f32.mrb[11].mxu0 }
 0x11a   :  { %v1950_v37 = vpop.f32.mrb[11].mxu1  ;;  %v1376_v38 = vadd.f32 %v1920_v32, %v1327_v11  ;;  %v1923_v39 = vadd.f32 %v1922_v36, %v1921_v34 }
 0x11b   :  { %v1951_v40 = vadd.f32 %v1950_v37, %v1949_v35 }
 0x11c   :  { %v1425_v41 = vadd.f32 %v1948_v33, %v1376_v38  ;;  %v1379_v42 = vadd.f32 %v1923_v39, %v1330_v13 }
 0x11e   :  { %v1428_v43 = vadd.f32 %v1951_v40, %v1379_v42  ;;  %v1924_v44 = vpop.f32.mrb[12].mxu0 }
 0x11f   :  { %v1925_v45 = vpop.f32.mrb[13].mxu0  ;;  %v1952_v50 = vpop.f32.mrb[12].mxu1 }
 0x120   :  { %v1926_v46 = vadd.f32 %v1925_v45, %v1924_v44  ;;  %v1927_v47 = vpop.f32.mrb[14].mxu0  ;;  %v1953_v52 = vpop.f32.mrb[13].mxu1 }
 0x121   :  { %v1928_v48 = vpop.f32.mrb[15].mxu0  ;;  %v1954_v54 = vadd.f32 %v1953_v52, %v1952_v50  ;;  %v1955_v55 = vpop.f32.mrb[14].mxu1 }
 0x122   :  { %v1384_v49 = vadd.f32 %v1926_v46, %v1335_v25  ;;  %v1929_v51 = vadd.f32 %v1928_v48, %v1927_v47  ;;  %v1956_v56 = vpop.f32.mrb[15].mxu1 }
 0x123   :  { %v1957_v58 = vadd.f32 %v1956_v56, %v1955_v55 }
 0x124   :  { %v1387_v53 = vadd.f32 %v1929_v51, %v1338_v27  ;;  %v1433_v57 = vadd.f32 %v1954_v54, %v1384_v49 }
 0x126   :  { %v1436_v59 = vadd.f32 %v1957_v58, %v1387_v53 }
 0x136   :  { %v1974_v60 = vpop.f32.mrb[16].mxu0 }
 0x137   :  { %v2002_v61 = vpop.f32.mrb[16].mxu1  ;;  %v1975_v62 = vpop.f32.mrb[17].mxu0 }
 0x138   :  { %v1976_v63 = vadd.f32 %v1975_v62, %v1974_v60  ;;  %v2003_v0 = vpop.f32.mrb[17].mxu1  ;;  %v1977_v1 = vpop.f32.mrb[18].mxu0 }
 0x139   :  { %v2004_v2 = vadd.f32 %v2003_v0, %v2002_v61  ;;  %v2005_v3 = vpop.f32.mrb[18].mxu1  ;;  %v1978_v4 = vpop.f32.mrb[19].mxu0 }
 0x13a   :  { %v1474_v5 = vadd.f32 %v1976_v63, %v1425_v41  ;;  %v1979_v6 = vadd.f32 %v1978_v4, %v1977_v1  ;;  %v2006_v7 = vpop.f32.mrb[19].mxu1 }
 0x13b   :  { %v2007_v8 = vadd.f32 %v2006_v7, %v2005_v3 }
 0x13c   :  { %v1523_v9 = vadd.f32 %v2004_v2, %v1474_v5  ;;  %v1477_v10 = vadd.f32 %v1979_v6, %v1428_v43 }
 0x13e   :  { %v1526_v11 = vadd.f32 %v2007_v8, %v1477_v10  ;;  %v1980_v12 = vpop.f32.mrb[20].mxu0 }
 0x13f   :  { %v1981_v13 = vpop.f32.mrb[21].mxu0  ;;  %v2008_v16 = vpop.f32.mrb[20].mxu1 }
 0x140   :  { %v1982_v14 = vadd.f32 %v1981_v13, %v1980_v12  ;;  %v1983_v15 = vpop.f32.mrb[22].mxu0  ;;  %v2009_v20 = vpop.f32.mrb[21].mxu1 }
 0x141   :  { %v1984_v17 = vpop.f32.mrb[23].mxu0  ;;  %v2010_v21 = vadd.f32 %v2009_v20, %v2008_v16  ;;  %v2011_v22 = vpop.f32.mrb[22].mxu1 }
 0x142   :  { %v1482_v18 = vadd.f32 %v1982_v14, %v1433_v57  ;;  %v1985_v19 = vadd.f32 %v1984_v17, %v1983_v15  ;;  %v2012_v24 = vpop.f32.mrb[23].mxu1 }
 0x143   :  { %v2013_v26 = vadd.f32 %v2012_v24, %v2011_v22 }
 0x144   :  { %v1485_v23 = vadd.f32 %v1985_v19, %v1436_v59  ;;  %v1531_v25 = vadd.f32 %v2010_v21, %v1482_v18 }
 0x146   :  { %v1534_v27 = vadd.f32 %v2013_v26, %v1485_v23 }
 0x156   :  { %v2030_v28 = vpop.f32.mrb[24].mxu0 }
 0x157   :  { %v2058_v29 = vpop.f32.mrb[24].mxu1  ;;  %v2031_v30 = vpop.f32.mrb[25].mxu0 }
 0x158   :  { %v2032_v31 = vadd.f32 %v2031_v30, %v2030_v28  ;;  %v2059_v32 = vpop.f32.mrb[25].mxu1  ;;  %v2033_v33 = vpop.f32.mrb[26].mxu0 }
 0x159   :  { %v2060_v34 = vadd.f32 %v2059_v32, %v2058_v29  ;;  %v2061_v35 = vpop.f32.mrb[26].mxu1  ;;  %v2034_v36 = vpop.f32.mrb[27].mxu0 }
 0x15a   :  { %v1572_v37 = vadd.f32 %v2032_v31, %v1523_v9  ;;  %v2035_v38 = vadd.f32 %v2034_v36, %v2033_v33  ;;  %v2062_v39 = vpop.f32.mrb[27].mxu1 }
 0x15b   :  { %v2063_v40 = vadd.f32 %v2062_v39, %v2061_v35 }
 0x15c   :  { %v1621_v41 = vadd.f32 %v2060_v34, %v1572_v37  ;;  %v1575_v42 = vadd.f32 %v2035_v38, %v1526_v11 }
 0x15e   :  { %v1624_v43 = vadd.f32 %v2063_v40, %v1575_v42  ;;  %v2036_v44 = vpop.f32.mrb[28].mxu0  ;;  %1639 = vst [vmem:[%s2724_s2] sm:$0xff] %v1621_v41  ;;  %v1659_v50 = vmul.f32 %v1621_v41, %v1621_v41 }
 0x15f   :  { %v2064_v45 = vpop.f32.mrb[28].mxu1  ;;  %v2037_v46 = vpop.f32.mrb[29].mxu0 }
 0x160   :  { %v2038_v47 = vadd.f32 %v2037_v46, %v2036_v44  ;;  %v2065_v48 = vpop.f32.mrb[29].mxu1  ;;  %v2039_v49 = vpop.f32.mrb[30].mxu0  ;;  %1640 = vst [vmem:[%s2724_s2 + $0x8] sm:$0xff] %v1624_v43  ;;  %v1650_v54 = vadd.f32 %v1624_v43, %v1621_v41  ;;  %v1660_v55 = vmul.f32 %v1624_v43, %v1624_v43 }
 0x161   :  { %v2066_v51 = vadd.f32 %v2065_v48, %v2064_v45  ;;  %v2067_v52 = vpop.f32.mrb[30].mxu1  ;;  %v2040_v53 = vpop.f32.mrb[31].mxu0 }
 0x162   :  { %v1580_v56 = vadd.f32 %v2038_v47, %v1531_v25  ;;  %v2041_v57 = vadd.f32 %v2040_v53, %v2039_v49  ;;  %v2068_v58 = vpop.f32.mrb[31].mxu1  ;;  %v1663_v60 = vadd.f32 %v1660_v55, %v1659_v50 }
 0x163   :  { %v2069_v59 = vadd.f32 %v2068_v58, %v2067_v52 }
 0x164   :  { %v1629_v61 = vadd.f32 %v2066_v51, %v1580_v56  ;;  %v1583_v62 = vadd.f32 %v2041_v57, %v1534_v27 }
 0x166   :  { %v1632_v63 = vadd.f32 %v2069_v59, %v1583_v62  ;;  %1641 = vst [vmem:[%s2724_s2 + $0x10] sm:$0xff] %v1629_v61  ;;  %v1651_v0 = vadd.f32 %v1650_v54, %v1629_v61  ;;  %v1661_v1 = vmul.f32 %v1629_v61, %v1629_v61 }
 0x168   :  { %v1664_v2 = vadd.f32 %v1663_v60, %v1661_v1  ;;  %1642 = vst [vmem:[%s2724_s2 + $0x18] sm:$0xff] %v1632_v63  ;;  %v1652_v3 = vadd.f32 %v1651_v0, %v1632_v63  ;;  %v1662_v4 = vmul.f32 %v1632_v63, %v1632_v63 }
 0x16a   :  { %v1653_v5 = vrot.slane %v1652_v3, 4  ;;  %v1665_v6 = vadd.f32 %v1664_v2, %v1662_v4 }
 0x16c   :  { %v1654_v7 = vadd.f32 %v1653_v5, %v1652_v3  ;;  %v1666_v8 = vrot.slane %v1665_v6, 4 }
 0x16e   :  { %v1655_v9 = vrot.slane %v1654_v7, 2  ;;  %v1667_v10 = vadd.f32 %v1666_v8, %v1665_v6 }
 0x170   :  { %v1656_v11 = vadd.f32 %v1655_v9, %v1654_v7  ;;  %v1668_v12 = vrot.slane %v1667_v10, 2 }
 0x172   :  { %v1657_v13 = vrot.slane %v1656_v11, 1  ;;  %v1669_v14 = vadd.f32 %v1668_v12, %v1667_v10 }
 0x174   :  { %v1658_v15 = vadd.f32 %v1657_v13, %v1656_v11  ;;  %v1670_v16 = vrot.slane %v1669_v14, 1 }
 0x176   :  { %v1671_v17 = vadd.f32 %v1670_v16, %v1669_v14  ;;  %1672 = vst [vmem:[%s2725_s3] sm:$0xff] %v1658_v15 }
 0x178   :  { %1673 = vst [vmem:[%s2726_s4] sm:$0xff] %v1671_v17 }

// kernel: discriminator_forward.17
= control target key start
LH: loop header
LB: loop body
LE: loop exit
PB: predicated region body
PF: predicated region fallthrough
CT: control target
= control target key end

     0   :  { %v1926_v22 = vmov 1966171168   ;;  %v276_v24 = vlaneseq  ;;  %vm1480_vm0 = vcmask 1024   ;;  %s2369_s1 = inlined_call_operand.vmem [shape: bf16[2048,1], index: 1, kind: input, shape index: {}]   ;;  %s2370_s0 = inlined_call_operand.vmem [shape: bf16[2,2048], index: 0, kind: input, shape index: {}]   ;;  %s2371_s2 = inlined_call_operand.vmem [shape: f32[2,1], index: 2, kind: output, shape index: {}]  }
   0x1   :  { %v1792_v0 = vld [vmem:[%s2369_s1 + $0x40] sm:$0xff]   ;;  %v1796_v4 = vld [vmem:[%s2369_s1 + $0x48] sm:$0xff]   ;;  %v1800_v8 = vld [vmem:[%s2369_s1 + $0x50] sm:$0xff]   ;;  %v274_v23 = vunpack.c.l.s4 %v1926_v22 }
   0x2   :  { %v1793_v1 = vld [vmem:[%s2369_s1 + $0xc0] sm:$0xff]   ;;  %1615 = vmatprep.subr.bf16.mxu0 %v1792_v0  ;;  %v1797_v5 = vld [vmem:[%s2369_s1 + $0xc8] sm:$0xff]   ;;  %v1801_v9 = vld [vmem:[%s2369_s1 + $0xd0] sm:$0xff]   ;;  %v277_v30 = vshrl.u32 %v276_v24, 7 }
   0x3   :  { %v1794_v2 = vld [vmem:[%s2369_s1] sm:$0xff]   ;;  %1637 = vmatprep.subr.bf16.mxu1 %v1793_v1  ;;  %v1798_v6 = vld [vmem:[%s2369_s1 + $0x8] sm:$0xff]   ;;  %v1802_v10 = vld [vmem:[%s2369_s1 + $0x10] sm:$0xff]   ;;  %v275_v29 = vunpack.c.0.s8 %v274_v23 }
   0x4   :  { %v1795_v3 = vld [vmem:[%s2369_s1 + $0x80] sm:$0xff]   ;;  %1616 = vmatpush3.bf16.msra.mxu0 %v1794_v2  ;;  %v1799_v7 = vld [vmem:[%s2369_s1 + $0x88] sm:$0xff]   ;;  %v1803_v11 = vld [vmem:[%s2369_s1 + $0x90] sm:$0xff]  }
   0x5   :  { %1638 = vmatpush3.bf16.msra.mxu1 %v1795_v3  ;;  %1617 = vmatprep.subr.bf16.mxu0 %v1796_v4  ;;  %v1804_v12 = vld [vmem:[%s2369_s1 + $0x58] sm:$0xff]   ;;  %v1808_v16 = vld [vmem:[%s2369_s1 + $0x60] sm:$0xff]   ;;  %v1812_v20 = vld [vmem:[%s2369_s1 + $0x68] sm:$0xff]   ;;  %v2032_v35 = vsub.s32 %v275_v29, %v277_v30 }
   0x6   :  { %1639 = vmatprep.subr.bf16.mxu1 %v1797_v5  ;;  %v1805_v13 = vld [vmem:[%s2369_s1 + $0xd8] sm:$0xff]   ;;  %v1809_v17 = vld [vmem:[%s2369_s1 + $0xe0] sm:$0xff]   ;;  %v1813_v21 = vld [vmem:[%s2369_s1 + $0xe8] sm:$0xff]  }
   0x7   :  { %v1806_v14 = vld [vmem:[%s2369_s1 + $0x18] sm:$0xff]   ;;  %v1810_v18 = vld [vmem:[%s2369_s1 + $0x20] sm:$0xff]   ;;  %v1814_v25 = vld [vmem:[%s2369_s1 + $0x28] sm:$0xff]  }
   0x8   :  { %1618 = vmatpush3.bf16.msra.mxu0 %v1798_v6  ;;  %v1807_v15 = vld [vmem:[%s2369_s1 + $0x98] sm:$0xff]   ;;  %v1811_v19 = vld [vmem:[%s2369_s1 + $0xa0] sm:$0xff]   ;;  %v1815_v26 = vld [vmem:[%s2369_s1 + $0xa8] sm:$0xff]  }
   0x9   :  { %1640 = vmatpush3.bf16.msra.mxu1 %v1799_v7  ;;  %1619 = vmatprep.subr.bf16.mxu0 %v1800_v8  ;;  %v1816_v27 = vld [vmem:[%s2369_s1 + $0x70] sm:$0xff]   ;;  %v1820_v33 = vld [vmem:[%s2369_s1 + $0x78] sm:$0xff]   ;;  %v12_v38 = vld [vmem:[%s2370_s0] sm:$0xff] }
   0xa   :  { %1641 = vmatprep.subr.bf16.mxu1 %v1801_v9  ;;  %v1817_v28 = vld [vmem:[%s2369_s1 + $0xf0] sm:$0xff]   ;;  %v1821_v34 = vld [vmem:[%s2369_s1 + $0xf8] sm:$0xff]   ;;  %v272_v39 = vcombine.high %v12_v38, %v12_v38  ;;  %v279_v40 = vrot.slane %v12_v38, %v2032_v35  ;;  %v1826_v41 = vld [vmem:[%s2369_s1 + $0x140] sm:$0xff]  }
   0xb   :  { %v1818_v31 = vld [vmem:[%s2369_s1 + $0x30] sm:$0xff]   ;;  %v1822_v36 = vld [vmem:[%s2369_s1 + $0x38] sm:$0xff]   ;;  %v1827_v42 = vld [vmem:[%s2369_s1 + $0x1c0] sm:$0xff]  }
   0xc   :  { %1620 = vmatpush3.bf16.msra.mxu0 %v1802_v10  ;;  %v1819_v32 = vld [vmem:[%s2369_s1 + $0xb0] sm:$0xff]   ;;  %v1823_v37 = vld [vmem:[%s2369_s1 + $0xb8] sm:$0xff]   ;;  %v287_v43 = vcombine.high %v279_v40, %v279_v40  ;;  %v295_v44 = vrot.slane %v279_v40, %v2032_v35  ;;  %v2052_v45 = vrot.slane %v272_v39, %v2032_v35  ;;  %v1828_v47 = vld [vmem:[%s2369_s1 + $0x100] sm:$0xff]  }
   0xd   :  { %1642 = vmatpush3.bf16.msra.mxu1 %v1803_v11  ;;  %1621 = vmatprep.subr.bf16.mxu0 %v1804_v12  ;;  %v1830_v50 = vld [vmem:[%s2369_s1 + $0x148] sm:$0xff]   ;;  %v1829_v52 = vld [vmem:[%s2369_s1 + $0x180] sm:$0xff]   ;;  %v1834_v57 = vld [vmem:[%s2369_s1 + $0x150] sm:$0xff]  }
   0xe   :  { %1643 = vmatprep.subr.bf16.mxu1 %v1805_v13  ;;  %v309_v46 = vrot.slane %v287_v43, %v2032_v35  ;;  %v288_v48 = vcombine.high %v2052_v45, %v2052_v45  ;;  %v317_v49 = vcombine.high %v295_v44, %v295_v44  ;;  %v1831_v54 = vld [vmem:[%s2369_s1 + $0x1c8] sm:$0xff]   ;;  %v1835_v59 = vld [vmem:[%s2369_s1 + $0x1d0] sm:$0xff]   ;;  %v1838_v61 = vld [vmem:[%s2369_s1 + $0x158] sm:$0xff]  }
   0xf   :  { %v1832_v55 = vld [vmem:[%s2369_s1 + $0x108] sm:$0xff]   ;;  %v1836_v60 = vld [vmem:[%s2369_s1 + $0x110] sm:$0xff]   ;;  %v1839_v63 = vld [vmem:[%s2369_s1 + $0x1d8] sm:$0xff]  }
  0x10   :  { %1622 = vmatpush3.bf16.msra.mxu0 %v1806_v14  ;;  %1186 = vmatprep.mubr.bf16.mxu0 %v309_v46  ;;  %v319_v51 = vcombine.high %v309_v46, %v309_v46  ;;  %v316_v53 = vrot.slane %v288_v48, %v2032_v35  ;;  %v1833_v58 = vld [vmem:[%s2369_s1 + $0x188] sm:$0xff]   ;;  %v1837_v62 = vld [vmem:[%s2369_s1 + $0x190] sm:$0xff]   ;;  %v1840_v0 = vld [vmem:[%s2369_s1 + $0x118] sm:$0xff]  }
  0x11   :  { %1644 = vmatpush3.bf16.msra.mxu1 %v1807_v15  ;;  %1623 = vmatprep.subr.bf16.mxu0 %v1808_v16  ;;  %v1842_v1 = vld [vmem:[%s2369_s1 + $0x160] sm:$0xff]   ;;  %v1841_v2 = vld [vmem:[%s2369_s1 + $0x198] sm:$0xff]   ;;  %v2112_v5 = vld [vmem:[%s2370_s0 + $0x8] sm:$0xff] }
  0x12   :  { %1645 = vmatprep.subr.bf16.mxu1 %v1809_v17  ;;  %1226 = vmatprep.mubr.bf16.mxu1 %v319_v51  ;;  %v320_v56 = vcombine.high %v316_v53, %v316_v53  ;;  %v1843_v3 = vld [vmem:[%s2369_s1 + $0x1e0] sm:$0xff]   ;;  %v1846_v6 = vld [vmem:[%s2369_s1 + $0x168] sm:$0xff]   ;;  %v1850_v10 = vld [vmem:[%s2369_s1 + $0x170] sm:$0xff]   ;;  %v2134_v12 = vrot.slane %v2112_v5, %v2032_v35  ;;  %v321_v46 = vcombine.high %v2112_v5, %v2112_v5 }
  0x13   :  { %v1844_v4 = vld [vmem:[%s2369_s1 + $0x120] sm:$0xff]   ;;  %v1847_v8 = vld [vmem:[%s2369_s1 + $0x1e8] sm:$0xff]   ;;  %v1851_v13 = vld [vmem:[%s2369_s1 + $0x1f0] sm:$0xff]  }
  0x14   :  { %1624 = vmatpush3.bf16.msra.mxu0 %v1810_v18  ;;  %v1845_v7 = vld [vmem:[%s2369_s1 + $0x1a0] sm:$0xff]   ;;  %v1848_v9 = vld [vmem:[%s2369_s1 + $0x128] sm:$0xff]   ;;  %v1852_v14 = vld [vmem:[%s2369_s1 + $0x130] sm:$0xff]   ;;  %v336_v17 = vcombine.high %v2134_v12, %v2134_v12 }
  0x15   :  { %1646 = vmatpush3.bf16.msra.mxu1 %v1811_v19  ;;  %1625 = vmatprep.subr.bf16.mxu0 %v1812_v20  ;;  %v1849_v11 = vld [vmem:[%s2369_s1 + $0x1a8] sm:$0xff]   ;;  %v1854_v15 = vld [vmem:[%s2369_s1 + $0x178] sm:$0xff]   ;;  %v1853_v16 = vld [vmem:[%s2369_s1 + $0x1b0] sm:$0xff]   ;;  %v302_v20 = vrot.slane %v2052_v45, %v2032_v35 }
  0x16   :  { %1647 = vmatprep.subr.bf16.mxu1 %v1813_v21  ;;  %v1855_v18 = vld [vmem:[%s2369_s1 + $0x1f8] sm:$0xff]   ;;  %v1858_v21 = vld [vmem:[%s2369_s1 + $0x240] sm:$0xff]   ;;  %v358_v23 = vrot.slane %v336_v17, %v2032_v35  ;;  %v1863_v30 = vld [vmem:[%s2369_s1 + $0x2c8] sm:$0xff]  }
  0x17   :  { %v1856_v19 = vld [vmem:[%s2369_s1 + $0x138] sm:$0xff]   ;;  %v1859_v24 = vld [vmem:[%s2369_s1 + $0x2c0] sm:$0xff]   ;;  %v1869_v38 = vld [vmem:[%s2369_s1 + $0x290] sm:$0xff]  }
  0x18   :  { %1626 = vmatpush3.bf16.msra.mxu0 %v1814_v25  ;;  %v1857_v22 = vld [vmem:[%s2369_s1 + $0x1b8] sm:$0xff]   ;;  %v1860_v25 = vld [vmem:[%s2369_s1 + $0x200] sm:$0xff]   ;;  %v368_v29 = vcombine.high %v358_v23, %v358_v23  ;;  %v1878_v45 = vld [vmem:[%s2369_s1 + $0x268] sm:$0xff]  }
  0x19   :  { %1648 = vmatpush3.bf16.msra.mxu1 %v1815_v26  ;;  %1627 = vmatprep.subr.bf16.mxu0 %v1816_v27  ;;  %v318_v26 = vcombine.high %v302_v20, %v302_v20  ;;  %v1862_v27 = vld [vmem:[%s2369_s1 + $0x248] sm:$0xff]   ;;  %v1871_v39 = vld [vmem:[%s2369_s1 + $0x2d8] sm:$0xff]   ;;  %v1875_v43 = vld [vmem:[%s2369_s1 + $0x2e0] sm:$0xff]  }
  0x1a   :  { %1649 = vmatprep.subr.bf16.mxu1 %v1817_v28  ;;  %v1861_v28 = vld [vmem:[%s2369_s1 + $0x280] sm:$0xff]   ;;  %v1872_v40 = vld [vmem:[%s2369_s1 + $0x218] sm:$0xff]   ;;  %v1879_v48 = vld [vmem:[%s2369_s1 + $0x2e8] sm:$0xff]  }
  0x1b   :  { %v1881_v51 = vld [vmem:[%s2369_s1 + $0x2a8] sm:$0xff]   ;;  %v1905_v17 = vld [vmem:[%s2369_s1 + $0x398] sm:$0xff]  }
  0x1c   :  { %1628 = vmatpush3.bf16.msra.mxu0 %v1818_v31  ;;  %v1864_v31 = vld [vmem:[%s2369_s1 + $0x208] sm:$0xff]  }
  0x1d   :  { %1650 = vmatpush3.bf16.msra.mxu1 %v1819_v32  ;;  %1629 = vmatprep.subr.bf16.mxu0 %v1820_v33  ;;  %v1866_v32 = vld [vmem:[%s2369_s1 + $0x250] sm:$0xff]   ;;  %v1865_v33 = vld [vmem:[%s2369_s1 + $0x288] sm:$0xff]  }
  0x1e   :  { %1651 = vmatprep.subr.bf16.mxu1 %v1821_v34  ;;  %v1867_v34 = vld [vmem:[%s2369_s1 + $0x2d0] sm:$0xff]  }
  0x20   :  { %1630 = vmatpush3.bf16.msra.mxu0 %v1822_v36  ;;  %v1868_v36 = vld [vmem:[%s2369_s1 + $0x210] sm:$0xff]  }
  0x21   :  { %1652 = vmatpush3.bf16.msra.mxu1 %v1823_v37  ;;  %1659 = vmatprep.subr.bf16.mxu0 %v1826_v41  ;;  %v1870_v37 = vld [vmem:[%s2369_s1 + $0x258] sm:$0xff]   ;;  %v1874_v41 = vld [vmem:[%s2369_s1 + $0x260] sm:$0xff]  }
  0x22   :  { %1681 = vmatprep.subr.bf16.mxu1 %v1827_v42  ;;  %v1873_v42 = vld [vmem:[%s2369_s1 + $0x298] sm:$0xff]  }
  0x23   :  { %1187 = vmatmul.mubr.bf16.vlgmr.msra.gmra.mrb[0].mxu0 %v295_v44  ;;  %v1876_v44 = vld [vmem:[%s2369_s1 + $0x220] sm:$0xff]  }
  0x24   :  { %1660 = vmatpush3.bf16.msra.mxu0 %v1828_v47  ;;  %1227 = vmatmul.mubr.bf16.vlgmr.msra.gmra.mrb[0].mxu1 %v317_v49  ;;  %v1877_v47 = vld [vmem:[%s2369_s1 + $0x2a0] sm:$0xff]   ;;  %v1880_v49 = vld [vmem:[%s2369_s1 + $0x228] sm:$0xff]  }
  0x25   :  { %1661 = vmatprep.subr.bf16.mxu0 %v1830_v50  ;;  %1682 = vmatpush3.bf16.msra.mxu1 %v1829_v52  ;;  %v1882_v50 = vld [vmem:[%s2369_s1 + $0x270] sm:$0xff]   ;;  %v2240_v52 = vrot.slane %v321_v46, %v2032_v35 }
  0x26   :  { %1266 = vmatprep.mubr.bf16.mxu0 %v316_v53  ;;  %1683 = vmatprep.subr.bf16.mxu1 %v1831_v54  ;;  %v1883_v53 = vld [vmem:[%s2369_s1 + $0x2f0] sm:$0xff]  }
  0x27   :  { %1306 = vmatprep.mubr.bf16.mxu1 %v320_v56  ;;  %v1884_v54 = vld [vmem:[%s2369_s1 + $0x230] sm:$0xff]  }
  0x28   :  { %1662 = vmatpush3.bf16.msra.mxu0 %v1832_v55  ;;  %v1886_v55 = vld [vmem:[%s2369_s1 + $0x278] sm:$0xff]   ;;  %v1885_v56 = vld [vmem:[%s2369_s1 + $0x2b0] sm:$0xff]  }
  0x29   :  { %1663 = vmatprep.subr.bf16.mxu0 %v1834_v57  ;;  %1684 = vmatpush3.bf16.msra.mxu1 %v1833_v58  ;;  %v337_v57 = vcombine.high %v2240_v52, %v2240_v52  ;;  %v1887_v58 = vld [vmem:[%s2369_s1 + $0x2f8] sm:$0xff]  }
  0x2a   :  { %1685 = vmatprep.subr.bf16.mxu1 %v1835_v59  ;;  %v1888_v59 = vld [vmem:[%s2369_s1 + $0x238] sm:$0xff]  }
  0x2c   :  { %1664 = vmatpush3.bf16.msra.mxu0 %v1836_v60  ;;  %v344_v60 = vrot.slane %v2134_v12, %v2032_v35  ;;  %v1902_v12 = vld [vmem:[%s2369_s1 + $0x358] sm:$0xff]  }
  0x2d   :  { %1665 = vmatprep.subr.bf16.mxu0 %v1838_v61  ;;  %1686 = vmatpush3.bf16.msra.mxu1 %v1837_v62  ;;  %v1890_v61 = vld [vmem:[%s2369_s1 + $0x340] sm:$0xff]   ;;  %v1889_v62 = vld [vmem:[%s2369_s1 + $0x2b8] sm:$0xff]  }
  0x2e   :  { %1687 = vmatprep.subr.bf16.mxu1 %v1839_v63  ;;  %v365_v63 = vrot.slane %v337_v57, %v2032_v35 }
  0x30   :  { %1666 = vmatpush3.bf16.msra.mxu0 %v1840_v0  ;;  %v1891_v0 = vld [vmem:[%s2369_s1 + $0x3c0] sm:$0xff]   ;;  %v369_v5 = vcombine.high %v365_v63, %v365_v63 }
  0x31   :  { %1667 = vmatprep.subr.bf16.mxu0 %v1842_v1  ;;  %1688 = vmatpush3.bf16.msra.mxu1 %v1841_v2  ;;  %v1892_v1 = vld [vmem:[%s2369_s1 + $0x300] sm:$0xff]   ;;  %v366_v2 = vcombine.high %v344_v60, %v344_v60 }
  0x32   :  { %1689 = vmatprep.subr.bf16.mxu1 %v1843_v3  ;;  %v1894_v3 = vld [vmem:[%s2369_s1 + $0x348] sm:$0xff]  }
  0x34   :  { %1668 = vmatpush3.bf16.msra.mxu0 %v1844_v4  ;;  %v1893_v4 = vld [vmem:[%s2369_s1 + $0x380] sm:$0xff]  }
  0x35   :  { %1669 = vmatprep.subr.bf16.mxu0 %v1846_v6  ;;  %1690 = vmatpush3.bf16.msra.mxu1 %v1845_v7  ;;  %v1895_v6 = vld [vmem:[%s2369_s1 + $0x3c8] sm:$0xff]  }
  0x36   :  { %1691 = vmatprep.subr.bf16.mxu1 %v1847_v8  ;;  %v1896_v7 = vld [vmem:[%s2369_s1 + $0x308] sm:$0xff]   ;;  %v1898_v8 = vld [vmem:[%s2369_s1 + $0x350] sm:$0xff]  }
  0x38   :  { %1670 = vmatpush3.bf16.msra.mxu0 %v1848_v9  ;;  %v1897_v9 = vld [vmem:[%s2369_s1 + $0x388] sm:$0xff]  }
  0x39   :  { %1671 = vmatprep.subr.bf16.mxu0 %v1850_v10  ;;  %1692 = vmatpush3.bf16.msra.mxu1 %v1849_v11  ;;  %v1899_v10 = vld [vmem:[%s2369_s1 + $0x3d0] sm:$0xff]  }
  0x3a   :  { %1693 = vmatprep.subr.bf16.mxu1 %v1851_v13  ;;  %v1900_v11 = vld [vmem:[%s2369_s1 + $0x310] sm:$0xff]  }
  0x3b   :  { %v1901_v13 = vld [vmem:[%s2369_s1 + $0x390] sm:$0xff]  }
  0x3c   :  { %1672 = vmatpush3.bf16.msra.mxu0 %v1852_v14  ;;  %v1903_v14 = vld [vmem:[%s2369_s1 + $0x3d8] sm:$0xff]  }
  0x3d   :  { %1673 = vmatprep.subr.bf16.mxu0 %v1854_v15  ;;  %1694 = vmatpush3.bf16.msra.mxu1 %v1853_v16  ;;  %v1904_v15 = vld [vmem:[%s2369_s1 + $0x318] sm:$0xff]   ;;  %v1906_v16 = vld [vmem:[%s2369_s1 + $0x360] sm:$0xff]  }
  0x3e   :  { %1695 = vmatprep.subr.bf16.mxu1 %v1855_v18  ;;  %v1907_v18 = vld [vmem:[%s2369_s1 + $0x3e0] sm:$0xff]  }
  0x40   :  { %1674 = vmatpush3.bf16.msra.mxu0 %v1856_v19  ;;  %v1908_v19 = vld [vmem:[%s2369_s1 + $0x320] sm:$0xff]  }
  0x41   :  { %1703 = vmatprep.subr.bf16.mxu0 %v1858_v21  ;;  %1696 = vmatpush3.bf16.msra.mxu1 %v1857_v22  ;;  %v1909_v21 = vld [vmem:[%s2369_s1 + $0x3a0] sm:$0xff]   ;;  %v1911_v22 = vld [vmem:[%s2369_s1 + $0x3e8] sm:$0xff]  }
  0x42   :  { %1725 = vmatprep.subr.bf16.mxu1 %v1859_v24  ;;  %v1914_v24 = vld [vmem:[%s2369_s1 + $0x370] sm:$0xff]  }
  0x43   :  { %1267 = vmatmul.mubr.bf16.vlgmr.msra.gmra.mrb[4].mxu0 %v302_v20  ;;  %v1910_v20 = vld [vmem:[%s2369_s1 + $0x368] sm:$0xff]  }
  0x44   :  { %1704 = vmatpush3.bf16.msra.mxu0 %v1860_v25  ;;  %1346 = vmatprep.mubr.bf16.mxu0 %v358_v23  ;;  %v1912_v23 = vld [vmem:[%s2369_s1 + $0x328] sm:$0xff]  }
  0x45   :  { %1307 = vmatmul.mubr.bf16.vlgmr.msra.gmra.mrb[4].mxu1 %v318_v26  ;;  %1705 = vmatprep.subr.bf16.mxu0 %v1862_v27  ;;  %v1913_v25 = vld [vmem:[%s2369_s1 + $0x3a8] sm:$0xff]   ;;  %v1915_v26 = vld [vmem:[%s2369_s1 + $0x3f0] sm:$0xff]  }
  0x46   :  { %1726 = vmatpush3.bf16.msra.mxu1 %v1861_v28  ;;  %1386 = vmatprep.mubr.bf16.mxu1 %v368_v29  ;;  %v1916_v27 = vld [vmem:[%s2369_s1 + $0x330] sm:$0xff]   ;;  %v1918_v28 = vld [vmem:[%s2369_s1 + $0x378] sm:$0xff]  }
  0x47   :  { %1727 = vmatprep.subr.bf16.mxu1 %v1863_v30  ;;  %v1917_v29 = vld [vmem:[%s2369_s1 + $0x3b0] sm:$0xff]   ;;  %v1919_v30 = vld [vmem:[%s2369_s1 + $0x3f8] sm:$0xff]  }
  0x48   :  { %1706 = vmatpush3.bf16.msra.mxu0 %v1864_v31  ;;  %v1920_v31 = vld [vmem:[%s2369_s1 + $0x338] sm:$0xff]  }
  0x49   :  { %1707 = vmatprep.subr.bf16.mxu0 %v1866_v32  ;;  %v351_v32 = vrot.slane %v2240_v52, %v2032_v35 }
  0x4a   :  { %1728 = vmatpush3.bf16.msra.mxu1 %v1865_v33  ;;  %v1921_v33 = vld [vmem:[%s2369_s1 + $0x3b8] sm:$0xff]  }
  0x4b   :  { %1729 = vmatprep.subr.bf16.mxu1 %v1867_v34  ;;  %v367_v34 = vcombine.high %v351_v32, %v351_v32 }
  0x4c   :  { %1708 = vmatpush3.bf16.msra.mxu0 %v1868_v36 }
  0x4d   :  { %1709 = vmatprep.subr.bf16.mxu0 %v1870_v37 }
  0x4e   :  { %1730 = vmatpush3.bf16.msra.mxu1 %v1869_v38 }
  0x4f   :  { %1731 = vmatprep.subr.bf16.mxu1 %v1871_v39 }
  0x50   :  { %1710 = vmatpush3.bf16.msra.mxu0 %v1872_v40 }
  0x51   :  { %1711 = vmatprep.subr.bf16.mxu0 %v1874_v41 }
  0x52   :  { %1732 = vmatpush3.bf16.msra.mxu1 %v1873_v42 }
  0x53   :  { %1733 = vmatprep.subr.bf16.mxu1 %v1875_v43 }
  0x54   :  { %1712 = vmatpush3.bf16.msra.mxu0 %v1876_v44 }
  0x55   :  { %1713 = vmatprep.subr.bf16.mxu0 %v1878_v45 }
  0x56   :  { %1734 = vmatpush3.bf16.msra.mxu1 %v1877_v47 }
  0x57   :  { %1735 = vmatprep.subr.bf16.mxu1 %v1879_v48 }
  0x58   :  { %1714 = vmatpush3.bf16.msra.mxu0 %v1880_v49 }
  0x59   :  { %1715 = vmatprep.subr.bf16.mxu0 %v1882_v50 }
  0x5a   :  { %1736 = vmatpush3.bf16.msra.mxu1 %v1881_v51 }
  0x5b   :  { %1737 = vmatprep.subr.bf16.mxu1 %v1883_v53 }
  0x5c   :  { %1716 = vmatpush3.bf16.msra.mxu0 %v1884_v54 }
  0x5d   :  { %1717 = vmatprep.subr.bf16.mxu0 %v1886_v55 }
  0x5e   :  { %1738 = vmatpush3.bf16.msra.mxu1 %v1885_v56 }
  0x5f   :  { %1739 = vmatprep.subr.bf16.mxu1 %v1887_v58 }
  0x60   :  { %1718 = vmatpush3.bf16.msra.mxu0 %v1888_v59 }
  0x61   :  { %1747 = vmatprep.subr.bf16.mxu0 %v1890_v61 }
  0x62   :  { %1740 = vmatpush3.bf16.msra.mxu1 %v1889_v62 }
  0x63   :  { %1347 = vmatmul.mubr.bf16.vlgmr.msra.gmra.mrb[8].mxu0 %v344_v60  ;;  %1769 = vmatprep.subr.bf16.mxu1 %v1891_v0 }
  0x64   :  { %1748 = vmatpush3.bf16.msra.mxu0 %v1892_v1  ;;  %1426 = vmatprep.mubr.bf16.mxu0 %v365_v63 }
  0x65   :  { %1387 = vmatmul.mubr.bf16.vlgmr.msra.gmra.mrb[8].mxu1 %v366_v2  ;;  %1749 = vmatprep.subr.bf16.mxu0 %v1894_v3 }
  0x66   :  { %1770 = vmatpush3.bf16.msra.mxu1 %v1893_v4  ;;  %1466 = vmatprep.mubr.bf16.mxu1 %v369_v5 }
  0x67   :  { %1771 = vmatprep.subr.bf16.mxu1 %v1895_v6 }
  0x68   :  { %1750 = vmatpush3.bf16.msra.mxu0 %v1896_v7 }
  0x69   :  { %1751 = vmatprep.subr.bf16.mxu0 %v1898_v8 }
  0x6a   :  { %1772 = vmatpush3.bf16.msra.mxu1 %v1897_v9 }
  0x6b   :  { %1773 = vmatprep.subr.bf16.mxu1 %v1899_v10 }
  0x6c   :  { %1752 = vmatpush3.bf16.msra.mxu0 %v1900_v11 }
  0x6d   :  { %1753 = vmatprep.subr.bf16.mxu0 %v1902_v12 }
  0x6e   :  { %1774 = vmatpush3.bf16.msra.mxu1 %v1901_v13 }
  0x6f   :  { %1775 = vmatprep.subr.bf16.mxu1 %v1903_v14 }
  0x70   :  { %1754 = vmatpush3.bf16.msra.mxu0 %v1904_v15 }
  0x71   :  { %1755 = vmatprep.subr.bf16.mxu0 %v1906_v16 }
  0x72   :  { %1776 = vmatpush3.bf16.msra.mxu1 %v1905_v17 }
  0x73   :  { %1777 = vmatprep.subr.bf16.mxu1 %v1907_v18 }
  0x74   :  { %1756 = vmatpush3.bf16.msra.mxu0 %v1908_v19 }
  0x75   :  { %1757 = vmatprep.subr.bf16.mxu0 %v1910_v20 }
  0x76   :  { %1778 = vmatpush3.bf16.msra.mxu1 %v1909_v21 }
  0x77   :  { %1779 = vmatprep.subr.bf16.mxu1 %v1911_v22 }
  0x78   :  { %1758 = vmatpush3.bf16.msra.mxu0 %v1912_v23 }
  0x79   :  { %1759 = vmatprep.subr.bf16.mxu0 %v1914_v24 }
  0x7a   :  { %1780 = vmatpush3.bf16.msra.mxu1 %v1913_v25 }
  0x7b   :  { %1781 = vmatprep.subr.bf16.mxu1 %v1915_v26 }
  0x7c   :  { %1760 = vmatpush3.bf16.msra.mxu0 %v1916_v27 }
  0x7d   :  { %1761 = vmatprep.subr.bf16.mxu0 %v1918_v28 }
  0x7e   :  { %1782 = vmatpush3.bf16.msra.mxu1 %v1917_v29 }
  0x7f   :  { %1783 = vmatprep.subr.bf16.mxu1 %v1919_v30 }
  0x80   :  { %1762 = vmatpush3.bf16.msra.mxu0 %v1920_v31 }
  0x82   :  { %1784 = vmatpush3.bf16.msra.mxu1 %v1921_v33 }
  0x83   :  { %1427 = vmatmul.mubr.bf16.vlgmr.msra.gmra.mrb[12].mxu0 %v351_v32 }
  0x85   :  { %1467 = vmatmul.mubr.bf16.vlgmr.msra.gmra.mrb[12].mxu1 %v367_v34 }
  0xf6   :  { %v1631_v36 = vpop.f32.mrb[0].mxu0 }
  0xf7   :  { %v1632_v37 = vpop.f32.mrb[1].mxu0  ;;  %v1653_v38 = vpop.f32.mrb[0].mxu1 }
  0xf8   :  { %v1633_v39 = vadd.f32 %v1632_v37, %v1631_v36  ;;  %v1634_v40 = vpop.f32.mrb[2].mxu0  ;;  %v1654_v41 = vpop.f32.mrb[1].mxu1 }
  0xf9   :  { %v1635_v42 = vpop.f32.mrb[3].mxu0  ;;  %v1655_v43 = vadd.f32 %v1654_v41, %v1653_v38  ;;  %v1656_v35 = vpop.f32.mrb[2].mxu1 }
  0xfa   :  { %v1657_v44 = vpop.f32.mrb[3].mxu1 }
  0xfb   :  { %v1229_v45 = vadd.f32 %v1655_v43, %v1633_v39 }
 0x116   :  { %v1675_v46 = vpop.f32.mrb[4].mxu0 }
 0x117   :  { %v1676_v47 = vpop.f32.mrb[5].mxu0 }
 0x118   :  { %v1697_v48 = vpop.f32.mrb[4].mxu1  ;;  %v1677_v49 = vadd.f32 %v1676_v47, %v1675_v46  ;;  %v1678_v50 = vpop.f32.mrb[6].mxu0 }
 0x119   :  { %v1698_v51 = vpop.f32.mrb[5].mxu1  ;;  %v1679_v52 = vpop.f32.mrb[7].mxu0 }
 0x11a   :  { %v1269_v53 = vadd.f32 %v1677_v49, %v1229_v45  ;;  %v1699_v54 = vadd.f32 %v1698_v51, %v1697_v48  ;;  %v1700_v55 = vpop.f32.mrb[6].mxu1 }
 0x11b   :  { %v1701_v56 = vpop.f32.mrb[7].mxu1 }
 0x11c   :  { %v1309_v57 = vadd.f32 %v1699_v54, %v1269_v53 }
 0x136   :  { %v1719_v58 = vpop.f32.mrb[8].mxu0 }
 0x137   :  { %v1720_v59 = vpop.f32.mrb[9].mxu0 }
 0x138   :  { %v1741_v60 = vpop.f32.mrb[8].mxu1  ;;  %v1721_v61 = vadd.f32 %v1720_v59, %v1719_v58  ;;  %v1722_v62 = vpop.f32.mrb[10].mxu0 }
 0x139   :  { %v1742_v63 = vpop.f32.mrb[9].mxu1  ;;  %v1723_v0 = vpop.f32.mrb[11].mxu0 }
 0x13a   :  { %v1349_v1 = vadd.f32 %v1721_v61, %v1309_v57  ;;  %v1743_v2 = vadd.f32 %v1742_v63, %v1741_v60  ;;  %v1744_v3 = vpop.f32.mrb[10].mxu1 }
 0x13b   :  { %v1745_v4 = vpop.f32.mrb[11].mxu1 }
 0x13c   :  { %v1389_v5 = vadd.f32 %v1743_v2, %v1349_v1 }
 0x156   :  { %v1763_v6 = vpop.f32.mrb[12].mxu0 }
 0x157   :  { %v1764_v7 = vpop.f32.mrb[13].mxu0 }
 0x158   :  { %v1785_v8 = vpop.f32.mrb[12].mxu1  ;;  %v1765_v9 = vadd.f32 %v1764_v7, %v1763_v6  ;;  %v1766_v10 = vpop.f32.mrb[14].mxu0 }
 0x159   :  { %v1786_v11 = vpop.f32.mrb[13].mxu1  ;;  %v1767_v12 = vpop.f32.mrb[15].mxu0 }
 0x15a   :  { %v1429_v13 = vadd.f32 %v1765_v9, %v1389_v5  ;;  %v1787_v14 = vadd.f32 %v1786_v11, %v1785_v8  ;;  %v1788_v15 = vpop.f32.mrb[14].mxu1 }
 0x15b   :  { %v1789_v16 = vpop.f32.mrb[15].mxu1 }
 0x15c   :  { %v1469_v17 = vadd.f32 %v1787_v14, %v1429_v13 }
 0x15e   :  { %v1614_v18 = vmul.f32 -1.442695, %v1469_v17 }
 0x160   :  { %1922 = vpow2.f32 %v1614_v18 }
 0x16a   :  { %v1923_v19 = vpop.eup %1922 }
 0x16b   :  { %v1477_v20 = vadd.f32 1.0, %v1923_v19 }
 0x16d   :  { %1924 = vrcp.f32 %v1477_v20 }
 0x177   :  { %v1925_v21 = vpop.eup %1924 }
 0x178   :  { %1481 = vst.msk [vmem:[%s2371_s2] sm:$0x3] %vm1480_vm0, %v1925_v21 }

</bundles_post_ra>
